<compile_context>
chip_gen: v5e
topology: v5e:2x2
jax: 0.10.0
libtpu: 0.0.40
codegen_flags: <defaults>
</compile_context>

<pallas_src>
import jax
import jax.numpy as jnp
from jax.experimental import pallas as pl
from jax.experimental.pallas import tpu as pltpu

_BN_EPS = 1e-5


def _rup(x, m):
    return (x + m - 1) // m * m


# -----------------------------------------------------------------------------
# Pallas kernels
# -----------------------------------------------------------------------------
def _mm_stats_kernel(a_ref, b_ref, o_ref, sum_ref, sq_ref):
    # Full-K matmul (bf16 operands, f32 accumulate) + fused BN-stat epilogue.
    y = jnp.dot(a_ref[...], b_ref[...], preferred_element_type=jnp.float32)
    o_ref[...] = y
    sum_ref[...] = jnp.broadcast_to(jnp.sum(y, axis=0, keepdims=True), sum_ref.shape)
    sq_ref[...] = jnp.broadcast_to(jnp.sum(y * y, axis=0, keepdims=True), sq_ref.shape)


def _mm_tanh_kernel(a_ref, b_ref, o_ref):
    # Final layer: matmul with tanh fused into the epilogue.
    y = jnp.dot(a_ref[...], b_ref[...], preferred_element_type=jnp.float32)
    o_ref[...] = jnp.tanh(y)


def _scale_relu_kernel(x_ref, s_ref, b_ref, o_ref):
    # Folded BatchNorm affine + ReLU, emits bf16 for the next layer's patches.
    v = x_ref[...] * s_ref[...] + b_ref[...]
    o_ref[...] = jnp.maximum(v, 0.0).astype(o_ref.dtype)


# -----------------------------------------------------------------------------
# Pallas wrappers
# -----------------------------------------------------------------------------
def matmul_stats(a, b, *, tm):
    """a: (B, M, K) bf16, b: (B, K, Np) bf16 -> (y (B,M,Np) f32, per-block sum, sumsq)."""
    B, M, K = a.shape
    Np = b.shape[2]
    Mb = M // tm
    return pl.pallas_call(
        _mm_stats_kernel,
        out_shape=(jax.ShapeDtypeStruct((B, M, Np), jnp.float32),
                   jax.ShapeDtypeStruct((B, Mb, 8, Np), jnp.float32),
                   jax.ShapeDtypeStruct((B, Mb, 8, Np), jnp.float32)),
        grid_spec=pltpu.PrefetchScalarGridSpec(
            num_scalar_prefetch=0,
            grid=(B, Mb),
            in_specs=[pl.BlockSpec((None, tm, K), lambda p, i: (p, i, 0)),
                      pl.BlockSpec((None, K, Np), lambda p, i: (p, 0, 0))],
            out_specs=[pl.BlockSpec((None, tm, Np), lambda p, i: (p, i, 0)),
                       pl.BlockSpec((None, None, 8, Np), lambda p, i: (p, i, 0, 0)),
                       pl.BlockSpec((None, None, 8, Np), lambda p, i: (p, i, 0, 0))]),
        compiler_params=pltpu.CompilerParams(
            dimension_semantics=("parallel", "parallel")),
    )(a, b)


def matmul_tanh(a, b, *, tm):
    """a: (B, M, K) bf16, b: (B, K, Np) bf16 -> tanh(a @ b) (B, M, Np) f32."""
    B, M, K = a.shape
    Np = b.shape[2]
    Mb = M // tm
    return pl.pallas_call(
        _mm_tanh_kernel,
        out_shape=jax.ShapeDtypeStruct((B, M, Np), jnp.float32),
        grid_spec=pltpu.PrefetchScalarGridSpec(
            num_scalar_prefetch=0,
            grid=(B, Mb),
            in_specs=[pl.BlockSpec((None, tm, K), lambda p, i: (p, i, 0)),
                      pl.BlockSpec((None, K, Np), lambda p, i: (p, 0, 0))],
            out_specs=pl.BlockSpec((None, tm, Np), lambda p, i: (p, i, 0))),
        compiler_params=pltpu.CompilerParams(
            dimension_semantics=("parallel", "parallel")),
    )(a, b)


def scale_relu(y, scale, shift, *, tm, out_dtype=jnp.bfloat16):
    """y: (B, M, Cp) f32, per-channel affine (folded BN) + ReLU -> (B, M, Cp) bf16."""
    B, M, Cp = y.shape
    Mb = M // tm
    c = scale.shape[0]
    s = jnp.zeros((1, Cp), jnp.float32).at[0, :c].set(scale)
    t = jnp.zeros((1, Cp), jnp.float32).at[0, :c].set(shift)
    return pl.pallas_call(
        _scale_relu_kernel,
        out_shape=jax.ShapeDtypeStruct((B, M, Cp), out_dtype),
        grid_spec=pltpu.PrefetchScalarGridSpec(
            num_scalar_prefetch=0,
            grid=(B, Mb),
            in_specs=[pl.BlockSpec((None, tm, Cp), lambda p, i: (p, i, 0)),
                      pl.BlockSpec((1, Cp), lambda p, i: (0, 0)),
                      pl.BlockSpec((1, Cp), lambda p, i: (0, 0))],
            out_specs=pl.BlockSpec((None, tm, Cp), lambda p, i: (p, i, 0))),
        compiler_params=pltpu.CompilerParams(
            dimension_semantics=("parallel", "parallel")),
    )(y, s, t)


# -----------------------------------------------------------------------------
# ConvTranspose2d (k=4, s=2, p=1) phase-decomposition glue (layout only, in XLA)
# -----------------------------------------------------------------------------
# out[oy, ox] with phases (py, px) = (oy%2, ox%2) only touches a 2x2 input window and
# a 2x2 subset of kernel taps: tap (dy, dx) -> kernel index (2*(1-dy)+(1-py), ...).
def _phase_patches(x):
    """x: (N, H, W, C) bf16 -> ((4, N*H*W, 4*C) patches, (N, H, W))."""
    N, H, W, C = x.shape
    xp = jnp.pad(x, ((0, 0), (1, 1), (1, 1), (0, 0)))
    phases = []
    for py in range(2):
        for px in range(2):
            taps = [xp[:, py + dy:py + dy + H, px + dx:px + dx + W, :]
                    for dy in range(2) for dx in range(2)]
            phases.append(jnp.stack(taps, axis=3).reshape(N * H * W, 4 * C))
    return jnp.stack(phases, axis=0), (N, H, W)


def _phase_weights(w, n_pad):
    """PyTorch convT weight (Cin, Cout, 4, 4) -> (4, 4*Cin, n_pad) bf16 phase matrices."""
    cin, cout = w.shape[0], w.shape[1]
    mats = []
    for py in range(2):
        for px in range(2):
            taps = [w[:, :, 2 * (1 - dy) + (1 - py), 2 * (1 - dx) + (1 - px)]
                    for dy in range(2) for dx in range(2)]
            mats.append(jnp.stack(taps, axis=0).reshape(4 * cin, cout))
    b = jnp.stack(mats, axis=0)
    return jnp.pad(b, ((0, 0), (0, 0), (0, n_pad - cout))).astype(jnp.bfloat16)


def _phase_reassemble(yp, N, H, W, C):
    """yp: (4, N*H*W, C) in phase order (py, px) -> (N, 2H, 2W, C)."""
    a = yp.reshape(2, 2, N, H, W, C)
    return jnp.transpose(a, (2, 3, 0, 4, 1, 5)).reshape(N, 2 * H, 2 * W, C)


def _bn_affine(sums, sqs, m, gamma, beta):
    mean = sums / m
    var = jnp.maximum(sqs / m - mean * mean, 0.0)   # guard fp32 cancellation
    scale = gamma * jax.lax.rsqrt(var + _BN_EPS)
    return scale, beta - mean * scale


# -----------------------------------------------------------------------------
# Generator forward (ConvT -> BN(train stats) -> ReLU x4, ConvT -> Tanh)
# -----------------------------------------------------------------------------
@jax.jit
def generator_forward(x_nchw, params):
    N, nz = x_nchw.shape[0], x_nchw.shape[1]

    # ---- layer 0: ConvTranspose2d(nz, 256, 4, 1, 0) on 1x1 input == dense matmul ----
    w0 = params["w0"]                                       # (nz, c0, 4, 4)
    c0 = w0.shape[1]
    kp, mp = _rup(nz, 128), _rup(N, 8)
    a0 = jnp.pad(x_nchw.reshape(N, nz), ((0, mp - N), (0, kp - nz)))
    a0 = a0.astype(jnp.bfloat16)[None]                      # (1, mp, kp)
    b0 = jnp.transpose(w0, (0, 2, 3, 1)).reshape(nz, 16 * c0)   # cols = (oy, ox, cout)
    b0 = jnp.pad(b0, ((0, kp - nz), (0, 0))).astype(jnp.bfloat16)[None]
    y0, s0, q0 = matmul_stats(a0, b0, tm=mp)                # y0: (1, mp, 16*c0) f32
    m0 = N * 16
    sums = s0[0, 0, 0].reshape(16, c0).sum(axis=0)          # fold spatial into channel
    sqs = q0[0, 0, 0].reshape(16, c0).sum(axis=0)
    scale, shift = _bn_affine(sums, sqs, m0, params["gamma0"], params["beta0"])
    y0 = y0[0, :N].reshape(1, m0, c0)                       # rows=(n,oy,ox), cols=channel
    x = scale_relu(y0, scale, shift, tm=m0).reshape(N, 4, 4, c0)   # NHWC bf16

    # ---- layers 1..4: ConvTranspose2d(k=4, s=2, p=1) phase-decomposed matmuls ----
    for li in range(1, 5):
        w = params[f"w{li}"]
        cout = w.shape[1]
        np_ = _rup(cout, 128)
        bmats = _phase_weights(w, np_)                      # (4, 4*cin, np_) bf16
        patches, (n_, h, w_) = _phase_patches(x)            # (4, M, 4*cin) bf16
        m = patches.shape[1]
        tm = m if m <= 2048 else 2048
        assert m % tm == 0
        if li < 4:
            y, s, q = matmul_stats(patches, bmats, tm=tm)   # y: (4, M, np_) f32
            sums = s[:, :, 0, :cout].sum(axis=(0, 1))
            sqs = q[:, :, 0, :cout].sum(axis=(0, 1))
            scale, shift = _bn_affine(sums, sqs, 4 * m,
                                      params[f"gamma{li}"], params[f"beta{li}"])
            ya = scale_relu(y, scale, shift, tm=tm)[:, :, :cout]
            x = _phase_reassemble(ya, n_, h, w_, cout)      # (N, 2H, 2W, cout) bf16
        else:
            y = matmul_tanh(patches, bmats, tm=tm)[:, :, :cout]   # tanh fused, f32
            x = _phase_reassemble(y, n_, h, w_, cout)       # (N, 64, 64, 3) f32
    return jnp.transpose(x, (0, 3, 1, 2))                   # NHWC -> NCHW


def init_params(key):
    nz, ngf = 100, 32
    chans = [nz, ngf * 8, ngf * 4, ngf * 2, ngf, 3]
    params = {}
    keys = jax.random.split(key, 2 * (len(chans) - 1))
    for li in range(len(chans) - 1):
        cin, cout = chans[li], chans[li + 1]
        params[f"w{li}"] = 0.02 * jax.random.normal(
            keys[2 * li], (cin, cout, 4, 4), jnp.float32)   # ConvTranspose2d weight
        if li < len(chans) - 2:
            params[f"gamma{li}"] = 1.0 + 0.02 * jax.random.normal(
                keys[2 * li + 1], (cout,), jnp.float32)
            params[f"beta{li}"] = jnp.zeros((cout,), jnp.float32)
    return params


if __name__ == "__main__":
    key = jax.random.PRNGKey(0)
    pkey, xkey = jax.random.split(key)
    params = init_params(pkey)
    # DCGAN latent: (batch=2, nz=100, 1, 1) in NCHW, as the module's first layer implies.
    x = jax.random.normal(xkey, (2, 100, 1, 1), jnp.float32)
    out = generator_forward(x, params)
    out = jax.block_until_ready(out)
    assert out.shape == (2, 3, 64, 64), out.shape
    assert bool(jnp.all(jnp.abs(out) <= 1.0 + 1e-6))  # tanh range sanity check
    print("KERNEL_OK")
</pallas_src>

<mosaic_0001>
module attributes {stable_mosaic.version = 11 : i64} {
  func.func @_mm_stats_kernel(%arg0: i32, %arg1: i32, %arg2: memref<1x8x128xbf16, #tpu.memory_space<vmem>>, %arg3: memref<1x128x4096xbf16, #tpu.memory_space<vmem>>, %arg4: memref<1x8x4096xf32, #tpu.memory_space<vmem>>, %arg5: memref<1x1x8x4096xf32, #tpu.memory_space<vmem>>, %arg6: memref<1x1x8x4096xf32, #tpu.memory_space<vmem>>) attributes {dimension_semantics = [#tpu.dimension_semantics<parallel>, #tpu.dimension_semantics<parallel>], iteration_bounds = array<i64: 1, 1>, scalar_prefetch = 0 : i64, scratch_operands = 0 : i64, tpu.core_type = #tpu.core_type<tc>, window_params = [{transform_indices = @transform_0, window_bounds = array<i64: 1, 8, 128>}, {transform_indices = @transform_1, window_bounds = array<i64: 1, 128, 4096>}, {transform_indices = @transform_2, window_bounds = array<i64: 1, 8, 4096>}, {transform_indices = @transform_3, window_bounds = array<i64: 1, 1, 8, 4096>}, {transform_indices = @transform_4, window_bounds = array<i64: 1, 1, 8, 4096>}]} {
    %c0 = arith.constant 0 : index
    %c0_0 = arith.constant 0 : index
    %c0_1 = arith.constant 0 : index
    %0 = vector.load %arg2[%c0, %c0_0, %c0_1] : memref<1x8x128xbf16, #tpu.memory_space<vmem>>, vector<1x8x128xbf16>
    %1 = vector.shape_cast %0 : vector<1x8x128xbf16> to vector<8x128xbf16>
    %c0_2 = arith.constant 0 : index
    %c0_3 = arith.constant 0 : index
    %c0_4 = arith.constant 0 : index
    %2 = vector.load %arg3[%c0_2, %c0_3, %c0_4] : memref<1x128x4096xbf16, #tpu.memory_space<vmem>>, vector<1x128x4096xbf16>
    %3 = vector.shape_cast %2 : vector<1x128x4096xbf16> to vector<128x4096xbf16>
    %cst = arith.constant dense<0.000000e+00> : vector<8x4096xf32>
    %4 = tpu.matmul %1, %3, %cst {dimension_numbers = #tpu.dot_dimension_numbers<[1], [0], [0], [1], [0, 0, 1, 1], [], []>} : vector<8x128xbf16>, vector<128x4096xbf16>, vector<8x4096xf32> -> vector<8x4096xf32>
    %c0_5 = arith.constant 0 : index
    %c0_6 = arith.constant 0 : index
    %c0_7 = arith.constant 0 : index
    %5 = vector.load %arg4[%c0_5, %c0_6, %c0_7] : memref<1x8x4096xf32, #tpu.memory_space<vmem>>, vector<1x8x4096xf32>
    %6 = vector.shape_cast %5 : vector<1x8x4096xf32> to vector<8x4096xf32>
    %7 = vector.shape_cast %4 : vector<8x4096xf32> to vector<1x8x4096xf32>
    tpu.vector_store %arg4[%c0_5, %c0_6, %c0_7], %7 {strides = array<i32>} : memref<1x8x4096xf32, #tpu.memory_space<vmem>>, vector<1x8x4096xf32>,
    %cst_8 = arith.constant dense<0.000000e+00> : vector<4096xf32>
    %8 = vector.multi_reduction <add>, %4, %cst_8 [0] : vector<8x4096xf32> to vector<4096xf32>
    %9 = vector.shape_cast %8 : vector<4096xf32> to vector<1x4096xf32>
    %10 = vector.shape_cast %9 : vector<1x4096xf32> to vector<1x4096xf32>
    %11 = vector.broadcast %10 : vector<1x4096xf32> to vector<8x4096xf32>
    %c0_9 = arith.constant 0 : index
    %c0_10 = arith.constant 0 : index
    %c0_11 = arith.constant 0 : index
    %c0_12 = arith.constant 0 : index
    %12 = vector.load %arg5[%c0_9, %c0_10, %c0_11, %c0_12] : memref<1x1x8x4096xf32, #tpu.memory_space<vmem>>, vector<1x1x8x4096xf32>
    %13 = vector.shape_cast %12 : vector<1x1x8x4096xf32> to vector<8x4096xf32>
    %14 = vector.shape_cast %11 : vector<8x4096xf32> to vector<1x1x8x4096xf32>
    tpu.vector_store %arg5[%c0_9, %c0_10, %c0_11, %c0_12], %14 {strides = array<i32>} : memref<1x1x8x4096xf32, #tpu.memory_space<vmem>>, vector<1x1x8x4096xf32>,
    %15 = arith.mulf %4, %4 : vector<8x4096xf32>
    %cst_13 = arith.constant dense<0.000000e+00> : vector<4096xf32>
    %16 = vector.multi_reduction <add>, %15, %cst_13 [0] : vector<8x4096xf32> to vector<4096xf32>
    %17 = vector.shape_cast %16 : vector<4096xf32> to vector<1x4096xf32>
    %18 = vector.shape_cast %17 : vector<1x4096xf32> to vector<1x4096xf32>
    %19 = vector.broadcast %18 : vector<1x4096xf32> to vector<8x4096xf32>
    %c0_14 = arith.constant 0 : index
    %c0_15 = arith.constant 0 : index
    %c0_16 = arith.constant 0 : index
    %c0_17 = arith.constant 0 : index
    %20 = vector.load %arg6[%c0_14, %c0_15, %c0_16, %c0_17] : memref<1x1x8x4096xf32, #tpu.memory_space<vmem>>, vector<1x1x8x4096xf32>
    %21 = vector.shape_cast %20 : vector<1x1x8x4096xf32> to vector<8x4096xf32>
    %22 = vector.shape_cast %19 : vector<8x4096xf32> to vector<1x1x8x4096xf32>
    tpu.vector_store %arg6[%c0_14, %c0_15, %c0_16, %c0_17], %22 {strides = array<i32>} : memref<1x1x8x4096xf32, #tpu.memory_space<vmem>>, vector<1x1x8x4096xf32>,
    return
  }
  func.func @transform_0(%arg0: i32, %arg1: i32) -> (i32, i32, i32) {
    %c0_i32 = arith.constant 0 : i32
    %c0_i32_0 = arith.constant 0 : i32
    return %arg0, %arg1, %c0_i32 : i32, i32, i32
  }
  func.func @transform_1(%arg0: i32, %arg1: i32) -> (i32, i32, i32) {
    %c0_i32 = arith.constant 0 : i32
    %c0_i32_0 = arith.constant 0 : i32
    %c0_i32_1 = arith.constant 0 : i32
    return %arg0, %c0_i32, %c0_i32_0 : i32, i32, i32
  }
  func.func @transform_2(%arg0: i32, %arg1: i32) -> (i32, i32, i32) {
    %c0_i32 = arith.constant 0 : i32
    %c0_i32_0 = arith.constant 0 : i32
    return %arg0, %arg1, %c0_i32 : i32, i32, i32
  }
  func.func @transform_3(%arg0: i32, %arg1: i32) -> (i32, i32, i32, i32) {
    %c0_i32 = arith.constant 0 : i32
    %c0_i32_0 = arith.constant 0 : i32
    %c0_i32_1 = arith.constant 0 : i32
    return %arg0, %arg1, %c0_i32, %c0_i32_0 : i32, i32, i32, i32
  }
  func.func @transform_4(%arg0: i32, %arg1: i32) -> (i32, i32, i32, i32) {
    %c0_i32 = arith.constant 0 : i32
    %c0_i32_0 = arith.constant 0 : i32
    %c0_i32_1 = arith.constant 0 : i32
    return %arg0, %arg1, %c0_i32, %c0_i32_0 : i32, i32, i32, i32
  }
}

module attributes {stable_mosaic.version = 11 : i64} {
  func.func @_scale_relu_kernel(%arg0: i32, %arg1: i32, %arg2: memref<1x32x256xf32, #tpu.memory_space<vmem>>, %arg3: memref<1x256xf32, #tpu.memory_space<vmem>>, %arg4: memref<1x256xf32, #tpu.memory_space<vmem>>, %arg5: memref<1x32x256xbf16, #tpu.memory_space<vmem>>) attributes {dimension_semantics = [#tpu.dimension_semantics<parallel>, #tpu.dimension_semantics<parallel>], iteration_bounds = array<i64: 1, 1>, scalar_prefetch = 0 : i64, scratch_operands = 0 : i64, tpu.core_type = #tpu.core_type<tc>, window_params = [{transform_indices = @transform_0, window_bounds = array<i64: 1, 32, 256>}, {pipeline_mode = #tpu.pipeline_mode<synchronous>, transform_indices = @transform_1, window_bounds = array<i64: 1, 256>}, {pipeline_mode = #tpu.pipeline_mode<synchronous>, transform_indices = @transform_2, window_bounds = array<i64: 1, 256>}, {transform_indices = @transform_3, window_bounds = array<i64: 1, 32, 256>}]} {
    %c0 = arith.constant 0 : index
    %c0_0 = arith.constant 0 : index
    %c0_1 = arith.constant 0 : index
    %0 = vector.load %arg2[%c0, %c0_0, %c0_1] : memref<1x32x256xf32, #tpu.memory_space<vmem>>, vector<1x32x256xf32>
    %1 = vector.shape_cast %0 : vector<1x32x256xf32> to vector<32x256xf32>
    %c0_2 = arith.constant 0 : index
    %c0_3 = arith.constant 0 : index
    %2 = vector.load %arg3[%c0_2, %c0_3] : memref<1x256xf32, #tpu.memory_space<vmem>>, vector<1x256xf32>
    %3 = vector.broadcast %2 : vector<1x256xf32> to vector<32x256xf32>
    %4 = arith.mulf %1, %3 : vector<32x256xf32>
    %c0_4 = arith.constant 0 : index
    %c0_5 = arith.constant 0 : index
    %5 = vector.load %arg4[%c0_4, %c0_5] : memref<1x256xf32, #tpu.memory_space<vmem>>, vector<1x256xf32>
    %6 = vector.broadcast %5 : vector<1x256xf32> to vector<32x256xf32>
    %7 = arith.addf %4, %6 : vector<32x256xf32>
    %cst = arith.constant 0.000000e+00 : f32
    %8 = vector.broadcast %cst : f32 to vector<32x256xf32>
    %9 = arith.maximumf %7, %8 : vector<32x256xf32>
    %10 = arith.truncf %9 : vector<32x256xf32> to vector<32x256xbf16>
    %c0_6 = arith.constant 0 : index
    %c0_7 = arith.constant 0 : index
    %c0_8 = arith.constant 0 : index
    %11 = vector.load %arg5[%c0_6, %c0_7, %c0_8] : memref<1x32x256xbf16, #tpu.memory_space<vmem>>, vector<1x32x256xbf16>
    %12 = vector.shape_cast %11 : vector<1x32x256xbf16> to vector<32x256xbf16>
    %13 = vector.shape_cast %10 : vector<32x256xbf16> to vector<1x32x256xbf16>
    tpu.vector_store %arg5[%c0_6, %c0_7, %c0_8], %13 {strides = array<i32>} : memref<1x32x256xbf16, #tpu.memory_space<vmem>>, vector<1x32x256xbf16>,
    return
  }
  func.func @transform_0(%arg0: i32, %arg1: i32) -> (i32, i32, i32) {
    %c0_i32 = arith.constant 0 : i32
    %c0_i32_0 = arith.constant 0 : i32
    return %arg0, %arg1, %c0_i32 : i32, i32, i32
  }
  func.func @transform_1(%arg0: i32, %arg1: i32) -> (i32, i32) {
    %c0_i32 = arith.constant 0 : i32
    %c0_i32_0 = arith.constant 0 : i32
    %c0_i32_1 = arith.constant 0 : i32
    return %c0_i32, %c0_i32_0 : i32, i32
  }
  func.func @transform_2(%arg0: i32, %arg1: i32) -> (i32, i32) {
    %c0_i32 = arith.constant 0 : i32
    %c0_i32_0 = arith.constant 0 : i32
    %c0_i32_1 = arith.constant 0 : i32
    return %c0_i32, %c0_i32_0 : i32, i32
  }
  func.func @transform_3(%arg0: i32, %arg1: i32) -> (i32, i32, i32) {
    %c0_i32 = arith.constant 0 : i32
    %c0_i32_0 = arith.constant 0 : i32
    return %arg0, %arg1, %c0_i32 : i32, i32, i32
  }
}

module attributes {stable_mosaic.version = 11 : i64} {
  func.func @_mm_stats_kernel(%arg0: i32, %arg1: i32, %arg2: memref<1x32x1024xbf16, #tpu.memory_space<vmem>>, %arg3: memref<1x1024x128xbf16, #tpu.memory_space<vmem>>, %arg4: memref<1x32x128xf32, #tpu.memory_space<vmem>>, %arg5: memref<1x1x8x128xf32, #tpu.memory_space<vmem>>, %arg6: memref<1x1x8x128xf32, #tpu.memory_space<vmem>>) attributes {dimension_semantics = [#tpu.dimension_semantics<parallel>, #tpu.dimension_semantics<parallel>], iteration_bounds = array<i64: 4, 1>, scalar_prefetch = 0 : i64, scratch_operands = 0 : i64, tpu.core_type = #tpu.core_type<tc>, window_params = [{transform_indices = @transform_0, window_bounds = array<i64: 1, 32, 1024>}, {transform_indices = @transform_1, window_bounds = array<i64: 1, 1024, 128>}, {transform_indices = @transform_2, window_bounds = array<i64: 1, 32, 128>}, {transform_indices = @transform_3, window_bounds = array<i64: 1, 1, 8, 128>}, {transform_indices = @transform_4, window_bounds = array<i64: 1, 1, 8, 128>}]} {
    %c0 = arith.constant 0 : index
    %c0_0 = arith.constant 0 : index
    %c0_1 = arith.constant 0 : index
    %0 = vector.load %arg2[%c0, %c0_0, %c0_1] : memref<1x32x1024xbf16, #tpu.memory_space<vmem>>, vector<1x32x1024xbf16>
    %1 = vector.shape_cast %0 : vector<1x32x1024xbf16> to vector<32x1024xbf16>
    %c0_2 = arith.constant 0 : index
    %c0_3 = arith.constant 0 : index
    %c0_4 = arith.constant 0 : index
    %2 = vector.load %arg3[%c0_2, %c0_3, %c0_4] : memref<1x1024x128xbf16, #tpu.memory_space<vmem>>, vector<1x1024x128xbf16>
    %3 = vector.shape_cast %2 : vector<1x1024x128xbf16> to vector<1024x128xbf16>
    %cst = arith.constant dense<0.000000e+00> : vector<32x128xf32>
    %4 = tpu.matmul %1, %3, %cst {dimension_numbers = #tpu.dot_dimension_numbers<[1], [0], [0], [1], [0, 0, 1, 1], [], []>} : vector<32x1024xbf16>, vector<1024x128xbf16>, vector<32x128xf32> -> vector<32x128xf32>
    %c0_5 = arith.constant 0 : index
    %c0_6 = arith.constant 0 : index
    %c0_7 = arith.constant 0 : index
    %5 = vector.load %arg4[%c0_5, %c0_6, %c0_7] : memref<1x32x128xf32, #tpu.memory_space<vmem>>, vector<1x32x128xf32>
    %6 = vector.shape_cast %5 : vector<1x32x128xf32> to vector<32x128xf32>
    %7 = vector.shape_cast %4 : vector<32x128xf32> to vector<1x32x128xf32>
    tpu.vector_store %arg4[%c0_5, %c0_6, %c0_7], %7 {strides = array<i32>} : memref<1x32x128xf32, #tpu.memory_space<vmem>>, vector<1x32x128xf32>,
    %cst_8 = arith.constant dense<0.000000e+00> : vector<128xf32>
    %8 = vector.multi_reduction <add>, %4, %cst_8 [0] : vector<32x128xf32> to vector<128xf32>
    %9 = vector.shape_cast %8 : vector<128xf32> to vector<1x128xf32>
    %10 = vector.shape_cast %9 : vector<1x128xf32> to vector<1x128xf32>
    %11 = vector.broadcast %10 : vector<1x128xf32> to vector<8x128xf32>
    %c0_9 = arith.constant 0 : index
    %c0_10 = arith.constant 0 : index
    %c0_11 = arith.constant 0 : index
    %c0_12 = arith.constant 0 : index
    %12 = vector.load %arg5[%c0_9, %c0_10, %c0_11, %c0_12] : memref<1x1x8x128xf32, #tpu.memory_space<vmem>>, vector<1x1x8x128xf32>
    %13 = vector.shape_cast %12 : vector<1x1x8x128xf32> to vector<8x128xf32>
    %14 = vector.shape_cast %11 : vector<8x128xf32> to vector<1x1x8x128xf32>
    tpu.vector_store %arg5[%c0_9, %c0_10, %c0_11, %c0_12], %14 {strides = array<i32>} : memref<1x1x8x128xf32, #tpu.memory_space<vmem>>, vector<1x1x8x128xf32>,
    %15 = arith.mulf %4, %4 : vector<32x128xf32>
    %cst_13 = arith.constant dense<0.000000e+00> : vector<128xf32>
    %16 = vector.multi_reduction <add>, %15, %cst_13 [0] : vector<32x128xf32> to vector<128xf32>
    %17 = vector.shape_cast %16 : vector<128xf32> to vector<1x128xf32>
    %18 = vector.shape_cast %17 : vector<1x128xf32> to vector<1x128xf32>
    %19 = vector.broadcast %18 : vector<1x128xf32> to vector<8x128xf32>
    %c0_14 = arith.constant 0 : index
    %c0_15 = arith.constant 0 : index
    %c0_16 = arith.constant 0 : index
    %c0_17 = arith.constant 0 : index
    %20 = vector.load %arg6[%c0_14, %c0_15, %c0_16, %c0_17] : memref<1x1x8x128xf32, #tpu.memory_space<vmem>>, vector<1x1x8x128xf32>
    %21 = vector.shape_cast %20 : vector<1x1x8x128xf32> to vector<8x128xf32>
    %22 = vector.shape_cast %19 : vector<8x128xf32> to vector<1x1x8x128xf32>
    tpu.vector_store %arg6[%c0_14, %c0_15, %c0_16, %c0_17], %22 {strides = array<i32>} : memref<1x1x8x128xf32, #tpu.memory_space<vmem>>, vector<1x1x8x128xf32>,
    return
  }
  func.func @transform_0(%arg0: i32, %arg1: i32) -> (i32, i32, i32) {
    %c0_i32 = arith.constant 0 : i32
    %c0_i32_0 = arith.constant 0 : i32
    return %arg0, %arg1, %c0_i32 : i32, i32, i32
  }
  func.func @transform_1(%arg0: i32, %arg1: i32) -> (i32, i32, i32) {
    %c0_i32 = arith.constant 0 : i32
    %c0_i32_0 = arith.constant 0 : i32
    %c0_i32_1 = arith.constant 0 : i32
    return %arg0, %c0_i32, %c0_i32_0 : i32, i32, i32
  }
  func.func @transform_2(%arg0: i32, %arg1: i32) -> (i32, i32, i32) {
    %c0_i32 = arith.constant 0 : i32
    %c0_i32_0 = arith.constant 0 : i32
    return %arg0, %arg1, %c0_i32 : i32, i32, i32
  }
  func.func @transform_3(%arg0: i32, %arg1: i32) -> (i32, i32, i32, i32) {
    %c0_i32 = arith.constant 0 : i32
    %c0_i32_0 = arith.constant 0 : i32
    %c0_i32_1 = arith.constant 0 : i32
    return %arg0, %arg1, %c0_i32, %c0_i32_0 : i32, i32, i32, i32
  }
  func.func @transform_4(%arg0: i32, %arg1: i32) -> (i32, i32, i32, i32) {
    %c0_i32 = arith.constant 0 : i32
    %c0_i32_0 = arith.constant 0 : i32
    %c0_i32_1 = arith.constant 0 : i32
    return %arg0, %arg1, %c0_i32, %c0_i32_0 : i32, i32, i32, i32
  }
}

module attributes {stable_mosaic.version = 11 : i64} {
  func.func @_scale_relu_kernel(%arg0: i32, %arg1: i32, %arg2: memref<1x32x128xf32, #tpu.memory_space<vmem>>, %arg3: memref<1x128xf32, #tpu.memory_space<vmem>>, %arg4: memref<1x128xf32, #tpu.memory_space<vmem>>, %arg5: memref<1x32x128xbf16, #tpu.memory_space<vmem>>) attributes {dimension_semantics = [#tpu.dimension_semantics<parallel>, #tpu.dimension_semantics<parallel>], iteration_bounds = array<i64: 4, 1>, scalar_prefetch = 0 : i64, scratch_operands = 0 : i64, tpu.core_type = #tpu.core_type<tc>, window_params = [{transform_indices = @transform_0, window_bounds = array<i64: 1, 32, 128>}, {pipeline_mode = #tpu.pipeline_mode<synchronous>, transform_indices = @transform_1, window_bounds = array<i64: 1, 128>}, {pipeline_mode = #tpu.pipeline_mode<synchronous>, transform_indices = @transform_2, window_bounds = array<i64: 1, 128>}, {transform_indices = @transform_3, window_bounds = array<i64: 1, 32, 128>}]} {
    %c0 = arith.constant 0 : index
    %c0_0 = arith.constant 0 : index
    %c0_1 = arith.constant 0 : index
    %0 = vector.load %arg2[%c0, %c0_0, %c0_1] : memref<1x32x128xf32, #tpu.memory_space<vmem>>, vector<1x32x128xf32>
    %1 = vector.shape_cast %0 : vector<1x32x128xf32> to vector<32x128xf32>
    %c0_2 = arith.constant 0 : index
    %c0_3 = arith.constant 0 : index
    %2 = vector.load %arg3[%c0_2, %c0_3] : memref<1x128xf32, #tpu.memory_space<vmem>>, vector<1x128xf32>
    %3 = vector.broadcast %2 : vector<1x128xf32> to vector<32x128xf32>
    %4 = arith.mulf %1, %3 : vector<32x128xf32>
    %c0_4 = arith.constant 0 : index
    %c0_5 = arith.constant 0 : index
    %5 = vector.load %arg4[%c0_4, %c0_5] : memref<1x128xf32, #tpu.memory_space<vmem>>, vector<1x128xf32>
    %6 = vector.broadcast %5 : vector<1x128xf32> to vector<32x128xf32>
    %7 = arith.addf %4, %6 : vector<32x128xf32>
    %cst = arith.constant 0.000000e+00 : f32
    %8 = vector.broadcast %cst : f32 to vector<32x128xf32>
    %9 = arith.maximumf %7, %8 : vector<32x128xf32>
    %10 = arith.truncf %9 : vector<32x128xf32> to vector<32x128xbf16>
    %c0_6 = arith.constant 0 : index
    %c0_7 = arith.constant 0 : index
    %c0_8 = arith.constant 0 : index
    %11 = vector.load %arg5[%c0_6, %c0_7, %c0_8] : memref<1x32x128xbf16, #tpu.memory_space<vmem>>, vector<1x32x128xbf16>
    %12 = vector.shape_cast %11 : vector<1x32x128xbf16> to vector<32x128xbf16>
    %13 = vector.shape_cast %10 : vector<32x128xbf16> to vector<1x32x128xbf16>
    tpu.vector_store %arg5[%c0_6, %c0_7, %c0_8], %13 {strides = array<i32>} : memref<1x32x128xbf16, #tpu.memory_space<vmem>>, vector<1x32x128xbf16>,
    return
  }
  func.func @transform_0(%arg0: i32, %arg1: i32) -> (i32, i32, i32) {
    %c0_i32 = arith.constant 0 : i32
    %c0_i32_0 = arith.constant 0 : i32
    return %arg0, %arg1, %c0_i32 : i32, i32, i32
  }
  func.func @transform_1(%arg0: i32, %arg1: i32) -> (i32, i32) {
    %c0_i32 = arith.constant 0 : i32
    %c0_i32_0 = arith.constant 0 : i32
    %c0_i32_1 = arith.constant 0 : i32
    return %c0_i32, %c0_i32_0 : i32, i32
  }
  func.func @transform_2(%arg0: i32, %arg1: i32) -> (i32, i32) {
    %c0_i32 = arith.constant 0 : i32
    %c0_i32_0 = arith.constant 0 : i32
    %c0_i32_1 = arith.constant 0 : i32
    return %c0_i32, %c0_i32_0 : i32, i32
  }
  func.func @transform_3(%arg0: i32, %arg1: i32) -> (i32, i32, i32) {
    %c0_i32 = arith.constant 0 : i32
    %c0_i32_0 = arith.constant 0 : i32
    return %arg0, %arg1, %c0_i32 : i32, i32, i32
  }
}

module attributes {stable_mosaic.version = 11 : i64} {
  func.func @_mm_stats_kernel(%arg0: i32, %arg1: i32, %arg2: memref<1x128x512xbf16, #tpu.memory_space<vmem>>, %arg3: memref<1x512x128xbf16, #tpu.memory_space<vmem>>, %arg4: memref<1x128x128xf32, #tpu.memory_space<vmem>>, %arg5: memref<1x1x8x128xf32, #tpu.memory_space<vmem>>, %arg6: memref<1x1x8x128xf32, #tpu.memory_space<vmem>>) attributes {dimension_semantics = [#tpu.dimension_semantics<parallel>, #tpu.dimension_semantics<parallel>], iteration_bounds = array<i64: 4, 1>, scalar_prefetch = 0 : i64, scratch_operands = 0 : i64, tpu.core_type = #tpu.core_type<tc>, window_params = [{transform_indices = @transform_0, window_bounds = array<i64: 1, 128, 512>}, {transform_indices = @transform_1, window_bounds = array<i64: 1, 512, 128>}, {transform_indices = @transform_2, window_bounds = array<i64: 1, 128, 128>}, {transform_indices = @transform_3, window_bounds = array<i64: 1, 1, 8, 128>}, {transform_indices = @transform_4, window_bounds = array<i64: 1, 1, 8, 128>}]} {
    %c0 = arith.constant 0 : index
    %c0_0 = arith.constant 0 : index
    %c0_1 = arith.constant 0 : index
    %0 = vector.load %arg2[%c0, %c0_0, %c0_1] : memref<1x128x512xbf16, #tpu.memory_space<vmem>>, vector<1x128x512xbf16>
    %1 = vector.shape_cast %0 : vector<1x128x512xbf16> to vector<128x512xbf16>
    %c0_2 = arith.constant 0 : index
    %c0_3 = arith.constant 0 : index
    %c0_4 = arith.constant 0 : index
    %2 = vector.load %arg3[%c0_2, %c0_3, %c0_4] : memref<1x512x128xbf16, #tpu.memory_space<vmem>>, vector<1x512x128xbf16>
    %3 = vector.shape_cast %2 : vector<1x512x128xbf16> to vector<512x128xbf16>
    %cst = arith.constant dense<0.000000e+00> : vector<128x128xf32>
    %4 = tpu.matmul %1, %3, %cst {dimension_numbers = #tpu.dot_dimension_numbers<[1], [0], [0], [1], [0, 0, 1, 1], [], []>} : vector<128x512xbf16>, vector<512x128xbf16>, vector<128x128xf32> -> vector<128x128xf32>
    %c0_5 = arith.constant 0 : index
    %c0_6 = arith.constant 0 : index
    %c0_7 = arith.constant 0 : index
    %5 = vector.load %arg4[%c0_5, %c0_6, %c0_7] : memref<1x128x128xf32, #tpu.memory_space<vmem>>, vector<1x128x128xf32>
    %6 = vector.shape_cast %5 : vector<1x128x128xf32> to vector<128x128xf32>
    %7 = vector.shape_cast %4 : vector<128x128xf32> to vector<1x128x128xf32>
    tpu.vector_store %arg4[%c0_5, %c0_6, %c0_7], %7 {strides = array<i32>} : memref<1x128x128xf32, #tpu.memory_space<vmem>>, vector<1x128x128xf32>,
    %cst_8 = arith.constant dense<0.000000e+00> : vector<128xf32>
    %8 = vector.multi_reduction <add>, %4, %cst_8 [0] : vector<128x128xf32> to vector<128xf32>
    %9 = vector.shape_cast %8 : vector<128xf32> to vector<1x128xf32>
    %10 = vector.shape_cast %9 : vector<1x128xf32> to vector<1x128xf32>
    %11 = vector.broadcast %10 : vector<1x128xf32> to vector<8x128xf32>
    %c0_9 = arith.constant 0 : index
    %c0_10 = arith.constant 0 : index
    %c0_11 = arith.constant 0 : index
    %c0_12 = arith.constant 0 : index
    %12 = vector.load %arg5[%c0_9, %c0_10, %c0_11, %c0_12] : memref<1x1x8x128xf32, #tpu.memory_space<vmem>>, vector<1x1x8x128xf32>
    %13 = vector.shape_cast %12 : vector<1x1x8x128xf32> to vector<8x128xf32>
    %14 = vector.shape_cast %11 : vector<8x128xf32> to vector<1x1x8x128xf32>
    tpu.vector_store %arg5[%c0_9, %c0_10, %c0_11, %c0_12], %14 {strides = array<i32>} : memref<1x1x8x128xf32, #tpu.memory_space<vmem>>, vector<1x1x8x128xf32>,
    %15 = arith.mulf %4, %4 : vector<128x128xf32>
    %cst_13 = arith.constant dense<0.000000e+00> : vector<128xf32>
    %16 = vector.multi_reduction <add>, %15, %cst_13 [0] : vector<128x128xf32> to vector<128xf32>
    %17 = vector.shape_cast %16 : vector<128xf32> to vector<1x128xf32>
    %18 = vector.shape_cast %17 : vector<1x128xf32> to vector<1x128xf32>
    %19 = vector.broadcast %18 : vector<1x128xf32> to vector<8x128xf32>
    %c0_14 = arith.constant 0 : index
    %c0_15 = arith.constant 0 : index
    %c0_16 = arith.constant 0 : index
    %c0_17 = arith.constant 0 : index
    %20 = vector.load %arg6[%c0_14, %c0_15, %c0_16, %c0_17] : memref<1x1x8x128xf32, #tpu.memory_space<vmem>>, vector<1x1x8x128xf32>
    %21 = vector.shape_cast %20 : vector<1x1x8x128xf32> to vector<8x128xf32>
    %22 = vector.shape_cast %19 : vector<8x128xf32> to vector<1x1x8x128xf32>
    tpu.vector_store %arg6[%c0_14, %c0_15, %c0_16, %c0_17], %22 {strides = array<i32>} : memref<1x1x8x128xf32, #tpu.memory_space<vmem>>, vector<1x1x8x128xf32>,
    return
  }
  func.func @transform_0(%arg0: i32, %arg1: i32) -> (i32, i32, i32) {
    %c0_i32 = arith.constant 0 : i32
    %c0_i32_0 = arith.constant 0 : i32
    return %arg0, %arg1, %c0_i32 : i32, i32, i32
  }
  func.func @transform_1(%arg0: i32, %arg1: i32) -> (i32, i32, i32) {
    %c0_i32 = arith.constant 0 : i32
    %c0_i32_0 = arith.constant 0 : i32
    %c0_i32_1 = arith.constant 0 : i32
    return %arg0, %c0_i32, %c0_i32_0 : i32, i32, i32
  }
  func.func @transform_2(%arg0: i32, %arg1: i32) -> (i32, i32, i32) {
    %c0_i32 = arith.constant 0 : i32
    %c0_i32_0 = arith.constant 0 : i32
    return %arg0, %arg1, %c0_i32 : i32, i32, i32
  }
  func.func @transform_3(%arg0: i32, %arg1: i32) -> (i32, i32, i32, i32) {
    %c0_i32 = arith.constant 0 : i32
    %c0_i32_0 = arith.constant 0 : i32
    %c0_i32_1 = arith.constant 0 : i32
    return %arg0, %arg1, %c0_i32, %c0_i32_0 : i32, i32, i32, i32
  }
  func.func @transform_4(%arg0: i32, %arg1: i32) -> (i32, i32, i32, i32) {
    %c0_i32 = arith.constant 0 : i32
    %c0_i32_0 = arith.constant 0 : i32
    %c0_i32_1 = arith.constant 0 : i32
    return %arg0, %arg1, %c0_i32, %c0_i32_0 : i32, i32, i32, i32
  }
}

module attributes {stable_mosaic.version = 11 : i64} {
  func.func @_scale_relu_kernel(%arg0: i32, %arg1: i32, %arg2: memref<1x128x128xf32, #tpu.memory_space<vmem>>, %arg3: memref<1x128xf32, #tpu.memory_space<vmem>>, %arg4: memref<1x128xf32, #tpu.memory_space<vmem>>, %arg5: memref<1x128x128xbf16, #tpu.memory_space<vmem>>) attributes {dimension_semantics = [#tpu.dimension_semantics<parallel>, #tpu.dimension_semantics<parallel>], iteration_bounds = array<i64: 4, 1>, scalar_prefetch = 0 : i64, scratch_operands = 0 : i64, tpu.core_type = #tpu.core_type<tc>, window_params = [{transform_indices = @transform_0, window_bounds = array<i64: 1, 128, 128>}, {pipeline_mode = #tpu.pipeline_mode<synchronous>, transform_indices = @transform_1, window_bounds = array<i64: 1, 128>}, {pipeline_mode = #tpu.pipeline_mode<synchronous>, transform_indices = @transform_2, window_bounds = array<i64: 1, 128>}, {transform_indices = @transform_3, window_bounds = array<i64: 1, 128, 128>}]} {
    %c0 = arith.constant 0 : index
    %c0_0 = arith.constant 0 : index
    %c0_1 = arith.constant 0 : index
    %0 = vector.load %arg2[%c0, %c0_0, %c0_1] : memref<1x128x128xf32, #tpu.memory_space<vmem>>, vector<1x128x128xf32>
    %1 = vector.shape_cast %0 : vector<1x128x128xf32> to vector<128x128xf32>
    %c0_2 = arith.constant 0 : index
    %c0_3 = arith.constant 0 : index
    %2 = vector.load %arg3[%c0_2, %c0_3] : memref<1x128xf32, #tpu.memory_space<vmem>>, vector<1x128xf32>
    %3 = vector.broadcast %2 : vector<1x128xf32> to vector<128x128xf32>
    %4 = arith.mulf %1, %3 : vector<128x128xf32>
    %c0_4 = arith.constant 0 : index
    %c0_5 = arith.constant 0 : index
    %5 = vector.load %arg4[%c0_4, %c0_5] : memref<1x128xf32, #tpu.memory_space<vmem>>, vector<1x128xf32>
    %6 = vector.broadcast %5 : vector<1x128xf32> to vector<128x128xf32>
    %7 = arith.addf %4, %6 : vector<128x128xf32>
    %cst = arith.constant 0.000000e+00 : f32
    %8 = vector.broadcast %cst : f32 to vector<128x128xf32>
    %9 = arith.maximumf %7, %8 : vector<128x128xf32>
    %10 = arith.truncf %9 : vector<128x128xf32> to vector<128x128xbf16>
    %c0_6 = arith.constant 0 : index
    %c0_7 = arith.constant 0 : index
    %c0_8 = arith.constant 0 : index
    %11 = vector.load %arg5[%c0_6, %c0_7, %c0_8] : memref<1x128x128xbf16, #tpu.memory_space<vmem>>, vector<1x128x128xbf16>
    %12 = vector.shape_cast %11 : vector<1x128x128xbf16> to vector<128x128xbf16>
    %13 = vector.shape_cast %10 : vector<128x128xbf16> to vector<1x128x128xbf16>
    tpu.vector_store %arg5[%c0_6, %c0_7, %c0_8], %13 {strides = array<i32>} : memref<1x128x128xbf16, #tpu.memory_space<vmem>>, vector<1x128x128xbf16>,
    return
  }
  func.func @transform_0(%arg0: i32, %arg1: i32) -> (i32, i32, i32) {
    %c0_i32 = arith.constant 0 : i32
    %c0_i32_0 = arith.constant 0 : i32
    return %arg0, %arg1, %c0_i32 : i32, i32, i32
  }
  func.func @transform_1(%arg0: i32, %arg1: i32) -> (i32, i32) {
    %c0_i32 = arith.constant 0 : i32
    %c0_i32_0 = arith.constant 0 : i32
    %c0_i32_1 = arith.constant 0 : i32
    return %c0_i32, %c0_i32_0 : i32, i32
  }
  func.func @transform_2(%arg0: i32, %arg1: i32) -> (i32, i32) {
    %c0_i32 = arith.constant 0 : i32
    %c0_i32_0 = arith.constant 0 : i32
    %c0_i32_1 = arith.constant 0 : i32
    return %c0_i32, %c0_i32_0 : i32, i32
  }
  func.func @transform_3(%arg0: i32, %arg1: i32) -> (i32, i32, i32) {
    %c0_i32 = arith.constant 0 : i32
    %c0_i32_0 = arith.constant 0 : i32
    return %arg0, %arg1, %c0_i32 : i32, i32, i32
  }
}

module attributes {stable_mosaic.version = 11 : i64} {
  func.func @_mm_stats_kernel(%arg0: i32, %arg1: i32, %arg2: memref<1x512x256xbf16, #tpu.memory_space<vmem>>, %arg3: memref<1x256x128xbf16, #tpu.memory_space<vmem>>, %arg4: memref<1x512x128xf32, #tpu.memory_space<vmem>>, %arg5: memref<1x1x8x128xf32, #tpu.memory_space<vmem>>, %arg6: memref<1x1x8x128xf32, #tpu.memory_space<vmem>>) attributes {dimension_semantics = [#tpu.dimension_semantics<parallel>, #tpu.dimension_semantics<parallel>], iteration_bounds = array<i64: 4, 1>, scalar_prefetch = 0 : i64, scratch_operands = 0 : i64, tpu.core_type = #tpu.core_type<tc>, window_params = [{transform_indices = @transform_0, window_bounds = array<i64: 1, 512, 256>}, {transform_indices = @transform_1, window_bounds = array<i64: 1, 256, 128>}, {transform_indices = @transform_2, window_bounds = array<i64: 1, 512, 128>}, {transform_indices = @transform_3, window_bounds = array<i64: 1, 1, 8, 128>}, {transform_indices = @transform_4, window_bounds = array<i64: 1, 1, 8, 128>}]} {
    %c0 = arith.constant 0 : index
    %c0_0 = arith.constant 0 : index
    %c0_1 = arith.constant 0 : index
    %0 = vector.load %arg2[%c0, %c0_0, %c0_1] : memref<1x512x256xbf16, #tpu.memory_space<vmem>>, vector<1x512x256xbf16>
    %1 = vector.shape_cast %0 : vector<1x512x256xbf16> to vector<512x256xbf16>
    %c0_2 = arith.constant 0 : index
    %c0_3 = arith.constant 0 : index
    %c0_4 = arith.constant 0 : index
    %2 = vector.load %arg3[%c0_2, %c0_3, %c0_4] : memref<1x256x128xbf16, #tpu.memory_space<vmem>>, vector<1x256x128xbf16>
    %3 = vector.shape_cast %2 : vector<1x256x128xbf16> to vector<256x128xbf16>
    %cst = arith.constant dense<0.000000e+00> : vector<512x128xf32>
    %4 = tpu.matmul %1, %3, %cst {dimension_numbers = #tpu.dot_dimension_numbers<[1], [0], [0], [1], [0, 0, 1, 1], [], []>} : vector<512x256xbf16>, vector<256x128xbf16>, vector<512x128xf32> -> vector<512x128xf32>
    %c0_5 = arith.constant 0 : index
    %c0_6 = arith.constant 0 : index
    %c0_7 = arith.constant 0 : index
    %5 = vector.load %arg4[%c0_5, %c0_6, %c0_7] : memref<1x512x128xf32, #tpu.memory_space<vmem>>, vector<1x512x128xf32>
    %6 = vector.shape_cast %5 : vector<1x512x128xf32> to vector<512x128xf32>
    %7 = vector.shape_cast %4 : vector<512x128xf32> to vector<1x512x128xf32>
    tpu.vector_store %arg4[%c0_5, %c0_6, %c0_7], %7 {strides = array<i32>} : memref<1x512x128xf32, #tpu.memory_space<vmem>>, vector<1x512x128xf32>,
    %cst_8 = arith.constant dense<0.000000e+00> : vector<128xf32>
    %8 = vector.multi_reduction <add>, %4, %cst_8 [0] : vector<512x128xf32> to vector<128xf32>
    %9 = vector.shape_cast %8 : vector<128xf32> to vector<1x128xf32>
    %10 = vector.shape_cast %9 : vector<1x128xf32> to vector<1x128xf32>
    %11 = vector.broadcast %10 : vector<1x128xf32> to vector<8x128xf32>
    %c0_9 = arith.constant 0 : index
    %c0_10 = arith.constant 0 : index
    %c0_11 = arith.constant 0 : index
    %c0_12 = arith.constant 0 : index
    %12 = vector.load %arg5[%c0_9, %c0_10, %c0_11, %c0_12] : memref<1x1x8x128xf32, #tpu.memory_space<vmem>>, vector<1x1x8x128xf32>
    %13 = vector.shape_cast %12 : vector<1x1x8x128xf32> to vector<8x128xf32>
    %14 = vector.shape_cast %11 : vector<8x128xf32> to vector<1x1x8x128xf32>
    tpu.vector_store %arg5[%c0_9, %c0_10, %c0_11, %c0_12], %14 {strides = array<i32>} : memref<1x1x8x128xf32, #tpu.memory_space<vmem>>, vector<1x1x8x128xf32>,
    %15 = arith.mulf %4, %4 : vector<512x128xf32>
    %cst_13 = arith.constant dense<0.000000e+00> : vector<128xf32>
    %16 = vector.multi_reduction <add>, %15, %cst_13 [0] : vector<512x128xf32> to vector<128xf32>
    %17 = vector.shape_cast %16 : vector<128xf32> to vector<1x128xf32>
    %18 = vector.shape_cast %17 : vector<1x128xf32> to vector<1x128xf32>
    %19 = vector.broadcast %18 : vector<1x128xf32> to vector<8x128xf32>
    %c0_14 = arith.constant 0 : index
    %c0_15 = arith.constant 0 : index
    %c0_16 = arith.constant 0 : index
    %c0_17 = arith.constant 0 : index
    %20 = vector.load %arg6[%c0_14, %c0_15, %c0_16, %c0_17] : memref<1x1x8x128xf32, #tpu.memory_space<vmem>>, vector<1x1x8x128xf32>
    %21 = vector.shape_cast %20 : vector<1x1x8x128xf32> to vector<8x128xf32>
    %22 = vector.shape_cast %19 : vector<8x128xf32> to vector<1x1x8x128xf32>
    tpu.vector_store %arg6[%c0_14, %c0_15, %c0_16, %c0_17], %22 {strides = array<i32>} : memref<1x1x8x128xf32, #tpu.memory_space<vmem>>, vector<1x1x8x128xf32>,
    return
  }
  func.func @transform_0(%arg0: i32, %arg1: i32) -> (i32, i32, i32) {
    %c0_i32 = arith.constant 0 : i32
    %c0_i32_0 = arith.constant 0 : i32
    return %arg0, %arg1, %c0_i32 : i32, i32, i32
  }
  func.func @transform_1(%arg0: i32, %arg1: i32) -> (i32, i32, i32) {
    %c0_i32 = arith.constant 0 : i32
    %c0_i32_0 = arith.constant 0 : i32
    %c0_i32_1 = arith.constant 0 : i32
    return %arg0, %c0_i32, %c0_i32_0 : i32, i32, i32
  }
  func.func @transform_2(%arg0: i32, %arg1: i32) -> (i32, i32, i32) {
    %c0_i32 = arith.constant 0 : i32
    %c0_i32_0 = arith.constant 0 : i32
    return %arg0, %arg1, %c0_i32 : i32, i32, i32
  }
  func.func @transform_3(%arg0: i32, %arg1: i32) -> (i32, i32, i32, i32) {
    %c0_i32 = arith.constant 0 : i32
    %c0_i32_0 = arith.constant 0 : i32
    %c0_i32_1 = arith.constant 0 : i32
    return %arg0, %arg1, %c0_i32, %c0_i32_0 : i32, i32, i32, i32
  }
  func.func @transform_4(%arg0: i32, %arg1: i32) -> (i32, i32, i32, i32) {
    %c0_i32 = arith.constant 0 : i32
    %c0_i32_0 = arith.constant 0 : i32
    %c0_i32_1 = arith.constant 0 : i32
    return %arg0, %arg1, %c0_i32, %c0_i32_0 : i32, i32, i32, i32
  }
}

module attributes {stable_mosaic.version = 11 : i64} {
  func.func @_scale_relu_kernel(%arg0: i32, %arg1: i32, %arg2: memref<1x512x128xf32, #tpu.memory_space<vmem>>, %arg3: memref<1x128xf32, #tpu.memory_space<vmem>>, %arg4: memref<1x128xf32, #tpu.memory_space<vmem>>, %arg5: memref<1x512x128xbf16, #tpu.memory_space<vmem>>) attributes {dimension_semantics = [#tpu.dimension_semantics<parallel>, #tpu.dimension_semantics<parallel>], iteration_bounds = array<i64: 4, 1>, scalar_prefetch = 0 : i64, scratch_operands = 0 : i64, tpu.core_type = #tpu.core_type<tc>, window_params = [{transform_indices = @transform_0, window_bounds = array<i64: 1, 512, 128>}, {pipeline_mode = #tpu.pipeline_mode<synchronous>, transform_indices = @transform_1, window_bounds = array<i64: 1, 128>}, {pipeline_mode = #tpu.pipeline_mode<synchronous>, transform_indices = @transform_2, window_bounds = array<i64: 1, 128>}, {transform_indices = @transform_3, window_bounds = array<i64: 1, 512, 128>}]} {
    %c0 = arith.constant 0 : index
    %c0_0 = arith.constant 0 : index
    %c0_1 = arith.constant 0 : index
    %0 = vector.load %arg2[%c0, %c0_0, %c0_1] : memref<1x512x128xf32, #tpu.memory_space<vmem>>, vector<1x512x128xf32>
    %1 = vector.shape_cast %0 : vector<1x512x128xf32> to vector<512x128xf32>
    %c0_2 = arith.constant 0 : index
    %c0_3 = arith.constant 0 : index
    %2 = vector.load %arg3[%c0_2, %c0_3] : memref<1x128xf32, #tpu.memory_space<vmem>>, vector<1x128xf32>
    %3 = vector.broadcast %2 : vector<1x128xf32> to vector<512x128xf32>
    %4 = arith.mulf %1, %3 : vector<512x128xf32>
    %c0_4 = arith.constant 0 : index
    %c0_5 = arith.constant 0 : index
    %5 = vector.load %arg4[%c0_4, %c0_5] : memref<1x128xf32, #tpu.memory_space<vmem>>, vector<1x128xf32>
    %6 = vector.broadcast %5 : vector<1x128xf32> to vector<512x128xf32>
    %7 = arith.addf %4, %6 : vector<512x128xf32>
    %cst = arith.constant 0.000000e+00 : f32
    %8 = vector.broadcast %cst : f32 to vector<512x128xf32>
    %9 = arith.maximumf %7, %8 : vector<512x128xf32>
    %10 = arith.truncf %9 : vector<512x128xf32> to vector<512x128xbf16>
    %c0_6 = arith.constant 0 : index
    %c0_7 = arith.constant 0 : index
    %c0_8 = arith.constant 0 : index
    %11 = vector.load %arg5[%c0_6, %c0_7, %c0_8] : memref<1x512x128xbf16, #tpu.memory_space<vmem>>, vector<1x512x128xbf16>
    %12 = vector.shape_cast %11 : vector<1x512x128xbf16> to vector<512x128xbf16>
    %13 = vector.shape_cast %10 : vector<512x128xbf16> to vector<1x512x128xbf16>
    tpu.vector_store %arg5[%c0_6, %c0_7, %c0_8], %13 {strides = array<i32>} : memref<1x512x128xbf16, #tpu.memory_space<vmem>>, vector<1x512x128xbf16>,
    return
  }
  func.func @transform_0(%arg0: i32, %arg1: i32) -> (i32, i32, i32) {
    %c0_i32 = arith.constant 0 : i32
    %c0_i32_0 = arith.constant 0 : i32
    return %arg0, %arg1, %c0_i32 : i32, i32, i32
  }
  func.func @transform_1(%arg0: i32, %arg1: i32) -> (i32, i32) {
    %c0_i32 = arith.constant 0 : i32
    %c0_i32_0 = arith.constant 0 : i32
    %c0_i32_1 = arith.constant 0 : i32
    return %c0_i32, %c0_i32_0 : i32, i32
  }
  func.func @transform_2(%arg0: i32, %arg1: i32) -> (i32, i32) {
    %c0_i32 = arith.constant 0 : i32
    %c0_i32_0 = arith.constant 0 : i32
    %c0_i32_1 = arith.constant 0 : i32
    return %c0_i32, %c0_i32_0 : i32, i32
  }
  func.func @transform_3(%arg0: i32, %arg1: i32) -> (i32, i32, i32) {
    %c0_i32 = arith.constant 0 : i32
    %c0_i32_0 = arith.constant 0 : i32
    return %arg0, %arg1, %c0_i32 : i32, i32, i32
  }
}

module attributes {stable_mosaic.version = 11 : i64} {
  func.func @_mm_tanh_kernel(%arg0: i32, %arg1: i32, %arg2: memref<1x2048x128xbf16, #tpu.memory_space<vmem>>, %arg3: memref<1x128x128xbf16, #tpu.memory_space<vmem>>, %arg4: memref<1x2048x128xf32, #tpu.memory_space<vmem>>) attributes {dimension_semantics = [#tpu.dimension_semantics<parallel>, #tpu.dimension_semantics<parallel>], iteration_bounds = array<i64: 4, 1>, scalar_prefetch = 0 : i64, scratch_operands = 0 : i64, tpu.core_type = #tpu.core_type<tc>, window_params = [{transform_indices = @transform_0, window_bounds = array<i64: 1, 2048, 128>}, {transform_indices = @transform_1, window_bounds = array<i64: 1, 128, 128>}, {transform_indices = @transform_2, window_bounds = array<i64: 1, 2048, 128>}]} {
    %c0 = arith.constant 0 : index
    %c0_0 = arith.constant 0 : index
    %c0_1 = arith.constant 0 : index
    %0 = vector.load %arg2[%c0, %c0_0, %c0_1] : memref<1x2048x128xbf16, #tpu.memory_space<vmem>>, vector<1x2048x128xbf16>
    %1 = vector.shape_cast %0 : vector<1x2048x128xbf16> to vector<2048x128xbf16>
    %c0_2 = arith.constant 0 : index
    %c0_3 = arith.constant 0 : index
    %c0_4 = arith.constant 0 : index
    %2 = vector.load %arg3[%c0_2, %c0_3, %c0_4] : memref<1x128x128xbf16, #tpu.memory_space<vmem>>, vector<1x128x128xbf16>
    %3 = vector.shape_cast %2 : vector<1x128x128xbf16> to vector<128x128xbf16>
    %cst = arith.constant dense<0.000000e+00> : vector<2048x128xf32>
    %4 = tpu.matmul %1, %3, %cst {dimension_numbers = #tpu.dot_dimension_numbers<[1], [0], [0], [1], [0, 0, 1, 1], [], []>} : vector<2048x128xbf16>, vector<128x128xbf16>, vector<2048x128xf32> -> vector<2048x128xf32>
    %5 = math.tanh %4 : vector<2048x128xf32>
    %c0_5 = arith.constant 0 : index
    %c0_6 = arith.constant 0 : index
    %c0_7 = arith.constant 0 : index
    %6 = vector.load %arg4[%c0_5, %c0_6, %c0_7] : memref<1x2048x128xf32, #tpu.memory_space<vmem>>, vector<1x2048x128xf32>
    %7 = vector.shape_cast %6 : vector<1x2048x128xf32> to vector<2048x128xf32>
    %8 = vector.shape_cast %5 : vector<2048x128xf32> to vector<1x2048x128xf32>
    tpu.vector_store %arg4[%c0_5, %c0_6, %c0_7], %8 {strides = array<i32>} : memref<1x2048x128xf32, #tpu.memory_space<vmem>>, vector<1x2048x128xf32>,
    return
  }
  func.func @transform_0(%arg0: i32, %arg1: i32) -> (i32, i32, i32) {
    %c0_i32 = arith.constant 0 : i32
    %c0_i32_0 = arith.constant 0 : i32
    return %arg0, %arg1, %c0_i32 : i32, i32, i32
  }
  func.func @transform_1(%arg0: i32, %arg1: i32) -> (i32, i32, i32) {
    %c0_i32 = arith.constant 0 : i32
    %c0_i32_0 = arith.constant 0 : i32
    %c0_i32_1 = arith.constant 0 : i32
    return %arg0, %c0_i32, %c0_i32_0 : i32, i32, i32
  }
  func.func @transform_2(%arg0: i32, %arg1: i32) -> (i32, i32, i32) {
    %c0_i32 = arith.constant 0 : i32
    %c0_i32_0 = arith.constant 0 : i32
    return %arg0, %arg1, %c0_i32 : i32, i32, i32
  }
}

</mosaic_0001>

<bundles_post_ra>
// kernel: squeeze.73
= control target key start
LH: loop header
LB: loop body
LE: loop exit
PB: predicated region body
PF: predicated region fallthrough
CT: control target
= control target key end

     0   :  { %s128_s0 = inlined_call_operand.vmem [shape: f32[4096], index: 0, kind: input, shape index: {}]   ;;  %s129_s1 = inlined_call_operand.vmem [shape: f32[16,256], index: 1, kind: output, shape index: {}]  }
   0x1   :  { %v2_v0 = vld [vmem:[%s128_s0] sm:$0xff]   ;;  %v43_v1 = vld [vmem:[%s128_s0 + $0x8] sm:$0xff]   ;;  %v48_v2 = vld [vmem:[%s128_s0 + $0x10] sm:$0xff]  }
   0x2   :  { %3 = vst [vmem:[%s129_s1] ss:$8 sm:$0x3] %v2_v0   ;;  %v53_v3 = vld [vmem:[%s128_s0 + $0x18] sm:$0xff]  }
   0x3   :  { %40 = vst [vmem:[%s129_s1 - $0xf] ss:$8 sm:$0xc] %v2_v0  }
   0x4   :  { %41 = vst [vmem:[%s129_s1 - $0x1e] ss:$8 sm:$0x30] %v2_v0  }
   0x5   :  { %42 = vst [vmem:[%s129_s1 - $0x2d] ss:$8 sm:$0xc0] %v2_v0  }
   0x6   :  { %44 = vst [vmem:[%s129_s1 + $0x4] ss:$8 sm:$0x3] %v43_v1  }
   0x7   :  { %45 = vst [vmem:[%s129_s1 - $0xb] ss:$8 sm:$0xc] %v43_v1  }
   0x8   :  { %46 = vst [vmem:[%s129_s1 - $0x1a] ss:$8 sm:$0x30] %v43_v1  }
   0x9   :  { %47 = vst [vmem:[%s129_s1 - $0x29] ss:$8 sm:$0xc0] %v43_v1  }
   0xa   :  { %49 = vst [vmem:[%s129_s1 + $0x10] ss:$8 sm:$0x3] %v48_v2  }
   0xb   :  { %50 = vst [vmem:[%s129_s1 + $0x1] ss:$8 sm:$0xc] %v48_v2  }
   0xc   :  { %51 = vst [vmem:[%s129_s1 - $0xe] ss:$8 sm:$0x30] %v48_v2  }
   0xd   :  { %52 = vst [vmem:[%s129_s1 - $0x1d] ss:$8 sm:$0xc0] %v48_v2  }
   0xe   :  { %54 = vst [vmem:[%s129_s1 + $0x14] ss:$8 sm:$0x3] %v53_v3  }
   0xf   :  { %55 = vst [vmem:[%s129_s1 + $0x5] ss:$8 sm:$0xc] %v53_v3  }
  0x10   :  { %56 = vst [vmem:[%s129_s1 - $0xa] ss:$8 sm:$0x30] %v53_v3  }
  0x11   :  { %57 = vst [vmem:[%s129_s1 - $0x19] ss:$8 sm:$0xc0] %v53_v3  }

// kernel: squeeze.75
= control target key start
LH: loop header
LB: loop body
LE: loop exit
PB: predicated region body
PF: predicated region fallthrough
CT: control target
= control target key end

     0   :  { %s712_s0 = inlined_call_operand.vmem [shape: f32[1,2,4096], index: 0, kind: input, shape index: {}]   ;;  %s713_s1 = inlined_call_operand.vmem [shape: f32[1,32,256], index: 1, kind: output, shape index: {}]  }
   0x1   :  { %v320_v0 = vld [vmem:[%s712_s0 + $0x3e] sm:$0x3]  ;;  %v321_v1 = vld [vmem:[%s712_s0 + $0x3c] sm:$0x3]  ;;  %v322_v2 = vld [vmem:[%s712_s0 + $0x3a] sm:$0x3] }
   0x2   :  { %7 = vst [vmem:[#allocation0 + $0x48] sm:$0x3] %v320_v0  ;;  %v323_v3 = vld [vmem:[%s712_s0 + $0x38] sm:$0x3]  ;;  %v324_v4 = vld [vmem:[%s712_s0 + $0x36] sm:$0x3] }
   0x3   :  { %11 = vst [vmem:[#allocation0 + $0xf8] sm:$0x3] %v321_v1  ;;  %v325_v5 = vld [vmem:[%s712_s0 + $0x34] sm:$0x3]  ;;  %v326_v6 = vld [vmem:[%s712_s0 + $0x32] sm:$0x3] }
   0x4   :  { %15 = vst [vmem:[#allocation0 + $0x20] sm:$0x3] %v322_v2  ;;  %v327_v7 = vld [vmem:[%s712_s0 + $0x30] sm:$0x3]  ;;  %v328_v8 = vld [vmem:[%s712_s0 + $0x2e] sm:$0x3] }
   0x5   :  { %19 = vst [vmem:[#allocation0 + $0xe0] sm:$0x3] %v323_v3  ;;  %v329_v9 = vld [vmem:[%s712_s0 + $0x2c] sm:$0x3]  ;;  %v330_v10 = vld [vmem:[%s712_s0 + $0x2a] sm:$0x3] }
   0x6   :  { %23 = vst [vmem:[#allocation0 + $0xa8] sm:$0x3] %v324_v4  ;;  %v331_v11 = vld [vmem:[%s712_s0 + $0x28] sm:$0x3]  ;;  %v332_v12 = vld [vmem:[%s712_s0 + $0x26] sm:$0x3] }
   0x7   :  { %27 = vst [vmem:[#allocation0 + $0x90] sm:$0x3] %v325_v5  ;;  %v333_v13 = vld [vmem:[%s712_s0 + $0x24] sm:$0x3]  ;;  %v334_v14 = vld [vmem:[%s712_s0 + $0x22] sm:$0x3] }
   0x8   :  { %31 = vst [vmem:[#allocation0 + $0xc8] sm:$0x3] %v326_v6  ;;  %v335_v15 = vld [vmem:[%s712_s0 + $0x20] sm:$0x3]  ;;  %v336_v16 = vld [vmem:[%s712_s0 + $0x1e] sm:$0x3] }
   0x9   :  { %35 = vst [vmem:[#allocation0 + $0xb0] sm:$0x3] %v327_v7  ;;  %v337_v17 = vld [vmem:[%s712_s0 + $0x1c] sm:$0x3]  ;;  %v338_v18 = vld [vmem:[%s712_s0 + $0x1a] sm:$0x3] }
   0xa   :  { %39 = vst [vmem:[#allocation0 + $0x78] sm:$0x3] %v328_v8  ;;  %v339_v19 = vld [vmem:[%s712_s0 + $0x18] sm:$0x3]  ;;  %v340_v20 = vld [vmem:[%s712_s0 + $0x16] sm:$0x3] }
   0xb   :  { %43 = vst [vmem:[#allocation0 + $0x70] sm:$0x3] %v329_v9  ;;  %v341_v21 = vld [vmem:[%s712_s0 + $0x14] sm:$0x3]  ;;  %v342_v22 = vld [vmem:[%s712_s0 + $0x12] sm:$0x3] }
   0xc   :  { %47 = vst [vmem:[#allocation0 + $0x10] sm:$0x3] %v330_v10  ;;  %v343_v23 = vld [vmem:[%s712_s0 + $0x10] sm:$0x3]  ;;  %v344_v24 = vld [vmem:[%s712_s0 + $0xe] sm:$0x3] }
   0xd   :  { %51 = vst [vmem:[#allocation0 + $0x40] sm:$0x3] %v331_v11  ;;  %v345_v25 = vld [vmem:[%s712_s0 + $0xc] sm:$0x3]  ;;  %v346_v26 = vld [vmem:[%s712_s0 + $0xa] sm:$0x3] }
   0xe   :  { %55 = vst [vmem:[#allocation0 + $0x98] sm:$0x3] %v332_v12  ;;  %v347_v27 = vld [vmem:[%s712_s0 + $0x8] sm:$0x3]  ;;  %v348_v28 = vld [vmem:[%s712_s0 + $0x6] sm:$0x3] }
   0xf   :  { %59 = vst [vmem:[#allocation0 + $0x8] sm:$0x3] %v333_v13  ;;  %v349_v29 = vld [vmem:[%s712_s0 + $0x4] sm:$0x3]  ;;  %v350_v30 = vld [vmem:[%s712_s0 + $0x2] sm:$0x3] }
  0x10   :  { %63 = vst [vmem:[#allocation0 + $0xf0] sm:$0x3] %v334_v14  ;;  %v128_v31 = vld [vmem:[%s712_s0] sm:$0x3]  ;;  %v273_v56 = vld [vmem:[#allocation0 + $0xb0] sm:$0x3]  }
  0x11   :  { %67 = vst [vmem:[#allocation0 + $0x80] sm:$0x3] %v335_v15  ;;  %v267_v55 = vld [vmem:[#allocation0 + $0x78] sm:$0x3]   ;;  %v279_v57 = vld [vmem:[#allocation0 + $0xc8] sm:$0x3]  }
  0x12   :  { %71 = vst [vmem:[#allocation0 + $0xc0] sm:$0x3] %v336_v16  ;;  %v261_v54 = vld [vmem:[#allocation0 + $0x70] sm:$0x3]   ;;  %v291_v59 = vld [vmem:[#allocation0 + $0xa8] sm:$0x3]  }
  0x13   :  { %75 = vst [vmem:[#allocation0 + $0xa0] sm:$0x3] %v337_v17  ;;  %v255_v53 = vld [vmem:[#allocation0 + $0x10] sm:$0x3]   ;;  %v297_v60 = vld [vmem:[#allocation0 + $0xe0] sm:$0x3]  }
  0x14   :  { %79 = vst [vmem:[#allocation0 + $0xb8] sm:$0x3] %v338_v18  ;;  %v249_v52 = vld [vmem:[#allocation0 + $0x40] sm:$0x3]   ;;  %v285_v58 = vld [vmem:[#allocation0 + $0x90] sm:$0x3]  }
  0x15   :  { %83 = vst [vmem:[#allocation0 + $0x30] sm:$0x3] %v339_v19  ;;  %v243_v51 = vld [vmem:[#allocation0 + $0x98] sm:$0x3]   ;;  %v303_v61 = vld [vmem:[#allocation0 + $0x20] sm:$0x3]  }
  0x16   :  { %87 = vst [vmem:[#allocation0 + $0x18] sm:$0x3] %v340_v20  ;;  %v237_v50 = vld [vmem:[#allocation0 + $0x8] sm:$0x3]   ;;  %v309_v62 = vld [vmem:[#allocation0 + $0xf8] sm:$0x3]  }
  0x17   :  { %91 = vst [vmem:[#allocation0 + $0x68] sm:$0x3] %v341_v21  ;;  %v231_v49 = vld [vmem:[#allocation0 + $0xf0] sm:$0x3]   ;;  %v315_v63 = vld [vmem:[#allocation0 + $0x48] sm:$0x3]  }
  0x18   :  { %95 = vst [vmem:[#allocation0 + $0x88] sm:$0x3] %v342_v22  ;;  %v225_v48 = vld [vmem:[#allocation0 + $0x80] sm:$0x3]  }
  0x19   :  { %99 = vst [vmem:[#allocation0 + $0x38] sm:$0x3] %v343_v23  ;;  %v219_v47 = vld [vmem:[#allocation0 + $0xc0] sm:$0x3]  }
  0x1a   :  { %103 = vst [vmem:[#allocation0 + $0x50] sm:$0x3] %v344_v24  ;;  %v213_v46 = vld [vmem:[#allocation0 + $0xa0] sm:$0x3]  }
  0x1b   :  { %107 = vst [vmem:[#allocation0 + $0x28] sm:$0x3] %v345_v25  ;;  %v207_v45 = vld [vmem:[#allocation0 + $0xb8] sm:$0x3]  }
  0x1c   :  { %111 = vst [vmem:[#allocation0 + $0xe8] sm:$0x3] %v346_v26  ;;  %v201_v44 = vld [vmem:[#allocation0 + $0x30] sm:$0x3]  }
  0x1d   :  { %115 = vst [vmem:[#allocation0 + $0xd0] sm:$0x3] %v347_v27  ;;  %v195_v43 = vld [vmem:[#allocation0 + $0x18] sm:$0x3]  }
  0x1e   :  { %119 = vst [vmem:[#allocation0 + $0x58] sm:$0x3] %v348_v28  ;;  %v189_v42 = vld [vmem:[#allocation0 + $0x68] sm:$0x3]  }
  0x1f   :  { %123 = vst [vmem:[#allocation0] sm:$0x3] %v349_v29  ;;  %v183_v41 = vld [vmem:[#allocation0 + $0x88] sm:$0x3]  }
  0x20   :  { %127 = vst [vmem:[#allocation0 + $0xd8] sm:$0x3] %v350_v30  ;;  %v177_v40 = vld [vmem:[#allocation0 + $0x38] sm:$0x3]  }
  0x21   :  { %129 = vst [vmem:[#allocation0 + $0x60] sm:$0x3] %v128_v31  ;;  %v171_v32 = vld [vmem:[#allocation0 + $0x50] sm:$0x3]  }
  0x22   :  { %v165_v33 = vld [vmem:[#allocation0 + $0x28] sm:$0x3]   ;;  %364 = vst [vmem:[%s713_s1 + $0xb] sm:$0x1] %v171_v32  }
  0x23   :  { %v159_v34 = vld [vmem:[#allocation0 + $0xe8] sm:$0x3]   ;;  %362 = vst [vmem:[%s713_s1 + $0x3] sm:$0x1] %v165_v33  }
  0x24   :  { %v153_v35 = vld [vmem:[#allocation0 + $0xd0] sm:$0x3]   ;;  %360 = vst [vmem:[%s713_s1 + $0xa] sm:$0x1] %v159_v34  }
  0x25   :  { %v147_v36 = vld [vmem:[#allocation0 + $0x58] sm:$0x3]   ;;  %358 = vst [vmem:[%s713_s1 + $0x2] sm:$0x1] %v153_v35  }
  0x26   :  { %v141_v37 = vld [vmem:[#allocation0] sm:$0x3]   ;;  %356 = vst [vmem:[%s713_s1 + $0x9] sm:$0x1] %v147_v36  }
  0x27   :  { %v135_v38 = vld [vmem:[#allocation0 + $0xd8] sm:$0x3]   ;;  %354 = vst [vmem:[%s713_s1 + $0x1] sm:$0x1] %v141_v37  }
  0x28   :  { %v130_v39 = vld [vmem:[#allocation0 + $0x60] sm:$0x3]   ;;  %352 = vst [vmem:[%s713_s1 + $0x8] sm:$0x1] %v135_v38  }
  0x29   :  { %131 = vst [vmem:[%s713_s1] sm:$0x1] %v130_v39  }
  0x2a   :  { %351 = vst [vmem:[%s713_s1 + $0x1f] sm:$0x2] %v130_v39  }
  0x2b   :  { %353 = vst [vmem:[%s713_s1 + $0x27] sm:$0x2] %v135_v38  }
  0x2c   :  { %355 = vst [vmem:[%s713_s1 + $0x20] sm:$0x2] %v141_v37  }
  0x2d   :  { %357 = vst [vmem:[%s713_s1 + $0x28] sm:$0x2] %v147_v36  }
  0x2e   :  { %359 = vst [vmem:[%s713_s1 + $0x21] sm:$0x2] %v153_v35  }
  0x2f   :  { %361 = vst [vmem:[%s713_s1 + $0x29] sm:$0x2] %v159_v34  }
  0x30   :  { %363 = vst [vmem:[%s713_s1 + $0x22] sm:$0x2] %v165_v33  }
  0x31   :  { %365 = vst [vmem:[%s713_s1 + $0x2a] sm:$0x2] %v171_v32  }
  0x32   :  { %366 = vst [vmem:[%s713_s1 + $0x4] sm:$0x1] %v177_v40  }
  0x33   :  { %367 = vst [vmem:[%s713_s1 + $0x23] sm:$0x2] %v177_v40  }
  0x34   :  { %368 = vst [vmem:[%s713_s1 + $0xc] sm:$0x1] %v183_v41  }
  0x35   :  { %369 = vst [vmem:[%s713_s1 + $0x2b] sm:$0x2] %v183_v41  }
  0x36   :  { %370 = vst [vmem:[%s713_s1 + $0x5] sm:$0x1] %v189_v42  }
  0x37   :  { %371 = vst [vmem:[%s713_s1 + $0x24] sm:$0x2] %v189_v42  }
  0x38   :  { %372 = vst [vmem:[%s713_s1 + $0xd] sm:$0x1] %v195_v43  }
  0x39   :  { %373 = vst [vmem:[%s713_s1 + $0x2c] sm:$0x2] %v195_v43  }
  0x3a   :  { %374 = vst [vmem:[%s713_s1 + $0x6] sm:$0x1] %v201_v44  }
  0x3b   :  { %375 = vst [vmem:[%s713_s1 + $0x25] sm:$0x2] %v201_v44  }
  0x3c   :  { %376 = vst [vmem:[%s713_s1 + $0xe] sm:$0x1] %v207_v45  }
  0x3d   :  { %377 = vst [vmem:[%s713_s1 + $0x2d] sm:$0x2] %v207_v45  }
  0x3e   :  { %378 = vst [vmem:[%s713_s1 + $0x7] sm:$0x1] %v213_v46  }
  0x3f   :  { %379 = vst [vmem:[%s713_s1 + $0x26] sm:$0x2] %v213_v46  }
  0x40   :  { %380 = vst [vmem:[%s713_s1 + $0xf] sm:$0x1] %v219_v47  }
  0x41   :  { %381 = vst [vmem:[%s713_s1 + $0x2e] sm:$0x2] %v219_v47  }
  0x42   :  { %382 = vst [vmem:[%s713_s1 + $0x10] sm:$0x1] %v225_v48  }
  0x43   :  { %383 = vst [vmem:[%s713_s1 + $0x2f] sm:$0x2] %v225_v48  }
  0x44   :  { %384 = vst [vmem:[%s713_s1 + $0x18] sm:$0x1] %v231_v49  }
  0x45   :  { %385 = vst [vmem:[%s713_s1 + $0x37] sm:$0x2] %v231_v49  }
  0x46   :  { %386 = vst [vmem:[%s713_s1 + $0x11] sm:$0x1] %v237_v50  }
  0x47   :  { %387 = vst [vmem:[%s713_s1 + $0x30] sm:$0x2] %v237_v50  }
  0x48   :  { %388 = vst [vmem:[%s713_s1 + $0x19] sm:$0x1] %v243_v51  }
  0x49   :  { %389 = vst [vmem:[%s713_s1 + $0x38] sm:$0x2] %v243_v51  }
  0x4a   :  { %390 = vst [vmem:[%s713_s1 + $0x12] sm:$0x1] %v249_v52  }
  0x4b   :  { %391 = vst [vmem:[%s713_s1 + $0x31] sm:$0x2] %v249_v52  }
  0x4c   :  { %392 = vst [vmem:[%s713_s1 + $0x1a] sm:$0x1] %v255_v53  }
  0x4d   :  { %393 = vst [vmem:[%s713_s1 + $0x39] sm:$0x2] %v255_v53  }
  0x4e   :  { %394 = vst [vmem:[%s713_s1 + $0x13] sm:$0x1] %v261_v54  }
  0x4f   :  { %395 = vst [vmem:[%s713_s1 + $0x32] sm:$0x2] %v261_v54  }
  0x50   :  { %396 = vst [vmem:[%s713_s1 + $0x1b] sm:$0x1] %v267_v55  }
  0x51   :  { %397 = vst [vmem:[%s713_s1 + $0x3a] sm:$0x2] %v267_v55  }
  0x52   :  { %398 = vst [vmem:[%s713_s1 + $0x14] sm:$0x1] %v273_v56  }
  0x53   :  { %399 = vst [vmem:[%s713_s1 + $0x33] sm:$0x2] %v273_v56  }
  0x54   :  { %400 = vst [vmem:[%s713_s1 + $0x1c] sm:$0x1] %v279_v57  }
  0x55   :  { %401 = vst [vmem:[%s713_s1 + $0x3b] sm:$0x2] %v279_v57  }
  0x56   :  { %402 = vst [vmem:[%s713_s1 + $0x15] sm:$0x1] %v285_v58  }
  0x57   :  { %403 = vst [vmem:[%s713_s1 + $0x34] sm:$0x2] %v285_v58  }
  0x58   :  { %404 = vst [vmem:[%s713_s1 + $0x1d] sm:$0x1] %v291_v59  }
  0x59   :  { %405 = vst [vmem:[%s713_s1 + $0x3c] sm:$0x2] %v291_v59  }
  0x5a   :  { %406 = vst [vmem:[%s713_s1 + $0x16] sm:$0x1] %v297_v60  }
  0x5b   :  { %407 = vst [vmem:[%s713_s1 + $0x35] sm:$0x2] %v297_v60  }
  0x5c   :  { %408 = vst [vmem:[%s713_s1 + $0x1e] sm:$0x1] %v303_v61  }
  0x5d   :  { %409 = vst [vmem:[%s713_s1 + $0x3d] sm:$0x2] %v303_v61  }
  0x5e   :  { %410 = vst [vmem:[%s713_s1 + $0x17] sm:$0x1] %v309_v62  }
  0x5f   :  { %411 = vst [vmem:[%s713_s1 + $0x36] sm:$0x2] %v309_v62  }
  0x60   :  { %412 = vst [vmem:[%s713_s1 + $0x1f] sm:$0x1] %v315_v63  }
  0x61   :  { %413 = vst [vmem:[%s713_s1 + $0x3e] sm:$0x2] %v315_v63  }

// kernel: generator_forward.10
= control target key start
LH: loop header
LB: loop body
LE: loop exit
PB: predicated region body
PF: predicated region fallthrough
CT: control target
= control target key end

     0   :  { %s132_s0 = inlined_call_operand.vmem [shape: f32[1,32,256], index: 0, kind: input, shape index: {}]   ;;  %s133_s1 = inlined_call_operand.vmem [shape: f32[1,256], index: 1, kind: input, shape index: {}]   ;;  %s134_s2 = inlined_call_operand.vmem [shape: f32[1,256], index: 2, kind: input, shape index: {}]   ;;  %s135_s3 = inlined_call_operand.vmem [shape: bf16[1,32,256], index: 3, kind: output, shape index: {}]  }
   0x1   :  { %v14_v0 = vld [vmem:[%s132_s0] sm:$0xff]  ;;  %v15_v1 = vld [vmem:[%s132_s0 + $0x8] sm:$0xff]  ;;  %v16_v6 = vld [vmem:[%s132_s0 + $0x10] sm:$0xff] }
   0x2   :  { %v22_v2 = vld [vmem:[%s133_s1] sm:$0x3]  ;;  %v17_v7 = vld [vmem:[%s132_s0 + $0x18] sm:$0xff]  ;;  %v19_v11 = vld [vmem:[%s132_s0 + $0x28] sm:$0xff] }
   0x3   :  { %v24_v3 = vperm.slane %v22_v2, 0  ;;  %v25_v4 = vperm.slane %v22_v2, 1  ;;  %v36_v5 = vld [vmem:[%s134_s2] sm:$0x3]  ;;  %v20_v12 = vld [vmem:[%s132_s0 + $0x30] sm:$0xff]  ;;  %v21_v17 = vld [vmem:[%s132_s0 + $0x38] sm:$0xff] }
   0x4   :  { %v38_v8 = vperm.slane %v36_v5, 0  ;;  %v39_v9 = vperm.slane %v36_v5, 1  ;;  %v18_v10 = vld [vmem:[%s132_s0 + $0x20] sm:$0xff] }
   0x5   :  { %v28_v13 = vmul.f32 %v24_v3, %v14_v0  ;;  %v29_v14 = vmul.f32 %v25_v4, %v15_v1  ;;  %v30_v15 = vmul.f32 %v24_v3, %v16_v6  ;;  %v31_v16 = vmul.f32 %v25_v4, %v17_v7 }
   0x6   :  { %v32_v18 = vmul.f32 %v24_v3, %v18_v10  ;;  %v33_v19 = vmul.f32 %v25_v4, %v19_v11  ;;  %v34_v20 = vmul.f32 %v24_v3, %v20_v12  ;;  %v35_v21 = vmul.f32 %v25_v4, %v21_v17 }
   0x7   :  { %v42_v22 = vadd.f32 %v38_v8, %v28_v13  ;;  %v43_v23 = vadd.f32 %v39_v9, %v29_v14  ;;  %v44_v24 = vadd.f32 %v38_v8, %v30_v15  ;;  %v45_v25 = vadd.f32 %v39_v9, %v31_v16 }
   0x8   :  { %v46_v26 = vadd.f32 %v38_v8, %v32_v18  ;;  %v47_v27 = vadd.f32 %v39_v9, %v33_v19  ;;  %v48_v28 = vadd.f32 %v38_v8, %v34_v20  ;;  %v49_v29 = vadd.f32 %v39_v9, %v35_v21 }
   0x9   :  { %v50_v30 = vmax.f32 %v42_v22, 0.0  ;;  %v51_v31 = vmax.f32 %v43_v23, 0.0  ;;  %v52_v32 = vmax.f32 %v44_v24, 0.0  ;;  %v53_v33 = vmax.f32 %v45_v25, 0.0 }
   0xa   :  { %v54_v34 = vmax.f32 %v46_v26, 0.0  ;;  %v55_v35 = vmax.f32 %v47_v27, 0.0  ;;  %v56_v36 = vmax.f32 %v48_v28, 0.0  ;;  %v57_v37 = vmax.f32 %v49_v29, 0.0 }
   0xb   :  { %v58_v38 = vpack.c.bf16 %v51_v31, %v50_v30  ;;  %v59_v39 = vpack.c.bf16 %v53_v33, %v52_v32 }
   0xc   :  { %v60_v40 = vpack.c.bf16 %v55_v35, %v54_v34  ;;  %v61_v41 = vpack.c.bf16 %v57_v37, %v56_v36 }
   0xd   :  { %62 = vst [vmem:[%s135_s3] sm:$0xff] %v58_v38 }
   0xe   :  { %63 = vst [vmem:[%s135_s3 + $0x8] sm:$0xff] %v59_v39 }
   0xf   :  { %64 = vst [vmem:[%s135_s3 + $0x10] sm:$0xff] %v60_v40 }
  0x10   :  { %65 = vst [vmem:[%s135_s3 + $0x18] sm:$0xff] %v61_v41 }

// kernel: generator_forward.9
= control target key start
LH: loop header
LB: loop body
LE: loop exit
PB: predicated region body
PF: predicated region fallthrough
CT: control target
= control target key end

     0   :  { %s6026_s1 = inlined_call_operand.vmem [shape: bf16[1,128,4096], index: 1, kind: input, shape index: {}]   ;;  %s6027_s0 = inlined_call_operand.vmem [shape: bf16[1,8,128], index: 0, kind: input, shape index: {}]   ;;  %s6028_s2 = inlined_call_operand.vmem [shape: f32[1,8,4096], index: 2, kind: output, shape index: {0}]   ;;  %s6029_s3 = inlined_call_operand.vmem [shape: f32[1,1,8,4096], index: 3, kind: output, shape index: {1}]   ;;  %s6030_s4 = inlined_call_operand.vmem [shape: f32[1,1,8,4096], index: 4, kind: output, shape index: {2}]  }
   0x1   :  { %v3389_v0 = vld [vmem:[%s6026_s1 + $0x700] sm:$0xf]  ;;  %v3739_v2 = vld [vmem:[%s6026_s1 + $0x704] sm:$0xf]  ;;  %v3397_v5 = vld [vmem:[%s6026_s1 + $0x708] sm:$0xf] }
   0x2   :  { %v3755_v1 = vld [vmem:[%s6026_s1 + $0x77c] sm:$0xf0]  ;;  %v3391_v4 = vld [vmem:[%s6026_s1 + $0x780] sm:$0xf0]  ;;  %v3756_v6 = vld [vmem:[%s6026_s1 + $0x784] sm:$0xf0] }
   0x3   :  { %v3390_v3 = vor.u32 %v3755_v1, %v3389_v0  ;;  %v3394_v7 = vor.u32 %v3739_v2, %v3391_v4  ;;  %v3398_v8 = vor.u32 %v3756_v6, %v3397_v5  ;;  %v3740_v9 = vld [vmem:[%s6026_s1 + $0x70c] sm:$0xf]  ;;  %v3261_v11 = vld [vmem:[%s6026_s1 + $0x600] sm:$0xf]  ;;  %v3707_v14 = vld [vmem:[%s6026_s1 + $0x604] sm:$0xf] }
   0x4   :  { %v3399_v10 = vld [vmem:[%s6026_s1 + $0x788] sm:$0xf0]  ;;  %v3723_v13 = vld [vmem:[%s6026_s1 + $0x67c] sm:$0xf0]  ;;  %v3263_v15 = vld [vmem:[%s6026_s1 + $0x680] sm:$0xf0] }
   0x5   :  { %1551 = vmatpush.bf16.msra.mxu0 %v3390_v3  ;;  %v3402_v12 = vor.u32 %v3740_v9, %v3399_v10  ;;  %1564 = vmatpush.bf16.msra.mxu1 %v3394_v7  ;;  %v3262_v16 = vor.u32 %v3723_v13, %v3261_v11  ;;  %v3266_v17 = vor.u32 %v3707_v14, %v3263_v15  ;;  %v3269_v18 = vld [vmem:[%s6026_s1 + $0x608] sm:$0xf]  ;;  %v3708_v20 = vld [vmem:[%s6026_s1 + $0x60c] sm:$0xf]  ;;  %v3133_v23 = vld [vmem:[%s6026_s1 + $0x500] sm:$0xf] }
   0x6   :  { %1577 = vmatpush.bf16.msra.mxu2 %v3398_v8  ;;  %v3724_v19 = vld [vmem:[%s6026_s1 + $0x684] sm:$0xf0]  ;;  %v3271_v22 = vld [vmem:[%s6026_s1 + $0x688] sm:$0xf0]  ;;  %v3691_v24 = vld [vmem:[%s6026_s1 + $0x57c] sm:$0xf0] }
   0x7   :  { %1590 = vmatpush.bf16.msra.mxu3 %v3402_v12  ;;  %v3270_v21 = vor.u32 %v3724_v19, %v3269_v18  ;;  %v3274_v25 = vor.u32 %v3708_v20, %v3271_v22  ;;  %v3675_v26 = vld [vmem:[%s6026_s1 + $0x504] sm:$0xf]  ;;  %v3141_v28 = vld [vmem:[%s6026_s1 + $0x508] sm:$0xf]  ;;  %v3134_v29 = vor.u32 %v3691_v24, %v3133_v23  ;;  %v3676_v31 = vld [vmem:[%s6026_s1 + $0x50c] sm:$0xf] }
   0x8   :  { %v3135_v27 = vld [vmem:[%s6026_s1 + $0x580] sm:$0xf0]  ;;  %v3692_v30 = vld [vmem:[%s6026_s1 + $0x584] sm:$0xf0]  ;;  %v3143_v32 = vld [vmem:[%s6026_s1 + $0x588] sm:$0xf0] }
   0x9   :  { %1552 = vmatpush.bf16.msra.mxu0 %v3262_v16  ;;  %1565 = vmatpush.bf16.msra.mxu1 %v3266_v17  ;;  %v3138_v33 = vor.u32 %v3675_v26, %v3135_v27  ;;  %v3142_v34 = vor.u32 %v3692_v30, %v3141_v28  ;;  %v3005_v35 = vld [vmem:[%s6026_s1 + $0x400] sm:$0xf]  ;;  %v3643_v37 = vld [vmem:[%s6026_s1 + $0x404] sm:$0xf]  ;;  %v3146_v38 = vor.u32 %v3676_v31, %v3143_v32  ;;  %v3013_v40 = vld [vmem:[%s6026_s1 + $0x408] sm:$0xf] }
   0xa   :  { %1578 = vmatpush.bf16.msra.mxu2 %v3270_v21  ;;  %v3659_v36 = vld [vmem:[%s6026_s1 + $0x47c] sm:$0xf0]  ;;  %v3007_v39 = vld [vmem:[%s6026_s1 + $0x480] sm:$0xf0]  ;;  %v3660_v41 = vld [vmem:[%s6026_s1 + $0x484] sm:$0xf0] }
   0xb   :  { %1591 = vmatpush.bf16.msra.mxu3 %v3274_v25  ;;  %v3644_v42 = vld [vmem:[%s6026_s1 + $0x40c] sm:$0xf]  ;;  %v3006_v44 = vor.u32 %v3659_v36, %v3005_v35  ;;  %v3010_v45 = vor.u32 %v3643_v37, %v3007_v39  ;;  %v3014_v46 = vor.u32 %v3660_v41, %v3013_v40  ;;  %v2877_v47 = vld [vmem:[%s6026_s1 + $0x300] sm:$0xf]  ;;  %v3611_v49 = vld [vmem:[%s6026_s1 + $0x304] sm:$0xf] }
   0xc   :  { %v3015_v43 = vld [vmem:[%s6026_s1 + $0x488] sm:$0xf0]  ;;  %v3627_v48 = vld [vmem:[%s6026_s1 + $0x37c] sm:$0xf0]  ;;  %v2879_v51 = vld [vmem:[%s6026_s1 + $0x380] sm:$0xf0] }
   0xd   :  { %1553 = vmatpush.bf16.msra.mxu0 %v3134_v29  ;;  %1566 = vmatpush.bf16.msra.mxu1 %v3138_v33  ;;  %v3018_v50 = vor.u32 %v3644_v42, %v3015_v43  ;;  %v2885_v52 = vld [vmem:[%s6026_s1 + $0x308] sm:$0xf]  ;;  %v3612_v54 = vld [vmem:[%s6026_s1 + $0x30c] sm:$0xf]  ;;  %v2878_v56 = vor.u32 %v3627_v48, %v2877_v47  ;;  %v2882_v57 = vor.u32 %v3611_v49, %v2879_v51  ;;  %v2749_v59 = vld [vmem:[%s6026_s1 + $0x200] sm:$0xf] }
   0xe   :  { %1579 = vmatpush.bf16.msra.mxu2 %v3142_v34  ;;  %v3628_v53 = vld [vmem:[%s6026_s1 + $0x384] sm:$0xf0]  ;;  %v2887_v55 = vld [vmem:[%s6026_s1 + $0x388] sm:$0xf0]  ;;  %v3595_v60 = vld [vmem:[%s6026_s1 + $0x27c] sm:$0xf0] }
   0xf   :  { %1592 = vmatpush.bf16.msra.mxu3 %v3146_v38  ;;  %v2886_v58 = vor.u32 %v3628_v53, %v2885_v52  ;;  %v3579_v61 = vld [vmem:[%s6026_s1 + $0x204] sm:$0xf]  ;;  %v2890_v62 = vor.u32 %v3612_v54, %v2887_v55  ;;  %v2757_v0 = vld [vmem:[%s6026_s1 + $0x208] sm:$0xf]  ;;  %v3580_v2 = vld [vmem:[%s6026_s1 + $0x20c] sm:$0xf]  ;;  %v2750_v4 = vor.u32 %v3595_v60, %v2749_v59 }
  0x10   :  { %v2751_v63 = vld [vmem:[%s6026_s1 + $0x280] sm:$0xf0]  ;;  %v3596_v1 = vld [vmem:[%s6026_s1 + $0x284] sm:$0xf0]  ;;  %v2759_v3 = vld [vmem:[%s6026_s1 + $0x288] sm:$0xf0] }
  0x11   :  { %1554 = vmatpush.bf16.msra.mxu0 %v3006_v44  ;;  %1567 = vmatpush.bf16.msra.mxu1 %v3010_v45  ;;  %v2754_v5 = vor.u32 %v3579_v61, %v2751_v63  ;;  %v2758_v6 = vor.u32 %v3596_v1, %v2757_v0  ;;  %v2621_v7 = vld [vmem:[%s6026_s1 + $0x100] sm:$0xf]  ;;  %v3547_v9 = vld [vmem:[%s6026_s1 + $0x104] sm:$0xf]  ;;  %v2762_v10 = vor.u32 %v3580_v2, %v2759_v3  ;;  %v2629_v12 = vld [vmem:[%s6026_s1 + $0x108] sm:$0xf] }
  0x12   :  { %1580 = vmatpush.bf16.msra.mxu2 %v3014_v46  ;;  %v3563_v8 = vld [vmem:[%s6026_s1 + $0x17c] sm:$0xf0]  ;;  %v2623_v11 = vld [vmem:[%s6026_s1 + $0x180] sm:$0xf0]  ;;  %v3564_v13 = vld [vmem:[%s6026_s1 + $0x184] sm:$0xf0] }
  0x13   :  { %1593 = vmatpush.bf16.msra.mxu3 %v3018_v50  ;;  %v3548_v14 = vld [vmem:[%s6026_s1 + $0x10c] sm:$0xf]  ;;  %v2622_v16 = vor.u32 %v3563_v8, %v2621_v7  ;;  %v2493_v17 = vld [vmem:[%s6026_s1] sm:$0xf]  ;;  %v2626_v19 = vor.u32 %v3547_v9, %v2623_v11  ;;  %v2630_v20 = vor.u32 %v3564_v13, %v2629_v12  ;;  %v3515_v21 = vld [vmem:[%s6026_s1 + $0x4] sm:$0xf] }
  0x14   :  { %v2631_v15 = vld [vmem:[%s6026_s1 + $0x188] sm:$0xf0]  ;;  %v3531_v18 = vld [vmem:[%s6026_s1 + $0x7c] sm:$0xf0]  ;;  %v2495_v22 = vld [vmem:[%s6026_s1 + $0x80] sm:$0xf0] }
  0x15   :  { %1555 = vmatpush.bf16.msra.mxu0 %v2878_v56  ;;  %1568 = vmatpush.bf16.msra.mxu1 %v2882_v57  ;;  %v2501_v23 = vld [vmem:[%s6026_s1 + $0x8] sm:$0xf]  ;;  %v2634_v24 = vor.u32 %v3548_v14, %v2631_v15  ;;  %v3516_v26 = vld [vmem:[%s6026_s1 + $0xc] sm:$0xf]  ;;  %v3405_v28 = vld [vmem:[%s6026_s1 + $0x710] sm:$0xf]  ;;  %v2494_v31 = vor.u32 %v3531_v18, %v2493_v17  ;;  %v2498_v35 = vor.u32 %v3515_v21, %v2495_v22 }
  0x16   :  { %1581 = vmatpush.bf16.msra.mxu2 %v2886_v58  ;;  %v3532_v25 = vld [vmem:[%s6026_s1 + $0x84] sm:$0xf0]  ;;  %v2503_v27 = vld [vmem:[%s6026_s1 + $0x88] sm:$0xf0]  ;;  %v3757_v29 = vld [vmem:[%s6026_s1 + $0x78c] sm:$0xf0] }
  0x17   :  { %1594 = vmatpush.bf16.msra.mxu3 %v2890_v62  ;;  %v3741_v30 = vld [vmem:[%s6026_s1 + $0x714] sm:$0xf]  ;;  %v3413_v33 = vld [vmem:[%s6026_s1 + $0x718] sm:$0xf]  ;;  %v2502_v36 = vor.u32 %v3532_v25, %v2501_v23  ;;  %v3742_v37 = vld [vmem:[%s6026_s1 + $0x71c] sm:$0xf]  ;;  %v2506_v39 = vor.u32 %v3516_v26, %v2503_v27  ;;  %v3406_v40 = vor.u32 %v3757_v29, %v3405_v28 }
  0x18   :  { %v3407_v32 = vld [vmem:[%s6026_s1 + $0x790] sm:$0xf0]  ;;  %v3758_v34 = vld [vmem:[%s6026_s1 + $0x794] sm:$0xf0]  ;;  %v3415_v38 = vld [vmem:[%s6026_s1 + $0x798] sm:$0xf0] }
  0x19   :  { %1556 = vmatpush.bf16.msra.mxu0 %v2750_v4  ;;  %1569 = vmatpush.bf16.msra.mxu1 %v2754_v5  ;;  %v3410_v41 = vor.u32 %v3741_v30, %v3407_v32  ;;  %v3414_v42 = vor.u32 %v3758_v34, %v3413_v33  ;;  %v3277_v43 = vld [vmem:[%s6026_s1 + $0x610] sm:$0xf]  ;;  %v3709_v45 = vld [vmem:[%s6026_s1 + $0x614] sm:$0xf]  ;;  %v3418_v46 = vor.u32 %v3742_v37, %v3415_v38  ;;  %v3285_v48 = vld [vmem:[%s6026_s1 + $0x618] sm:$0xf] }
  0x1a   :  { %1582 = vmatpush.bf16.msra.mxu2 %v2758_v6  ;;  %v3725_v44 = vld [vmem:[%s6026_s1 + $0x68c] sm:$0xf0]  ;;  %v3279_v47 = vld [vmem:[%s6026_s1 + $0x690] sm:$0xf0]  ;;  %v3726_v49 = vld [vmem:[%s6026_s1 + $0x694] sm:$0xf0] }
  0x1b   :  { %1595 = vmatpush.bf16.msra.mxu3 %v2762_v10  ;;  %v3710_v50 = vld [vmem:[%s6026_s1 + $0x61c] sm:$0xf]  ;;  %v3278_v52 = vor.u32 %v3725_v44, %v3277_v43  ;;  %v3282_v53 = vor.u32 %v3709_v45, %v3279_v47  ;;  %v3286_v54 = vor.u32 %v3726_v49, %v3285_v48  ;;  %v3149_v55 = vld [vmem:[%s6026_s1 + $0x510] sm:$0xf]  ;;  %v3677_v57 = vld [vmem:[%s6026_s1 + $0x514] sm:$0xf] }
  0x1c   :  { %v3287_v51 = vld [vmem:[%s6026_s1 + $0x698] sm:$0xf0]  ;;  %v3693_v56 = vld [vmem:[%s6026_s1 + $0x58c] sm:$0xf0]  ;;  %v3151_v59 = vld [vmem:[%s6026_s1 + $0x590] sm:$0xf0] }
  0x1d   :  { %1557 = vmatpush.bf16.msra.mxu0 %v2622_v16  ;;  %1570 = vmatpush.bf16.msra.mxu1 %v2626_v19  ;;  %v3290_v58 = vor.u32 %v3710_v50, %v3287_v51  ;;  %v3157_v60 = vld [vmem:[%s6026_s1 + $0x518] sm:$0xf]  ;;  %v3678_v62 = vld [vmem:[%s6026_s1 + $0x51c] sm:$0xf]  ;;  %v3150_v0 = vor.u32 %v3693_v56, %v3149_v55  ;;  %v4065_v1 = vld [vmem:[%s6027_s0] sm:$0xf]  ;;  %v3154_v2 = vor.u32 %v3677_v57, %v3151_v59 }
  0x1e   :  { %1583 = vmatpush.bf16.msra.mxu2 %v2630_v20  ;;  %v3694_v61 = vld [vmem:[%s6026_s1 + $0x594] sm:$0xf0]  ;;  %v3159_v63 = vld [vmem:[%s6026_s1 + $0x598] sm:$0xf0]  ;;  %v3021_v4 = vld [vmem:[%s6026_s1 + $0x410] sm:$0xf] }
  0x1f   :  { %1596 = vmatpush.bf16.msra.mxu3 %v2634_v24  ;;  %v3158_v3 = vor.u32 %v3694_v61, %v3157_v60  ;;  %v3661_v5 = vld [vmem:[%s6026_s1 + $0x48c] sm:$0xf0]  ;;  %v3645_v6 = vld [vmem:[%s6026_s1 + $0x414] sm:$0xf]  ;;  %v3162_v7 = vor.u32 %v3678_v62, %v3159_v63  ;;  %v3029_v9 = vld [vmem:[%s6026_s1 + $0x418] sm:$0xf] }
  0x20   :  { %v3023_v8 = vld [vmem:[%s6026_s1 + $0x490] sm:$0xf0]  ;;  %v3662_v10 = vld [vmem:[%s6026_s1 + $0x494] sm:$0xf0]  ;;  %v3646_v11 = vld [vmem:[%s6026_s1 + $0x41c] sm:$0xf]  ;;  %v3022_v13 = vor.u32 %v3661_v5, %v3021_v4 }
  0x21   :  { %1558 = vmatpush.bf16.msra.mxu0 %v2494_v31  ;;  %1571 = vmatpush.bf16.msra.mxu1 %v2498_v35  ;;  %v3031_v12 = vld [vmem:[%s6026_s1 + $0x498] sm:$0xf0]  ;;  %v3026_v14 = vor.u32 %v3645_v6, %v3023_v8  ;;  %v3030_v15 = vor.u32 %v3662_v10, %v3029_v9  ;;  %v2893_v16 = vld [vmem:[%s6026_s1 + $0x310] sm:$0xf]  ;;  %v3613_v18 = vld [vmem:[%s6026_s1 + $0x314] sm:$0xf] }
  0x22   :  { %1584 = vmatpush.bf16.msra.mxu2 %v2502_v36  ;;  %v3629_v17 = vld [vmem:[%s6026_s1 + $0x38c] sm:$0xf0]  ;;  %v3034_v19 = vor.u32 %v3646_v11, %v3031_v12  ;;  %v2895_v20 = vld [vmem:[%s6026_s1 + $0x390] sm:$0xf0]  ;;  %v2901_v21 = vld [vmem:[%s6026_s1 + $0x318] sm:$0xf] }
  0x23   :  { %1597 = vmatpush.bf16.msra.mxu3 %v2506_v39  ;;  %v3630_v22 = vld [vmem:[%s6026_s1 + $0x394] sm:$0xf0]  ;;  %v3614_v23 = vld [vmem:[%s6026_s1 + $0x31c] sm:$0xf]  ;;  %v2894_v25 = vor.u32 %v3629_v17, %v2893_v16  ;;  %v2898_v26 = vor.u32 %v3613_v18, %v2895_v20  ;;  %v2765_v28 = vld [vmem:[%s6026_s1 + $0x210] sm:$0xf] }
  0x24   :  { %1559 = vmatmul.bf16.vlgmr.msra.gmra.mxu0 %v4065_v1  ;;  %1572 = vmatmul.bf16.vlgmr.msra.gmra.mxu1 %v4065_v1  ;;  %v2903_v24 = vld [vmem:[%s6026_s1 + $0x398] sm:$0xf0]  ;;  %v2902_v27 = vor.u32 %v3630_v22, %v2901_v21  ;;  %v3597_v29 = vld [vmem:[%s6026_s1 + $0x28c] sm:$0xf0]  ;;  %v3581_v30 = vld [vmem:[%s6026_s1 + $0x214] sm:$0xf] }
  0x25   :  { %1603 = vmatpush.bf16.msrb.mxu0 %v3406_v40  ;;  %1616 = vmatpush.bf16.msrb.mxu1 %v3410_v41  ;;  %v2906_v31 = vor.u32 %v3614_v23, %v2903_v24  ;;  %v2767_v32 = vld [vmem:[%s6026_s1 + $0x290] sm:$0xf0]  ;;  %v2773_v33 = vld [vmem:[%s6026_s1 + $0x218] sm:$0xf]  ;;  %v3582_v35 = vld [vmem:[%s6026_s1 + $0x21c] sm:$0xf]  ;;  %v2766_v37 = vor.u32 %v3597_v29, %v2765_v28 }
  0x26   :  { %1629 = vmatpush.bf16.msrb.mxu2 %v3414_v42  ;;  %1598 = vmatmul.bf16.vlgmr.msra.gmra.mxu3 %v4065_v1  ;;  %v3598_v34 = vld [vmem:[%s6026_s1 + $0x294] sm:$0xf0]  ;;  %v2775_v36 = vld [vmem:[%s6026_s1 + $0x298] sm:$0xf0]  ;;  %v2770_v38 = vor.u32 %v3581_v30, %v2767_v32  ;;  %v2637_v40 = vld [vmem:[%s6026_s1 + $0x110] sm:$0xf] }
  0x27   :  { %1642 = vmatpush.bf16.msrb.mxu3 %v3418_v46  ;;  %1585 = vmatmul.bf16.vlgmr.msra.gmra.mxu2 %v4065_v1  ;;  %v2774_v39 = vor.u32 %v3598_v34, %v2773_v33  ;;  %v3565_v41 = vld [vmem:[%s6026_s1 + $0x18c] sm:$0xf0]  ;;  %v3549_v42 = vld [vmem:[%s6026_s1 + $0x114] sm:$0xf]  ;;  %v2778_v43 = vor.u32 %v3582_v35, %v2775_v36  ;;  %v2645_v45 = vld [vmem:[%s6026_s1 + $0x118] sm:$0xf] }
  0x28   :  { %v2639_v44 = vld [vmem:[%s6026_s1 + $0x190] sm:$0xf0]  ;;  %v3566_v46 = vld [vmem:[%s6026_s1 + $0x194] sm:$0xf0]  ;;  %v3550_v47 = vld [vmem:[%s6026_s1 + $0x11c] sm:$0xf]  ;;  %v2638_v49 = vor.u32 %v3565_v41, %v2637_v40 }
  0x29   :  { %1604 = vmatpush.bf16.msrb.mxu0 %v3278_v52  ;;  %1617 = vmatpush.bf16.msrb.mxu1 %v3282_v53  ;;  %v2647_v48 = vld [vmem:[%s6026_s1 + $0x198] sm:$0xf0]  ;;  %v2509_v50 = vld [vmem:[%s6026_s1 + $0x10] sm:$0xf]  ;;  %v2642_v52 = vor.u32 %v3549_v42, %v2639_v44  ;;  %v2646_v53 = vor.u32 %v3566_v46, %v2645_v45  ;;  %v2511_v55 = vld [vmem:[%s6026_s1 + $0x90] sm:$0xf0] }
  0x2a   :  { %1630 = vmatpush.bf16.msrb.mxu2 %v3286_v54  ;;  %v3533_v51 = vld [vmem:[%s6026_s1 + $0x8c] sm:$0xf0]  ;;  %v3517_v54 = vld [vmem:[%s6026_s1 + $0x14] sm:$0xf]  ;;  %v2517_v56 = vld [vmem:[%s6026_s1 + $0x18] sm:$0xf]  ;;  %v2650_v57 = vor.u32 %v3550_v47, %v2647_v48 }
  0x2b   :  { %1643 = vmatpush.bf16.msrb.mxu3 %v3290_v58  ;;  %v3534_v58 = vld [vmem:[%s6026_s1 + $0x94] sm:$0xf0]  ;;  %v3518_v59 = vld [vmem:[%s6026_s1 + $0x1c] sm:$0xf]  ;;  %v3421_v61 = vld [vmem:[%s6026_s1 + $0x720] sm:$0xf]  ;;  %v2514_v5 = vor.u32 %v3517_v54, %v2511_v55 }
  0x2c   :  { %v2519_v60 = vld [vmem:[%s6026_s1 + $0x98] sm:$0xf0]  ;;  %v3759_v62 = vld [vmem:[%s6026_s1 + $0x79c] sm:$0xf0]  ;;  %v3743_v63 = vld [vmem:[%s6026_s1 + $0x724] sm:$0xf]  ;;  %v2518_v6 = vor.u32 %v3534_v58, %v2517_v56 }
  0x2d   :  { %1605 = vmatpush.bf16.msrb.mxu0 %v3150_v0  ;;  %1618 = vmatpush.bf16.msrb.mxu1 %v3154_v2  ;;  %v2510_v0 = vor.u32 %v3533_v51, %v2509_v50  ;;  %v3423_v2 = vld [vmem:[%s6026_s1 + $0x7a0] sm:$0xf0]  ;;  %v3760_v4 = vld [vmem:[%s6026_s1 + $0x7a4] sm:$0xf0]  ;;  %v3431_v8 = vld [vmem:[%s6026_s1 + $0x7a8] sm:$0xf0]  ;;  %v2522_v9 = vor.u32 %v3518_v59, %v2519_v60  ;;  %v3422_v10 = vor.u32 %v3759_v62, %v3421_v61 }
  0x2e   :  { %1631 = vmatpush.bf16.msrb.mxu2 %v3158_v3  ;;  %v3429_v3 = vld [vmem:[%s6026_s1 + $0x728] sm:$0xf]  ;;  %v3426_v11 = vor.u32 %v3743_v63, %v3423_v2  ;;  %v3295_v17 = vld [vmem:[%s6026_s1 + $0x6a0] sm:$0xf0]  ;;  %v3712_v20 = vld [vmem:[%s6026_s1 + $0x62c] sm:$0xf] }
  0x2f   :  { %1644 = vmatpush.bf16.msrb.mxu3 %v3162_v7  ;;  %v3744_v7 = vld [vmem:[%s6026_s1 + $0x72c] sm:$0xf]  ;;  %v3430_v12 = vor.u32 %v3760_v4, %v3429_v3  ;;  %v3301_v18 = vld [vmem:[%s6026_s1 + $0x628] sm:$0xf]  ;;  %v3167_v29 = vld [vmem:[%s6026_s1 + $0x5a0] sm:$0xf0] }
  0x30   :  { %v3434_v16 = vor.u32 %v3744_v7, %v3431_v8  ;;  %v3303_v21 = vld [vmem:[%s6026_s1 + $0x6a8] sm:$0xf0]  ;;  %v3173_v30 = vld [vmem:[%s6026_s1 + $0x528] sm:$0xf]  ;;  %v3039_v41 = vld [vmem:[%s6026_s1 + $0x4a0] sm:$0xf0] }
  0x31   :  { %1606 = vmatpush.bf16.msrb.mxu0 %v3022_v13  ;;  %1619 = vmatpush.bf16.msrb.mxu1 %v3026_v14  ;;  %v3293_v13 = vld [vmem:[%s6026_s1 + $0x620] sm:$0xf]  ;;  %v3306_v28 = vor.u32 %v3712_v20, %v3303_v21  ;;  %v3680_v32 = vld [vmem:[%s6026_s1 + $0x52c] sm:$0xf]  ;;  %v3045_v42 = vld [vmem:[%s6026_s1 + $0x428] sm:$0xf] }
  0x32   :  { %1632 = vmatpush.bf16.msrb.mxu2 %v3030_v15  ;;  %v3727_v14 = vld [vmem:[%s6026_s1 + $0x69c] sm:$0xf0]  ;;  %v3711_v15 = vld [vmem:[%s6026_s1 + $0x624] sm:$0xf]  ;;  %v3175_v33 = vld [vmem:[%s6026_s1 + $0x5a8] sm:$0xf0] }
  0x33   :  { %1645 = vmatpush.bf16.msrb.mxu3 %v3034_v19  ;;  %v3728_v19 = vld [vmem:[%s6026_s1 + $0x6a4] sm:$0xf0]  ;;  %v3294_v22 = vor.u32 %v3727_v14, %v3293_v13  ;;  %v3298_v23 = vor.u32 %v3711_v15, %v3295_v17  ;;  %v3178_v40 = vor.u32 %v3680_v32, %v3175_v33  ;;  %v3648_v44 = vld [vmem:[%s6026_s1 + $0x42c] sm:$0xf]  ;;  %v3631_v50 = vld [vmem:[%s6026_s1 + $0x39c] sm:$0xf0] }
  0x34   :  { %v3302_v24 = vor.u32 %v3728_v19, %v3301_v18  ;;  %v3047_v45 = vld [vmem:[%s6026_s1 + $0x4a8] sm:$0xf0]  ;;  %v3615_v51 = vld [vmem:[%s6026_s1 + $0x324] sm:$0xf]  ;;  %v2917_v54 = vld [vmem:[%s6026_s1 + $0x328] sm:$0xf] }
  0x35   :  { %1607 = vmatpush.bf16.msrb.mxu0 %v2894_v25  ;;  %1620 = vmatpush.bf16.msrb.mxu1 %v2898_v26  ;;  %v3165_v25 = vld [vmem:[%s6026_s1 + $0x520] sm:$0xf]  ;;  %v3632_v55 = vld [vmem:[%s6026_s1 + $0x3a4] sm:$0xf0]  ;;  %v3616_v56 = vld [vmem:[%s6026_s1 + $0x32c] sm:$0xf] }
  0x36   :  { %1633 = vmatpush.bf16.msrb.mxu2 %v2902_v27  ;;  %v3695_v26 = vld [vmem:[%s6026_s1 + $0x59c] sm:$0xf0]  ;;  %v3679_v27 = vld [vmem:[%s6026_s1 + $0x524] sm:$0xf]  ;;  %v2918_v60 = vor.u32 %v3632_v55, %v2917_v54  ;;  %v2789_v3 = vld [vmem:[%s6026_s1 + $0x228] sm:$0xf] }
  0x37   :  { %1646 = vmatpush.bf16.msrb.mxu3 %v2906_v31  ;;  %v3696_v31 = vld [vmem:[%s6026_s1 + $0x5a4] sm:$0xf0]  ;;  %v3166_v34 = vor.u32 %v3695_v26, %v3165_v25  ;;  %v3170_v35 = vor.u32 %v3679_v27, %v3167_v29  ;;  %v2781_v61 = vld [vmem:[%s6026_s1 + $0x220] sm:$0xf]  ;;  %v3583_v63 = vld [vmem:[%s6026_s1 + $0x224] sm:$0xf] }
  0x38   :  { %v3174_v36 = vor.u32 %v3696_v31, %v3173_v30  ;;  %v3599_v62 = vld [vmem:[%s6026_s1 + $0x29c] sm:$0xf0]  ;;  %v2783_v2 = vld [vmem:[%s6026_s1 + $0x2a0] sm:$0xf0]  ;;  %v3600_v4 = vld [vmem:[%s6026_s1 + $0x2a4] sm:$0xf0] }
  0x39   :  { %1608 = vmatpush.bf16.msrb.mxu0 %v2766_v37  ;;  %1621 = vmatpush.bf16.msrb.mxu1 %v2770_v38  ;;  %v3037_v37 = vld [vmem:[%s6026_s1 + $0x420] sm:$0xf]  ;;  %v2782_v7 = vor.u32 %v3599_v62, %v2781_v61  ;;  %v2786_v8 = vor.u32 %v3583_v63, %v2783_v2  ;;  %v2655_v14 = vld [vmem:[%s6026_s1 + $0x1a0] sm:$0xf0]  ;;  %v2661_v15 = vld [vmem:[%s6026_s1 + $0x128] sm:$0xf] }
  0x3a   :  { %1634 = vmatpush.bf16.msrb.mxu2 %v2774_v39  ;;  %v3663_v38 = vld [vmem:[%s6026_s1 + $0x49c] sm:$0xf0]  ;;  %v3647_v39 = vld [vmem:[%s6026_s1 + $0x424] sm:$0xf]  ;;  %v3552_v17 = vld [vmem:[%s6026_s1 + $0x12c] sm:$0xf] }
  0x3b   :  { %1647 = vmatpush.bf16.msrb.mxu3 %v2778_v43  ;;  %v3664_v43 = vld [vmem:[%s6026_s1 + $0x4a4] sm:$0xf0]  ;;  %v3038_v46 = vor.u32 %v3663_v38, %v3037_v37  ;;  %v3042_v47 = vor.u32 %v3647_v39, %v3039_v41  ;;  %v2663_v18 = vld [vmem:[%s6026_s1 + $0x1a8] sm:$0xf0]  ;;  %v2525_v20 = vld [vmem:[%s6026_s1 + $0x20] sm:$0xf] }
  0x3c   :  { %v3046_v48 = vor.u32 %v3664_v43, %v3045_v42  ;;  %v3535_v21 = vld [vmem:[%s6026_s1 + $0x9c] sm:$0xf0]  ;;  %v2527_v25 = vld [vmem:[%s6026_s1 + $0xa0] sm:$0xf0]  ;;  %v2533_v26 = vld [vmem:[%s6026_s1 + $0x28] sm:$0xf]  ;;  %v2666_v27 = vor.u32 %v3552_v17, %v2663_v18 }
  0x3d   :  { %1609 = vmatpush.bf16.msrb.mxu0 %v2638_v49  ;;  %1622 = vmatpush.bf16.msrb.mxu1 %v2642_v52  ;;  %v2909_v49 = vld [vmem:[%s6026_s1 + $0x320] sm:$0xf]  ;;  %v3050_v52 = vor.u32 %v3648_v44, %v3047_v45  ;;  %v3520_v29 = vld [vmem:[%s6026_s1 + $0x2c] sm:$0xf]  ;;  %v3437_v31 = vld [vmem:[%s6026_s1 + $0x730] sm:$0xf] }
  0x3e   :  { %1635 = vmatpush.bf16.msrb.mxu2 %v2646_v53  ;;  %v2911_v53 = vld [vmem:[%s6026_s1 + $0x3a0] sm:$0xf0]  ;;  %v2910_v58 = vor.u32 %v3631_v50, %v2909_v49  ;;  %v2535_v30 = vld [vmem:[%s6026_s1 + $0xa8] sm:$0xf0]  ;;  %v3761_v32 = vld [vmem:[%s6026_s1 + $0x7ac] sm:$0xf0] }
  0x3f   :  { %1648 = vmatpush.bf16.msrb.mxu3 %v2650_v57  ;;  %v2919_v57 = vld [vmem:[%s6026_s1 + $0x3a8] sm:$0xf0]  ;;  %v2914_v59 = vor.u32 %v3615_v51, %v2911_v53  ;;  %v3745_v33 = vld [vmem:[%s6026_s1 + $0x734] sm:$0xf]  ;;  %v3762_v37 = vld [vmem:[%s6026_s1 + $0x7b4] sm:$0xf0]  ;;  %v2538_v42 = vor.u32 %v3520_v29, %v2535_v30  ;;  %v3438_v43 = vor.u32 %v3761_v32, %v3437_v31 }
  0x40   :  { %v3447_v41 = vld [vmem:[%s6026_s1 + $0x7b8] sm:$0xf0]  ;;  %v3311_v50 = vld [vmem:[%s6026_s1 + $0x6b0] sm:$0xf0]  ;;  %v3317_v51 = vld [vmem:[%s6026_s1 + $0x638] sm:$0xf] }
  0x41   :  { %1610 = vmatpush.bf16.msrb.mxu0 %v2510_v0  ;;  %1623 = vmatpush.bf16.msrb.mxu1 %v2514_v5  ;;  %v2922_v0 = vor.u32 %v3616_v56, %v2919_v57  ;;  %v3584_v5 = vld [vmem:[%s6026_s1 + $0x22c] sm:$0xf]  ;;  %v3714_v53 = vld [vmem:[%s6026_s1 + $0x63c] sm:$0xf]  ;;  %v3183_v62 = vld [vmem:[%s6026_s1 + $0x5b0] sm:$0xf0] }
  0x42   :  { %1636 = vmatpush.bf16.msrb.mxu2 %v2518_v6  ;;  %v2791_v6 = vld [vmem:[%s6026_s1 + $0x2a8] sm:$0xf0]  ;;  %v3319_v54 = vld [vmem:[%s6026_s1 + $0x6b8] sm:$0xf0]  ;;  %v3189_v63 = vld [vmem:[%s6026_s1 + $0x538] sm:$0xf] }
  0x43   :  { %1649 = vmatpush.bf16.msrb.mxu3 %v2522_v9  ;;  %v2790_v9 = vor.u32 %v3600_v4, %v2789_v3  ;;  %v2794_v13 = vor.u32 %v3584_v5, %v2791_v6  ;;  %v3322_v61 = vor.u32 %v3714_v53, %v3319_v54  ;;  %v3682_v2 = vld [vmem:[%s6026_s1 + $0x53c] sm:$0xf]  ;;  %v2797_v31 = vld [vmem:[%s6026_s1 + $0x230] sm:$0xf] }
  0x44   :  { %1611 = vmatmul.bf16.vlgmr.msrb.gmra.mxu0 %v4065_v1  ;;  %1624 = vmatmul.bf16.vlgmr.msrb.gmra.mxu1 %v4065_v1  ;;  %v3191_v3 = vld [vmem:[%s6026_s1 + $0x5b8] sm:$0xf0]  ;;  %v3601_v32 = vld [vmem:[%s6026_s1 + $0x2ac] sm:$0xf0] }
  0x45   :  { %1655 = vmatpush.bf16.msra.mxu0 %v3422_v10  ;;  %1668 = vmatpush.bf16.msra.mxu1 %v3426_v11  ;;  %v2653_v10 = vld [vmem:[%s6026_s1 + $0x120] sm:$0xf]  ;;  %v2541_v53 = vld [vmem:[%s6026_s1 + $0x30] sm:$0xf] }
  0x46   :  { %1681 = vmatpush.bf16.msra.mxu2 %v3430_v12  ;;  %1650 = vmatmul.bf16.vlgmr.msrb.gmra.mxu3 %v4065_v1  ;;  %v3567_v11 = vld [vmem:[%s6026_s1 + $0x19c] sm:$0xf0]  ;;  %v3551_v12 = vld [vmem:[%s6026_s1 + $0x124] sm:$0xf]  ;;  %v3537_v54 = vld [vmem:[%s6026_s1 + $0xac] sm:$0xf0] }
  0x47   :  { %1694 = vmatpush.bf16.msra.mxu3 %v3434_v16  ;;  %1637 = vmatmul.bf16.vlgmr.msrb.gmra.mxu2 %v4065_v1  ;;  %v3568_v16 = vld [vmem:[%s6026_s1 + $0x1a4] sm:$0xf0]  ;;  %v2654_v19 = vor.u32 %v3567_v11, %v2653_v10  ;;  %v3194_v10 = vor.u32 %v3682_v2, %v3191_v3  ;;  %v3055_v11 = vld [vmem:[%s6026_s1 + $0x4b0] sm:$0xf0]  ;;  %v3763_v2 = vld [vmem:[%s6026_s1 + $0x7bc] sm:$0xf0] }
  0x48   :  { %v3747_v3 = vld [vmem:[%s6026_s1 + $0x744] sm:$0xf] }
  0x49   :  { %1656 = vmatpush.bf16.msra.mxu0 %v3294_v22  ;;  %1669 = vmatpush.bf16.msra.mxu1 %v3298_v23  ;;  %v2658_v22 = vor.u32 %v3551_v12, %v2655_v14  ;;  %v2662_v23 = vor.u32 %v3568_v16, %v2661_v15  ;;  %v3061_v12 = vld [vmem:[%s6026_s1 + $0x438] sm:$0xf]  ;;  %v3650_v14 = vld [vmem:[%s6026_s1 + $0x43c] sm:$0xf] }
  0x4a   :  { %1682 = vmatpush.bf16.msra.mxu2 %v3302_v24  ;;  %v3519_v24 = vld [vmem:[%s6026_s1 + $0x24] sm:$0xf]  ;;  %v3063_v15 = vld [vmem:[%s6026_s1 + $0x4b8] sm:$0xf0] }
  0x4b   :  { %1695 = vmatpush.bf16.msra.mxu3 %v3306_v28  ;;  %v3536_v28 = vld [vmem:[%s6026_s1 + $0xa4] sm:$0xf0]  ;;  %v2530_v38 = vor.u32 %v3519_v24, %v2527_v25  ;;  %v2933_v24 = vld [vmem:[%s6026_s1 + $0x338] sm:$0xf] }
  0x4c   :  { %v2534_v39 = vor.u32 %v3536_v28, %v2533_v26  ;;  %v3634_v25 = vld [vmem:[%s6026_s1 + $0x3b4] sm:$0xf0]  ;;  %v3618_v26 = vld [vmem:[%s6026_s1 + $0x33c] sm:$0xf] }
  0x4d   :  { %1657 = vmatpush.bf16.msra.mxu0 %v3166_v34  ;;  %1670 = vmatpush.bf16.msra.mxu1 %v3170_v35  ;;  %v2526_v34 = vor.u32 %v3535_v21, %v2525_v20  ;;  %v3439_v35 = vld [vmem:[%s6026_s1 + $0x7b0] sm:$0xf0]  ;;  %v3633_v20 = vld [vmem:[%s6026_s1 + $0x3ac] sm:$0xf0]  ;;  %v2934_v30 = vor.u32 %v3634_v25, %v2933_v24  ;;  %v3335_v24 = vld [vmem:[%s6026_s1 + $0x6c8] sm:$0xf0] }
  0x4e   :  { %1683 = vmatpush.bf16.msra.mxu2 %v3174_v36  ;;  %v3445_v36 = vld [vmem:[%s6026_s1 + $0x738] sm:$0xf]  ;;  %v3442_v44 = vor.u32 %v3745_v33, %v3439_v35  ;;  %v3617_v21 = vld [vmem:[%s6026_s1 + $0x334] sm:$0xf] }
  0x4f   :  { %1696 = vmatpush.bf16.msra.mxu3 %v3178_v40  ;;  %v3746_v40 = vld [vmem:[%s6026_s1 + $0x73c] sm:$0xf]  ;;  %v3446_v45 = vor.u32 %v3762_v37, %v3445_v36  ;;  %v3585_v33 = vld [vmem:[%s6026_s1 + $0x234] sm:$0xf]  ;;  %v2805_v36 = vld [vmem:[%s6026_s1 + $0x238] sm:$0xf] }
  0x50   :  { %v3450_v49 = vor.u32 %v3746_v40, %v3447_v41  ;;  %v2799_v35 = vld [vmem:[%s6026_s1 + $0x2b0] sm:$0xf0]  ;;  %v3602_v37 = vld [vmem:[%s6026_s1 + $0x2b4] sm:$0xf0]  ;;  %v2798_v40 = vor.u32 %v3601_v32, %v2797_v31  ;;  %v3199_v32 = vld [vmem:[%s6026_s1 + $0x5c0] sm:$0xf0] }
  0x51   :  { %1658 = vmatpush.bf16.msra.mxu0 %v3038_v46  ;;  %1671 = vmatpush.bf16.msra.mxu1 %v3042_v47  ;;  %v3309_v46 = vld [vmem:[%s6026_s1 + $0x630] sm:$0xf]  ;;  %v2802_v41 = vor.u32 %v3585_v33, %v2799_v35  ;;  %v3205_v33 = vld [vmem:[%s6026_s1 + $0x548] sm:$0xf]  ;;  %v3684_v35 = vld [vmem:[%s6026_s1 + $0x54c] sm:$0xf] }
  0x52   :  { %1684 = vmatpush.bf16.msra.mxu2 %v3046_v48  ;;  %v3729_v47 = vld [vmem:[%s6026_s1 + $0x6ac] sm:$0xf0]  ;;  %v3713_v48 = vld [vmem:[%s6026_s1 + $0x634] sm:$0xf] }
  0x53   :  { %1697 = vmatpush.bf16.msra.mxu3 %v3050_v52  ;;  %v3730_v52 = vld [vmem:[%s6026_s1 + $0x6b4] sm:$0xf0]  ;;  %v3310_v55 = vor.u32 %v3729_v47, %v3309_v46  ;;  %v3314_v56 = vor.u32 %v3713_v48, %v3311_v50  ;;  %v2671_v47 = vld [vmem:[%s6026_s1 + $0x1b0] sm:$0xf0]  ;;  %v3554_v50 = vld [vmem:[%s6026_s1 + $0x13c] sm:$0xf] }
  0x54   :  { %v3318_v57 = vor.u32 %v3730_v52, %v3317_v51  ;;  %v2677_v48 = vld [vmem:[%s6026_s1 + $0x138] sm:$0xf]  ;;  %v2679_v51 = vld [vmem:[%s6026_s1 + $0x1b8] sm:$0xf0] }
  0x55   :  { %1659 = vmatpush.bf16.msra.mxu0 %v2910_v58  ;;  %1672 = vmatpush.bf16.msra.mxu1 %v2914_v59  ;;  %v3181_v58 = vld [vmem:[%s6026_s1 + $0x530] sm:$0xf] }
  0x56   :  { %1685 = vmatpush.bf16.msra.mxu2 %v2918_v60  ;;  %v3697_v59 = vld [vmem:[%s6026_s1 + $0x5ac] sm:$0xf0]  ;;  %v3681_v60 = vld [vmem:[%s6026_s1 + $0x534] sm:$0xf] }
  0x57   :  { %1698 = vmatpush.bf16.msra.mxu3 %v2922_v0  ;;  %v3698_v0 = vld [vmem:[%s6026_s1 + $0x5b4] sm:$0xf0]  ;;  %v3182_v4 = vor.u32 %v3697_v59, %v3181_v58  ;;  %v3186_v5 = vor.u32 %v3681_v60, %v3183_v62  ;;  %v2543_v58 = vld [vmem:[%s6026_s1 + $0xb0] sm:$0xf0]  ;;  %v2682_v60 = vor.u32 %v3554_v50, %v2679_v51  ;;  %v3522_v62 = vld [vmem:[%s6026_s1 + $0x3c] sm:$0xf] }
  0x58   :  { %v3190_v6 = vor.u32 %v3698_v0, %v3189_v63  ;;  %v2549_v59 = vld [vmem:[%s6026_s1 + $0x38] sm:$0xf]  ;;  %v2551_v63 = vld [vmem:[%s6026_s1 + $0xb8] sm:$0xf0]  ;;  %v3453_v0 = vld [vmem:[%s6026_s1 + $0x740] sm:$0xf] }
  0x59   :  { %1660 = vmatpush.bf16.msra.mxu0 %v2782_v7  ;;  %1673 = vmatpush.bf16.msra.mxu1 %v2786_v8  ;;  %v3053_v7 = vld [vmem:[%s6026_s1 + $0x430] sm:$0xf]  ;;  %v2941_v51 = vld [vmem:[%s6026_s1 + $0x340] sm:$0xf] }
  0x5a   :  { %1686 = vmatpush.bf16.msra.mxu2 %v2790_v9  ;;  %v3665_v8 = vld [vmem:[%s6026_s1 + $0x4ac] sm:$0xf0]  ;;  %v3649_v9 = vld [vmem:[%s6026_s1 + $0x434] sm:$0xf] }
  0x5b   :  { %1699 = vmatpush.bf16.msra.mxu3 %v2794_v13  ;;  %v3666_v13 = vld [vmem:[%s6026_s1 + $0x4b4] sm:$0xf0]  ;;  %v3054_v16 = vor.u32 %v3665_v8, %v3053_v7  ;;  %v3058_v17 = vor.u32 %v3649_v9, %v3055_v11  ;;  %v3764_v7 = vld [vmem:[%s6026_s1 + $0x7c4] sm:$0xf0]  ;;  %v3463_v11 = vld [vmem:[%s6026_s1 + $0x7c8] sm:$0xf0] }
  0x5c   :  { %v3062_v18 = vor.u32 %v3666_v13, %v3061_v12  ;;  %v2554_v12 = vor.u32 %v3522_v62, %v2551_v63  ;;  %v3454_v13 = vor.u32 %v3763_v2, %v3453_v0  ;;  %v2813_v63 = vld [vmem:[%s6026_s1 + $0x240] sm:$0xf]  ;;  %v3587_v2 = vld [vmem:[%s6026_s1 + $0x244] sm:$0xf] }
  0x5d   :  { %1661 = vmatpush.bf16.msra.mxu0 %v2654_v19  ;;  %1674 = vmatpush.bf16.msra.mxu1 %v2658_v22  ;;  %v2925_v19 = vld [vmem:[%s6026_s1 + $0x330] sm:$0xf]  ;;  %v3066_v22 = vor.u32 %v3650_v14, %v3063_v15  ;;  %v3603_v0 = vld [vmem:[%s6026_s1 + $0x2bc] sm:$0xf0] }
  0x5e   :  { %1687 = vmatpush.bf16.msra.mxu2 %v2662_v23  ;;  %v2927_v23 = vld [vmem:[%s6026_s1 + $0x3b0] sm:$0xf0]  ;;  %v2926_v28 = vor.u32 %v3633_v20, %v2925_v19  ;;  %v3327_v20 = vld [vmem:[%s6026_s1 + $0x6c0] sm:$0xf0] }
  0x5f   :  { %1700 = vmatpush.bf16.msra.mxu3 %v2666_v27  ;;  %v2935_v27 = vld [vmem:[%s6026_s1 + $0x3b8] sm:$0xf0]  ;;  %v2930_v29 = vor.u32 %v3617_v21, %v2927_v23  ;;  %v3333_v21 = vld [vmem:[%s6026_s1 + $0x648] sm:$0xf]  ;;  %v3716_v23 = vld [vmem:[%s6026_s1 + $0x64c] sm:$0xf] }
  0x60   :  { %v3338_v31 = vor.u32 %v3716_v23, %v3335_v24  ;;  %v3539_v23 = vld [vmem:[%s6026_s1 + $0xbc] sm:$0xf0] }
  0x61   :  { %1662 = vmatpush.bf16.msra.mxu0 %v2526_v34  ;;  %1675 = vmatpush.bf16.msra.mxu1 %v2530_v38  ;;  %v2938_v34 = vor.u32 %v3618_v26, %v2935_v27  ;;  %v3586_v38 = vld [vmem:[%s6026_s1 + $0x23c] sm:$0xf] }
  0x62   :  { %1688 = vmatpush.bf16.msra.mxu2 %v2534_v39  ;;  %v2807_v39 = vld [vmem:[%s6026_s1 + $0x2b8] sm:$0xf0] }
  0x63   :  { %1701 = vmatpush.bf16.msra.mxu3 %v2538_v42  ;;  %v2806_v42 = vor.u32 %v3602_v37, %v2805_v36  ;;  %v2810_v46 = vor.u32 %v3586_v38, %v2807_v39  ;;  %v3207_v36 = vld [vmem:[%s6026_s1 + $0x5c8] sm:$0xf0] }
  0x64   :  { %1663 = vmatmul.bf16.vlgmr.msra.gmra.mxu0 %v4065_v1  ;;  %1676 = vmatmul.bf16.vlgmr.msra.gmra.mxu1 %v4065_v1 }
  0x65   :  { %1707 = vmatpush.bf16.msrb.mxu0 %v3438_v43  ;;  %1720 = vmatpush.bf16.msrb.mxu1 %v3442_v44  ;;  %v2669_v43 = vld [vmem:[%s6026_s1 + $0x130] sm:$0xf] }
  0x66   :  { %1733 = vmatpush.bf16.msrb.mxu2 %v3446_v45  ;;  %1702 = vmatmul.bf16.vlgmr.msra.gmra.mxu3 %v4065_v1  ;;  %v3569_v44 = vld [vmem:[%s6026_s1 + $0x1ac] sm:$0xf0]  ;;  %v3553_v45 = vld [vmem:[%s6026_s1 + $0x134] sm:$0xf] }
  0x67   :  { %1746 = vmatpush.bf16.msrb.mxu3 %v3450_v49  ;;  %1689 = vmatmul.bf16.vlgmr.msra.gmra.mxu2 %v4065_v1  ;;  %v3570_v49 = vld [vmem:[%s6026_s1 + $0x1b4] sm:$0xf0]  ;;  %v2670_v52 = vor.u32 %v3569_v44, %v2669_v43  ;;  %v3210_v43 = vor.u32 %v3684_v35, %v3207_v36  ;;  %v3077_v44 = vld [vmem:[%s6026_s1 + $0x448] sm:$0xf]  ;;  %v3749_v35 = vld [vmem:[%s6026_s1 + $0x754] sm:$0xf] }
  0x69   :  { %1708 = vmatpush.bf16.msrb.mxu0 %v3310_v55  ;;  %1721 = vmatpush.bf16.msrb.mxu1 %v3314_v56  ;;  %v2674_v55 = vor.u32 %v3553_v45, %v2671_v47  ;;  %v2678_v56 = vor.u32 %v3570_v49, %v2677_v48  ;;  %v3668_v45 = vld [vmem:[%s6026_s1 + $0x4c4] sm:$0xf0]  ;;  %v3079_v47 = vld [vmem:[%s6026_s1 + $0x4c8] sm:$0xf0] }
  0x6a   :  { %1734 = vmatpush.bf16.msrb.mxu2 %v3318_v57  ;;  %v3521_v57 = vld [vmem:[%s6026_s1 + $0x34] sm:$0xf]  ;;  %v3078_v50 = vor.u32 %v3668_v45, %v3077_v44 }
  0x6b   :  { %1747 = vmatpush.bf16.msrb.mxu3 %v3322_v61  ;;  %v3538_v61 = vld [vmem:[%s6026_s1 + $0xb4] sm:$0xf0]  ;;  %v2546_v8 = vor.u32 %v3521_v57, %v2543_v58  ;;  %v3636_v57 = vld [vmem:[%s6026_s1 + $0x3c4] sm:$0xf0]  ;;  %v3620_v58 = vld [vmem:[%s6026_s1 + $0x34c] sm:$0xf] }
  0x6c   :  { %v2550_v9 = vor.u32 %v3538_v61, %v2549_v59  ;;  %v2951_v59 = vld [vmem:[%s6026_s1 + $0x3c8] sm:$0xf0] }
  0x6d   :  { %1709 = vmatpush.bf16.msrb.mxu0 %v3182_v4  ;;  %1722 = vmatpush.bf16.msrb.mxu1 %v3186_v5  ;;  %v2542_v4 = vor.u32 %v3537_v54, %v2541_v53  ;;  %v3455_v5 = vld [vmem:[%s6026_s1 + $0x7c0] sm:$0xf0] }
  0x6e   :  { %1735 = vmatpush.bf16.msrb.mxu2 %v3190_v6  ;;  %v3461_v6 = vld [vmem:[%s6026_s1 + $0x748] sm:$0xf]  ;;  %v3458_v14 = vor.u32 %v3747_v3, %v3455_v5  ;;  %v3619_v53 = vld [vmem:[%s6026_s1 + $0x344] sm:$0xf]  ;;  %v2954_v3 = vor.u32 %v3620_v58, %v2951_v59 }
  0x6f   :  { %1748 = vmatpush.bf16.msrb.mxu3 %v3194_v10  ;;  %v3748_v10 = vld [vmem:[%s6026_s1 + $0x74c] sm:$0xf]  ;;  %v3462_v15 = vor.u32 %v3764_v7, %v3461_v6  ;;  %v2821_v5 = vld [vmem:[%s6026_s1 + $0x248] sm:$0xf] }
  0x70   :  { %v3466_v19 = vor.u32 %v3748_v10, %v3463_v11  ;;  %v3604_v6 = vld [vmem:[%s6026_s1 + $0x2c4] sm:$0xf0]  ;;  %v3588_v7 = vld [vmem:[%s6026_s1 + $0x24c] sm:$0xf] }
  0x71   :  { %1710 = vmatpush.bf16.msrb.mxu0 %v3054_v16  ;;  %1723 = vmatpush.bf16.msrb.mxu1 %v3058_v17  ;;  %v3325_v16 = vld [vmem:[%s6026_s1 + $0x640] sm:$0xf]  ;;  %v2822_v11 = vor.u32 %v3604_v6, %v2821_v5  ;;  %v3223_v5 = vld [vmem:[%s6026_s1 + $0x5d8] sm:$0xf0]  ;;  %v3085_v6 = vld [vmem:[%s6026_s1 + $0x450] sm:$0xf] }
  0x72   :  { %1736 = vmatpush.bf16.msrb.mxu2 %v3062_v18  ;;  %v3731_v17 = vld [vmem:[%s6026_s1 + $0x6bc] sm:$0xf0]  ;;  %v3715_v18 = vld [vmem:[%s6026_s1 + $0x644] sm:$0xf] }
  0x73   :  { %1749 = vmatpush.bf16.msrb.mxu3 %v3066_v22  ;;  %v3732_v22 = vld [vmem:[%s6026_s1 + $0x6c4] sm:$0xf0]  ;;  %v3326_v25 = vor.u32 %v3731_v17, %v3325_v16  ;;  %v3330_v26 = vor.u32 %v3715_v18, %v3327_v20  ;;  %v2687_v16 = vld [vmem:[%s6026_s1 + $0x1c0] sm:$0xf0]  ;;  %v2695_v20 = vld [vmem:[%s6026_s1 + $0x1c8] sm:$0xf0] }
  0x74   :  { %v3334_v27 = vor.u32 %v3732_v22, %v3333_v21  ;;  %v2693_v17 = vld [vmem:[%s6026_s1 + $0x148] sm:$0xf]  ;;  %v2557_v22 = vld [vmem:[%s6026_s1 + $0x40] sm:$0xf] }
  0x75   :  { %1711 = vmatpush.bf16.msrb.mxu0 %v2926_v28  ;;  %1724 = vmatpush.bf16.msrb.mxu1 %v2930_v29  ;;  %v3197_v28 = vld [vmem:[%s6026_s1 + $0x540] sm:$0xf]  ;;  %v3572_v18 = vld [vmem:[%s6026_s1 + $0x1c4] sm:$0xf0]  ;;  %v2558_v36 = vor.u32 %v3539_v23, %v2557_v22  ;;  %v4907_v22 = vld [vmem:[%s6026_s1 + $0x358] sm:$0xf] }
  0x76   :  { %1737 = vmatpush.bf16.msrb.mxu2 %v2934_v30  ;;  %v3699_v29 = vld [vmem:[%s6026_s1 + $0x5bc] sm:$0xf0]  ;;  %v3683_v30 = vld [vmem:[%s6026_s1 + $0x544] sm:$0xf]  ;;  %v4912_v23 = vld [vmem:[%s6026_s1 + $0x3d4] sm:$0xf0] }
  0x77   :  { %1750 = vmatpush.bf16.msrb.mxu3 %v2938_v34  ;;  %v3700_v34 = vld [vmem:[%s6026_s1 + $0x5c4] sm:$0xf0]  ;;  %v3198_v37 = vor.u32 %v3699_v29, %v3197_v28  ;;  %v3202_v38 = vor.u32 %v3683_v30, %v3199_v32  ;;  %v2567_v32 = vld [vmem:[%s6026_s1 + $0xc8] sm:$0xf0] }
  0x78   :  { %v3206_v39 = vor.u32 %v3700_v34, %v3205_v33  ;;  %v2565_v28 = vld [vmem:[%s6026_s1 + $0x48] sm:$0xf]  ;;  %v3469_v33 = vld [vmem:[%s6026_s1 + $0x750] sm:$0xf] }
  0x79   :  { %1712 = vmatpush.bf16.msrb.mxu0 %v2798_v40  ;;  %1725 = vmatpush.bf16.msrb.mxu1 %v2802_v41  ;;  %v3069_v40 = vld [vmem:[%s6026_s1 + $0x440] sm:$0xf]  ;;  %v3540_v30 = vld [vmem:[%s6026_s1 + $0xc4] sm:$0xf0]  ;;  %v3765_v34 = vld [vmem:[%s6026_s1 + $0x7cc] sm:$0xf0] }
  0x7a   :  { %1738 = vmatpush.bf16.msrb.mxu2 %v2806_v42  ;;  %v3667_v41 = vld [vmem:[%s6026_s1 + $0x4bc] sm:$0xf0]  ;;  %v3651_v42 = vld [vmem:[%s6026_s1 + $0x444] sm:$0xf]  ;;  %v3470_v44 = vor.u32 %v3765_v34, %v3469_v33  ;;  %v4957_v33 = vld [vmem:[%s6026_s1 + $0x25c] sm:$0xf] }
  0x7b   :  { %1751 = vmatpush.bf16.msrb.mxu3 %v2810_v46  ;;  %v3652_v46 = vld [vmem:[%s6026_s1 + $0x44c] sm:$0xf]  ;;  %v3070_v48 = vor.u32 %v3667_v41, %v3069_v40  ;;  %v2566_v41 = vor.u32 %v3540_v30, %v2565_v28  ;;  %v4937_v28 = vld [vmem:[%s6026_s1 + $0x254] sm:$0xf]  ;;  %v4947_v30 = vld [vmem:[%s6026_s1 + $0x258] sm:$0xf] }
  0x7c   :  { %v3082_v54 = vor.u32 %v3652_v46, %v3079_v47  ;;  %v3341_v47 = vld [vmem:[%s6026_s1 + $0x650] sm:$0xf]  ;;  %v4962_v34 = vld [vmem:[%s6026_s1 + $0x2d8] sm:$0xf0] }
  0x7d   :  { %1713 = vmatpush.bf16.msrb.mxu0 %v2670_v52  ;;  %1726 = vmatpush.bf16.msrb.mxu1 %v2674_v55  ;;  %v3635_v52 = vld [vmem:[%s6026_s1 + $0x3bc] sm:$0xf0]  ;;  %v2943_v55 = vld [vmem:[%s6026_s1 + $0x3c0] sm:$0xf0] }
  0x7e   :  { %1739 = vmatpush.bf16.msrb.mxu2 %v2678_v56  ;;  %v2949_v56 = vld [vmem:[%s6026_s1 + $0x348] sm:$0xf]  ;;  %v2946_v61 = vor.u32 %v3619_v53, %v2943_v55  ;;  %v3734_v53 = vld [vmem:[%s6026_s1 + $0x6d4] sm:$0xf0]  ;;  %v3351_v55 = vld [vmem:[%s6026_s1 + $0x6d8] sm:$0xf0] }
  0x7f   :  { %1752 = vmatpush.bf16.msrb.mxu3 %v2682_v60  ;;  %v2942_v60 = vor.u32 %v3635_v52, %v2941_v51  ;;  %v2950_v62 = vor.u32 %v3636_v57, %v2949_v56  ;;  %v3343_v51 = vld [vmem:[%s6026_s1 + $0x6d0] sm:$0xf0]  ;;  %v3349_v52 = vld [vmem:[%s6026_s1 + $0x658] sm:$0xf]  ;;  %v3213_v57 = vld [vmem:[%s6026_s1 + $0x550] sm:$0xf] }
  0x80   :  { %v3350_v59 = vor.u32 %v3734_v53, %v3349_v52  ;;  %v5026_v53 = vld [vmem:[%s6026_s1 + $0xcc] sm:$0xf0] }
  0x81   :  { %1714 = vmatpush.bf16.msrb.mxu0 %v2542_v4  ;;  %1727 = vmatpush.bf16.msrb.mxu1 %v2546_v8  ;;  %v2815_v4 = vld [vmem:[%s6026_s1 + $0x2c0] sm:$0xf0]  ;;  %v2823_v8 = vld [vmem:[%s6026_s1 + $0x2c8] sm:$0xf0] }
  0x82   :  { %1740 = vmatpush.bf16.msrb.mxu2 %v2550_v9  ;;  %v2814_v9 = vor.u32 %v3603_v0, %v2813_v63  ;;  %v2818_v10 = vor.u32 %v3587_v2, %v2815_v4  ;;  %v3221_v0 = vld [vmem:[%s6026_s1 + $0x558] sm:$0xf]  ;;  %v4851_v4 = vld [vmem:[%s6027_s0] sm:$0xf] }
  0x83   :  { %1753 = vmatpush.bf16.msrb.mxu3 %v2554_v12  ;;  %v2685_v12 = vld [vmem:[%s6026_s1 + $0x140] sm:$0xf]  ;;  %v3702_v2 = vld [vmem:[%s6026_s1 + $0x5d4] sm:$0xf0] }
  0x84   :  { %1715 = vmatmul.bf16.vlgmr.msrb.gmra.mxu0 %v4065_v1  ;;  %1728 = vmatmul.bf16.vlgmr.msrb.gmra.mxu1 %v4065_v1 }
  0x85   :  { %1759 = vmatpush.bf16.msra.mxu0 %v3454_v13  ;;  %1772 = vmatpush.bf16.msra.mxu1 %v3458_v14  ;;  %v3571_v13 = vld [vmem:[%s6026_s1 + $0x1bc] sm:$0xf0]  ;;  %v3555_v14 = vld [vmem:[%s6026_s1 + $0x144] sm:$0xf] }
  0x86   :  { %1785 = vmatpush.bf16.msra.mxu2 %v3462_v15  ;;  %1754 = vmatmul.bf16.vlgmr.msrb.gmra.mxu3 %v4065_v1  ;;  %v2826_v15 = vor.u32 %v3588_v7, %v2823_v8  ;;  %v2686_v21 = vor.u32 %v3571_v13, %v2685_v12  ;;  %v2690_v24 = vor.u32 %v3555_v14, %v2687_v16  ;;  %v3669_v7 = vld [vmem:[%s6026_s1 + $0x4cc] sm:$0xf0]  ;;  %v3670_v14 = vld [vmem:[%s6026_s1 + $0x4d4] sm:$0xf0]  ;;  %v3095_v16 = vld [vmem:[%s6026_s1 + $0x4d8] sm:$0xf0] }
  0x87   :  { %1798 = vmatpush.bf16.msra.mxu3 %v3466_v19  ;;  %1741 = vmatmul.bf16.vlgmr.msrb.gmra.mxu2 %v4065_v1  ;;  %v3071_v1 = vld [vmem:[%s6026_s1 + $0x4c0] sm:$0xf0]  ;;  %v3556_v19 = vld [vmem:[%s6026_s1 + $0x14c] sm:$0xf]  ;;  %v3222_v13 = vor.u32 %v3702_v2, %v3221_v0  ;;  %v5060_v2 = vld [vmem:[%s6026_s1 + $0x5c] sm:$0xf] }
  0x88   :  { %v3074_v49 = vor.u32 %v3651_v42, %v3071_v1  ;;  %v2698_v29 = vor.u32 %v3556_v19, %v2695_v20  ;;  %v3750_v42 = vld [vmem:[%s6026_s1 + $0x75c] sm:$0xf]  ;;  %v4892_v19 = vld [vmem:[%s6026_s1 + $0x3cc] sm:$0xf0]  ;;  %v4897_v20 = vld [vmem:[%s6026_s1 + $0x354] sm:$0xf] }
  0x89   :  { %1760 = vmatpush.bf16.msra.mxu0 %v3326_v25  ;;  %1773 = vmatpush.bf16.msra.mxu1 %v3330_v26  ;;  %v2694_v25 = vor.u32 %v3572_v18, %v2693_v17  ;;  %v3523_v26 = vld [vmem:[%s6026_s1 + $0x44] sm:$0xf]  ;;  %v4887_v18 = vld [vmem:[%s6026_s1 + $0x350] sm:$0xf] }
  0x8a   :  { %1786 = vmatpush.bf16.msra.mxu2 %v3334_v27  ;;  %v2559_v27 = vld [vmem:[%s6026_s1 + $0xc0] sm:$0xf0] }
  0x8b   :  { %1799 = vmatpush.bf16.msra.mxu3 %v3338_v31  ;;  %v3524_v31 = vld [vmem:[%s6026_s1 + $0x4c] sm:$0xf]  ;;  %v2562_v40 = vor.u32 %v3523_v26, %v2559_v27  ;;  %v4927_v26 = vld [vmem:[%s6026_s1 + $0x250] sm:$0xf] }
  0x8c   :  { %v2570_v1 = vor.u32 %v3524_v31, %v2567_v32  ;;  %v4932_v27 = vld [vmem:[%s6026_s1 + $0x2cc] sm:$0xf0]  ;;  %v3086_v31 = vor.u32 %v3669_v7, %v3085_v6  ;;  %v4952_v32 = vld [vmem:[%s6026_s1 + $0x2d4] sm:$0xf0] }
  0x8d   :  { %1761 = vmatpush.bf16.msra.mxu0 %v3198_v37  ;;  %1774 = vmatpush.bf16.msra.mxu1 %v3202_v38  ;;  %v3471_v37 = vld [vmem:[%s6026_s1 + $0x7d0] sm:$0xf0]  ;;  %v3477_v38 = vld [vmem:[%s6026_s1 + $0x758] sm:$0xf]  ;;  %v2838_v52 = vor.u32 %v4952_v32, %v4947_v30 }
  0x8e   :  { %1787 = vmatpush.bf16.msra.mxu2 %v3206_v39  ;;  %v3766_v39 = vld [vmem:[%s6026_s1 + $0x7d4] sm:$0xf0]  ;;  %v3474_v45 = vor.u32 %v3749_v35, %v3471_v37  ;;  %v4967_v37 = vld [vmem:[%s6026_s1 + $0x150] sm:$0xf] }
  0x8f   :  { %1800 = vmatpush.bf16.msra.mxu3 %v3210_v43  ;;  %v3479_v43 = vld [vmem:[%s6026_s1 + $0x7d8] sm:$0xf0]  ;;  %v3478_v46 = vor.u32 %v3766_v39, %v3477_v38  ;;  %v4972_v38 = vld [vmem:[%s6026_s1 + $0x1cc] sm:$0xf0]  ;;  %v4977_v39 = vld [vmem:[%s6026_s1 + $0x154] sm:$0xf] }
  0x91   :  { %1762 = vmatpush.bf16.msra.mxu0 %v3070_v48  ;;  %1775 = vmatpush.bf16.msra.mxu1 %v3074_v49  ;;  %v3733_v48 = vld [vmem:[%s6026_s1 + $0x6cc] sm:$0xf0]  ;;  %v3717_v49 = vld [vmem:[%s6026_s1 + $0x654] sm:$0xf] }
  0x92   :  { %1788 = vmatpush.bf16.msra.mxu2 %v3078_v50  ;;  %v3482_v50 = vor.u32 %v3750_v42, %v3479_v43  ;;  %v3342_v56 = vor.u32 %v3733_v48, %v3341_v47  ;;  %v3346_v58 = vor.u32 %v3717_v49, %v3343_v51  ;;  %v4987_v42 = vld [vmem:[%s6026_s1 + $0x158] sm:$0xf]  ;;  %v5008_v47 = vld [vmem:[%s6026_s1 + $0x1d8] sm:$0xf0]  ;;  %v5013_v48 = vld [vmem:[%s6026_s1 + $0x50] sm:$0xf] }
  0x93   :  { %1801 = vmatpush.bf16.msra.mxu3 %v3082_v54  ;;  %v3718_v54 = vld [vmem:[%s6026_s1 + $0x65c] sm:$0xf]  ;;  %v4992_v43 = vld [vmem:[%s6026_s1 + $0x1d4] sm:$0xf0] }
  0x94   :  { %v3354_v63 = vor.u32 %v3718_v54, %v3351_v55  ;;  %v5031_v54 = vld [vmem:[%s6026_s1 + $0x54] sm:$0xf]  ;;  %v2710_v7 = vor.u32 %v4992_v43, %v4987_v42  ;;  %v5150_v43 = vld [vmem:[%s6026_s1 + $0x664] sm:$0xf] }
  0x95   :  { %1763 = vmatpush.bf16.msra.mxu0 %v2942_v60  ;;  %1776 = vmatpush.bf16.msra.mxu1 %v2946_v61  ;;  %v3701_v60 = vld [vmem:[%s6026_s1 + $0x5cc] sm:$0xf0]  ;;  %v3685_v61 = vld [vmem:[%s6026_s1 + $0x554] sm:$0xf] }
  0x96   :  { %1789 = vmatpush.bf16.msra.mxu2 %v2950_v62  ;;  %v3215_v62 = vld [vmem:[%s6026_s1 + $0x5d0] sm:$0xf0]  ;;  %v3214_v8 = vor.u32 %v3701_v60, %v3213_v57  ;;  %v2842_v57 = vor.u32 %v4957_v33, %v4962_v34  ;;  %v5091_v34 = vld [vmem:[%s6026_s1 + $0x760] sm:$0xf] }
  0x97   :  { %1802 = vmatpush.bf16.msra.mxu3 %v2954_v3  ;;  %v3686_v3 = vld [vmem:[%s6026_s1 + $0x55c] sm:$0xf]  ;;  %v3218_v12 = vor.u32 %v3685_v61, %v3215_v62  ;;  %v5036_v55 = vld [vmem:[%s6026_s1 + $0xd0] sm:$0xf0] }
  0x98   :  { %v3226_v17 = vor.u32 %v3686_v3, %v3223_v5  ;;  %v5065_v3 = vld [vmem:[%s6026_s1 + $0xd8] sm:$0xf0] }
  0x99   :  { %1764 = vmatpush.bf16.msra.mxu0 %v2814_v9  ;;  %1777 = vmatpush.bf16.msra.mxu1 %v2818_v10  ;;  %v3653_v9 = vld [vmem:[%s6026_s1 + $0x454] sm:$0xf] }
  0x9a   :  { %1790 = vmatpush.bf16.msra.mxu2 %v2822_v11  ;;  %v3087_v10 = vld [vmem:[%s6026_s1 + $0x4d0] sm:$0xf0]  ;;  %v3093_v11 = vld [vmem:[%s6026_s1 + $0x458] sm:$0xf] }
  0x9b   :  { %1803 = vmatpush.bf16.msra.mxu3 %v2826_v15  ;;  %v3654_v15 = vld [vmem:[%s6026_s1 + $0x45c] sm:$0xf]  ;;  %v3090_v35 = vor.u32 %v3653_v9, %v3087_v10 }
  0x9d   :  { %1765 = vmatpush.bf16.msra.mxu0 %v2686_v21  ;;  %1778 = vmatpush.bf16.msra.mxu1 %v2690_v24  ;;  %v4902_v21 = vld [vmem:[%s6026_s1 + $0x3d0] sm:$0xf0]  ;;  %v4917_v24 = vld [vmem:[%s6026_s1 + $0x35c] sm:$0xf] }
  0x9e   :  { %1791 = vmatpush.bf16.msra.mxu2 %v2694_v25  ;;  %v4922_v25 = vld [vmem:[%s6026_s1 + $0x3d8] sm:$0xf0] }
  0x9f   :  { %1804 = vmatpush.bf16.msra.mxu3 %v2698_v29  ;;  %v4942_v29 = vld [vmem:[%s6026_s1 + $0x2d0] sm:$0xf0]  ;;  %v2970_v49 = vor.u32 %v4917_v24, %v4922_v25 }
  0xa0   :  { %v2834_v51 = vor.u32 %v4937_v28, %v4942_v29 }
  0xa1   :  { %1766 = vmatpush.bf16.msra.mxu0 %v2558_v36  ;;  %1779 = vmatpush.bf16.msra.mxu1 %v2562_v40  ;;  %v3094_v36 = vor.u32 %v3670_v14, %v3093_v11  ;;  %v3098_v40 = vor.u32 %v3654_v15, %v3095_v16  ;;  %v1573_v62 = vpop.f32.mrf.mxu1  ;;  %v2574_v11 = vor.u32 %v5026_v53, %v5013_v48 }
  0xa2   :  { %1792 = vmatpush.bf16.msra.mxu2 %v2566_v41  ;;  %v4982_v41 = vld [vmem:[%s6026_s1 + $0x1d0] sm:$0xf0]  ;;  %1968 = vst [vmem:[%s6028_s2 + $0x8] sm:$0xff] %v1573_v62  ;;  %v2005_v5 = vrot.slane %v1573_v62, 4  ;;  %v2224_v6 = vmul.f32 %v1573_v62, %v1573_v62  ;;  %v2586_v16 = vor.u32 %v5060_v2, %v5065_v3  ;;  %v3237_v2 = vld [vmem:[%s6026_s1 + $0x568] sm:$0xf] }
  0xa3   :  { %1805 = vmatpush.bf16.msra.mxu3 %v2570_v1  ;;  %v2958_v1 = vor.u32 %v4892_v19, %v4887_v18  ;;  %v2706_v0 = vor.u32 %v4977_v39, %v4982_v41  ;;  %v3704_v3 = vld [vmem:[%s6026_s1 + $0x5e4] sm:$0xf0] }
  0xa4   :  { %1767 = vmatmul.bf16.vlgmr.msra.gmra.mxu0 %v4851_v4  ;;  %1780 = vmatmul.bf16.vlgmr.msra.gmra.mxu1 %v4851_v4  ;;  %v2261_v14 = vrot.slane %v2224_v6, 4 }
  0xa5   :  { %1811 = vmatpush.bf16.msrb.mxu0 %v3470_v44  ;;  %1824 = vmatpush.bf16.msrb.mxu1 %v3474_v45  ;;  %v2962_v44 = vor.u32 %v4897_v20, %v4902_v21  ;;  %v2966_v45 = vor.u32 %v4912_v23, %v4907_v22 }
  0xa6   :  { %1837 = vmatpush.bf16.msrb.mxu2 %v3478_v46  ;;  %1806 = vmatmul.bf16.vlgmr.msra.gmra.mxu3 %v4851_v4  ;;  %v5003_v46 = vld [vmem:[%s6026_s1 + $0x15c] sm:$0xf]  ;;  %v2262_v21 = vadd.f32 %v2261_v14, %v2224_v6 }
  0xa7   :  { %1850 = vmatpush.bf16.msrb.mxu3 %v3482_v50  ;;  %1793 = vmatmul.bf16.vlgmr.msra.gmra.mxu2 %v4851_v4  ;;  %v2830_v50 = vor.u32 %v4932_v27, %v4927_v26 }
  0xa8   :  { %v2263_v30 = vrot.slane %v2262_v21, 2 }
  0xa9   :  { %1812 = vmatpush.bf16.msrb.mxu0 %v3342_v56  ;;  %1825 = vmatpush.bf16.msrb.mxu1 %v3346_v58  ;;  %v1560_v56 = vpop.f32.mrf.mxu0  ;;  %v5043_v58 = vld [vmem:[%s6026_s1 + $0x58] sm:$0xf]  ;;  %v1599_v24 = vpop.f32.mrf.mxu3 }
  0xaa   :  { %1838 = vmatpush.bf16.msrb.mxu2 %v3350_v59  ;;  %v5048_v59 = vld [vmem:[%s6026_s1 + $0xd4] sm:$0xf0]  ;;  %1967 = vst [vmem:[%s6028_s2] sm:$0xff] %v1560_v56  ;;  %v1999_v60 = vrot.slane %v1560_v56, 4  ;;  %v2223_v61 = vmul.f32 %v1560_v56, %v1560_v56  ;;  %v1586_v19 = vpop.f32.mrf.mxu2  ;;  %v2017_v27 = vrot.slane %v1599_v24, 4  ;;  %v2226_v28 = vmul.f32 %v1599_v24, %v1599_v24 }
  0xab   :  { %1851 = vmatpush.bf16.msrb.mxu3 %v3354_v63  ;;  %v2702_v63 = vor.u32 %v4972_v38, %v4967_v37  ;;  %v2582_v15 = vor.u32 %v5048_v59, %v5043_v58  ;;  %1969 = vst [vmem:[%s6028_s2 + $0x10] sm:$0xff] %v1586_v19  ;;  %v2011_v22 = vrot.slane %v1586_v19, 4  ;;  %v2225_v23 = vmul.f32 %v1586_v19, %v1586_v19  ;;  %v5132_v37 = vld [vmem:[%s6026_s1 + $0x660] sm:$0xf]  ;;  %v3687_v58 = vld [vmem:[%s6026_s1 + $0x564] sm:$0xf] }
  0xac   :  { %v2000_v9 = vadd.f32 %v1999_v60, %v1560_v56  ;;  %v2255_v10 = vrot.slane %v2223_v61, 4  ;;  %1970 = vst [vmem:[%s6028_s2 + $0x18] sm:$0xff] %v1599_v24  ;;  %v5137_v38 = vld [vmem:[%s6026_s1 + $0x6dc] sm:$0xf0]  ;;  %v3231_v59 = vld [vmem:[%s6026_s1 + $0x5e0] sm:$0xf0] }
  0xad   :  { %1813 = vmatpush.bf16.msrb.mxu0 %v3214_v8  ;;  %1826 = vmatpush.bf16.msrb.mxu1 %v3218_v12  ;;  %v2714_v8 = vor.u32 %v5003_v46, %v5008_v47  ;;  %v2578_v12 = vor.u32 %v5031_v54, %v5036_v55  ;;  %v2267_v32 = vrot.slane %v2225_v23, 4  ;;  %v3358_v54 = vor.u32 %v5137_v38, %v5132_v37  ;;  %v5334_v37 = vld [vmem:[%s6026_s1 + $0x2e0] sm:$0xf0] }
  0xae   :  { %1839 = vmatpush.bf16.msrb.mxu2 %v3222_v13  ;;  %v2006_v13 = vadd.f32 %v2005_v5, %v1573_v62  ;;  %v2256_v18 = vadd.f32 %v2255_v10, %v2223_v61  ;;  %v3493_v61 = vld [vmem:[%s6026_s1 + $0x768] sm:$0xf]  ;;  %v3752_v10 = vld [vmem:[%s6026_s1 + $0x76c] sm:$0xf] }
  0xaf   :  { %1852 = vmatpush.bf16.msrb.mxu3 %v3226_v17  ;;  %v2001_v17 = vrot.slane %v2000_v9, 2  ;;  %v2268_v60 = vadd.f32 %v2267_v32, %v2225_v23  ;;  %v3365_v23 = vld [vmem:[%s6026_s1 + $0x668] sm:$0xf]  ;;  %v3703_v32 = vld [vmem:[%s6026_s1 + $0x5dc] sm:$0xf0] }
  0xb0   :  { %v2007_v20 = vrot.slane %v2006_v13, 2  ;;  %v2257_v26 = vrot.slane %v2256_v18, 2 }
  0xb1   :  { %1814 = vmatpush.bf16.msrb.mxu0 %v3086_v31  ;;  %1827 = vmatpush.bf16.msrb.mxu1 %v3090_v35  ;;  %v2002_v25 = vadd.f32 %v2001_v17, %v2000_v9  ;;  %v2012_v31 = vadd.f32 %v2011_v22, %v1586_v19  ;;  %v1562_v33 = vpop.f32.mrf.mxu0  ;;  %v5096_v35 = vld [vmem:[%s6026_s1 + $0x7dc] sm:$0xf0]  ;;  %v2269_v19 = vrot.slane %v2268_v60, 2 }
  0xb2   :  { %1840 = vmatpush.bf16.msrb.mxu2 %v3094_v36  ;;  %v2008_v29 = vadd.f32 %v2007_v20, %v2006_v13  ;;  %v3495_v13 = vld [vmem:[%s6026_s1 + $0x7e8] sm:$0xf0]  ;;  %v3486_v42 = vor.u32 %v5096_v35, %v5091_v34 }
  0xb3   :  { %1853 = vmatpush.bf16.msrb.mxu3 %v3098_v40  ;;  %v2003_v36 = vrot.slane %v2002_v25, 1  ;;  %v2258_v40 = vadd.f32 %v2257_v26, %v2256_v18  ;;  %v2013_v56 = vrot.slane %v2012_v31, 2  ;;  %v2270_v47 = vadd.f32 %v2269_v19, %v2268_v60  ;;  %v3688_v33 = vld [vmem:[%s6026_s1 + $0x56c] sm:$0xf]  ;;  %v5286_v60 = vld [vmem:[%s6026_s1 + $0x364] sm:$0xf] }
  0xb4   :  { %v3239_v34 = vld [vmem:[%s6026_s1 + $0x5e8] sm:$0xf0]  ;;  %v5329_v19 = vld [vmem:[%s6026_s1 + $0x264] sm:$0xf] }
  0xb5   :  { %1815 = vmatpush.bf16.msrb.mxu0 %v2958_v1  ;;  %1828 = vmatpush.bf16.msrb.mxu1 %v2962_v44  ;;  %v2018_v1 = vadd.f32 %v2017_v27, %v1599_v24  ;;  %v2273_v44 = vrot.slane %v2226_v28, 4  ;;  %v2004_v62 = vadd.f32 %v2003_v36, %v2002_v25  ;;  %v2259_v5 = vrot.slane %v2258_v40, 1  ;;  %v3736_v24 = vld [vmem:[%s6026_s1 + $0x6e4] sm:$0xf0]  ;;  %v5232_v36 = vld [vmem:[%s6026_s1 + $0x460] sm:$0xf] }
  0xb6   :  { %1841 = vmatpush.bf16.msrb.mxu2 %v2966_v45  ;;  %v1575_v45 = vpop.f32.mrf.mxu1  ;;  %v2014_v18 = vadd.f32 %v2013_v56, %v2012_v31  ;;  %v3498_v27 = vor.u32 %v3752_v10, %v3495_v13  ;;  %v2271_v31 = vrot.slane %v2270_v47, 1  ;;  %v5281_v56 = vld [vmem:[%s6026_s1 + $0x3dc] sm:$0xf0]  ;;  %v5309_v10 = vld [vmem:[%s6026_s1 + $0x36c] sm:$0xf] }
  0xb7   :  { %1854 = vmatpush.bf16.msrb.mxu3 %v2970_v49  ;;  %v5101_v49 = vld [vmem:[%s6026_s1 + $0x764] sm:$0xf]  ;;  %v2019_v6 = vrot.slane %v2018_v1, 2  ;;  %v2274_v9 = vadd.f32 %v2273_v44, %v2226_v28  ;;  %2191 = vst [vmem:[%s6029_s3] sm:$0xff] %v2004_v62  ;;  %v2260_v39 = vadd.f32 %v2259_v5, %v2258_v40  ;;  %v3720_v28 = vld [vmem:[%s6026_s1 + $0x66c] sm:$0xf] }
  0xb8   :  { %v2015_v46 = vrot.slane %v2014_v18, 1  ;;  %v2272_v55 = vadd.f32 %v2271_v31, %v2270_v47  ;;  %v5237_v40 = vld [vmem:[%s6026_s1 + $0x4dc] sm:$0xf0]  ;;  %v5247_v44 = vld [vmem:[%s6026_s1 + $0x4e0] sm:$0xf0] }
  0xb9   :  { %1816 = vmatpush.bf16.msrb.mxu0 %v2830_v50  ;;  %1829 = vmatpush.bf16.msrb.mxu1 %v2834_v51  ;;  %v5106_v50 = vld [vmem:[%s6026_s1 + $0x7e0] sm:$0xf0]  ;;  %v2009_v51 = vrot.slane %v2008_v29, 1  ;;  %v2020_v41 = vadd.f32 %v2019_v6, %v2018_v1  ;;  %2447 = vst [vmem:[%s6030_s4] sm:$0xff] %v2260_v39  ;;  %v5256_v45 = vld [vmem:[%s6026_s1 + $0x468] sm:$0xf]  ;;  %v3234_v6 = vor.u32 %v3687_v58, %v3231_v59 }
  0xba   :  { %1842 = vmatpush.bf16.msrb.mxu2 %v2838_v52  ;;  %v2264_v52 = vadd.f32 %v2263_v30, %v2262_v21  ;;  %v3490_v21 = vor.u32 %v5101_v49, %v5106_v50  ;;  %v2016_v30 = vadd.f32 %v2015_v46, %v2014_v18  ;;  %2449 = vst [vmem:[%s6030_s4 + $0x10] sm:$0xff] %v2272_v55  ;;  %v5242_v1 = vld [vmem:[%s6026_s1 + $0x464] sm:$0xf]  ;;  %v5261_v49 = vld [vmem:[%s6026_s1 + $0x4e4] sm:$0xf0] }
  0xbb   :  { %1855 = vmatpush.bf16.msrb.mxu3 %v2842_v57  ;;  %v3768_v57 = vld [vmem:[%s6026_s1 + $0x7e4] sm:$0xf0]  ;;  %v2010_v14 = vadd.f32 %v2009_v51, %v2008_v29  ;;  %v2021_v25 = vrot.slane %v2020_v41, 1  ;;  %v3367_v29 = vld [vmem:[%s6026_s1 + $0x6e8] sm:$0xf0]  ;;  %v3102_v38 = vor.u32 %v5237_v40, %v5232_v36  ;;  %v3106_v39 = vor.u32 %v5242_v1, %v5247_v44 }
  0xbc   :  { %v2265_v17 = vrot.slane %v2264_v52, 1  ;;  %v3494_v22 = vor.u32 %v3768_v57, %v3493_v61  ;;  %2193 = vst [vmem:[%s6029_s3 + $0x10] sm:$0xff] %v2016_v30  ;;  %v3370_v35 = vor.u32 %v3720_v28, %v3367_v29  ;;  %v5266_v50 = vld [vmem:[%s6026_s1 + $0x46c] sm:$0xf]  ;;  %v5293_v57 = vld [vmem:[%s6026_s1 + $0x3e0] sm:$0xf0] }
  0xbd   :  { %1817 = vmatpush.bf16.msrb.mxu0 %v2702_v63  ;;  %1830 = vmatpush.bf16.msrb.mxu1 %v2706_v0  ;;  %v2275_v63 = vrot.slane %v2274_v9, 2  ;;  %v1588_v0 = vpop.f32.mrf.mxu2  ;;  %2192 = vst [vmem:[%s6029_s3 + $0x8] sm:$0xff] %v2010_v14  ;;  %v2022_v48 = vadd.f32 %v2021_v25, %v2020_v41  ;;  %v5271_v51 = vld [vmem:[%s6026_s1 + $0x4e8] sm:$0xf0]  ;;  %v5298_v62 = vld [vmem:[%s6026_s1 + $0x368] sm:$0xf] }
  0xbe   :  { %1843 = vmatpush.bf16.msrb.mxu2 %v2710_v7  ;;  %v5155_v7 = vld [vmem:[%s6026_s1 + $0x6e0] sm:$0xf0]  ;;  %v2266_v20 = vadd.f32 %v2265_v17, %v2264_v52  ;;  %v5276_v52 = vld [vmem:[%s6026_s1 + $0x360] sm:$0xf]  ;;  %v5303_v5 = vld [vmem:[%s6026_s1 + $0x3e4] sm:$0xf0]  ;;  %v3242_v17 = vor.u32 %v3688_v33, %v3239_v34 }
  0xbf   :  { %1856 = vmatpush.bf16.msrb.mxu3 %v2714_v8  ;;  %v1601_v8 = vpop.f32.mrf.mxu3  ;;  %v2276_v26 = vadd.f32 %v2275_v63, %v2274_v9  ;;  %2194 = vst [vmem:[%s6029_s3 + $0x18] sm:$0xff] %v2022_v48  ;;  %v3238_v9 = vor.u32 %v3704_v3, %v3237_v2  ;;  %v5314_v13 = vld [vmem:[%s6026_s1 + $0x3e8] sm:$0xf0]  ;;  %v5319_v14 = vld [vmem:[%s6026_s1 + $0x260] sm:$0xf] }
  0xc0   :  { %2448 = vst [vmem:[%s6030_s4 + $0x8] sm:$0xff] %v2266_v20  ;;  %v5324_v18 = vld [vmem:[%s6026_s1 + $0x2dc] sm:$0xf0]  ;;  %v5343_v41 = vld [vmem:[%s6026_s1 + $0x268] sm:$0xf]  ;;  %v2978_v20 = vor.u32 %v5286_v60, %v5293_v57  ;;  %v2986_v28 = vor.u32 %v5309_v10, %v5314_v13 }
  0xc1   :  { %1818 = vmatpush.bf16.msrb.mxu0 %v2574_v11  ;;  %1831 = vmatpush.bf16.msrb.mxu1 %v2578_v12  ;;  %v2277_v53 = vrot.slane %v2276_v26, 1  ;;  %v3229_v11 = vld [vmem:[%s6026_s1 + $0x560] sm:$0xf]  ;;  %v3362_v12 = vor.u32 %v5150_v43, %v5155_v7  ;;  %v5348_v63 = vld [vmem:[%s6026_s1 + $0x2e4] sm:$0xf0]  ;;  %v3114_v43 = vor.u32 %v5266_v50, %v5271_v51  ;;  %v2974_v7 = vor.u32 %v5281_v56, %v5276_v52 }
  0xc2   :  { %1844 = vmatpush.bf16.msrb.mxu2 %v2582_v15  ;;  %v3366_v15 = vor.u32 %v3736_v24, %v3365_v23  ;;  %v3230_v61 = vor.u32 %v3703_v32, %v3229_v11  ;;  %v5353_v0 = vld [vmem:[%s6026_s1 + $0x26c] sm:$0xf]  ;;  %v5371_v47 = vld [vmem:[%s6026_s1 + $0x160] sm:$0xf]  ;;  %v5383_v23 = vld [vmem:[%s6026_s1 + $0x164] sm:$0xf]  ;;  %v2846_v29 = vor.u32 %v5324_v18, %v5319_v14  ;;  %v2850_v11 = vor.u32 %v5329_v19, %v5334_v37 }
  0xc3   :  { %1857 = vmatpush.bf16.msrb.mxu3 %v2586_v16  ;;  %v2278_v16 = vadd.f32 %v2277_v53, %v2276_v26  ;;  %v5366_v46 = vld [vmem:[%s6026_s1 + $0x2e8] sm:$0xf0]  ;;  %v5376_v8 = vld [vmem:[%s6026_s1 + $0x1dc] sm:$0xf0]  ;;  %v5388_v24 = vld [vmem:[%s6026_s1 + $0x1e0] sm:$0xf0]  ;;  %v2854_v32 = vor.u32 %v5348_v63, %v5343_v41 }
  0xc4   :  { %1819 = vmatmul.bf16.vlgmr.msrb.gmra.mxu0 %v4851_v4  ;;  %1832 = vmatmul.bf16.vlgmr.msrb.gmra.mxu1 %v4851_v4  ;;  %v5400_v30 = vld [vmem:[%s6026_s1 + $0x168] sm:$0xf]  ;;  %v2858_v58 = vor.u32 %v5353_v0, %v5366_v46  ;;  %v2718_v59 = vor.u32 %v5376_v8, %v5371_v47  ;;  %v3560_v13 = vld [vmem:[%s6026_s1 + $0x16c] sm:$0xf]  ;;  %v3509_v0 = vld [vmem:[%s6026_s1 + $0x778] sm:$0xf] }
  0xc5   :  { %1863 = vmatpush.bf16.msra.mxu0 %v3486_v42  ;;  %1876 = vmatpush.bf16.msra.mxu1 %v3490_v21  ;;  %2450 = vst [vmem:[%s6030_s4 + $0x18] sm:$0xff] %v2278_v16  ;;  %v3110_v42 = vor.u32 %v5261_v49, %v5256_v45  ;;  %v1612_v21 = vpop.f32.mrf.mxu0  ;;  %v5405_v31 = vld [vmem:[%s6026_s1 + $0x1e4] sm:$0xf0]  ;;  %v2727_v14 = vld [vmem:[%s6026_s1 + $0x1e8] sm:$0xf0] }
  0xc6   :  { %1889 = vmatpush.bf16.msra.mxu2 %v3494_v22  ;;  %1858 = vmatmul.bf16.vlgmr.msrb.gmra.mxu3 %v4851_v4  ;;  %v2982_v22 = vor.u32 %v5303_v5, %v5298_v62  ;;  %1971 = vst [vmem:[%s6028_s2 + $0x20] sm:$0xff] %v1612_v21  ;;  %v2023_v25 = vrot.slane %v1612_v21, 4  ;;  %v2227_v26 = vmul.f32 %v1612_v21, %v1612_v21  ;;  %v3770_v46 = vld [vmem:[%s6026_s1 + $0x7f4] sm:$0xf0] }
  0xc7   :  { %1902 = vmatpush.bf16.msra.mxu3 %v3498_v27  ;;  %1845 = vmatmul.bf16.vlgmr.msrb.gmra.mxu2 %v4851_v4  ;;  %v1625_v27 = vpop.f32.mrf.mxu1 }
  0xc8   :  { %1972 = vst [vmem:[%s6028_s2 + $0x28] sm:$0xff] %v1625_v27  ;;  %v2029_v48 = vrot.slane %v1625_v27, 4  ;;  %v2228_v53 = vmul.f32 %v1625_v27, %v1625_v27  ;;  %v2279_v55 = vrot.slane %v2227_v26, 4 }
  0xc9   :  { %1864 = vmatpush.bf16.msra.mxu0 %v3358_v54  ;;  %1877 = vmatpush.bf16.msra.mxu1 %v3362_v12  ;;  %v2024_v54 = vadd.f32 %v2023_v25, %v1612_v21  ;;  %v2722_v12 = vor.u32 %v5383_v23, %v5388_v24  ;;  %v1651_v44 = vpop.f32.mrf.mxu3  ;;  %v5457_v21 = vld [vmem:[%s6026_s1 + $0x68] sm:$0xf] }
  0xca   :  { %1890 = vmatpush.bf16.msra.mxu2 %v3366_v15  ;;  %v2030_v2 = vadd.f32 %v2029_v48, %v1625_v27  ;;  %v2285_v3 = vrot.slane %v2228_v53, 4  ;;  %v2726_v15 = vor.u32 %v5405_v31, %v5400_v30  ;;  %v2280_v33 = vadd.f32 %v2279_v55, %v2227_v26  ;;  %v1638_v34 = vpop.f32.mrf.mxu2  ;;  %1974 = vst [vmem:[%s6028_s2 + $0x38] sm:$0xff] %v1651_v44  ;;  %v2599_v48 = vld [vmem:[%s6026_s1 + $0xe8] sm:$0xf0]  ;;  %v3721_v31 = vld [vmem:[%s6026_s1 + $0x674] sm:$0xf] }
  0xcb   :  { %1903 = vmatpush.bf16.msra.mxu3 %v3370_v35  ;;  %v2025_v16 = vrot.slane %v2024_v54, 2  ;;  %1973 = vst [vmem:[%s6028_s2 + $0x30] sm:$0xff] %v1638_v34  ;;  %v2035_v40 = vrot.slane %v1638_v34, 4  ;;  %v2229_v1 = vmul.f32 %v1638_v34, %v1638_v34  ;;  %v2041_v50 = vrot.slane %v1651_v44, 4 }
  0xcc   :  { %v2031_v35 = vrot.slane %v2030_v2, 2  ;;  %v2286_v36 = vadd.f32 %v2285_v3, %v2228_v53  ;;  %v2281_v49 = vrot.slane %v2280_v33, 2  ;;  %v2230_v51 = vmul.f32 %v1651_v44, %v1651_v44  ;;  %v3501_v53 = vld [vmem:[%s6026_s1 + $0x770] sm:$0xf] }
  0xcd   :  { %1865 = vmatpush.bf16.msra.mxu0 %v3230_v61  ;;  %1878 = vmatpush.bf16.msra.mxu1 %v3234_v6  ;;  %v2026_v45 = vadd.f32 %v2025_v16, %v2024_v54  ;;  %v2036_v60 = vadd.f32 %v2035_v40, %v1638_v34  ;;  %v2291_v61 = vrot.slane %v2229_v1, 4  ;;  %v1614_v57 = vpop.f32.mrf.mxu0  ;;  %v2042_v6 = vadd.f32 %v2041_v50, %v1651_v44  ;;  %v3769_v54 = vld [vmem:[%s6026_s1 + $0x7ec] sm:$0xf0]  ;;  %v3753_v16 = vld [vmem:[%s6026_s1 + $0x774] sm:$0xf] }
  0xce   :  { %1891 = vmatpush.bf16.msra.mxu2 %v3238_v9  ;;  %v2032_v52 = vadd.f32 %v2031_v35, %v2030_v2  ;;  %v2287_v56 = vrot.slane %v2286_v36, 2  ;;  %v2282_v5 = vadd.f32 %v2281_v49, %v2280_v33  ;;  %v2297_v9 = vrot.slane %v2230_v51, 4  ;;  %v3503_v33 = vld [vmem:[%s6026_s1 + $0x7f0] sm:$0xf0]  ;;  %v3511_v49 = vld [vmem:[%s6026_s1 + $0x7f8] sm:$0xf0] }
  0xcf   :  { %1904 = vmatpush.bf16.msra.mxu3 %v3242_v17  ;;  %v2027_v62 = vrot.slane %v2026_v45, 1  ;;  %v1627_v10 = vpop.f32.mrf.mxu1  ;;  %v2037_v19 = vrot.slane %v2036_v60, 2  ;;  %v2292_v37 = vadd.f32 %v2291_v61, %v2229_v1  ;;  %v2730_v3 = vor.u32 %v3560_v13, %v2727_v14  ;;  %v3381_v57 = vld [vmem:[%s6026_s1 + $0x678] sm:$0xf]  ;;  %v3245_v13 = vld [vmem:[%s6026_s1 + $0x570] sm:$0xf] }
  0xd0   :  { %v2033_v17 = vrot.slane %v2032_v52, 1  ;;  %v2288_v18 = vadd.f32 %v2287_v56, %v2286_v36  ;;  %v2283_v63 = vrot.slane %v2282_v5, 1  ;;  %v3502_v30 = vor.u32 %v3769_v54, %v3501_v53  ;;  %v3383_v10 = vld [vmem:[%s6026_s1 + $0x6f8] sm:$0xf0]  ;;  %v3705_v14 = vld [vmem:[%s6026_s1 + $0x5ec] sm:$0xf0] }
  0xd1   :  { %1866 = vmatpush.bf16.msra.mxu0 %v3102_v38  ;;  %1879 = vmatpush.bf16.msra.mxu1 %v3106_v39  ;;  %v5437_v38 = vld [vmem:[%s6026_s1 + $0x60] sm:$0xf]  ;;  %v2028_v41 = vadd.f32 %v2027_v62, %v2026_v45  ;;  %v2038_v27 = vadd.f32 %v2037_v19, %v2036_v60  ;;  %v1653_v40 = vpop.f32.mrf.mxu3  ;;  %v3754_v45 = vld [vmem:[%s6026_s1 + $0x77c] sm:$0xf]  ;;  %v3506_v60 = vor.u32 %v3753_v16, %v3503_v33  ;;  %v3738_v62 = vld [vmem:[%s6026_s1 + $0x6f4] sm:$0xf0] }
  0xd2   :  { %1892 = vmatpush.bf16.msra.mxu2 %v3110_v42  ;;  %v5442_v39 = vld [vmem:[%s6026_s1 + $0xdc] sm:$0xf0]  ;;  %v2043_v42 = vrot.slane %v2042_v6, 2  ;;  %v2034_v25 = vadd.f32 %v2033_v17, %v2032_v52  ;;  %v2289_v26 = vrot.slane %v2288_v18, 1  ;;  %v1640_v2 = vpop.f32.mrf.mxu2  ;;  %v3737_v52 = vld [vmem:[%s6026_s1 + $0x6ec] sm:$0xf0]  ;;  %v3510_v61 = vor.u32 %v3770_v46, %v3509_v0 }
  0xd3   :  { %1905 = vmatpush.bf16.msra.mxu3 %v3114_v43  ;;  %v2298_v43 = vadd.f32 %v2297_v9, %v2230_v51  ;;  %2195 = vst [vmem:[%s6029_s3 + $0x20] sm:$0xff] %v2028_v41  ;;  %v2039_v35 = vrot.slane %v2038_v27, 1  ;;  %v2590_v44 = vor.u32 %v5442_v39, %v5437_v38  ;;  %v3722_v9 = vld [vmem:[%s6026_s1 + $0x67c] sm:$0xf]  ;;  %v3247_v19 = vld [vmem:[%s6026_s1 + $0x5f0] sm:$0xf0]  ;;  %v3382_v39 = vor.u32 %v3738_v62, %v3381_v57 }
  0xd4   :  { %2196 = vst [vmem:[%s6029_s3 + $0x28] sm:$0xff] %v2034_v25  ;;  %v2290_v34 = vadd.f32 %v2289_v26, %v2288_v18  ;;  %v3689_v18 = vld [vmem:[%s6026_s1 + $0x574] sm:$0xf]  ;;  %v3706_v41 = vld [vmem:[%s6026_s1 + $0x5f4] sm:$0xf0]  ;;  %v3246_v54 = vor.u32 %v3705_v14, %v3245_v13 }
  0xd5   :  { %1867 = vmatpush.bf16.msra.mxu0 %v2974_v7  ;;  %1880 = vmatpush.bf16.msra.mxu1 %v2978_v20  ;;  %v5447_v7 = vld [vmem:[%s6026_s1 + $0x64] sm:$0xf]  ;;  %v2299_v55 = vrot.slane %v2298_v43, 2  ;;  %v2040_v50 = vadd.f32 %v2039_v35, %v2038_v27  ;;  %v5609_v25 = vld [vmem:[%s6026_s1 + $0x478] sm:$0xf]  ;;  %v3250_v2 = vor.u32 %v3689_v18, %v3247_v19 }
  0xd6   :  { %1893 = vmatpush.bf16.msra.mxu2 %v2982_v22  ;;  %v5452_v20 = vld [vmem:[%s6026_s1 + $0xe0] sm:$0xf0]  ;;  %v5462_v22 = vld [vmem:[%s6026_s1 + $0xe4] sm:$0xf0]  ;;  %2452 = vst [vmem:[%s6030_s4 + $0x28] sm:$0xff] %v2290_v34 }
  0xd7   :  { %1906 = vmatpush.bf16.msra.mxu3 %v2986_v28  ;;  %v2293_v28 = vrot.slane %v2292_v37, 2  ;;  %v2300_v1 = vadd.f32 %v2299_v55, %v2298_v43  ;;  %v2594_v47 = vor.u32 %v5447_v7, %v5452_v20  ;;  %v2598_v8 = vor.u32 %v5462_v22, %v5457_v21  ;;  %2197 = vst [vmem:[%s6029_s3 + $0x30] sm:$0xff] %v2040_v50  ;;  %v5588_v7 = vld [vmem:[%s6026_s1 + $0x470] sm:$0xf]  ;;  %v5598_v21 = vld [vmem:[%s6026_s1 + $0x474] sm:$0xf] }
  0xd8   :  { %v3386_v43 = vor.u32 %v3722_v9, %v3383_v10  ;;  %v5593_v20 = vld [vmem:[%s6026_s1 + $0x4ec] sm:$0xf0]  ;;  %v5603_v22 = vld [vmem:[%s6026_s1 + $0x4f0] sm:$0xf0]  ;;  %v5614_v26 = vld [vmem:[%s6026_s1 + $0x4f4] sm:$0xf0] }
  0xd9   :  { %1868 = vmatpush.bf16.msra.mxu0 %v2846_v29  ;;  %1881 = vmatpush.bf16.msra.mxu1 %v2850_v11  ;;  %v3528_v29 = vld [vmem:[%s6026_s1 + $0x6c] sm:$0xf]  ;;  %v2284_v11 = vadd.f32 %v2283_v63, %v2282_v5  ;;  %v2294_v36 = vadd.f32 %v2293_v28, %v2292_v37  ;;  %v2301_v24 = vrot.slane %v2300_v1, 1  ;;  %v3253_v37 = vld [vmem:[%s6026_s1 + $0x578] sm:$0xf]  ;;  %v3118_v0 = vor.u32 %v5593_v20, %v5588_v7 }
  0xda   :  { %1894 = vmatpush.bf16.msra.mxu2 %v2854_v32  ;;  %v2044_v32 = vadd.f32 %v2043_v42, %v2042_v6  ;;  %v3514_v6 = vor.u32 %v3754_v45, %v3511_v49  ;;  %v3690_v63 = vld [vmem:[%s6026_s1 + $0x57c] sm:$0xf]  ;;  %v5640_v53 = vld [vmem:[%s6026_s1 + $0x374] sm:$0xf]  ;;  %v5656_v55 = vld [vmem:[%s6026_s1 + $0x3f4] sm:$0xf0]  ;;  %v3122_v46 = vor.u32 %v5598_v21, %v5603_v22  ;;  %v3126_v45 = vor.u32 %v5614_v26, %v5609_v25 }
  0xdb   :  { %1907 = vmatpush.bf16.msra.mxu3 %v2858_v58  ;;  %2451 = vst [vmem:[%s6030_s4 + $0x20] sm:$0xff] %v2284_v11  ;;  %v2295_v51 = vrot.slane %v2294_v36, 1  ;;  %v2302_v5 = vadd.f32 %v2301_v24, %v2300_v1  ;;  %v3255_v42 = vld [vmem:[%s6026_s1 + $0x5f8] sm:$0xf0]  ;;  %v5646_v11 = vld [vmem:[%s6026_s1 + $0x3f0] sm:$0xf0] }
  0xdc   :  { %v2045_v58 = vrot.slane %v2044_v32, 1  ;;  %v5619_v27 = vld [vmem:[%s6026_s1 + $0x47c] sm:$0xf]  ;;  %v5671_v33 = vld [vmem:[%s6026_s1 + $0x270] sm:$0xf]  ;;  %v3258_v34 = vor.u32 %v3690_v63, %v3255_v42 }
  0xdd   :  { %1869 = vmatpush.bf16.msra.mxu0 %v2718_v59  ;;  %1882 = vmatpush.bf16.msra.mxu1 %v2722_v12  ;;  %v3373_v59 = vld [vmem:[%s6026_s1 + $0x670] sm:$0xf]  ;;  %v2602_v12 = vor.u32 %v3528_v29, %v2599_v48  ;;  %v2296_v56 = vadd.f32 %v2295_v51, %v2294_v36  ;;  %2454 = vst [vmem:[%s6030_s4 + $0x38] sm:$0xff] %v2302_v5  ;;  %v5624_v28 = vld [vmem:[%s6026_s1 + $0x4f8] sm:$0xf0] }
  0xde   :  { %1895 = vmatpush.bf16.msra.mxu2 %v2726_v15  ;;  %v2046_v23 = vadd.f32 %v2045_v58, %v2044_v32  ;;  %v3375_v15 = vld [vmem:[%s6026_s1 + $0x6f0] sm:$0xf0]  ;;  %v3374_v17 = vor.u32 %v3737_v52, %v3373_v59  ;;  %v5630_v29 = vld [vmem:[%s6026_s1 + $0x370] sm:$0xf]  ;;  %v5651_v32 = vld [vmem:[%s6026_s1 + $0x378] sm:$0xf]  ;;  %v3130_v49 = vor.u32 %v5619_v27, %v5624_v28  ;;  %v2994_v51 = vor.u32 %v5640_v53, %v5646_v11 }
  0xdf   :  { %1908 = vmatpush.bf16.msra.mxu3 %v2730_v3  ;;  %2453 = vst [vmem:[%s6030_s4 + $0x30] sm:$0xff] %v2296_v56  ;;  %v3378_v38 = vor.u32 %v3721_v31, %v3375_v15  ;;  %v5635_v48 = vld [vmem:[%s6026_s1 + $0x3ec] sm:$0xf0]  ;;  %v3254_v3 = vor.u32 %v3706_v41, %v3253_v37  ;;  %v5666_v16 = vld [vmem:[%s6026_s1 + $0x3f8] sm:$0xf0] }
  0xe0   :  { %2198 = vst [vmem:[%s6029_s3 + $0x38] sm:$0xff] %v2046_v23  ;;  %v5676_v35 = vld [vmem:[%s6026_s1 + $0x2ec] sm:$0xf0]  ;;  %v5681_v36 = vld [vmem:[%s6026_s1 + $0x274] sm:$0xf]  ;;  %v2990_v50 = vor.u32 %v5635_v48, %v5630_v29  ;;  %v2998_v23 = vor.u32 %v5656_v55, %v5651_v32 }
  0xe1   :  { %1870 = vmatpush.bf16.msra.mxu0 %v2590_v44  ;;  %1883 = vmatpush.bf16.msra.mxu1 %v2594_v47  ;;  %v5686_v40 = vld [vmem:[%s6026_s1 + $0x2f0] sm:$0xf0]  ;;  %v5695_v58 = vld [vmem:[%s6026_s1 + $0x278] sm:$0xf]  ;;  %v5705_v44 = vld [vmem:[%s6026_s1 + $0x27c] sm:$0xf]  ;;  %v1664_v52 = vpop.f32.mrf.mxu0  ;;  %v1677_v15 = vpop.f32.mrf.mxu1 }
  0xe2   :  { %1896 = vmatpush.bf16.msra.mxu2 %v2598_v8  ;;  %v5700_v1 = vld [vmem:[%s6026_s1 + $0x2f4] sm:$0xf0]  ;;  %v5718_v47 = vld [vmem:[%s6026_s1 + $0x2f8] sm:$0xf0]  ;;  %v5723_v8 = vld [vmem:[%s6026_s1 + $0x170] sm:$0xf]  ;;  %v2231_v31 = vmul.f32 %v1664_v52, %v1664_v52  ;;  %v2232_v5 = vmul.f32 %v1677_v15, %v1677_v15 }
  0xe3   :  { %1909 = vmatpush.bf16.msra.mxu3 %v2602_v12  ;;  %v5728_v59 = vld [vmem:[%s6026_s1 + $0x1ec] sm:$0xf0]  ;;  %v5735_v24 = vld [vmem:[%s6026_s1 + $0x174] sm:$0xf]  ;;  %1975 = vst [vmem:[%s6028_s2 + $0x40] sm:$0xff] %v1664_v52  ;;  %v2053_v62 = vrot.slane %v1677_v15, 4  ;;  %v2870_v9 = vor.u32 %v5700_v1, %v5695_v58  ;;  %v2874_v14 = vor.u32 %v5705_v44, %v5718_v47 }
  0xe4   :  { %1871 = vmatmul.bf16.vlgmr.msra.gmra.mxu0 %v4851_v4  ;;  %1884 = vmatmul.bf16.vlgmr.msra.gmra.mxu1 %v4851_v4  ;;  %v5740_v12 = vld [vmem:[%s6026_s1 + $0x1f0] sm:$0xf0]  ;;  %v5757_v57 = vld [vmem:[%s6026_s1 + $0x1f4] sm:$0xf0]  ;;  %1976 = vst [vmem:[%s6028_s2 + $0x48] sm:$0xff] %v1677_v15  ;;  %v2303_v13 = vrot.slane %v2231_v31, 4 }
  0xe5   :  { %1915 = vmatpush.bf16.msrb.mxu0 %v3502_v30  ;;  %1928 = vmatpush.bf16.msrb.mxu1 %v3506_v60  ;;  %v2047_v30 = vrot.slane %v1664_v52, 4  ;;  %v2862_v60 = vor.u32 %v5676_v35, %v5671_v33  ;;  %v2054_v18 = vadd.f32 %v2053_v62, %v1677_v15  ;;  %v2309_v19 = vrot.slane %v2232_v5, 4  ;;  %v3562_v35 = vld [vmem:[%s6026_s1 + $0x17c] sm:$0xf]  ;;  %v2605_v1 = vld [vmem:[%s6026_s1 + $0x70] sm:$0xf] }
  0xe6   :  { %1941 = vmatpush.bf16.msrb.mxu2 %v3510_v61  ;;  %1910 = vmatmul.bf16.vlgmr.msra.gmra.mxu3 %v4851_v4  ;;  %v5752_v61 = vld [vmem:[%s6026_s1 + $0x178] sm:$0xf]  ;;  %v2738_v37 = vor.u32 %v5735_v24, %v5740_v12  ;;  %v2304_v41 = vadd.f32 %v2303_v13, %v2231_v31  ;;  %v3545_v44 = vld [vmem:[%s6026_s1 + $0xec] sm:$0xf0]  ;;  %v3529_v47 = vld [vmem:[%s6026_s1 + $0x74] sm:$0xf] }
  0xe7   :  { %1954 = vmatpush.bf16.msrb.mxu3 %v3514_v6  ;;  %1897 = vmatmul.bf16.vlgmr.msra.gmra.mxu2 %v4851_v4  ;;  %v5661_v4 = vld [vmem:[%s6026_s1 + $0x37c] sm:$0xf]  ;;  %v2866_v6 = vor.u32 %v5681_v36, %v5686_v40  ;;  %v2048_v10 = vadd.f32 %v2047_v30, %v1664_v52  ;;  %v2055_v42 = vrot.slane %v2054_v18, 2  ;;  %v2607_v52 = vld [vmem:[%s6026_s1 + $0xf0] sm:$0xf0] }
  0xe8   :  { %v3002_v56 = vor.u32 %v5661_v4, %v5666_v16  ;;  %v2305_v25 = vrot.slane %v2304_v41, 2  ;;  %v2743_v36 = vld [vmem:[%s6026_s1 + $0x1f8] sm:$0xf0]  ;;  %v3546_v62 = vld [vmem:[%s6026_s1 + $0xf4] sm:$0xf0] }
  0xe9   :  { %1916 = vmatpush.bf16.msrb.mxu0 %v3374_v17  ;;  %1929 = vmatpush.bf16.msrb.mxu1 %v3378_v38  ;;  %v2734_v17 = vor.u32 %v5728_v59, %v5723_v8  ;;  %v2742_v38 = vor.u32 %v5757_v57, %v5752_v61  ;;  %v1703_v21 = vpop.f32.mrf.mxu3  ;;  %v2056_v28 = vadd.f32 %v2055_v42, %v2054_v18  ;;  %v3530_v13 = vld [vmem:[%s6026_s1 + $0x7c] sm:$0xf]  ;;  %v3772_v12 = vld [vmem:[%s6027_s0] sm:$0xf] }
  0xea   :  { %1942 = vmatpush.bf16.msrb.mxu2 %v3382_v39  ;;  %v2049_v39 = vrot.slane %v2048_v10, 2  ;;  %v1690_v63 = vpop.f32.mrf.mxu2  ;;  %1978 = vst [vmem:[%s6028_s2 + $0x58] sm:$0xff] %v1703_v21  ;;  %v2065_v26 = vrot.slane %v1703_v21, 4  ;;  %v2234_v27 = vmul.f32 %v1703_v21, %v1703_v21  ;;  %v2306_v32 = vadd.f32 %v2305_v25, %v2304_v41 }
  0xeb   :  { %1955 = vmatpush.bf16.msrb.mxu3 %v3386_v43  ;;  %v2310_v43 = vadd.f32 %v2309_v19, %v2232_v5  ;;  %1977 = vst [vmem:[%s6028_s2 + $0x50] sm:$0xff] %v1690_v63  ;;  %v2059_v7 = vrot.slane %v1690_v63, 4  ;;  %v2233_v20 = vmul.f32 %v1690_v63, %v1690_v63  ;;  %v2057_v4 = vrot.slane %v2056_v28, 1 }
  0xec   :  { %v2050_v22 = vadd.f32 %v2049_v39, %v2048_v10  ;;  %v2066_v55 = vadd.f32 %v2065_v26, %v1703_v21  ;;  %v2606_v39 = vor.u32 %v3545_v44, %v2605_v1  ;;  %v2610_v42 = vor.u32 %v3529_v47, %v2607_v52 }
  0xed   :  { %1917 = vmatpush.bf16.msrb.mxu0 %v3246_v54  ;;  %1930 = vmatpush.bf16.msrb.mxu1 %v3250_v2  ;;  %v2311_v29 = vrot.slane %v2310_v43, 2  ;;  %v2060_v48 = vadd.f32 %v2059_v7, %v1690_v63  ;;  %v2315_v53 = vrot.slane %v2233_v20, 4  ;;  %v1666_v54 = vpop.f32.mrf.mxu0  ;;  %v2321_v2 = vrot.slane %v2234_v27, 4 }
  0xee   :  { %1943 = vmatpush.bf16.msrb.mxu2 %v3254_v3  ;;  %v2051_v11 = vrot.slane %v2050_v22, 1  ;;  %v1679_v3 = vpop.f32.mrf.mxu1 }
  0xef   :  { %1956 = vmatpush.bf16.msrb.mxu3 %v3258_v34  ;;  %v2312_v16 = vadd.f32 %v2311_v29, %v2310_v43  ;;  %v2061_v33 = vrot.slane %v2060_v48, 2  ;;  %v2316_v34 = vadd.f32 %v2315_v53, %v2233_v20  ;;  %v2322_v58 = vadd.f32 %v2321_v2, %v2234_v27 }
  0xf0   :  { %v2052_v40 = vadd.f32 %v2051_v11, %v2050_v22 }
  0xf1   :  { %1918 = vmatpush.bf16.msrb.mxu0 %v3118_v0  ;;  %1931 = vmatpush.bf16.msrb.mxu1 %v3122_v46  ;;  %v2307_v0 = vrot.slane %v2306_v32, 1  ;;  %v2067_v46 = vrot.slane %v2066_v55, 2  ;;  %v2323_v31 = vrot.slane %v2322_v58, 2  ;;  %v1705_v10 = vpop.f32.mrf.mxu3 }
  0xf2   :  { %1944 = vmatpush.bf16.msrb.mxu2 %v3126_v45  ;;  %v2058_v45 = vadd.f32 %v2057_v4, %v2056_v28  ;;  %2199 = vst [vmem:[%s6029_s3 + $0x40] sm:$0xff] %v2052_v40  ;;  %v1692_v15 = vpop.f32.mrf.mxu2 }
  0xf3   :  { %1957 = vmatpush.bf16.msrb.mxu3 %v3130_v49  ;;  %v2313_v49 = vrot.slane %v2312_v16, 1  ;;  %v2068_v30 = vadd.f32 %v2067_v46, %v2066_v55  ;;  %v2324_v19 = vadd.f32 %v2323_v31, %v2322_v58 }
  0xf4   :  { %2200 = vst [vmem:[%s6029_s3 + $0x48] sm:$0xff] %v2058_v45 }
  0xf5   :  { %1919 = vmatpush.bf16.msrb.mxu0 %v2990_v50  ;;  %1932 = vmatpush.bf16.msrb.mxu1 %v2994_v51  ;;  %v2062_v50 = vadd.f32 %v2061_v33, %v2060_v48  ;;  %v2317_v51 = vrot.slane %v2316_v34, 2  ;;  %v2314_v5 = vadd.f32 %v2313_v49, %v2312_v16  ;;  %v2069_v18 = vrot.slane %v2068_v30, 1 }
  0xf6   :  { %1945 = vmatpush.bf16.msrb.mxu2 %v2998_v23  ;;  %v2308_v23 = vadd.f32 %v2307_v0, %v2306_v32  ;;  %v2325_v8 = vrot.slane %v2324_v19, 1 }
  0xf7   :  { %1958 = vmatpush.bf16.msrb.mxu3 %v3002_v56  ;;  %v2746_v56 = vor.u32 %v3562_v35, %v2743_v36  ;;  %2456 = vst [vmem:[%s6030_s4 + $0x48] sm:$0xff] %v2314_v5  ;;  %v2070_v7 = vadd.f32 %v2069_v18, %v2068_v30 }
  0xf8   :  { %2455 = vst [vmem:[%s6030_s4 + $0x40] sm:$0xff] %v2308_v23  ;;  %v2326_v24 = vadd.f32 %v2325_v8, %v2324_v19 }
  0xf9   :  { %1920 = vmatpush.bf16.msrb.mxu0 %v2862_v60  ;;  %1933 = vmatpush.bf16.msrb.mxu1 %v2866_v6  ;;  %v2613_v60 = vld [vmem:[%s6026_s1 + $0x78] sm:$0xf]  ;;  %v2063_v6 = vrot.slane %v2062_v50, 1  ;;  %2202 = vst [vmem:[%s6029_s3 + $0x58] sm:$0xff] %v2070_v7 }
  0xfa   :  { %1946 = vmatpush.bf16.msrb.mxu2 %v2870_v9  ;;  %v2318_v9 = vadd.f32 %v2317_v51, %v2316_v34  ;;  %v2614_v43 = vor.u32 %v3546_v62, %v2613_v60  ;;  %2458 = vst [vmem:[%s6030_s4 + $0x58] sm:$0xff] %v2326_v24 }
  0xfb   :  { %1959 = vmatpush.bf16.msrb.mxu3 %v2874_v14  ;;  %v2615_v14 = vld [vmem:[%s6026_s1 + $0xf8] sm:$0xf0]  ;;  %v2064_v41 = vadd.f32 %v2063_v6, %v2062_v50 }
  0xfc   :  { %v2319_v63 = vrot.slane %v2318_v9, 1  ;;  %v2618_v59 = vor.u32 %v3530_v13, %v2615_v14 }
  0xfd   :  { %1921 = vmatpush.bf16.msrb.mxu0 %v2734_v17  ;;  %1934 = vmatpush.bf16.msrb.mxu1 %v2738_v37  ;;  %2201 = vst [vmem:[%s6029_s3 + $0x50] sm:$0xff] %v2064_v41 }
  0xfe   :  { %1947 = vmatpush.bf16.msrb.mxu2 %v2742_v38  ;;  %v2320_v17 = vadd.f32 %v2319_v63, %v2318_v9 }
  0xff   :  { %1960 = vmatpush.bf16.msrb.mxu3 %v2746_v56 }
 0x100   :  { %2457 = vst [vmem:[%s6030_s4 + $0x50] sm:$0xff] %v2320_v17 }
 0x101   :  { %1922 = vmatpush.bf16.msrb.mxu0 %v2606_v39  ;;  %1935 = vmatpush.bf16.msrb.mxu1 %v2610_v42  ;;  %v1716_v61 = vpop.f32.mrf.mxu0  ;;  %v1729_v38 = vpop.f32.mrf.mxu1 }
 0x102   :  { %1948 = vmatpush.bf16.msrb.mxu2 %v2614_v43  ;;  %1979 = vst [vmem:[%s6028_s2 + $0x60] sm:$0xff] %v1716_v61  ;;  %v2071_v57 = vrot.slane %v1716_v61, 4  ;;  %v2235_v37 = vmul.f32 %v1716_v61, %v1716_v61  ;;  %v2077_v20 = vrot.slane %v1729_v38, 4  ;;  %v2236_v21 = vmul.f32 %v1729_v38, %v1729_v38 }
 0x103   :  { %1961 = vmatpush.bf16.msrb.mxu3 %v2618_v59  ;;  %1980 = vst [vmem:[%s6028_s2 + $0x68] sm:$0xff] %v1729_v38 }
 0x104   :  { %1923 = vmatmul.bf16.vlgmr.msrb.gmra.mxu0 %v3772_v12  ;;  %1936 = vmatmul.bf16.vlgmr.msrb.gmra.mxu1 %v3772_v12  ;;  %v2072_v22 = vadd.f32 %v2071_v57, %v1716_v61  ;;  %v2327_v25 = vrot.slane %v2235_v37, 4  ;;  %v2078_v26 = vadd.f32 %v2077_v20, %v1729_v38  ;;  %v2333_v27 = vrot.slane %v2236_v21, 4 }
 0x105   :  { %1949 = vmatmul.bf16.vlgmr.msrb.gmra.mxu2 %v3772_v12 }
 0x106   :  { %1962 = vmatmul.bf16.vlgmr.msrb.gmra.mxu3 %v3772_v12  ;;  %v2073_v28 = vrot.slane %v2072_v22, 2  ;;  %v2328_v29 = vadd.f32 %v2327_v25, %v2235_v37  ;;  %v2079_v53 = vrot.slane %v2078_v26, 2  ;;  %v2334_v54 = vadd.f32 %v2333_v27, %v2236_v21 }
 0x108   :  { %v2074_v2 = vadd.f32 %v2073_v28, %v2072_v22  ;;  %v2329_v3 = vrot.slane %v2328_v29, 2  ;;  %v2080_v33 = vadd.f32 %v2079_v53, %v2078_v26  ;;  %v2335_v34 = vrot.slane %v2334_v54, 2 }
 0x109   :  { %v1755_v55 = vpop.f32.mrf.mxu3  ;;  %v1718_v40 = vpop.f32.mrf.mxu0 }
 0x10a   :  { %v1742_v48 = vpop.f32.mrf.mxu2  ;;  %1982 = vst [vmem:[%s6028_s2 + $0x78] sm:$0xff] %v1755_v55  ;;  %v2089_v4 = vrot.slane %v1755_v55, 4  ;;  %v2238_v16 = vmul.f32 %v1755_v55, %v1755_v55  ;;  %v2075_v0 = vrot.slane %v2074_v2, 1  ;;  %v2330_v46 = vadd.f32 %v2329_v3, %v2328_v29  ;;  %v1731_v44 = vpop.f32.mrf.mxu1 }
 0x10b   :  { %1981 = vst [vmem:[%s6028_s2 + $0x70] sm:$0xff] %v1742_v48  ;;  %v2083_v11 = vrot.slane %v1742_v48, 4  ;;  %v2237_v32 = vmul.f32 %v1742_v48, %v1742_v48  ;;  %v2081_v45 = vrot.slane %v2080_v33, 1  ;;  %v2336_v49 = vadd.f32 %v2335_v34, %v2334_v54 }
 0x10c   :  { %v2090_v58 = vadd.f32 %v2089_v4, %v1755_v55  ;;  %v2345_v1 = vrot.slane %v2238_v16, 4  ;;  %v2076_v47 = vadd.f32 %v2075_v0, %v2074_v2  ;;  %v2331_v52 = vrot.slane %v2330_v46, 1 }
 0x10d   :  { %v2084_v35 = vadd.f32 %v2083_v11, %v1742_v48  ;;  %v2339_v36 = vrot.slane %v2237_v32, 4  ;;  %v2082_v31 = vadd.f32 %v2081_v45, %v2080_v33  ;;  %v2337_v15 = vrot.slane %v2336_v49, 1 }
 0x10e   :  { %v2091_v23 = vrot.slane %v2090_v58, 2  ;;  %v2346_v30 = vadd.f32 %v2345_v1, %v2238_v16  ;;  %2203 = vst [vmem:[%s6029_s3 + $0x60] sm:$0xff] %v2076_v47  ;;  %v2332_v62 = vadd.f32 %v2331_v52, %v2330_v46 }
 0x10f   :  { %v2085_v50 = vrot.slane %v2084_v35, 2  ;;  %v2340_v51 = vadd.f32 %v2339_v36, %v2237_v32  ;;  %2204 = vst [vmem:[%s6029_s3 + $0x68] sm:$0xff] %v2082_v31  ;;  %v2338_v10 = vadd.f32 %v2337_v15, %v2336_v49 }
 0x110   :  { %v2092_v5 = vadd.f32 %v2091_v23, %v2090_v58  ;;  %v2347_v6 = vrot.slane %v2346_v30, 2  ;;  %2459 = vst [vmem:[%s6030_s4 + $0x60] sm:$0xff] %v2332_v62 }
 0x111   :  { %v2086_v56 = vadd.f32 %v2085_v50, %v2084_v35  ;;  %v2341_v60 = vrot.slane %v2340_v51, 2  ;;  %v1757_v18 = vpop.f32.mrf.mxu3  ;;  %2460 = vst [vmem:[%s6030_s4 + $0x68] sm:$0xff] %v2338_v10 }
 0x112   :  { %v1744_v9 = vpop.f32.mrf.mxu2  ;;  %v2093_v19 = vrot.slane %v2092_v5, 1  ;;  %v2348_v39 = vadd.f32 %v2347_v6, %v2346_v30 }
 0x113   :  { %v2087_v13 = vrot.slane %v2086_v56, 1  ;;  %v2342_v14 = vadd.f32 %v2341_v60, %v2340_v51 }
 0x114   :  { %v2094_v42 = vadd.f32 %v2093_v19, %v2092_v5  ;;  %v2349_v43 = vrot.slane %v2348_v39, 1 }
 0x115   :  { %v2088_v41 = vadd.f32 %v2087_v13, %v2086_v56  ;;  %v2343_v63 = vrot.slane %v2342_v14, 1 }
 0x116   :  { %2206 = vst [vmem:[%s6029_s3 + $0x78] sm:$0xff] %v2094_v42  ;;  %v2350_v8 = vadd.f32 %v2349_v43, %v2348_v39 }
 0x117   :  { %2205 = vst [vmem:[%s6029_s3 + $0x70] sm:$0xff] %v2088_v41  ;;  %v2344_v7 = vadd.f32 %v2343_v63, %v2342_v14 }
 0x118   :  { %2462 = vst [vmem:[%s6030_s4 + $0x78] sm:$0xff] %v2350_v8 }
 0x119   :  { %2461 = vst [vmem:[%s6030_s4 + $0x70] sm:$0xff] %v2344_v7 }
 0x121   :  { %v1768_v59 = vpop.f32.mrf.mxu0  ;;  %v1781_v12 = vpop.f32.mrf.mxu1 }
 0x122   :  { %1983 = vst [vmem:[%s6028_s2 + $0x80] sm:$0xff] %v1768_v59  ;;  %v2095_v17 = vrot.slane %v1768_v59, 4  ;;  %v2239_v24 = vmul.f32 %v1768_v59, %v1768_v59  ;;  %v2101_v61 = vrot.slane %v1781_v12, 4  ;;  %v2240_v57 = vmul.f32 %v1781_v12, %v1781_v12 }
 0x123   :  { %1984 = vst [vmem:[%s6028_s2 + $0x88] sm:$0xff] %v1781_v12 }
 0x124   :  { %v2096_v37 = vadd.f32 %v2095_v17, %v1768_v59  ;;  %v2351_v38 = vrot.slane %v2239_v24, 4  ;;  %v2102_v20 = vadd.f32 %v2101_v61, %v1781_v12  ;;  %v2357_v21 = vrot.slane %v2240_v57, 4 }
 0x126   :  { %v2097_v22 = vrot.slane %v2096_v37, 2  ;;  %v2352_v25 = vadd.f32 %v2351_v38, %v2239_v24  ;;  %v2103_v27 = vrot.slane %v2102_v20, 2  ;;  %v2358_v28 = vadd.f32 %v2357_v21, %v2240_v57 }
 0x128   :  { %v2098_v54 = vadd.f32 %v2097_v22, %v2096_v37  ;;  %v2353_v11 = vrot.slane %v2352_v25, 2  ;;  %v2104_v2 = vadd.f32 %v2103_v27, %v2102_v20  ;;  %v2359_v3 = vrot.slane %v2358_v28, 2 }
 0x129   :  { %v1807_v53 = vpop.f32.mrf.mxu3  ;;  %v1770_v33 = vpop.f32.mrf.mxu0 }
 0x12a   :  { %v1794_v26 = vpop.f32.mrf.mxu2  ;;  %1986 = vst [vmem:[%s6028_s2 + $0x98] sm:$0xff] %v1807_v53  ;;  %v2113_v32 = vrot.slane %v1807_v53, 4  ;;  %v2242_v55 = vmul.f32 %v1807_v53, %v1807_v53  ;;  %v2099_v34 = vrot.slane %v2098_v54, 1  ;;  %v2354_v35 = vadd.f32 %v2353_v11, %v2352_v25  ;;  %v1783_v0 = vpop.f32.mrf.mxu1 }
 0x12b   :  { %1985 = vst [vmem:[%s6028_s2 + $0x90] sm:$0xff] %v1794_v26  ;;  %v2107_v29 = vrot.slane %v1794_v26, 4  ;;  %v2241_v48 = vmul.f32 %v1794_v26, %v1794_v26  ;;  %v2105_v46 = vrot.slane %v2104_v2, 1  ;;  %v2360_v58 = vadd.f32 %v2359_v3, %v2358_v28 }
 0x12c   :  { %v2114_v36 = vadd.f32 %v2113_v32, %v1807_v53  ;;  %v2369_v40 = vrot.slane %v2242_v55, 4  ;;  %v2100_v45 = vadd.f32 %v2099_v34, %v2098_v54  ;;  %v2355_v49 = vrot.slane %v2354_v35, 1 }
 0x12d   :  { %v2108_v4 = vadd.f32 %v2107_v29, %v1794_v26  ;;  %v2363_v16 = vrot.slane %v2241_v48, 4  ;;  %v2106_v47 = vadd.f32 %v2105_v46, %v2104_v2  ;;  %v2361_v52 = vrot.slane %v2360_v58, 1 }
 0x12e   :  { %v2115_v50 = vrot.slane %v2114_v36, 2  ;;  %v2370_v51 = vadd.f32 %v2369_v40, %v2242_v55  ;;  %2207 = vst [vmem:[%s6029_s3 + $0x80] sm:$0xff] %v2100_v45  ;;  %v2356_v31 = vadd.f32 %v2355_v49, %v2354_v35 }
 0x12f   :  { %v2109_v1 = vrot.slane %v2108_v4, 2  ;;  %v2364_v44 = vadd.f32 %v2363_v16, %v2241_v48  ;;  %2208 = vst [vmem:[%s6029_s3 + $0x88] sm:$0xff] %v2106_v47  ;;  %v2362_v62 = vadd.f32 %v2361_v52, %v2360_v58 }
 0x130   :  { %v2116_v15 = vadd.f32 %v2115_v50, %v2114_v36  ;;  %v2371_v56 = vrot.slane %v2370_v51, 2  ;;  %2463 = vst [vmem:[%s6030_s4 + $0x80] sm:$0xff] %v2356_v31 }
 0x131   :  { %v2110_v23 = vadd.f32 %v2109_v1, %v2108_v4  ;;  %v2365_v30 = vrot.slane %v2364_v44, 2  ;;  %v1809_v9 = vpop.f32.mrf.mxu3  ;;  %2464 = vst [vmem:[%s6030_s4 + $0x88] sm:$0xff] %v2362_v62 }
 0x132   :  { %v1796_v60 = vpop.f32.mrf.mxu2  ;;  %v2117_v10 = vrot.slane %v2116_v15, 1  ;;  %v2372_v13 = vadd.f32 %v2371_v56, %v2370_v51 }
 0x133   :  { %v2111_v5 = vrot.slane %v2110_v23, 1  ;;  %v2366_v6 = vadd.f32 %v2365_v30, %v2364_v44 }
 0x134   :  { %v2118_v19 = vadd.f32 %v2117_v10, %v2116_v15  ;;  %v2373_v39 = vrot.slane %v2372_v13, 1 }
 0x135   :  { %v2112_v14 = vadd.f32 %v2111_v5, %v2110_v23  ;;  %v2367_v18 = vrot.slane %v2366_v6, 1 }
 0x136   :  { %2210 = vst [vmem:[%s6029_s3 + $0x98] sm:$0xff] %v2118_v19  ;;  %v2374_v63 = vadd.f32 %v2373_v39, %v2372_v13 }
 0x137   :  { %2209 = vst [vmem:[%s6029_s3 + $0x90] sm:$0xff] %v2112_v14  ;;  %v2368_v41 = vadd.f32 %v2367_v18, %v2366_v6 }
 0x138   :  { %2466 = vst [vmem:[%s6030_s4 + $0x98] sm:$0xff] %v2374_v63 }
 0x139   :  { %2465 = vst [vmem:[%s6030_s4 + $0x90] sm:$0xff] %v2368_v41 }
 0x141   :  { %v1820_v42 = vpop.f32.mrf.mxu0  ;;  %v1833_v8 = vpop.f32.mrf.mxu1 }
 0x142   :  { %1987 = vst [vmem:[%s6028_s2 + $0xa0] sm:$0xff] %v1820_v42  ;;  %v2119_v43 = vrot.slane %v1820_v42, 4  ;;  %v2243_v7 = vmul.f32 %v1820_v42, %v1820_v42  ;;  %v2125_v59 = vrot.slane %v1833_v8, 4  ;;  %v2244_v17 = vmul.f32 %v1833_v8, %v1833_v8 }
 0x143   :  { %1988 = vst [vmem:[%s6028_s2 + $0xa8] sm:$0xff] %v1833_v8 }
 0x144   :  { %v2120_v24 = vadd.f32 %v2119_v43, %v1820_v42  ;;  %v2375_v12 = vrot.slane %v2243_v7, 4  ;;  %v2126_v61 = vadd.f32 %v2125_v59, %v1833_v8  ;;  %v2381_v57 = vrot.slane %v2244_v17, 4 }
 0x146   :  { %v2121_v37 = vrot.slane %v2120_v24, 2  ;;  %v2376_v38 = vadd.f32 %v2375_v12, %v2243_v7  ;;  %v2127_v21 = vrot.slane %v2126_v61, 2  ;;  %v2382_v22 = vadd.f32 %v2381_v57, %v2244_v17 }
 0x148   :  { %v2122_v28 = vadd.f32 %v2121_v37, %v2120_v24  ;;  %v2377_v29 = vrot.slane %v2376_v38, 2  ;;  %v2128_v54 = vadd.f32 %v2127_v21, %v2126_v61  ;;  %v2383_v11 = vrot.slane %v2382_v22, 2 }
 0x149   :  { %v1859_v27 = vpop.f32.mrf.mxu3  ;;  %v1822_v2 = vpop.f32.mrf.mxu0 }
 0x14a   :  { %v1846_v20 = vpop.f32.mrf.mxu2  ;;  %1990 = vst [vmem:[%s6028_s2 + $0xb8] sm:$0xff] %v1859_v27  ;;  %v2137_v48 = vrot.slane %v1859_v27, 4  ;;  %v2246_v53 = vmul.f32 %v1859_v27, %v1859_v27  ;;  %v2123_v3 = vrot.slane %v2122_v28, 1  ;;  %v2378_v4 = vadd.f32 %v2377_v29, %v2376_v38  ;;  %v1835_v34 = vpop.f32.mrf.mxu1 }
 0x14b   :  { %1989 = vst [vmem:[%s6028_s2 + $0xb0] sm:$0xff] %v1846_v20  ;;  %v2131_v25 = vrot.slane %v1846_v20, 4  ;;  %v2245_v26 = vmul.f32 %v1846_v20, %v1846_v20  ;;  %v2129_v35 = vrot.slane %v2128_v54, 1  ;;  %v2384_v36 = vadd.f32 %v2383_v11, %v2382_v22 }
 0x14c   :  { %v2138_v16 = vadd.f32 %v2137_v48, %v1859_v27  ;;  %v2393_v33 = vrot.slane %v2246_v53, 4  ;;  %v2124_v46 = vadd.f32 %v2123_v3, %v2122_v28  ;;  %v2379_v58 = vrot.slane %v2378_v4, 1 }
 0x14d   :  { %v2132_v32 = vadd.f32 %v2131_v25, %v1846_v20  ;;  %v2387_v55 = vrot.slane %v2245_v26, 4  ;;  %v2130_v45 = vadd.f32 %v2129_v35, %v2128_v54  ;;  %v2385_v49 = vrot.slane %v2384_v36, 1 }
 0x14e   :  { %v2139_v1 = vrot.slane %v2138_v16, 2  ;;  %v2394_v44 = vadd.f32 %v2393_v33, %v2246_v53  ;;  %2211 = vst [vmem:[%s6029_s3 + $0xa0] sm:$0xff] %v2124_v46  ;;  %v2380_v47 = vadd.f32 %v2379_v58, %v2378_v4 }
 0x14f   :  { %v2133_v40 = vrot.slane %v2132_v32, 2  ;;  %v2388_v0 = vadd.f32 %v2387_v55, %v2245_v26  ;;  %2212 = vst [vmem:[%s6029_s3 + $0xa8] sm:$0xff] %v2130_v45  ;;  %v2386_v31 = vadd.f32 %v2385_v49, %v2384_v36 }
 0x150   :  { %v2140_v52 = vadd.f32 %v2139_v1, %v2138_v16  ;;  %v2395_v23 = vrot.slane %v2394_v44, 2  ;;  %2467 = vst [vmem:[%s6030_s4 + $0xa0] sm:$0xff] %v2380_v47 }
 0x151   :  { %v2134_v50 = vadd.f32 %v2133_v40, %v2132_v32  ;;  %v2389_v51 = vrot.slane %v2388_v0, 2  ;;  %v1861_v60 = vpop.f32.mrf.mxu3  ;;  %2468 = vst [vmem:[%s6030_s4 + $0xa8] sm:$0xff] %v2386_v31 }
 0x152   :  { %v1848_v30 = vpop.f32.mrf.mxu2  ;;  %v2141_v62 = vrot.slane %v2140_v52, 1  ;;  %v2396_v5 = vadd.f32 %v2395_v23, %v2394_v44 }
 0x153   :  { %v2135_v15 = vrot.slane %v2134_v50, 1  ;;  %v2390_v56 = vadd.f32 %v2389_v51, %v2388_v0 }
 0x154   :  { %v2142_v10 = vadd.f32 %v2141_v62, %v2140_v52  ;;  %v2397_v13 = vrot.slane %v2396_v5, 1 }
 0x155   :  { %v2136_v6 = vadd.f32 %v2135_v15, %v2134_v50  ;;  %v2391_v9 = vrot.slane %v2390_v56, 1 }
 0x156   :  { %2214 = vst [vmem:[%s6029_s3 + $0xb8] sm:$0xff] %v2142_v10  ;;  %v2398_v18 = vadd.f32 %v2397_v13, %v2396_v5 }
 0x157   :  { %2213 = vst [vmem:[%s6029_s3 + $0xb0] sm:$0xff] %v2136_v6  ;;  %v2392_v14 = vadd.f32 %v2391_v9, %v2390_v56 }
 0x158   :  { %2470 = vst [vmem:[%s6030_s4 + $0xb8] sm:$0xff] %v2398_v18 }
 0x159   :  { %2469 = vst [vmem:[%s6030_s4 + $0xb0] sm:$0xff] %v2392_v14 }
 0x161   :  { %v1872_v19 = vpop.f32.mrf.mxu0  ;;  %v1885_v63 = vpop.f32.mrf.mxu1 }
 0x162   :  { %1991 = vst [vmem:[%s6028_s2 + $0xc0] sm:$0xff] %v1872_v19  ;;  %v2143_v39 = vrot.slane %v1872_v19, 4  ;;  %v2247_v41 = vmul.f32 %v1872_v19, %v1872_v19  ;;  %v2149_v42 = vrot.slane %v1885_v63, 4  ;;  %v2248_v43 = vmul.f32 %v1885_v63, %v1885_v63 }
 0x163   :  { %1992 = vst [vmem:[%s6028_s2 + $0xc8] sm:$0xff] %v1885_v63 }
 0x164   :  { %v2144_v7 = vadd.f32 %v2143_v39, %v1872_v19  ;;  %v2399_v8 = vrot.slane %v2247_v41, 4  ;;  %v2150_v59 = vadd.f32 %v2149_v42, %v1885_v63  ;;  %v2405_v17 = vrot.slane %v2248_v43, 4 }
 0x166   :  { %v2145_v24 = vrot.slane %v2144_v7, 2  ;;  %v2400_v12 = vadd.f32 %v2399_v8, %v2247_v41  ;;  %v2151_v57 = vrot.slane %v2150_v59, 2  ;;  %v2406_v37 = vadd.f32 %v2405_v17, %v2248_v43 }
 0x168   :  { %v2146_v22 = vadd.f32 %v2145_v24, %v2144_v7  ;;  %v2401_v25 = vrot.slane %v2400_v12, 2  ;;  %v2152_v28 = vadd.f32 %v2151_v57, %v2150_v59  ;;  %v2407_v29 = vrot.slane %v2406_v37, 2 }
 0x169   :  { %v1911_v21 = vpop.f32.mrf.mxu3  ;;  %v1874_v54 = vpop.f32.mrf.mxu0 }
 0x16a   :  { %v1898_v61 = vpop.f32.mrf.mxu2  ;;  %1994 = vst [vmem:[%s6028_s2 + $0xd8] sm:$0xff] %v1911_v21  ;;  %v2161_v26 = vrot.slane %v1911_v21, 4  ;;  %v2250_v27 = vmul.f32 %v1911_v21, %v1911_v21  ;;  %v2147_v11 = vrot.slane %v2146_v22, 1  ;;  %v2402_v32 = vadd.f32 %v2401_v25, %v2400_v12  ;;  %v1887_v3 = vpop.f32.mrf.mxu1 }
 0x16b   :  { %1993 = vst [vmem:[%s6028_s2 + $0xd0] sm:$0xff] %v1898_v61  ;;  %v2155_v38 = vrot.slane %v1898_v61, 4  ;;  %v2249_v20 = vmul.f32 %v1898_v61, %v1898_v61  ;;  %v2153_v4 = vrot.slane %v2152_v28, 1  ;;  %v2408_v16 = vadd.f32 %v2407_v29, %v2406_v37 }
 0x16c   :  { %v2162_v55 = vadd.f32 %v2161_v26, %v1911_v21  ;;  %v2417_v2 = vrot.slane %v2250_v27, 4  ;;  %v2148_v35 = vadd.f32 %v2147_v11, %v2146_v22  ;;  %v2403_v36 = vrot.slane %v2402_v32, 1 }
 0x16d   :  { %v2156_v48 = vadd.f32 %v2155_v38, %v1898_v61  ;;  %v2411_v53 = vrot.slane %v2249_v20, 4  ;;  %v2154_v46 = vadd.f32 %v2153_v4, %v2152_v28  ;;  %v2409_v58 = vrot.slane %v2408_v16, 1 }
 0x16e   :  { %v2163_v40 = vrot.slane %v2162_v55, 2  ;;  %v2418_v0 = vadd.f32 %v2417_v2, %v2250_v27  ;;  %2215 = vst [vmem:[%s6029_s3 + $0xc0] sm:$0xff] %v2148_v35  ;;  %v2404_v45 = vadd.f32 %v2403_v36, %v2402_v32 }
 0x16f   :  { %v2157_v33 = vrot.slane %v2156_v48, 2  ;;  %v2412_v34 = vadd.f32 %v2411_v53, %v2249_v20  ;;  %2216 = vst [vmem:[%s6029_s3 + $0xc8] sm:$0xff] %v2154_v46  ;;  %v2410_v47 = vadd.f32 %v2409_v58, %v2408_v16 }
 0x170   :  { %v2164_v49 = vadd.f32 %v2163_v40, %v2162_v55  ;;  %v2419_v50 = vrot.slane %v2418_v0, 2  ;;  %2471 = vst [vmem:[%s6030_s4 + $0xc0] sm:$0xff] %v2404_v45 }
 0x171   :  { %v2158_v1 = vadd.f32 %v2157_v33, %v2156_v48  ;;  %v2413_v44 = vrot.slane %v2412_v34, 2  ;;  %v1913_v30 = vpop.f32.mrf.mxu3  ;;  %2472 = vst [vmem:[%s6030_s4 + $0xc8] sm:$0xff] %v2410_v47 }
 0x172   :  { %v1900_v51 = vpop.f32.mrf.mxu2  ;;  %v2165_v31 = vrot.slane %v2164_v49, 1  ;;  %v2420_v15 = vadd.f32 %v2419_v50, %v2418_v0 }
 0x173   :  { %v2159_v52 = vrot.slane %v2158_v1, 1  ;;  %v2414_v23 = vadd.f32 %v2413_v44, %v2412_v34 }
 0x174   :  { %v2166_v62 = vadd.f32 %v2165_v31, %v2164_v49  ;;  %v2421_v5 = vrot.slane %v2420_v15, 1 }
 0x175   :  { %v2160_v56 = vadd.f32 %v2159_v52, %v2158_v1  ;;  %v2415_v60 = vrot.slane %v2414_v23, 1 }
 0x176   :  { %2218 = vst [vmem:[%s6029_s3 + $0xd8] sm:$0xff] %v2166_v62  ;;  %v2422_v9 = vadd.f32 %v2421_v5, %v2420_v15 }
 0x177   :  { %2217 = vst [vmem:[%s6029_s3 + $0xd0] sm:$0xff] %v2160_v56  ;;  %v2416_v6 = vadd.f32 %v2415_v60, %v2414_v23 }
 0x178   :  { %2474 = vst [vmem:[%s6030_s4 + $0xd8] sm:$0xff] %v2422_v9 }
 0x179   :  { %2473 = vst [vmem:[%s6030_s4 + $0xd0] sm:$0xff] %v2416_v6 }
 0x181   :  { %v1924_v10 = vpop.f32.mrf.mxu0  ;;  %v1937_v18 = vpop.f32.mrf.mxu1 }
 0x182   :  { %1995 = vst [vmem:[%s6028_s2 + $0xe0] sm:$0xff] %v1924_v10  ;;  %v2167_v13 = vrot.slane %v1924_v10, 4  ;;  %v2251_v14 = vmul.f32 %v1924_v10, %v1924_v10  ;;  %v2173_v19 = vrot.slane %v1937_v18, 4  ;;  %v2252_v39 = vmul.f32 %v1937_v18, %v1937_v18 }
 0x183   :  { %1996 = vst [vmem:[%s6028_s2 + $0xe8] sm:$0xff] %v1937_v18 }
 0x184   :  { %v2168_v41 = vadd.f32 %v2167_v13, %v1924_v10  ;;  %v2423_v63 = vrot.slane %v2251_v14, 4  ;;  %v2174_v42 = vadd.f32 %v2173_v19, %v1937_v18  ;;  %v2429_v43 = vrot.slane %v2252_v39, 4 }
 0x186   :  { %v2169_v7 = vrot.slane %v2168_v41, 2  ;;  %v2424_v8 = vadd.f32 %v2423_v63, %v2251_v14  ;;  %v2175_v59 = vrot.slane %v2174_v42, 2  ;;  %v2430_v17 = vadd.f32 %v2429_v43, %v2252_v39 }
 0x188   :  { %v2170_v24 = vadd.f32 %v2169_v7, %v2168_v41  ;;  %v2425_v12 = vrot.slane %v2424_v8, 2  ;;  %v1950_v61 = vpop.f32.mrf.mxu2  ;;  %v2176_v57 = vadd.f32 %v2175_v59, %v2174_v42  ;;  %v2431_v37 = vrot.slane %v2430_v17, 2 }
 0x189   :  { %1997 = vst [vmem:[%s6028_s2 + $0xf0] sm:$0xff] %v1950_v61  ;;  %v2179_v38 = vrot.slane %v1950_v61, 4  ;;  %v2253_v20 = vmul.f32 %v1950_v61, %v1950_v61  ;;  %v1963_v21 = vpop.f32.mrf.mxu3  ;;  %v1926_v22 = vpop.f32.mrf.mxu0 }
 0x18a   :  { %v2171_v25 = vrot.slane %v2170_v24, 1  ;;  %v2426_v26 = vadd.f32 %v2425_v12, %v2424_v8  ;;  %1998 = vst [vmem:[%s6028_s2 + $0xf8] sm:$0xff] %v1963_v21  ;;  %v2185_v27 = vrot.slane %v1963_v21, 4  ;;  %v2254_v28 = vmul.f32 %v1963_v21, %v1963_v21  ;;  %v1939_v29 = vpop.f32.mrf.mxu1 }
 0x18b   :  { %v2177_v48 = vrot.slane %v2176_v57, 1  ;;  %v2432_v53 = vadd.f32 %v2431_v37, %v2430_v17  ;;  %v2180_v54 = vadd.f32 %v2179_v38, %v1950_v61  ;;  %v2435_v11 = vrot.slane %v2253_v20, 4 }
 0x18c   :  { %v2172_v32 = vadd.f32 %v2171_v25, %v2170_v24  ;;  %v2427_v55 = vrot.slane %v2426_v26, 1  ;;  %v2186_v2 = vadd.f32 %v2185_v27, %v1963_v21  ;;  %v2441_v3 = vrot.slane %v2254_v28, 4 }
 0x18d   :  { %v2178_v4 = vadd.f32 %v2177_v48, %v2176_v57  ;;  %v2433_v16 = vrot.slane %v2432_v53, 1  ;;  %v2181_v33 = vrot.slane %v2180_v54, 2  ;;  %v2436_v34 = vadd.f32 %v2435_v11, %v2253_v20 }
 0x18e   :  { %2219 = vst [vmem:[%s6029_s3 + $0xe0] sm:$0xff] %v2172_v32  ;;  %v2428_v35 = vadd.f32 %v2427_v55, %v2426_v26  ;;  %v2187_v36 = vrot.slane %v2186_v2, 2  ;;  %v2442_v40 = vadd.f32 %v2441_v3, %v2254_v28 }
 0x18f   :  { %2220 = vst [vmem:[%s6029_s3 + $0xe8] sm:$0xff] %v2178_v4  ;;  %v2434_v0 = vadd.f32 %v2433_v16, %v2432_v53  ;;  %v2182_v46 = vadd.f32 %v2181_v33, %v2180_v54  ;;  %v2437_v58 = vrot.slane %v2436_v34, 2 }
 0x190   :  { %2475 = vst [vmem:[%s6030_s4 + $0xe0] sm:$0xff] %v2428_v35  ;;  %v2188_v1 = vadd.f32 %v2187_v36, %v2186_v2  ;;  %v2443_v44 = vrot.slane %v2442_v40, 2  ;;  %v1952_v45 = vpop.f32.mrf.mxu2 }
 0x191   :  { %2476 = vst [vmem:[%s6030_s4 + $0xe8] sm:$0xff] %v2434_v0  ;;  %v2183_v49 = vrot.slane %v2182_v46, 1  ;;  %v2438_v50 = vadd.f32 %v2437_v58, %v2436_v34  ;;  %v1965_v51 = vpop.f32.mrf.mxu3 }
 0x192   :  { %v2189_v47 = vrot.slane %v2188_v1, 1  ;;  %v2444_v52 = vadd.f32 %v2443_v44, %v2442_v40 }
 0x193   :  { %v2184_v23 = vadd.f32 %v2183_v49, %v2182_v46  ;;  %v2439_v30 = vrot.slane %v2438_v50, 1 }
 0x194   :  { %v2190_v31 = vadd.f32 %v2189_v47, %v2188_v1  ;;  %v2445_v15 = vrot.slane %v2444_v52, 1 }
 0x195   :  { %2221 = vst [vmem:[%s6029_s3 + $0xf0] sm:$0xff] %v2184_v23  ;;  %v2440_v56 = vadd.f32 %v2439_v30, %v2438_v50 }
 0x196   :  { %2222 = vst [vmem:[%s6029_s3 + $0xf8] sm:$0xff] %v2190_v31  ;;  %v2446_v60 = vadd.f32 %v2445_v15, %v2444_v52 }
 0x197   :  { %2477 = vst [vmem:[%s6030_s4 + $0xf0] sm:$0xff] %v2440_v56 }
 0x198   :  { %2478 = vst [vmem:[%s6030_s4 + $0xf8] sm:$0xff] %v2446_v60 }

// kernel: generator_forward.11
= control target key start
LH: loop header
LB: loop body
LE: loop exit
PB: predicated region body
PF: predicated region fallthrough
CT: control target
= control target key end

     0   :  { %s1760_s15 = smov 0   ;;  %s1762_s16 = smov 0   ;;  %s1914_s0 = inlined_call_operand.vmem [shape: bf16[4,32,1024], index: 0, kind: input, shape index: {}]   ;;  %s1915_s1 = inlined_call_operand.vmem [shape: bf16[4,1024,128], index: 1, kind: input, shape index: {}]   ;;  %s1916_s2 = inlined_call_operand.vmem [shape: f32[4,32,128], index: 2, kind: output, shape index: {0}]   ;;  %s1917_s3 = inlined_call_operand.vmem [shape: f32[4,1,8,128], index: 3, kind: output, shape index: {1}]   ;;  %s1918_s4 = inlined_call_operand.vmem [shape: f32[4,1,8,128], index: 4, kind: output, shape index: {2}]  }
   0x1   :  { %s1764_s17 = smov 0  }
   0x2 LB: > { %s27_s18 = sadd.s32 1, %s1729_s16  ;;  %p1273_p0 = scmp.ge.s32.totalorder %s1733_s17, 1  ;;  %s1733_s17 = sphi %s1764_s17, %s15_s17   ;;  %s1729_s16 = sphi %s1762_s16, %s1920_s16   ;;  %s1725_s15 = sphi %s1760_s15, %s1919_s15  }
   0x3   : > { %p29_p1 = scmp.ge.s32.totalorder %s27_s18, 4  ;;  %p203_p2 = scmp.lt.s32.totalorder %s1733_s17, 5 }
   0x5   : > { %s1922_s18 = smov (%p29_p1, %s27_s18), 0  ;;  %p204_p3 = pnand %p1273_p0, %p203_p2 }
   0x6   : > { %p258_p4 = scmp.lt.s32.totalorder (!%p204_p3), %s1725_s15, 3 }
   0x7   : > { %207 = sbr.rel (%p204_p3) target bundleno = 258 (0x102), region = 28 }
   0xc   : > { %s1924_s15 = smov (!%p258_p4, %s1725_s15), 3 }
   0xd   : > { %s1605_s19 = sshll.u32 %s1924_s15, 9  ;;  %s1604_s23 = sshll.u32 %s1924_s15, 7 }
   0xe   : > { %s1784_s22 = scalar_lea.vmem %s1915_s1, %s1605_s19  ;;  %s1816_s26 = scalar_lea.vmem %s1914_s0, %s1604_s23 }
   0xf   : > { %v1630_v0 = vld [vmem:[%s1784_s22 + $0x38] sm:$0xff]  ;;  %v1629_v4 = vld [vmem:[%s1784_s22 + $0x30] sm:$0xff]  ;;  %v1628_v8 = vld [vmem:[%s1784_s22 + $0x28] sm:$0xff]  ;;  %s1606_s27 = sshll.u32 %s1924_s15, 5  ;;  %s1280_s5 = sshll.u32 %s1924_s15, 3 }
  0x10   : > { %v1638_v1 = vld [vmem:[%s1784_s22 + $0x78] sm:$0xff]  ;;  %905 = vmatpush.bf16.msra.mxu0 %v1630_v0  ;;  %v1637_v5 = vld [vmem:[%s1784_s22 + $0x70] sm:$0xff]  ;;  %v1636_v9 = vld [vmem:[%s1784_s22 + $0x68] sm:$0xff]  ;;  %s1892_s30 = scalar_lea.vmem %s1916_s2, %s1606_s27  ;;  %s289_s8 = scalar_lea.vmem %s1917_s3, %s1280_s5 }
  0x11   : > { %v1646_v2 = vld [vmem:[%s1784_s22 + $0xb8] sm:$0xff]  ;;  %924 = vmatpush.bf16.msra.mxu1 %v1638_v1  ;;  %v1645_v6 = vld [vmem:[%s1784_s22 + $0xb0] sm:$0xff]  ;;  %v1644_v10 = vld [vmem:[%s1784_s22 + $0xa8] sm:$0xff]  ;;  %s296_s11 = scalar_lea.vmem %s1918_s4, %s1280_s5 }
  0x12   : > { %v1654_v3 = vld [vmem:[%s1784_s22 + $0xf8] sm:$0xff]  ;;  %943 = vmatpush.bf16.msra.mxu2 %v1646_v2  ;;  %v1653_v7 = vld [vmem:[%s1784_s22 + $0xf0] sm:$0xff]  ;;  %v1652_v11 = vld [vmem:[%s1784_s22 + $0xe8] sm:$0xff] }
  0x13   : > { %962 = vmatpush.bf16.msra.mxu3 %v1654_v3  ;;  %v1627_v12 = vld [vmem:[%s1784_s22 + $0x20] sm:$0xff]  ;;  %v1626_v16 = vld [vmem:[%s1784_s22 + $0x18] sm:$0xff]  ;;  %v1625_v20 = vld [vmem:[%s1784_s22 + $0x10] sm:$0xff] }
  0x14   : > { %906 = vmatpush.bf16.msra.mxu0 %v1629_v4  ;;  %v1635_v13 = vld [vmem:[%s1784_s22 + $0x60] sm:$0xff]  ;;  %v1634_v17 = vld [vmem:[%s1784_s22 + $0x58] sm:$0xff]  ;;  %v1633_v21 = vld [vmem:[%s1784_s22 + $0x50] sm:$0xff] }
  0x15   : > { %925 = vmatpush.bf16.msra.mxu1 %v1637_v5  ;;  %v1643_v14 = vld [vmem:[%s1784_s22 + $0xa0] sm:$0xff]  ;;  %v1642_v18 = vld [vmem:[%s1784_s22 + $0x98] sm:$0xff]  ;;  %v1641_v22 = vld [vmem:[%s1784_s22 + $0x90] sm:$0xff] }
  0x16   : > { %944 = vmatpush.bf16.msra.mxu2 %v1645_v6  ;;  %v1651_v15 = vld [vmem:[%s1784_s22 + $0xe0] sm:$0xff]  ;;  %v1650_v19 = vld [vmem:[%s1784_s22 + $0xd8] sm:$0xff]  ;;  %v1649_v23 = vld [vmem:[%s1784_s22 + $0xd0] sm:$0xff] }
  0x17   : > { %963 = vmatpush.bf16.msra.mxu3 %v1653_v7  ;;  %v1624_v24 = vld [vmem:[%s1784_s22 + $0x8] sm:$0xff]  ;;  %v1623_v28 = vld [vmem:[%s1784_s22] sm:$0xff]  ;;  %v1678_v40 = vld [vmem:[%s1784_s22 + $0x1b8] sm:$0xff] }
  0x18   : > { %907 = vmatpush.bf16.msra.mxu0 %v1628_v8  ;;  %v1632_v25 = vld [vmem:[%s1784_s22 + $0x48] sm:$0xff]  ;;  %v1631_v29 = vld [vmem:[%s1784_s22 + $0x40] sm:$0xff]  ;;  %v1662_v41 = vld [vmem:[%s1784_s22 + $0x138] sm:$0xff] }
  0x19   : > { %926 = vmatpush.bf16.msra.mxu1 %v1636_v9  ;;  %v1640_v26 = vld [vmem:[%s1784_s22 + $0x88] sm:$0xff]  ;;  %v1639_v30 = vld [vmem:[%s1784_s22 + $0x80] sm:$0xff]  ;;  %v1670_v46 = vld [vmem:[%s1784_s22 + $0x178] sm:$0xff] }
  0x1a   : > { %945 = vmatpush.bf16.msra.mxu2 %v1644_v10  ;;  %v1648_v27 = vld [vmem:[%s1784_s22 + $0xc8] sm:$0xff]  ;;  %v1647_v31 = vld [vmem:[%s1784_s22 + $0xc0] sm:$0xff]  ;;  %v1686_v47 = vld [vmem:[%s1784_s22 + $0x1f8] sm:$0xff] }
  0x1b   : > { %964 = vmatpush.bf16.msra.mxu3 %v1652_v11  ;;  %v1284_v32 = vld [vmem:[%s1816_s26] sm:$0xf]  ;;  %v1607_v34 = vld [vmem:[%s1816_s26 + $0x4] sm:$0xf]  ;;  %v1292_v36 = vld [vmem:[%s1816_s26 + $0x8] sm:$0xf] }
  0x1c   : > { %908 = vmatpush.bf16.msra.mxu0 %v1627_v12  ;;  %v1611_v33 = vld [vmem:[%s1816_s26 + $0x1c] sm:$0xf0]  ;;  %v1286_v35 = vld [vmem:[%s1816_s26 + $0x20] sm:$0xf0]  ;;  %v1612_v37 = vld [vmem:[%s1816_s26 + $0x24] sm:$0xf0] }
  0x1d   : > { %927 = vmatpush.bf16.msra.mxu1 %v1635_v13  ;;  %v1608_v38 = vld [vmem:[%s1816_s26 + $0xc] sm:$0xf]  ;;  %v1285_v42 = vor.u32 %v1611_v33, %v1284_v32  ;;  %v1289_v43 = vor.u32 %v1607_v34, %v1286_v35  ;;  %v1293_v44 = vor.u32 %v1612_v37, %v1292_v36  ;;  %v1677_v48 = vld [vmem:[%s1784_s22 + $0x1b0] sm:$0xff]  ;;  %v1675_v56 = vld [vmem:[%s1784_s22 + $0x1a0] sm:$0xff] }
  0x1e   : > { %946 = vmatpush.bf16.msra.mxu2 %v1643_v14  ;;  %v1294_v39 = vld [vmem:[%s1816_s26 + $0x28] sm:$0xf0]  ;;  %v1661_v49 = vld [vmem:[%s1784_s22 + $0x130] sm:$0xff]  ;;  %v1659_v57 = vld [vmem:[%s1784_s22 + $0x120] sm:$0xff] }
  0x1f   : > { %965 = vmatpush.bf16.msra.mxu3 %v1651_v15  ;;  %v1297_v45 = vor.u32 %v1608_v38, %v1294_v39  ;;  %v1669_v50 = vld [vmem:[%s1784_s22 + $0x170] sm:$0xff]  ;;  %v1676_v52 = vld [vmem:[%s1784_s22 + $0x1a8] sm:$0xff]  ;;  %v1667_v58 = vld [vmem:[%s1784_s22 + $0x160] sm:$0xff] }
  0x20   : > { %909 = vmatpush.bf16.msra.mxu0 %v1626_v16  ;;  %v1685_v51 = vld [vmem:[%s1784_s22 + $0x1f0] sm:$0xff]  ;;  %v1660_v53 = vld [vmem:[%s1784_s22 + $0x128] sm:$0xff]  ;;  %v1683_v59 = vld [vmem:[%s1784_s22 + $0x1e0] sm:$0xff] }
  0x21   : > { %928 = vmatpush.bf16.msra.mxu1 %v1634_v17  ;;  %v1668_v54 = vld [vmem:[%s1784_s22 + $0x168] sm:$0xff]  ;;  %v1316_v60 = vld [vmem:[%s1816_s26 + $0x40] sm:$0xf]  ;;  %v1615_v62 = vld [vmem:[%s1816_s26 + $0x44] sm:$0xf] }
  0x22   : > { %947 = vmatpush.bf16.msra.mxu2 %v1642_v18  ;;  %v1684_v55 = vld [vmem:[%s1784_s22 + $0x1e8] sm:$0xff]  ;;  %v1619_v61 = vld [vmem:[%s1816_s26 + $0x5c] sm:$0xf0]  ;;  %v1318_v63 = vld [vmem:[%s1816_s26 + $0x60] sm:$0xf0] }
  0x23   : > { %966 = vmatpush.bf16.msra.mxu3 %v1650_v19  ;;  %v1324_v0 = vld [vmem:[%s1816_s26 + $0x48] sm:$0xf]  ;;  %v1616_v2 = vld [vmem:[%s1816_s26 + $0x4c] sm:$0xf]  ;;  %v1674_v4 = vld [vmem:[%s1784_s22 + $0x198] sm:$0xff]  ;;  %v1317_v6 = vor.u32 %v1619_v61, %v1316_v60  ;;  %v1321_v7 = vor.u32 %v1615_v62, %v1318_v63 }
  0x24   : > { %910 = vmatpush.bf16.msra.mxu0 %v1625_v20  ;;  %v1620_v1 = vld [vmem:[%s1816_s26 + $0x64] sm:$0xf0]  ;;  %v1326_v3 = vld [vmem:[%s1816_s26 + $0x68] sm:$0xf0]  ;;  %v1658_v5 = vld [vmem:[%s1784_s22 + $0x118] sm:$0xff] }
  0x25   : > { %929 = vmatpush.bf16.msra.mxu1 %v1633_v21  ;;  %v1325_v8 = vor.u32 %v1620_v1, %v1324_v0  ;;  %v1329_v9 = vor.u32 %v1616_v2, %v1326_v3  ;;  %v1666_v10 = vld [vmem:[%s1784_s22 + $0x158] sm:$0xff]  ;;  %v1673_v12 = vld [vmem:[%s1784_s22 + $0x190] sm:$0xff]  ;;  %v1672_v16 = vld [vmem:[%s1784_s22 + $0x188] sm:$0xff] }
  0x26   : > { %948 = vmatpush.bf16.msra.mxu2 %v1641_v22  ;;  %v1682_v11 = vld [vmem:[%s1784_s22 + $0x1d8] sm:$0xff]  ;;  %v1657_v13 = vld [vmem:[%s1784_s22 + $0x110] sm:$0xff]  ;;  %v1656_v17 = vld [vmem:[%s1784_s22 + $0x108] sm:$0xff] }
  0x27   : > { %967 = vmatpush.bf16.msra.mxu3 %v1649_v23  ;;  %v1665_v14 = vld [vmem:[%s1784_s22 + $0x150] sm:$0xff]  ;;  %v1664_v18 = vld [vmem:[%s1784_s22 + $0x148] sm:$0xff]  ;;  %v1671_v20 = vld [vmem:[%s1784_s22 + $0x180] sm:$0xff] }
  0x28   : > { %911 = vmatpush.bf16.msra.mxu0 %v1624_v24  ;;  %v1681_v15 = vld [vmem:[%s1784_s22 + $0x1d0] sm:$0xff]  ;;  %v1680_v19 = vld [vmem:[%s1784_s22 + $0x1c8] sm:$0xff]  ;;  %v1655_v21 = vld [vmem:[%s1784_s22 + $0x100] sm:$0xff] }
  0x29   : > { %930 = vmatpush.bf16.msra.mxu1 %v1632_v25  ;;  %v1663_v22 = vld [vmem:[%s1784_s22 + $0x140] sm:$0xff]  ;;  %v1300_v24 = vld [vmem:[%s1816_s26 + $0x10] sm:$0xf]  ;;  %v1617_v38 = vld [vmem:[%s1816_s26 + $0x54] sm:$0xf] }
  0x2a   : > { %949 = vmatpush.bf16.msra.mxu2 %v1640_v26  ;;  %v1679_v23 = vld [vmem:[%s1784_s22 + $0x1c0] sm:$0xff]  ;;  %v1613_v25 = vld [vmem:[%s1816_s26 + $0x2c] sm:$0xf0]  ;;  %v1609_v26 = vld [vmem:[%s1816_s26 + $0x14] sm:$0xf] }
  0x2b   : > { %968 = vmatpush.bf16.msra.mxu3 %v1648_v27  ;;  %v1302_v27 = vld [vmem:[%s1816_s26 + $0x30] sm:$0xf0]  ;;  %v1301_v32 = vor.u32 %v1613_v25, %v1300_v24  ;;  %v1332_v36 = vld [vmem:[%s1816_s26 + $0x50] sm:$0xf] }
  0x2c   : > { %912 = vmatpush.bf16.msra.mxu0 %v1623_v28  ;;  %v1308_v28 = vld [vmem:[%s1816_s26 + $0x18] sm:$0xf]  ;;  %v1305_v33 = vor.u32 %v1609_v26, %v1302_v27  ;;  %v1621_v37 = vld [vmem:[%s1816_s26 + $0x6c] sm:$0xf0]  ;;  %v1334_v39 = vld [vmem:[%s1816_s26 + $0x70] sm:$0xf0] }
  0x2d   : > { %931 = vmatpush.bf16.msra.mxu1 %v1631_v29  ;;  %v1614_v29 = vld [vmem:[%s1816_s26 + $0x34] sm:$0xf0] }
  0x2e   : > { %950 = vmatpush.bf16.msra.mxu2 %v1639_v30  ;;  %v1610_v30 = vld [vmem:[%s1816_s26 + $0x1c] sm:$0xf]  ;;  %v1309_v34 = vor.u32 %v1614_v29, %v1308_v28 }
  0x2f   : > { %969 = vmatpush.bf16.msra.mxu3 %v1647_v31  ;;  %913 = vmatmul.bf16.vlgmr.msra.gmra.mxu0 %v1285_v42  ;;  %v1310_v31 = vld [vmem:[%s1816_s26 + $0x38] sm:$0xf0] }
  0x30   : > { %981 = vmatpush.bf16.msrb.mxu0 %v1662_v41  ;;  %932 = vmatmul.bf16.vlgmr.msra.gmra.mxu1 %v1289_v43  ;;  %v1313_v35 = vor.u32 %v1610_v30, %v1310_v31  ;;  %v1622_v41 = vld [vmem:[%s1816_s26 + $0x74] sm:$0xf0]  ;;  %v1618_v42 = vld [vmem:[%s1816_s26 + $0x5c] sm:$0xf] }
  0x31   : > { %951 = vmatmul.bf16.vlgmr.msra.gmra.mxu2 %v1293_v44  ;;  %1000 = vmatpush.bf16.msrb.mxu1 %v1670_v46  ;;  %v1342_v43 = vld [vmem:[%s1816_s26 + $0x78] sm:$0xf0]  ;;  %v1333_v44 = vor.u32 %v1621_v37, %v1332_v36 }
  0x32   : > { %1019 = vmatpush.bf16.msrb.mxu2 %v1678_v40  ;;  %970 = vmatmul.bf16.vlgmr.msra.gmra.mxu3 %v1297_v45  ;;  %v1340_v40 = vld [vmem:[%s1816_s26 + $0x58] sm:$0xf]  ;;  %v1337_v45 = vor.u32 %v1617_v38, %v1334_v39 }
  0x33   : > { %1038 = vmatpush.bf16.msrb.mxu3 %v1686_v47  ;;  %v1341_v46 = vor.u32 %v1622_v41, %v1340_v40  ;;  %v1345_v47 = vor.u32 %v1618_v42, %v1342_v43 }
  0x34   : > { %982 = vmatpush.bf16.msrb.mxu0 %v1661_v49 }
  0x35   : > { %1001 = vmatpush.bf16.msrb.mxu1 %v1669_v50 }
  0x36   : > { %1020 = vmatpush.bf16.msrb.mxu2 %v1677_v48 }
  0x37   : > { %1039 = vmatpush.bf16.msrb.mxu3 %v1685_v51 }
  0x38   : > { %983 = vmatpush.bf16.msrb.mxu0 %v1660_v53 }
  0x39   : > { %1002 = vmatpush.bf16.msrb.mxu1 %v1668_v54 }
  0x3a   : > { %1021 = vmatpush.bf16.msrb.mxu2 %v1676_v52 }
  0x3b   : > { %1040 = vmatpush.bf16.msrb.mxu3 %v1684_v55 }
  0x3c   : > { %984 = vmatpush.bf16.msrb.mxu0 %v1659_v57 }
  0x3d   : > { %1003 = vmatpush.bf16.msrb.mxu1 %v1667_v58 }
  0x3e   : > { %1022 = vmatpush.bf16.msrb.mxu2 %v1675_v56 }
  0x3f   : > { %1041 = vmatpush.bf16.msrb.mxu3 %v1683_v59  ;;  %918 = vmatmul.bf16.gmra.mxu0 %v1317_v6 }
  0x40   : > { %985 = vmatpush.bf16.msrb.mxu0 %v1658_v5  ;;  %937 = vmatmul.bf16.gmra.mxu1 %v1321_v7 }
  0x41   : > { %956 = vmatmul.bf16.gmra.mxu2 %v1325_v8  ;;  %1004 = vmatpush.bf16.msrb.mxu1 %v1666_v10 }
  0x42   : > { %1023 = vmatpush.bf16.msrb.mxu2 %v1674_v4  ;;  %975 = vmatmul.bf16.gmra.mxu3 %v1329_v9 }
  0x43   : > { %1042 = vmatpush.bf16.msrb.mxu3 %v1682_v11 }
  0x44   : > { %986 = vmatpush.bf16.msrb.mxu0 %v1657_v13 }
  0x45   : > { %1005 = vmatpush.bf16.msrb.mxu1 %v1665_v14 }
  0x46   : > { %1024 = vmatpush.bf16.msrb.mxu2 %v1673_v12 }
  0x47   : > { %1043 = vmatpush.bf16.msrb.mxu3 %v1681_v15 }
  0x48   : > { %987 = vmatpush.bf16.msrb.mxu0 %v1656_v17 }
  0x49   : > { %1006 = vmatpush.bf16.msrb.mxu1 %v1664_v18 }
  0x4a   : > { %1025 = vmatpush.bf16.msrb.mxu2 %v1672_v16 }
  0x4b   : > { %1044 = vmatpush.bf16.msrb.mxu3 %v1680_v19 }
  0x4c   : > { %988 = vmatpush.bf16.msrb.mxu0 %v1655_v21 }
  0x4d   : > { %1007 = vmatpush.bf16.msrb.mxu1 %v1663_v22 }
  0x4e   : > { %1026 = vmatpush.bf16.msrb.mxu2 %v1671_v20 }
  0x4f   : > { %1045 = vmatpush.bf16.msrb.mxu3 %v1679_v23  ;;  %989 = vmatmul.bf16.vlgmr.msrb.gmra.mxu0 %v1301_v32 }
  0x50   : > { %1008 = vmatmul.bf16.vlgmr.msrb.gmra.mxu1 %v1305_v33 }
  0x51   : > { %1027 = vmatmul.bf16.vlgmr.msrb.gmra.mxu2 %v1309_v34 }
  0x52   : > { %1046 = vmatmul.bf16.vlgmr.msrb.gmra.mxu3 %v1313_v35 }
  0x5f   : > { %994 = vmatmul.bf16.gmra.mxu0 %v1333_v44 }
  0x60   : > { %1013 = vmatmul.bf16.gmra.mxu1 %v1337_v45 }
  0x61   : > { %1032 = vmatmul.bf16.gmra.mxu2 %v1341_v46 }
  0x62   : > { %1051 = vmatmul.bf16.gmra.mxu3 %v1345_v47 }
  0xac   : > { %v914_v48 = vpop.f32.mrf.mxu0 }
  0xad   : > { %v933_v49 = vpop.f32.mrf.mxu1 }
  0xae   : > { %v934_v62 = vadd.f32 %v933_v49, %v914_v48 }
  0xb4   : > { %v952_v50 = vpop.f32.mrf.mxu2  ;;  %v916_v52 = vpop.f32.mrf.mxu0 }
  0xb5   : > { %v971_v51 = vpop.f32.mrf.mxu3  ;;  %v935_v53 = vpop.f32.mrf.mxu1  ;;  %v953_v63 = vadd.f32 %v952_v50, %v934_v62 }
  0xb6   : > { %v936_v5 = vadd.f32 %v935_v53, %v916_v52 }
  0xb7   : > { %v972_v2 = vadd.f32 %v971_v51, %v953_v63 }
  0xbc   : > { %v954_v54 = vpop.f32.mrf.mxu2  ;;  %v919_v56 = vpop.f32.mrf.mxu0 }
  0xbd   : > { %v973_v55 = vpop.f32.mrf.mxu3  ;;  %v938_v57 = vpop.f32.mrf.mxu1  ;;  %v955_v7 = vadd.f32 %v954_v54, %v936_v5 }
  0xbe   : > { %v939_v15 = vadd.f32 %v938_v57, %v919_v56 }
  0xbf   : > { %v974_v10 = vadd.f32 %v973_v55, %v955_v7 }
  0xc4   : > { %v957_v58 = vpop.f32.mrf.mxu2  ;;  %v921_v60 = vpop.f32.mrf.mxu0 }
  0xc5   : > { %v976_v59 = vpop.f32.mrf.mxu3  ;;  %v940_v61 = vpop.f32.mrf.mxu1  ;;  %v958_v18 = vadd.f32 %v957_v58, %v939_v15 }
  0xc6   : > { %v941_v25 = vadd.f32 %v940_v61, %v921_v60 }
  0xc7   : > { %v977_v21 = vadd.f32 %v976_v59, %v958_v18 }
  0xcc   : > { %v959_v0 = vpop.f32.mrf.mxu2  ;;  %v990_v3 = vpop.f32.mrf.mxu0 }
  0xcd   : > { %v978_v1 = vpop.f32.mrf.mxu3  ;;  %v1009_v4 = vpop.f32.mrf.mxu1  ;;  %v991_v6 = vadd.f32 %v990_v3, %v972_v2  ;;  %v960_v29 = vadd.f32 %v959_v0, %v941_v25 }
  0xcf   : > { %v1010_v8 = vadd.f32 %v1009_v4, %v991_v6  ;;  %v979_v32 = vadd.f32 %v978_v1, %v960_v29 }
  0xd4   : > { %v1028_v9 = vpop.f32.mrf.mxu2  ;;  %v992_v13 = vpop.f32.mrf.mxu0 }
  0xd5   : > { %v1029_v11 = vadd.f32 %v1028_v9, %v1010_v8  ;;  %v1047_v12 = vpop.f32.mrf.mxu3  ;;  %v1011_v14 = vpop.f32.mrf.mxu1  ;;  %v993_v17 = vadd.f32 %v992_v13, %v974_v10 }
  0xd7   : > { %v1048_v16 = vadd.f32 %v1047_v12, %v1029_v11  ;;  %v1012_v19 = vadd.f32 %v1011_v14, %v993_v17 }
  0xd9   : > { %1057 = vst [vmem:[%s1892_s30] sm:$0xff] %v1048_v16  ;;  %v1071_v42 = vmul.f32 %v1048_v16, %v1048_v16 }
  0xdc   : > { %v1030_v20 = vpop.f32.mrf.mxu2  ;;  %v995_v24 = vpop.f32.mrf.mxu0 }
  0xdd   : > { %v1031_v22 = vadd.f32 %v1030_v20, %v1012_v19  ;;  %v1049_v23 = vpop.f32.mrf.mxu3  ;;  %v996_v27 = vadd.f32 %v995_v24, %v977_v21  ;;  %v1014_v28 = vpop.f32.mrf.mxu1 }
  0xdf   : > { %v1050_v26 = vadd.f32 %v1049_v23, %v1031_v22  ;;  %v1015_v30 = vadd.f32 %v1014_v28, %v996_v27 }
  0xe1   : > { %1058 = vst [vmem:[%s1892_s30 + $0x8] sm:$0xff] %v1050_v26  ;;  %v1072_v39 = vmul.f32 %v1050_v26, %v1050_v26  ;;  %v1061_v43 = vadd.f32 %v1050_v26, %v1048_v16 }
  0xe3   : > { %v1075_v47 = vadd.f32 %v1072_v39, %v1071_v42 }
  0xe4   : > { %v1033_v31 = vpop.f32.mrf.mxu2  ;;  %v997_v35 = vpop.f32.mrf.mxu0 }
  0xe5   : > { %v1034_v33 = vadd.f32 %v1033_v31, %v1015_v30  ;;  %v1052_v34 = vpop.f32.mrf.mxu3  ;;  %v998_v37 = vadd.f32 %v997_v35, %v979_v32  ;;  %v1016_v38 = vpop.f32.mrf.mxu1 }
  0xe7   : > { %v1053_v36 = vadd.f32 %v1052_v34, %v1034_v33  ;;  %v1017_v40 = vadd.f32 %v1016_v38, %v998_v37 }
  0xe9   : > { %1059 = vst [vmem:[%s1892_s30 + $0x10] sm:$0xff] %v1053_v36  ;;  %v1073_v44 = vmul.f32 %v1053_v36, %v1053_v36  ;;  %v1062_v48 = vadd.f32 %v1061_v43, %v1053_v36 }
  0xeb   : > { %v1076_v50 = vadd.f32 %v1075_v47, %v1073_v44 }
  0xec   : > { %v1035_v41 = vpop.f32.mrf.mxu2 }
  0xed   : > { %v1036_v45 = vadd.f32 %v1035_v41, %v1017_v40  ;;  %v1054_v46 = vpop.f32.mrf.mxu3 }
  0xef   : > { %v1055_v49 = vadd.f32 %v1054_v46, %v1036_v45 }
  0xf1   : > { %1060 = vst [vmem:[%s1892_s30 + $0x18] sm:$0xff] %v1055_v49  ;;  %v1063_v51 = vadd.f32 %v1062_v48, %v1055_v49  ;;  %v1074_v52 = vmul.f32 %v1055_v49, %v1055_v49 }
  0xf3   : > { %v1064_v53 = vrot.slane %v1063_v51, 4  ;;  %v1077_v54 = vadd.f32 %v1076_v50, %v1074_v52 }
  0xf5   : > { %v1065_v55 = vadd.f32 %v1064_v53, %v1063_v51  ;;  %v1078_v56 = vrot.slane %v1077_v54, 4 }
  0xf7   : > { %v1066_v57 = vrot.slane %v1065_v55, 2  ;;  %v1079_v58 = vadd.f32 %v1078_v56, %v1077_v54 }
  0xf9   : > { %v1067_v59 = vadd.f32 %v1066_v57, %v1065_v55  ;;  %v1080_v60 = vrot.slane %v1079_v58, 2 }
  0xfb   : > { %v1068_v61 = vrot.slane %v1067_v59, 1  ;;  %v1081_v62 = vadd.f32 %v1080_v60, %v1079_v58 }
  0xfd   : > { %v1069_v63 = vadd.f32 %v1068_v61, %v1067_v59  ;;  %v1082_v0 = vrot.slane %v1081_v62, 1 }
  0xff   : > { %1070 = vst [vmem:[%s289_s8] sm:$0xff] %v1069_v63  ;;  %v1083_v1 = vadd.f32 %v1082_v0, %v1081_v62 }
 0x101   : > { %1084 = vst [vmem:[%s296_s11] sm:$0xff] %v1083_v1 }
 0x102 PF: > { %s15_s17 = sadd.s32 1, %s1733_s17   ;;  %s1919_s15 = smov %s1729_s16 }
 0x103   : > { %p12_p5 = scmp.ge.s32.totalorder %s15_s17, 6   ;;  %s1920_s16 = smov %s1922_s18 }
 0x105   :  { %14 = sbr.rel (!%p12_p5) target bundleno = 2 (0x2), region = 85 }

// kernel: generator_forward.12
= control target key start
LH: loop header
LB: loop body
LE: loop exit
PB: predicated region body
PF: predicated region fallthrough
CT: control target
= control target key end

     0   :  { %s423_s12 = smov 0   ;;  %s425_s13 = smov 0   ;;  %s462_s0 = inlined_call_operand.vmem [shape: f32[4,32,128], index: 0, kind: input, shape index: {}]   ;;  %s463_s1 = inlined_call_operand.vmem [shape: f32[1,128], index: 1, kind: input, shape index: {}]   ;;  %s464_s2 = inlined_call_operand.vmem [shape: f32[1,128], index: 2, kind: input, shape index: {}]   ;;  %s465_s3 = inlined_call_operand.vmem [shape: bf16[4,32,128], index: 3, kind: output, shape index: {}]  }
   0x1   :  { %s427_s14 = smov 0  }
   0x2 LB: > { %s25_s15 = sadd.s32 1, %s397_s13  ;;  %p333_p0 = scmp.ge.s32.totalorder %s401_s14, 1  ;;  %s401_s14 = sphi %s427_s14, %s13_s14   ;;  %s397_s13 = sphi %s425_s13, %s467_s13   ;;  %s393_s12 = sphi %s423_s12, %s466_s12  }
   0x3   : > { %p27_p1 = scmp.ge.s32.totalorder %s25_s15, 4  ;;  %p158_p2 = scmp.lt.s32.totalorder %s401_s14, 5 }
   0x5   : > { %s469_s15 = smov (%p27_p1, %s25_s15), 0  ;;  %p159_p3 = pnand %p333_p0, %p158_p2 }
   0x6   : > { %p191_p4 = scmp.lt.s32.totalorder (!%p159_p3), %s393_s12, 3 }
   0x7   : > { %162 = sbr.rel (%p159_p3) target bundleno = 26 (0x1a), region = 32 }
   0xc   : > { %s471_s12 = smov (!%p191_p4, %s393_s12), 3  ;;  %v377_v0 = vld [vmem:[%s463_s1] ss:$0 sm:$0xff] }
   0xd   : > { %s340_s18 = sshll.u32 %s471_s12, 5  ;;  %v378_v1 = vld [vmem:[%s464_s2] ss:$0 sm:$0xff]  ;;  %s341_s24 = sshll.u32 %s471_s12, 4 }
   0xe   : > { %s198_s21 = scalar_lea.vmem %s462_s0, %s340_s18  ;;  %s208_s27 = scalar_lea.vmem %s465_s3, %s341_s24 }
   0xf   : > { %v210_v2 = vld [vmem:[%s198_s21] sm:$0xff]  ;;  %v211_v3 = vld [vmem:[%s198_s21 + $0x8] sm:$0xff]  ;;  %v212_v4 = vld [vmem:[%s198_s21 + $0x10] sm:$0xff] }
  0x10   : > { %v218_v5 = vmul.f32 %v377_v0, %v210_v2  ;;  %v219_v6 = vmul.f32 %v377_v0, %v211_v3  ;;  %v213_v7 = vld [vmem:[%s198_s21 + $0x18] sm:$0xff]  ;;  %v220_v8 = vmul.f32 %v377_v0, %v212_v4 }
  0x11   : > { %v221_v9 = vmul.f32 %v377_v0, %v213_v7 }
  0x12   : > { %v226_v10 = vadd.f32 %v378_v1, %v218_v5  ;;  %v227_v11 = vadd.f32 %v378_v1, %v219_v6  ;;  %v228_v12 = vadd.f32 %v378_v1, %v220_v8 }
  0x13   : > { %v229_v13 = vadd.f32 %v378_v1, %v221_v9 }
  0x14   : > { %v230_v14 = vmax.f32 %v226_v10, 0.0  ;;  %v231_v15 = vmax.f32 %v227_v11, 0.0  ;;  %v232_v16 = vmax.f32 %v228_v12, 0.0 }
  0x15   : > { %v233_v17 = vmax.f32 %v229_v13, 0.0 }
  0x16   : > { %v345_v18 = vpack.c.bf16 %v231_v15, %v230_v14 }
  0x17   : > { %v350_v19 = vpack.c.bf16 %v233_v17, %v232_v16 }
  0x18   : > { %346 = vst [vmem:[%s208_s27] sm:$0xff] %v345_v18  }
  0x19   : > { %352 = vst [vmem:[%s208_s27 + $0x8] sm:$0xff] %v350_v19  }
  0x1a PF: > { %s13_s14 = sadd.s32 1, %s401_s14   ;;  %s466_s12 = smov %s397_s13 }
  0x1b   : > { %p10_p5 = scmp.ge.s32.totalorder %s13_s14, 6   ;;  %s467_s13 = smov %s469_s15 }
  0x1d   :  { %12 = sbr.rel (!%p10_p5) target bundleno = 2 (0x2), region = 62 }

// kernel: generator_forward.13
= control target key start
LH: loop header
LB: loop body
LE: loop exit
PB: predicated region body
PF: predicated region fallthrough
CT: control target
= control target key end

     0   :  { %s1612_s15 = smov 0   ;;  %s1614_s16 = smov 0   ;;  %s1787_s0 = inlined_call_operand.vmem [shape: bf16[4,128,512], index: 0, kind: input, shape index: {}]   ;;  %s1788_s1 = inlined_call_operand.vmem [shape: bf16[4,512,128], index: 1, kind: input, shape index: {}]   ;;  %s1789_s2 = inlined_call_operand.vmem [shape: f32[4,128,128], index: 2, kind: output, shape index: {0}]   ;;  %s1790_s3 = inlined_call_operand.vmem [shape: f32[4,1,8,128], index: 3, kind: output, shape index: {1}]   ;;  %s1791_s4 = inlined_call_operand.vmem [shape: f32[4,1,8,128], index: 4, kind: output, shape index: {2}]  }
   0x1   :  { %s1616_s17 = smov 0  }
   0x2 LB: > { %s27_s18 = sadd.s32 1, %s1581_s16  ;;  %p1205_p0 = scmp.ge.s32.totalorder %s1585_s17, 1  ;;  %s1585_s17 = sphi %s1616_s17, %s15_s17   ;;  %s1581_s16 = sphi %s1614_s16, %s1793_s16   ;;  %s1577_s15 = sphi %s1612_s15, %s1792_s15  }
   0x3   : > { %p29_p1 = scmp.ge.s32.totalorder %s27_s18, 4  ;;  %p203_p2 = scmp.lt.s32.totalorder %s1585_s17, 5 }
   0x5   : > { %s1795_s18 = smov (%p29_p1, %s27_s18), 0  ;;  %p204_p3 = pnand %p1205_p0, %p203_p2 }
   0x6   : > { %p258_p4 = scmp.lt.s32.totalorder (!%p204_p3), %s1577_s15, 3 }
   0x7   : > { %207 = sbr.rel (%p204_p3) target bundleno = 322 (0x142), region = 28 }
   0xc   : > { %s1797_s15 = smov (!%p258_p4, %s1577_s15), 3 }
   0xd   : > { %s1472_s19 = sshll.u32 %s1797_s15, 8  ;;  %s1474_s26 = sshll.u32 %s1797_s15, 7 }
   0xe   : > { %s1638_s22 = scalar_lea.vmem %s1788_s1, %s1472_s19  ;;  %s1671_s25 = scalar_lea.vmem %s1787_s0, %s1472_s19 }
   0xf   : > { %v1514_v0 = vld [vmem:[%s1638_s22 + $0x38] sm:$0xff]  ;;  %v1513_v4 = vld [vmem:[%s1638_s22 + $0x30] sm:$0xff]  ;;  %v1512_v8 = vld [vmem:[%s1638_s22 + $0x28] sm:$0xff]  ;;  %s1747_s29 = scalar_lea.vmem %s1789_s2, %s1474_s26  ;;  %s1212_s30 = sshll.u32 %s1797_s15, 3 }
  0x10   : > { %v1522_v1 = vld [vmem:[%s1638_s22 + $0x78] sm:$0xff]  ;;  %745 = vmatpush.bf16.msra.mxu0 %v1514_v0  ;;  %v1521_v5 = vld [vmem:[%s1638_s22 + $0x70] sm:$0xff]  ;;  %v1520_v9 = vld [vmem:[%s1638_s22 + $0x68] sm:$0xff]  ;;  %s289_s7 = scalar_lea.vmem %s1790_s3, %s1212_s30  ;;  %s296_s10 = scalar_lea.vmem %s1791_s4, %s1212_s30 }
  0x11   : > { %v1530_v2 = vld [vmem:[%s1638_s22 + $0xb8] sm:$0xff]  ;;  %794 = vmatpush.bf16.msra.mxu1 %v1522_v1  ;;  %v1529_v6 = vld [vmem:[%s1638_s22 + $0xb0] sm:$0xff]  ;;  %v1528_v10 = vld [vmem:[%s1638_s22 + $0xa8] sm:$0xff] }
  0x12   : > { %v1538_v3 = vld [vmem:[%s1638_s22 + $0xf8] sm:$0xff]  ;;  %843 = vmatpush.bf16.msra.mxu2 %v1530_v2  ;;  %v1537_v7 = vld [vmem:[%s1638_s22 + $0xf0] sm:$0xff]  ;;  %v1536_v11 = vld [vmem:[%s1638_s22 + $0xe8] sm:$0xff] }
  0x13   : > { %892 = vmatpush.bf16.msra.mxu3 %v1538_v3  ;;  %v1511_v12 = vld [vmem:[%s1638_s22 + $0x20] sm:$0xff]  ;;  %v1510_v16 = vld [vmem:[%s1638_s22 + $0x18] sm:$0xff]  ;;  %v1509_v20 = vld [vmem:[%s1638_s22 + $0x10] sm:$0xff] }
  0x14   : > { %746 = vmatpush.bf16.msra.mxu0 %v1513_v4  ;;  %v1519_v13 = vld [vmem:[%s1638_s22 + $0x60] sm:$0xff]  ;;  %v1518_v17 = vld [vmem:[%s1638_s22 + $0x58] sm:$0xff]  ;;  %v1517_v21 = vld [vmem:[%s1638_s22 + $0x50] sm:$0xff] }
  0x15   : > { %795 = vmatpush.bf16.msra.mxu1 %v1521_v5  ;;  %v1527_v14 = vld [vmem:[%s1638_s22 + $0xa0] sm:$0xff]  ;;  %v1526_v18 = vld [vmem:[%s1638_s22 + $0x98] sm:$0xff]  ;;  %v1525_v22 = vld [vmem:[%s1638_s22 + $0x90] sm:$0xff] }
  0x16   : > { %844 = vmatpush.bf16.msra.mxu2 %v1529_v6  ;;  %v1535_v15 = vld [vmem:[%s1638_s22 + $0xe0] sm:$0xff]  ;;  %v1534_v19 = vld [vmem:[%s1638_s22 + $0xd8] sm:$0xff]  ;;  %v1533_v23 = vld [vmem:[%s1638_s22 + $0xd0] sm:$0xff] }
  0x17   : > { %893 = vmatpush.bf16.msra.mxu3 %v1537_v7  ;;  %v1508_v24 = vld [vmem:[%s1638_s22 + $0x8] sm:$0xff]  ;;  %v1507_v28 = vld [vmem:[%s1638_s22] sm:$0xff]  ;;  %v1477_v33 = vld [vmem:[%s1671_s25 + $0xc] sm:$0xf0] }
  0x18   : > { %747 = vmatpush.bf16.msra.mxu0 %v1512_v8  ;;  %v1516_v25 = vld [vmem:[%s1638_s22 + $0x48] sm:$0xff]  ;;  %v1515_v29 = vld [vmem:[%s1638_s22 + $0x40] sm:$0xff]  ;;  %v1218_v35 = vld [vmem:[%s1671_s25 + $0x10] sm:$0xf0] }
  0x19   : > { %796 = vmatpush.bf16.msra.mxu1 %v1520_v9  ;;  %v1524_v26 = vld [vmem:[%s1638_s22 + $0x88] sm:$0xff]  ;;  %v1523_v30 = vld [vmem:[%s1638_s22 + $0x80] sm:$0xff]  ;;  %v1478_v37 = vld [vmem:[%s1671_s25 + $0x14] sm:$0xf0] }
  0x1a   : > { %845 = vmatpush.bf16.msra.mxu2 %v1528_v10  ;;  %v1532_v27 = vld [vmem:[%s1638_s22 + $0xc8] sm:$0xff]  ;;  %v1531_v31 = vld [vmem:[%s1638_s22 + $0xc0] sm:$0xff]  ;;  %v1226_v39 = vld [vmem:[%s1671_s25 + $0x18] sm:$0xf0] }
  0x1b   : > { %894 = vmatpush.bf16.msra.mxu3 %v1536_v11  ;;  %v1216_v32 = vld [vmem:[%s1671_s25] sm:$0xf]  ;;  %v1475_v34 = vld [vmem:[%s1671_s25 + $0x4] sm:$0xf]  ;;  %v1224_v36 = vld [vmem:[%s1671_s25 + $0x8] sm:$0xf] }
  0x1c   : > { %748 = vmatpush.bf16.msra.mxu0 %v1511_v12  ;;  %v1476_v38 = vld [vmem:[%s1671_s25 + $0xc] sm:$0xf]  ;;  %v1217_v40 = vor.u32 %v1477_v33, %v1216_v32  ;;  %v1221_v41 = vor.u32 %v1475_v34, %v1218_v35  ;;  %v1225_v42 = vor.u32 %v1478_v37, %v1224_v36  ;;  %v1232_v44 = vld [vmem:[%s1671_s25 + $0x20] sm:$0xf]  ;;  %v1481_v45 = vld [vmem:[%s1671_s25 + $0x2c] sm:$0xf0] }
  0x1d   : > { %797 = vmatpush.bf16.msra.mxu1 %v1519_v13  ;;  %v1229_v43 = vor.u32 %v1476_v38, %v1226_v39  ;;  %v1479_v46 = vld [vmem:[%s1671_s25 + $0x24] sm:$0xf]  ;;  %v1234_v47 = vld [vmem:[%s1671_s25 + $0x30] sm:$0xf0]  ;;  %v1240_v48 = vld [vmem:[%s1671_s25 + $0x28] sm:$0xf]  ;;  %v1233_v52 = vor.u32 %v1481_v45, %v1232_v44 }
  0x1e   : > { %846 = vmatpush.bf16.msra.mxu2 %v1527_v14  ;;  %v1482_v49 = vld [vmem:[%s1671_s25 + $0x34] sm:$0xf0]  ;;  %v1480_v50 = vld [vmem:[%s1671_s25 + $0x2c] sm:$0xf]  ;;  %v1242_v51 = vld [vmem:[%s1671_s25 + $0x38] sm:$0xf0]  ;;  %v1237_v53 = vor.u32 %v1479_v46, %v1234_v47 }
  0x1f   : > { %895 = vmatpush.bf16.msra.mxu3 %v1535_v15  ;;  %v1241_v54 = vor.u32 %v1482_v49, %v1240_v48  ;;  %v1245_v55 = vor.u32 %v1480_v50, %v1242_v51  ;;  %v1248_v56 = vld [vmem:[%s1671_s25 + $0x40] sm:$0xf]  ;;  %v1485_v57 = vld [vmem:[%s1671_s25 + $0x4c] sm:$0xf0]  ;;  %v1483_v58 = vld [vmem:[%s1671_s25 + $0x44] sm:$0xf] }
  0x20   : > { %749 = vmatpush.bf16.msra.mxu0 %v1510_v16  ;;  %v1250_v59 = vld [vmem:[%s1671_s25 + $0x50] sm:$0xf0]  ;;  %v1256_v60 = vld [vmem:[%s1671_s25 + $0x48] sm:$0xf]  ;;  %v1486_v61 = vld [vmem:[%s1671_s25 + $0x54] sm:$0xf0]  ;;  %v1249_v0 = vor.u32 %v1485_v57, %v1248_v56 }
  0x21   : > { %798 = vmatpush.bf16.msra.mxu1 %v1518_v17  ;;  %v1484_v62 = vld [vmem:[%s1671_s25 + $0x4c] sm:$0xf]  ;;  %v1258_v63 = vld [vmem:[%s1671_s25 + $0x58] sm:$0xf0]  ;;  %v1253_v1 = vor.u32 %v1483_v58, %v1250_v59  ;;  %v1257_v2 = vor.u32 %v1486_v61, %v1256_v60  ;;  %v1264_v4 = vld [vmem:[%s1671_s25 + $0x60] sm:$0xf] }
  0x22   : > { %847 = vmatpush.bf16.msra.mxu2 %v1526_v18  ;;  %v1261_v3 = vor.u32 %v1484_v62, %v1258_v63  ;;  %v1489_v5 = vld [vmem:[%s1671_s25 + $0x6c] sm:$0xf0]  ;;  %v1487_v6 = vld [vmem:[%s1671_s25 + $0x64] sm:$0xf]  ;;  %v1266_v7 = vld [vmem:[%s1671_s25 + $0x70] sm:$0xf0] }
  0x23   : > { %896 = vmatpush.bf16.msra.mxu3 %v1534_v19  ;;  %v1272_v8 = vld [vmem:[%s1671_s25 + $0x68] sm:$0xf]  ;;  %v1490_v9 = vld [vmem:[%s1671_s25 + $0x74] sm:$0xf0]  ;;  %v1488_v10 = vld [vmem:[%s1671_s25 + $0x6c] sm:$0xf]  ;;  %v1265_v12 = vor.u32 %v1489_v5, %v1264_v4  ;;  %v1269_v13 = vor.u32 %v1487_v6, %v1266_v7 }
  0x24   : > { %750 = vmatpush.bf16.msra.mxu0 %v1509_v20  ;;  %v1274_v11 = vld [vmem:[%s1671_s25 + $0x78] sm:$0xf0]  ;;  %v1273_v14 = vor.u32 %v1490_v9, %v1272_v8  ;;  %v1280_v16 = vld [vmem:[%s1671_s25 + $0x80] sm:$0xf]  ;;  %v1493_v17 = vld [vmem:[%s1671_s25 + $0x8c] sm:$0xf0] }
  0x25   : > { %799 = vmatpush.bf16.msra.mxu1 %v1517_v21  ;;  %v1277_v15 = vor.u32 %v1488_v10, %v1274_v11  ;;  %v1491_v18 = vld [vmem:[%s1671_s25 + $0x84] sm:$0xf]  ;;  %v1282_v19 = vld [vmem:[%s1671_s25 + $0x90] sm:$0xf0]  ;;  %v1288_v20 = vld [vmem:[%s1671_s25 + $0x88] sm:$0xf] }
  0x26   : > { %848 = vmatpush.bf16.msra.mxu2 %v1525_v22  ;;  %v1494_v21 = vld [vmem:[%s1671_s25 + $0x94] sm:$0xf0]  ;;  %v1492_v22 = vld [vmem:[%s1671_s25 + $0x8c] sm:$0xf]  ;;  %v1304_v32 = vld [vmem:[%s1671_s25 + $0xa8] sm:$0xf] }
  0x27   : > { %897 = vmatpush.bf16.msra.mxu3 %v1533_v23  ;;  %v1290_v23 = vld [vmem:[%s1671_s25 + $0x98] sm:$0xf0]  ;;  %v1498_v33 = vld [vmem:[%s1671_s25 + $0xb4] sm:$0xf0]  ;;  %v1496_v34 = vld [vmem:[%s1671_s25 + $0xac] sm:$0xf] }
  0x28   : > { %751 = vmatpush.bf16.msra.mxu0 %v1508_v24  ;;  %v1281_v24 = vor.u32 %v1493_v17, %v1280_v16  ;;  %v1306_v35 = vld [vmem:[%s1671_s25 + $0xb8] sm:$0xf0]  ;;  %v1305_v38 = vor.u32 %v1498_v33, %v1304_v32  ;;  %v1320_v44 = vld [vmem:[%s1671_s25 + $0xc8] sm:$0xf]  ;;  %v1502_v45 = vld [vmem:[%s1671_s25 + $0xd4] sm:$0xf0] }
  0x29   : > { %800 = vmatpush.bf16.msra.mxu1 %v1516_v25  ;;  %v1285_v25 = vor.u32 %v1491_v18, %v1282_v19  ;;  %v1309_v39 = vor.u32 %v1496_v34, %v1306_v35  ;;  %v1500_v46 = vld [vmem:[%s1671_s25 + $0xcc] sm:$0xf]  ;;  %v1322_v47 = vld [vmem:[%s1671_s25 + $0xd8] sm:$0xf0]  ;;  %v1321_v50 = vor.u32 %v1502_v45, %v1320_v44  ;;  %v1336_v56 = vld [vmem:[%s1671_s25 + $0xe8] sm:$0xf] }
  0x2a   : > { %849 = vmatpush.bf16.msra.mxu2 %v1524_v26  ;;  %v1289_v26 = vor.u32 %v1494_v21, %v1288_v20  ;;  %v1325_v51 = vor.u32 %v1500_v46, %v1322_v47  ;;  %v1506_v57 = vld [vmem:[%s1671_s25 + $0xf4] sm:$0xf0]  ;;  %v1504_v58 = vld [vmem:[%s1671_s25 + $0xec] sm:$0xf]  ;;  %v1338_v59 = vld [vmem:[%s1671_s25 + $0xf8] sm:$0xf0] }
  0x2b   : > { %898 = vmatpush.bf16.msra.mxu3 %v1532_v27  ;;  %v1293_v27 = vor.u32 %v1492_v22, %v1290_v23  ;;  %v1337_v62 = vor.u32 %v1506_v57, %v1336_v56  ;;  %v1341_v63 = vor.u32 %v1504_v58, %v1338_v59 }
  0x2c   : > { %752 = vmatpush.bf16.msra.mxu0 %v1507_v28  ;;  %v1296_v28 = vld [vmem:[%s1671_s25 + $0xa0] sm:$0xf] }
  0x2d   : > { %801 = vmatpush.bf16.msra.mxu1 %v1515_v29  ;;  %v1497_v29 = vld [vmem:[%s1671_s25 + $0xac] sm:$0xf0] }
  0x2e   : > { %850 = vmatpush.bf16.msra.mxu2 %v1523_v30  ;;  %v1495_v30 = vld [vmem:[%s1671_s25 + $0xa4] sm:$0xf]  ;;  %v1297_v36 = vor.u32 %v1497_v29, %v1296_v28 }
  0x2f   : > { %899 = vmatpush.bf16.msra.mxu3 %v1531_v31  ;;  %753 = vmatmul.bf16.vlgmr.msra.gmra.mxu0 %v1217_v40  ;;  %v1298_v31 = vld [vmem:[%s1671_s25 + $0xb0] sm:$0xf0]  ;;  %v1312_v40 = vld [vmem:[%s1671_s25 + $0xc0] sm:$0xf] }
  0x30   : > { %802 = vmatmul.bf16.vlgmr.msra.gmra.mxu1 %v1221_v41  ;;  %v1301_v37 = vor.u32 %v1495_v30, %v1298_v31  ;;  %v1501_v41 = vld [vmem:[%s1671_s25 + $0xcc] sm:$0xf0] }
  0x31   : > { %851 = vmatmul.bf16.vlgmr.msra.gmra.mxu2 %v1225_v42  ;;  %v1499_v42 = vld [vmem:[%s1671_s25 + $0xc4] sm:$0xf]  ;;  %v1313_v48 = vor.u32 %v1501_v41, %v1312_v40 }
  0x32   : > { %900 = vmatmul.bf16.vlgmr.msra.gmra.mxu3 %v1229_v43  ;;  %v1314_v43 = vld [vmem:[%s1671_s25 + $0xd0] sm:$0xf0] }
  0x33   : > { %v1317_v49 = vor.u32 %v1499_v42, %v1314_v43 }
  0x3f   : > { %758 = vmatmul.bf16.gmra.mxu0 %v1233_v52  ;;  %v1328_v52 = vld [vmem:[%s1671_s25 + $0xe0] sm:$0xf] }
  0x40   : > { %807 = vmatmul.bf16.gmra.mxu1 %v1237_v53  ;;  %v1505_v53 = vld [vmem:[%s1671_s25 + $0xec] sm:$0xf0] }
  0x41   : > { %856 = vmatmul.bf16.gmra.mxu2 %v1241_v54  ;;  %v1503_v54 = vld [vmem:[%s1671_s25 + $0xe4] sm:$0xf]  ;;  %v1329_v60 = vor.u32 %v1505_v53, %v1328_v52 }
  0x42   : > { %905 = vmatmul.bf16.gmra.mxu3 %v1245_v55  ;;  %v1330_v55 = vld [vmem:[%s1671_s25 + $0xf0] sm:$0xf0] }
  0x43   : > { %v1333_v61 = vor.u32 %v1503_v54, %v1330_v55 }
  0x4f   : > { %763 = vmatmul.bf16.gmra.mxu0 %v1249_v0 }
  0x50   : > { %812 = vmatmul.bf16.gmra.mxu1 %v1253_v1 }
  0x51   : > { %861 = vmatmul.bf16.gmra.mxu2 %v1257_v2 }
  0x52   : > { %910 = vmatmul.bf16.gmra.mxu3 %v1261_v3 }
  0x5f   : > { %768 = vmatmul.bf16.gmra.mxu0 %v1265_v12 }
  0x60   : > { %817 = vmatmul.bf16.gmra.mxu1 %v1269_v13 }
  0x61   : > { %866 = vmatmul.bf16.gmra.mxu2 %v1273_v14 }
  0x62   : > { %915 = vmatmul.bf16.gmra.mxu3 %v1277_v15 }
  0x6f   : > { %773 = vmatmul.bf16.gmra.mxu0 %v1281_v24 }
  0x70   : > { %822 = vmatmul.bf16.gmra.mxu1 %v1285_v25 }
  0x71   : > { %871 = vmatmul.bf16.gmra.mxu2 %v1289_v26 }
  0x72   : > { %920 = vmatmul.bf16.gmra.mxu3 %v1293_v27 }
  0x7f   : > { %778 = vmatmul.bf16.gmra.mxu0 %v1297_v36 }
  0x80   : > { %827 = vmatmul.bf16.gmra.mxu1 %v1301_v37 }
  0x81   : > { %876 = vmatmul.bf16.gmra.mxu2 %v1305_v38 }
  0x82   : > { %925 = vmatmul.bf16.gmra.mxu3 %v1309_v39 }
  0x8f   : > { %783 = vmatmul.bf16.gmra.mxu0 %v1313_v48 }
  0x90   : > { %832 = vmatmul.bf16.gmra.mxu1 %v1317_v49 }
  0x91   : > { %881 = vmatmul.bf16.gmra.mxu2 %v1321_v50 }
  0x92   : > { %930 = vmatmul.bf16.gmra.mxu3 %v1325_v51 }
  0x9f   : > { %788 = vmatmul.bf16.gmra.mxu0 %v1329_v60 }
  0xa0   : > { %837 = vmatmul.bf16.gmra.mxu1 %v1333_v61 }
  0xa1   : > { %886 = vmatmul.bf16.gmra.mxu2 %v1337_v62 }
  0xa2   : > { %935 = vmatmul.bf16.gmra.mxu3 %v1341_v63 }
  0xac   : > { %v754_v0 = vpop.f32.mrf.mxu0 }
  0xad   : > { %v803_v1 = vpop.f32.mrf.mxu1 }
  0xae   : > { %v804_v2 = vadd.f32 %v803_v1, %v754_v0 }
  0xb4   : > { %v852_v3 = vpop.f32.mrf.mxu2  ;;  %v756_v6 = vpop.f32.mrf.mxu0 }
  0xb5   : > { %v901_v4 = vpop.f32.mrf.mxu3  ;;  %v853_v5 = vadd.f32 %v852_v3, %v804_v2  ;;  %v805_v7 = vpop.f32.mrf.mxu1 }
  0xb6   : > { %v806_v9 = vadd.f32 %v805_v7, %v756_v6 }
  0xb7   : > { %v902_v8 = vadd.f32 %v901_v4, %v853_v5 }
  0xb9   : > { %941 = vst [vmem:[%s1747_s29] sm:$0xff] %v902_v8  ;;  %v979_v16 = vmul.f32 %v902_v8, %v902_v8 }
  0xbc   : > { %v854_v10 = vpop.f32.mrf.mxu2  ;;  %v759_v13 = vpop.f32.mrf.mxu0 }
  0xbd   : > { %v903_v11 = vpop.f32.mrf.mxu3  ;;  %v855_v12 = vadd.f32 %v854_v10, %v806_v9  ;;  %v808_v14 = vpop.f32.mrf.mxu1 }
  0xbe   : > { %v809_v19 = vadd.f32 %v808_v14, %v759_v13 }
  0xbf   : > { %v904_v15 = vadd.f32 %v903_v11, %v855_v12 }
  0xc1   : > { %942 = vst [vmem:[%s1747_s29 + $0x8] sm:$0xff] %v904_v15  ;;  %v957_v17 = vadd.f32 %v904_v15, %v902_v8  ;;  %v980_v18 = vmul.f32 %v904_v15, %v904_v15 }
  0xc3   : > { %v995_v20 = vadd.f32 %v980_v18, %v979_v16 }
  0xc4   : > { %v857_v21 = vpop.f32.mrf.mxu2  ;;  %v761_v24 = vpop.f32.mrf.mxu0 }
  0xc5   : > { %v906_v22 = vpop.f32.mrf.mxu3  ;;  %v858_v23 = vadd.f32 %v857_v21, %v809_v19  ;;  %v810_v25 = vpop.f32.mrf.mxu1 }
  0xc6   : > { %v811_v30 = vadd.f32 %v810_v25, %v761_v24 }
  0xc7   : > { %v907_v26 = vadd.f32 %v906_v22, %v858_v23 }
  0xc9   : > { %943 = vst [vmem:[%s1747_s29 + $0x10] sm:$0xff] %v907_v26  ;;  %v958_v27 = vadd.f32 %v957_v17, %v907_v26  ;;  %v981_v28 = vmul.f32 %v907_v26, %v907_v26 }
  0xcb   : > { %v996_v29 = vadd.f32 %v995_v20, %v981_v28 }
  0xcc   : > { %v859_v31 = vpop.f32.mrf.mxu2  ;;  %v764_v34 = vpop.f32.mrf.mxu0 }
  0xcd   : > { %v908_v32 = vpop.f32.mrf.mxu3  ;;  %v860_v33 = vadd.f32 %v859_v31, %v811_v30  ;;  %v813_v35 = vpop.f32.mrf.mxu1 }
  0xce   : > { %v814_v39 = vadd.f32 %v813_v35, %v764_v34 }
  0xcf   : > { %v909_v36 = vadd.f32 %v908_v32, %v860_v33 }
  0xd1   : > { %944 = vst [vmem:[%s1747_s29 + $0x18] sm:$0xff] %v909_v36  ;;  %v959_v37 = vadd.f32 %v958_v27, %v909_v36  ;;  %v982_v38 = vmul.f32 %v909_v36, %v909_v36 }
  0xd3   : > { %v997_v40 = vadd.f32 %v996_v29, %v982_v38 }
  0xd4   : > { %v862_v41 = vpop.f32.mrf.mxu2  ;;  %v766_v44 = vpop.f32.mrf.mxu0 }
  0xd5   : > { %v911_v42 = vpop.f32.mrf.mxu3  ;;  %v863_v43 = vadd.f32 %v862_v41, %v814_v39  ;;  %v815_v45 = vpop.f32.mrf.mxu1 }
  0xd6   : > { %v816_v50 = vadd.f32 %v815_v45, %v766_v44 }
  0xd7   : > { %v912_v46 = vadd.f32 %v911_v42, %v863_v43 }
  0xd9   : > { %945 = vst [vmem:[%s1747_s29 + $0x20] sm:$0xff] %v912_v46  ;;  %v1754_v47 = vadd.f32 %v959_v37, %v912_v46  ;;  %v983_v48 = vmul.f32 %v912_v46, %v912_v46 }
  0xdb   : > { %v1756_v49 = vadd.f32 %v997_v40, %v983_v48 }
  0xdc   : > { %v864_v51 = vpop.f32.mrf.mxu2  ;;  %v769_v54 = vpop.f32.mrf.mxu0 }
  0xdd   : > { %v913_v52 = vpop.f32.mrf.mxu3  ;;  %v865_v53 = vadd.f32 %v864_v51, %v816_v50  ;;  %v818_v55 = vpop.f32.mrf.mxu1 }
  0xde   : > { %v819_v57 = vadd.f32 %v818_v55, %v769_v54 }
  0xdf   : > { %v914_v56 = vadd.f32 %v913_v52, %v865_v53 }
  0xe1   : > { %946 = vst [vmem:[%s1747_s29 + $0x28] sm:$0xff] %v914_v56  ;;  %v984_v42 = vmul.f32 %v914_v56, %v914_v56  ;;  %v961_v46 = vadd.f32 %v1754_v47, %v914_v56 }
  0xe3   : > { %v999_v53 = vadd.f32 %v1756_v49, %v984_v42 }
  0xe4   : > { %v867_v58 = vpop.f32.mrf.mxu2  ;;  %v771_v61 = vpop.f32.mrf.mxu0 }
  0xe5   : > { %v916_v59 = vpop.f32.mrf.mxu3  ;;  %v868_v60 = vadd.f32 %v867_v58, %v819_v57  ;;  %v820_v62 = vpop.f32.mrf.mxu1 }
  0xe6   : > { %v821_v0 = vadd.f32 %v820_v62, %v771_v61 }
  0xe7   : > { %v917_v63 = vadd.f32 %v916_v59, %v868_v60 }
  0xe9   : > { %947 = vst [vmem:[%s1747_s29 + $0x30] sm:$0xff] %v917_v63  ;;  %v985_v48 = vmul.f32 %v917_v63, %v917_v63  ;;  %v962_v54 = vadd.f32 %v961_v46, %v917_v63 }
  0xeb   : > { %v1000_v58 = vadd.f32 %v999_v53, %v985_v48 }
  0xec   : > { %v869_v1 = vpop.f32.mrf.mxu2  ;;  %v774_v4 = vpop.f32.mrf.mxu0 }
  0xed   : > { %v918_v2 = vpop.f32.mrf.mxu3  ;;  %v870_v3 = vadd.f32 %v869_v1, %v821_v0  ;;  %v823_v5 = vpop.f32.mrf.mxu1 }
  0xee   : > { %v824_v7 = vadd.f32 %v823_v5, %v774_v4 }
  0xef   : > { %v919_v6 = vadd.f32 %v918_v2, %v870_v3 }
  0xf1   : > { %948 = vst [vmem:[%s1747_s29 + $0x38] sm:$0xff] %v919_v6  ;;  %v986_v55 = vmul.f32 %v919_v6, %v919_v6  ;;  %v963_v59 = vadd.f32 %v962_v54, %v919_v6 }
  0xf3   : > { %v1001_v62 = vadd.f32 %v1000_v58, %v986_v55 }
  0xf4   : > { %v872_v8 = vpop.f32.mrf.mxu2  ;;  %v776_v11 = vpop.f32.mrf.mxu0 }
  0xf5   : > { %v921_v9 = vpop.f32.mrf.mxu3  ;;  %v873_v10 = vadd.f32 %v872_v8, %v824_v7  ;;  %v825_v12 = vpop.f32.mrf.mxu1 }
  0xf6   : > { %v826_v14 = vadd.f32 %v825_v12, %v776_v11 }
  0xf7   : > { %v922_v13 = vadd.f32 %v921_v9, %v873_v10 }
  0xf9   : > { %949 = vst [vmem:[%s1747_s29 + $0x40] sm:$0xff] %v922_v13  ;;  %v987_v60 = vmul.f32 %v922_v13, %v922_v13  ;;  %v964_v0 = vadd.f32 %v963_v59, %v922_v13 }
  0xfb   : > { %v1002_v56 = vadd.f32 %v1001_v62, %v987_v60 }
  0xfc   : > { %v874_v15 = vpop.f32.mrf.mxu2  ;;  %v779_v18 = vpop.f32.mrf.mxu0 }
  0xfd   : > { %v923_v16 = vpop.f32.mrf.mxu3  ;;  %v875_v17 = vadd.f32 %v874_v15, %v826_v14  ;;  %v828_v19 = vpop.f32.mrf.mxu1 }
  0xfe   : > { %v829_v21 = vadd.f32 %v828_v19, %v779_v18 }
  0xff   : > { %v924_v20 = vadd.f32 %v923_v16, %v875_v17 }
 0x101   : > { %950 = vst [vmem:[%s1747_s29 + $0x48] sm:$0xff] %v924_v20  ;;  %v988_v1 = vmul.f32 %v924_v20, %v924_v20  ;;  %v965_v3 = vadd.f32 %v964_v0, %v924_v20 }
 0x103   : > { %v1003_v7 = vadd.f32 %v1002_v56, %v988_v1 }
 0x104   : > { %v877_v22 = vpop.f32.mrf.mxu2  ;;  %v781_v25 = vpop.f32.mrf.mxu0 }
 0x105   : > { %v926_v23 = vpop.f32.mrf.mxu3  ;;  %v878_v24 = vadd.f32 %v877_v22, %v829_v21  ;;  %v830_v26 = vpop.f32.mrf.mxu1 }
 0x106   : > { %v831_v28 = vadd.f32 %v830_v26, %v781_v25 }
 0x107   : > { %v927_v27 = vadd.f32 %v926_v23, %v878_v24 }
 0x109   : > { %951 = vst [vmem:[%s1747_s29 + $0x50] sm:$0xff] %v927_v27  ;;  %v989_v4 = vmul.f32 %v927_v27, %v927_v27  ;;  %v966_v49 = vadd.f32 %v965_v3, %v927_v27 }
 0x10b   : > { %v1004_v6 = vadd.f32 %v1003_v7, %v989_v4 }
 0x10c   : > { %v879_v29 = vpop.f32.mrf.mxu2  ;;  %v784_v32 = vpop.f32.mrf.mxu0 }
 0x10d   : > { %v928_v30 = vpop.f32.mrf.mxu3  ;;  %v880_v31 = vadd.f32 %v879_v29, %v831_v28  ;;  %v833_v33 = vpop.f32.mrf.mxu1 }
 0x10e   : > { %v834_v35 = vadd.f32 %v833_v33, %v784_v32 }
 0x10f   : > { %v929_v34 = vadd.f32 %v928_v30, %v880_v31 }
 0x111   : > { %952 = vst [vmem:[%s1747_s29 + $0x58] sm:$0xff] %v929_v34  ;;  %v990_v63 = vmul.f32 %v929_v34, %v929_v34  ;;  %v967_v11 = vadd.f32 %v966_v49, %v929_v34 }
 0x113   : > { %v1005_v13 = vadd.f32 %v1004_v6, %v990_v63 }
 0x114   : > { %v882_v36 = vpop.f32.mrf.mxu2  ;;  %v786_v39 = vpop.f32.mrf.mxu0 }
 0x115   : > { %v931_v37 = vpop.f32.mrf.mxu3  ;;  %v883_v38 = vadd.f32 %v882_v36, %v834_v35  ;;  %v835_v40 = vpop.f32.mrf.mxu1 }
 0x116   : > { %v836_v43 = vadd.f32 %v835_v40, %v786_v39 }
 0x117   : > { %v932_v41 = vadd.f32 %v931_v37, %v883_v38 }
 0x119   : > { %953 = vst [vmem:[%s1747_s29 + $0x60] sm:$0xff] %v932_v41  ;;  %v991_v12 = vmul.f32 %v932_v41, %v932_v41  ;;  %v968_v14 = vadd.f32 %v967_v11, %v932_v41 }
 0x11b   : > { %v1006_v18 = vadd.f32 %v1005_v13, %v991_v12 }
 0x11c   : > { %v884_v44 = vpop.f32.mrf.mxu2  ;;  %v789_v51 = vpop.f32.mrf.mxu0 }
 0x11d   : > { %v933_v45 = vpop.f32.mrf.mxu3  ;;  %v885_v50 = vadd.f32 %v884_v44, %v836_v43  ;;  %v838_v52 = vpop.f32.mrf.mxu1 }
 0x11e   : > { %v839_v61 = vadd.f32 %v838_v52, %v789_v51 }
 0x11f   : > { %v934_v57 = vadd.f32 %v933_v45, %v885_v50 }
 0x121   : > { %954 = vst [vmem:[%s1747_s29 + $0x68] sm:$0xff] %v934_v57  ;;  %v992_v15 = vmul.f32 %v934_v57, %v934_v57  ;;  %v969_v19 = vadd.f32 %v968_v14, %v934_v57 }
 0x123   : > { %v1007_v23 = vadd.f32 %v1006_v18, %v992_v15 }
 0x124   : > { %v887_v2 = vpop.f32.mrf.mxu2  ;;  %v791_v9 = vpop.f32.mrf.mxu0 }
 0x125   : > { %v936_v47 = vpop.f32.mrf.mxu3  ;;  %v888_v5 = vadd.f32 %v887_v2, %v839_v61  ;;  %v840_v10 = vpop.f32.mrf.mxu1 }
 0x126   : > { %v841_v16 = vadd.f32 %v840_v10, %v791_v9 }
 0x127   : > { %v937_v8 = vadd.f32 %v936_v47, %v888_v5 }
 0x129   : > { %955 = vst [vmem:[%s1747_s29 + $0x70] sm:$0xff] %v937_v8  ;;  %v993_v20 = vmul.f32 %v937_v8, %v937_v8  ;;  %v970_v24 = vadd.f32 %v969_v19, %v937_v8 }
 0x12b   : > { %v1008_v26 = vadd.f32 %v1007_v23, %v993_v20 }
 0x12c   : > { %v889_v17 = vpop.f32.mrf.mxu2 }
 0x12d   : > { %v890_v21 = vadd.f32 %v889_v17, %v841_v16  ;;  %v938_v22 = vpop.f32.mrf.mxu3 }
 0x12f   : > { %v939_v25 = vadd.f32 %v938_v22, %v890_v21 }
 0x131   : > { %956 = vst [vmem:[%s1747_s29 + $0x78] sm:$0xff] %v939_v25  ;;  %v971_v27 = vadd.f32 %v970_v24, %v939_v25  ;;  %v994_v28 = vmul.f32 %v939_v25, %v939_v25 }
 0x133   : > { %v972_v29 = vrot.slane %v971_v27, 4  ;;  %v1009_v30 = vadd.f32 %v1008_v26, %v994_v28 }
 0x135   : > { %v973_v31 = vadd.f32 %v972_v29, %v971_v27  ;;  %v1010_v32 = vrot.slane %v1009_v30, 4 }
 0x137   : > { %v974_v33 = vrot.slane %v973_v31, 2  ;;  %v1011_v34 = vadd.f32 %v1010_v32, %v1009_v30 }
 0x139   : > { %v975_v35 = vadd.f32 %v974_v33, %v973_v31  ;;  %v1012_v36 = vrot.slane %v1011_v34, 2 }
 0x13b   : > { %v976_v37 = vrot.slane %v975_v35, 1  ;;  %v1013_v38 = vadd.f32 %v1012_v36, %v1011_v34 }
 0x13d   : > { %v977_v39 = vadd.f32 %v976_v37, %v975_v35  ;;  %v1014_v40 = vrot.slane %v1013_v38, 1 }
 0x13f   : > { %978 = vst [vmem:[%s289_s7] sm:$0xff] %v977_v39  ;;  %v1015_v41 = vadd.f32 %v1014_v40, %v1013_v38 }
 0x141   : > { %1016 = vst [vmem:[%s296_s10] sm:$0xff] %v1015_v41 }
 0x142 PF: > { %s15_s17 = sadd.s32 1, %s1585_s17   ;;  %s1792_s15 = smov %s1581_s16 }
 0x143   : > { %p12_p5 = scmp.ge.s32.totalorder %s15_s17, 6   ;;  %s1793_s16 = smov %s1795_s18 }
 0x145   :  { %14 = sbr.rel (!%p12_p5) target bundleno = 2 (0x2), region = 85 }

// kernel: generator_forward.14
= control target key start
LH: loop header
LB: loop body
LE: loop exit
PB: predicated region body
PF: predicated region fallthrough
CT: control target
= control target key end

     0   :  { %s531_s12 = smov 0   ;;  %s533_s13 = smov 0   ;;  %s638_s0 = inlined_call_operand.vmem [shape: f32[4,128,128], index: 0, kind: input, shape index: {}]   ;;  %s639_s1 = inlined_call_operand.vmem [shape: f32[1,128], index: 1, kind: input, shape index: {}]   ;;  %s640_s2 = inlined_call_operand.vmem [shape: f32[1,128], index: 2, kind: input, shape index: {}]   ;;  %s641_s3 = inlined_call_operand.vmem [shape: bf16[4,128,128], index: 3, kind: output, shape index: {}]  }
   0x1   :  { %s535_s14 = smov 0  }
   0x2 LB: > { %s25_s15 = sadd.s32 1, %s505_s13  ;;  %p405_p0 = scmp.ge.s32.totalorder %s509_s14, 1  ;;  %s509_s14 = sphi %s535_s14, %s13_s14   ;;  %s505_s13 = sphi %s533_s13, %s643_s13   ;;  %s501_s12 = sphi %s531_s12, %s642_s12  }
   0x3   : > { %p27_p1 = scmp.ge.s32.totalorder %s25_s15, 4  ;;  %p158_p2 = scmp.lt.s32.totalorder %s509_s14, 5 }
   0x5   : > { %s645_s15 = smov (%p27_p1, %s25_s15), 0  ;;  %p159_p3 = pnand %p405_p0, %p158_p2 }
   0x6   : > { %p191_p4 = scmp.lt.s32.totalorder (!%p159_p3), %s501_s12, 3 }
   0x7   : > { %162 = sbr.rel (%p159_p3) target bundleno = 36 (0x24), region = 32 }
   0xc   : > { %s647_s12 = smov (!%p191_p4, %s501_s12), 3  ;;  %v554_v0 = vld [vmem:[%s639_s1] ss:$0 sm:$0xff] }
   0xd   : > { %s412_s18 = sshll.u32 %s647_s12, 7  ;;  %v565_v1 = vld [vmem:[%s640_s2] ss:$0 sm:$0xff]  ;;  %s413_s24 = sshll.u32 %s647_s12, 6 }
   0xe   : > { %s560_s21 = scalar_lea.vmem %s638_s0, %s412_s18  ;;  %s597_s27 = scalar_lea.vmem %s641_s3, %s413_s24 }
   0xf   : > { %v210_v2 = vld [vmem:[%s560_s21] sm:$0xff]  ;;  %v211_v3 = vld [vmem:[%s560_s21 + $0x8] sm:$0xff]  ;;  %v212_v4 = vld [vmem:[%s560_s21 + $0x10] sm:$0xff] }
  0x10   : > { %v230_v5 = vmul.f32 %v554_v0, %v210_v2  ;;  %v231_v6 = vmul.f32 %v554_v0, %v211_v3  ;;  %v213_v7 = vld [vmem:[%s560_s21 + $0x18] sm:$0xff]  ;;  %v232_v8 = vmul.f32 %v554_v0, %v212_v4  ;;  %v214_v9 = vld [vmem:[%s560_s21 + $0x20] sm:$0xff]  ;;  %v215_v10 = vld [vmem:[%s560_s21 + $0x28] sm:$0xff] }
  0x11   : > { %v233_v11 = vmul.f32 %v554_v0, %v213_v7  ;;  %v234_v12 = vmul.f32 %v554_v0, %v214_v9  ;;  %v235_v13 = vmul.f32 %v554_v0, %v215_v10  ;;  %v216_v14 = vld [vmem:[%s560_s21 + $0x30] sm:$0xff]  ;;  %v217_v15 = vld [vmem:[%s560_s21 + $0x38] sm:$0xff]  ;;  %v218_v24 = vld [vmem:[%s560_s21 + $0x40] sm:$0xff] }
  0x12   : > { %v250_v16 = vadd.f32 %v565_v1, %v230_v5  ;;  %v251_v17 = vadd.f32 %v565_v1, %v231_v6  ;;  %v252_v18 = vadd.f32 %v565_v1, %v232_v8  ;;  %v236_v19 = vmul.f32 %v554_v0, %v216_v14  ;;  %v219_v25 = vld [vmem:[%s560_s21 + $0x48] sm:$0xff]  ;;  %v220_v30 = vld [vmem:[%s560_s21 + $0x50] sm:$0xff]  ;;  %v221_v35 = vld [vmem:[%s560_s21 + $0x58] sm:$0xff] }
  0x13   : > { %v253_v20 = vadd.f32 %v565_v1, %v233_v11  ;;  %v254_v21 = vadd.f32 %v565_v1, %v234_v12  ;;  %v255_v22 = vadd.f32 %v565_v1, %v235_v13  ;;  %v237_v23 = vmul.f32 %v554_v0, %v217_v15  ;;  %v222_v36 = vld [vmem:[%s560_s21 + $0x60] sm:$0xff]  ;;  %v223_v41 = vld [vmem:[%s560_s21 + $0x68] sm:$0xff]  ;;  %v224_v42 = vld [vmem:[%s560_s21 + $0x70] sm:$0xff] }
  0x14   : > { %v266_v26 = vmax.f32 %v250_v16, 0.0  ;;  %v267_v27 = vmax.f32 %v251_v17, 0.0  ;;  %v268_v28 = vmax.f32 %v252_v18, 0.0  ;;  %v256_v29 = vadd.f32 %v565_v1, %v236_v19  ;;  %v225_v51 = vld [vmem:[%s560_s21 + $0x78] sm:$0xff] }
  0x15   : > { %v269_v31 = vmax.f32 %v253_v20, 0.0  ;;  %v270_v32 = vmax.f32 %v254_v21, 0.0  ;;  %v271_v33 = vmax.f32 %v255_v22, 0.0  ;;  %v257_v34 = vadd.f32 %v565_v1, %v237_v23 }
  0x16   : > { %v417_v37 = vpack.c.bf16 %v267_v27, %v266_v26  ;;  %v272_v38 = vmax.f32 %v256_v29, 0.0  ;;  %v238_v39 = vmul.f32 %v554_v0, %v218_v24  ;;  %v239_v40 = vmul.f32 %v554_v0, %v219_v25 }
  0x17   : > { %v422_v43 = vpack.c.bf16 %v269_v31, %v268_v28  ;;  %v427_v44 = vpack.c.bf16 %v271_v33, %v270_v32  ;;  %v273_v45 = vmax.f32 %v257_v34, 0.0  ;;  %v240_v46 = vmul.f32 %v554_v0, %v220_v30 }
  0x18   : > { %418 = vst [vmem:[%s597_s27] sm:$0xff] %v417_v37   ;;  %v258_v47 = vadd.f32 %v565_v1, %v238_v39  ;;  %v259_v48 = vadd.f32 %v565_v1, %v239_v40  ;;  %v241_v49 = vmul.f32 %v554_v0, %v221_v35  ;;  %v242_v50 = vmul.f32 %v554_v0, %v222_v36 }
  0x19   : > { %454 = vst [vmem:[%s597_s27 + $0x8] sm:$0xff] %v422_v43   ;;  %v432_v52 = vpack.c.bf16 %v273_v45, %v272_v38  ;;  %v260_v53 = vadd.f32 %v565_v1, %v240_v46  ;;  %v243_v54 = vmul.f32 %v554_v0, %v223_v41  ;;  %v244_v55 = vmul.f32 %v554_v0, %v224_v42 }
  0x1a   : > { %455 = vst [vmem:[%s597_s27 + $0x10] sm:$0xff] %v427_v44   ;;  %v274_v56 = vmax.f32 %v258_v47, 0.0  ;;  %v275_v57 = vmax.f32 %v259_v48, 0.0  ;;  %v261_v58 = vadd.f32 %v565_v1, %v241_v49  ;;  %v262_v59 = vadd.f32 %v565_v1, %v242_v50 }
  0x1b   : > { %456 = vst [vmem:[%s597_s27 + $0x18] sm:$0xff] %v432_v52   ;;  %v276_v60 = vmax.f32 %v260_v53, 0.0  ;;  %v263_v61 = vadd.f32 %v565_v1, %v243_v54  ;;  %v245_v62 = vmul.f32 %v554_v0, %v225_v51  ;;  %v264_v63 = vadd.f32 %v565_v1, %v244_v55 }
  0x1c   : > { %v437_v2 = vpack.c.bf16 %v275_v57, %v274_v56  ;;  %v277_v3 = vmax.f32 %v261_v58, 0.0  ;;  %v278_v4 = vmax.f32 %v262_v59, 0.0 }
  0x1d   : > { %v279_v5 = vmax.f32 %v263_v61, 0.0  ;;  %v265_v6 = vadd.f32 %v565_v1, %v245_v62  ;;  %v280_v7 = vmax.f32 %v264_v63, 0.0 }
  0x1e   : > { %457 = vst [vmem:[%s597_s27 + $0x20] sm:$0xff] %v437_v2   ;;  %v442_v8 = vpack.c.bf16 %v277_v3, %v276_v60 }
  0x1f   : > { %v447_v9 = vpack.c.bf16 %v279_v5, %v278_v4  ;;  %v281_v10 = vmax.f32 %v265_v6, 0.0 }
  0x20   : > { %458 = vst [vmem:[%s597_s27 + $0x28] sm:$0xff] %v442_v8  }
  0x21   : > { %459 = vst [vmem:[%s597_s27 + $0x30] sm:$0xff] %v447_v9   ;;  %v452_v11 = vpack.c.bf16 %v281_v10, %v280_v7 }
  0x23   : > { %460 = vst [vmem:[%s597_s27 + $0x38] sm:$0xff] %v452_v11  }
  0x24 PF: > { %s13_s14 = sadd.s32 1, %s509_s14   ;;  %s642_s12 = smov %s505_s13 }
  0x25   : > { %p10_p5 = scmp.ge.s32.totalorder %s13_s14, 6   ;;  %s643_s13 = smov %s645_s15 }
  0x27   :  { %12 = sbr.rel (!%p10_p5) target bundleno = 2 (0x2), region = 62 }

// kernel: generator_forward.15
= control target key start
LH: loop header
LB: loop body
LE: loop exit
PB: predicated region body
PF: predicated region fallthrough
CT: control target
= control target key end

     0   :  { %s2106_s15 = smov 0   ;;  %s2108_s16 = smov 0   ;;  %s2575_s0 = inlined_call_operand.vmem [shape: bf16[4,512,256], index: 0, kind: input, shape index: {}]   ;;  %s2576_s1 = inlined_call_operand.vmem [shape: bf16[4,256,128], index: 1, kind: input, shape index: {}]   ;;  %s2577_s2 = inlined_call_operand.vmem [shape: f32[4,512,128], index: 2, kind: output, shape index: {0}]   ;;  %s2578_s3 = inlined_call_operand.vmem [shape: f32[4,1,8,128], index: 3, kind: output, shape index: {1}]   ;;  %s2579_s4 = inlined_call_operand.vmem [shape: f32[4,1,8,128], index: 4, kind: output, shape index: {2}]  }
   0x1   :  { %s2110_s17 = smov 0  }
   0x2 LB: > { %s27_s18 = sadd.s32 1, %s2075_s16  ;;  %p1603_p0 = scmp.ge.s32.totalorder %s2079_s17, 1  ;;  %s2079_s17 = sphi %s2110_s17, %s15_s17   ;;  %s2075_s16 = sphi %s2108_s16, %s2581_s16   ;;  %s2071_s15 = sphi %s2106_s15, %s2580_s15  }
   0x3   : > { %p29_p1 = scmp.ge.s32.totalorder %s27_s18, 4  ;;  %p203_p2 = scmp.lt.s32.totalorder %s2079_s17, 5 }
   0x5   : > { %s2583_s18 = smov (%p29_p1, %s27_s18), 0  ;;  %p204_p3 = pnand %p1603_p0, %p203_p2 }
   0x6   : > { %p258_p4 = scmp.lt.s32.totalorder (!%p204_p3), %s2071_s15, 3 }
   0x7   : > { %207 = sbr.rel (%p204_p3) target bundleno = 505 (0x1f9), region = 28 }
   0xc   : > { %s2585_s15 = smov (!%p258_p4, %s2071_s15), 3 }
   0xd   : > { %s1935_s19 = sshll.u32 %s2585_s15, 7  ;;  %s1934_s23 = sshll.u32 %s2585_s15, 9 }
   0xe   : > { %s2130_s22 = scalar_lea.vmem %s2576_s1, %s1935_s19  ;;  %s2150_s26 = scalar_lea.vmem %s2575_s0, %s1934_s23 }
   0xf   : > { %v2008_v0 = vld [vmem:[%s2130_s22 + $0x38] sm:$0xff]  ;;  %v2007_v2 = vld [vmem:[%s2130_s22 + $0x30] sm:$0xff]  ;;  %v2006_v4 = vld [vmem:[%s2130_s22 + $0x28] sm:$0xff]  ;;  %s2225_s29 = scalar_lea.vmem %s2577_s2, %s1934_s23  ;;  %s1610_s30 = sshll.u32 %s2585_s15, 3 }
  0x10   : > { %v2016_v1 = vld [vmem:[%s2130_s22 + $0x78] sm:$0xff]  ;;  %809 = vmatpush.bf16.msra.mxu0 %v2008_v0  ;;  %v2015_v3 = vld [vmem:[%s2130_s22 + $0x70] sm:$0xff]  ;;  %2017 = vmatpush.bf16.msra.mxu2 %v2008_v0  ;;  %v2014_v5 = vld [vmem:[%s2130_s22 + $0x68] sm:$0xff]  ;;  %s289_s7 = scalar_lea.vmem %s2578_s3, %s1610_s30  ;;  %s296_s10 = scalar_lea.vmem %s2579_s4, %s1610_s30 }
  0x11   : > { %978 = vmatpush.bf16.msra.mxu1 %v2016_v1  ;;  %2025 = vmatpush.bf16.msra.mxu3 %v2016_v1  ;;  %v2005_v6 = vld [vmem:[%s2130_s22 + $0x20] sm:$0xff]  ;;  %v2004_v8 = vld [vmem:[%s2130_s22 + $0x18] sm:$0xff]  ;;  %v2003_v10 = vld [vmem:[%s2130_s22 + $0x10] sm:$0xff] }
  0x12   : > { %v2013_v7 = vld [vmem:[%s2130_s22 + $0x60] sm:$0xff]  ;;  %v2012_v9 = vld [vmem:[%s2130_s22 + $0x58] sm:$0xff]  ;;  %v2011_v11 = vld [vmem:[%s2130_s22 + $0x50] sm:$0xff] }
  0x13   : > { %v2002_v12 = vld [vmem:[%s2130_s22 + $0x8] sm:$0xff]  ;;  %v2001_v14 = vld [vmem:[%s2130_s22] sm:$0xff]  ;;  %v1622_v22 = vld [vmem:[%s2150_s26 + $0x10] sm:$0xf] }
  0x14   : > { %810 = vmatpush.bf16.msra.mxu0 %v2007_v2  ;;  %2018 = vmatpush.bf16.msra.mxu2 %v2007_v2  ;;  %v2010_v13 = vld [vmem:[%s2130_s22 + $0x48] sm:$0xff]  ;;  %v2009_v15 = vld [vmem:[%s2130_s22 + $0x40] sm:$0xff]  ;;  %v1940_v23 = vld [vmem:[%s2150_s26 + $0x14] sm:$0xf0] }
  0x15   : > { %979 = vmatpush.bf16.msra.mxu1 %v2015_v3  ;;  %2026 = vmatpush.bf16.msra.mxu3 %v2015_v3  ;;  %v1614_v16 = vld [vmem:[%s2150_s26] sm:$0xf]  ;;  %v1938_v17 = vld [vmem:[%s2150_s26 + $0x4] sm:$0xf0]  ;;  %v1937_v18 = vld [vmem:[%s2150_s26 + $0x4] sm:$0xf]  ;;  %v1623_v26 = vor.u32 %v1940_v23, %v1622_v22 }
  0x16   : > { %v1616_v19 = vld [vmem:[%s2150_s26 + $0x8] sm:$0xf0]  ;;  %v1615_v20 = vor.u32 %v1938_v17, %v1614_v16  ;;  %v1939_v24 = vld [vmem:[%s2150_s26 + $0x14] sm:$0xf]  ;;  %v1624_v25 = vld [vmem:[%s2150_s26 + $0x18] sm:$0xf0] }
  0x17   : > { %v1619_v21 = vor.u32 %v1937_v18, %v1616_v19  ;;  %v1627_v27 = vor.u32 %v1939_v24, %v1624_v25  ;;  %v1742_v28 = vld [vmem:[%s2150_s26 + $0x100] sm:$0xf]  ;;  %v1970_v29 = vld [vmem:[%s2150_s26 + $0x104] sm:$0xf0]  ;;  %v1969_v30 = vld [vmem:[%s2150_s26 + $0x104] sm:$0xf] }
  0x18   : > { %811 = vmatpush.bf16.msra.mxu0 %v2006_v4  ;;  %2019 = vmatpush.bf16.msra.mxu2 %v2006_v4  ;;  %v1743_v31 = vor.u32 %v1970_v29, %v1742_v28  ;;  %v1744_v32 = vld [vmem:[%s2150_s26 + $0x108] sm:$0xf0]  ;;  %v1630_v34 = vld [vmem:[%s2150_s26 + $0x20] sm:$0xf]  ;;  %v1942_v35 = vld [vmem:[%s2150_s26 + $0x24] sm:$0xf0] }
  0x19   : > { %980 = vmatpush.bf16.msra.mxu1 %v2014_v5  ;;  %2027 = vmatpush.bf16.msra.mxu3 %v2014_v5  ;;  %v1747_v33 = vor.u32 %v1969_v30, %v1744_v32  ;;  %v1941_v36 = vld [vmem:[%s2150_s26 + $0x24] sm:$0xf]  ;;  %v1632_v37 = vld [vmem:[%s2150_s26 + $0x28] sm:$0xf0]  ;;  %v1631_v38 = vor.u32 %v1942_v35, %v1630_v34  ;;  %v1750_v40 = vld [vmem:[%s2150_s26 + $0x110] sm:$0xf] }
  0x1a   : > { %v1635_v39 = vor.u32 %v1941_v36, %v1632_v37  ;;  %v1972_v41 = vld [vmem:[%s2150_s26 + $0x114] sm:$0xf0]  ;;  %v1971_v42 = vld [vmem:[%s2150_s26 + $0x114] sm:$0xf]  ;;  %v1752_v44 = vld [vmem:[%s2150_s26 + $0x118] sm:$0xf0] }
  0x1b   : > { %v1751_v43 = vor.u32 %v1972_v41, %v1750_v40  ;;  %v1755_v45 = vor.u32 %v1971_v42, %v1752_v44  ;;  %v1638_v46 = vld [vmem:[%s2150_s26 + $0x30] sm:$0xf]  ;;  %v1944_v47 = vld [vmem:[%s2150_s26 + $0x34] sm:$0xf0]  ;;  %v1943_v48 = vld [vmem:[%s2150_s26 + $0x34] sm:$0xf] }
  0x1c   : > { %812 = vmatpush.bf16.msra.mxu0 %v2005_v6  ;;  %2020 = vmatpush.bf16.msra.mxu2 %v2005_v6  ;;  %v1640_v49 = vld [vmem:[%s2150_s26 + $0x38] sm:$0xf0]  ;;  %v1639_v50 = vor.u32 %v1944_v47, %v1638_v46  ;;  %v1758_v52 = vld [vmem:[%s2150_s26 + $0x120] sm:$0xf]  ;;  %v1974_v53 = vld [vmem:[%s2150_s26 + $0x124] sm:$0xf0] }
  0x1d   : > { %981 = vmatpush.bf16.msra.mxu1 %v2013_v7  ;;  %2028 = vmatpush.bf16.msra.mxu3 %v2013_v7  ;;  %v1643_v51 = vor.u32 %v1943_v48, %v1640_v49  ;;  %v1973_v54 = vld [vmem:[%s2150_s26 + $0x124] sm:$0xf]  ;;  %v1759_v55 = vor.u32 %v1974_v53, %v1758_v52  ;;  %v1760_v56 = vld [vmem:[%s2150_s26 + $0x128] sm:$0xf0]  ;;  %v1646_v58 = vld [vmem:[%s2150_s26 + $0x40] sm:$0xf] }
  0x1e   : > { %v1763_v57 = vor.u32 %v1973_v54, %v1760_v56  ;;  %v1946_v59 = vld [vmem:[%s2150_s26 + $0x44] sm:$0xf0]  ;;  %v1945_v60 = vld [vmem:[%s2150_s26 + $0x44] sm:$0xf]  ;;  %v1648_v61 = vld [vmem:[%s2150_s26 + $0x48] sm:$0xf0] }
  0x1f   : > { %v1647_v62 = vor.u32 %v1946_v59, %v1646_v58  ;;  %v1651_v63 = vor.u32 %v1945_v60, %v1648_v61  ;;  %v1766_v0 = vld [vmem:[%s2150_s26 + $0x130] sm:$0xf]  ;;  %v1976_v1 = vld [vmem:[%s2150_s26 + $0x134] sm:$0xf0]  ;;  %v1975_v2 = vld [vmem:[%s2150_s26 + $0x134] sm:$0xf] }
  0x20   : > { %813 = vmatpush.bf16.msra.mxu0 %v2004_v8  ;;  %2021 = vmatpush.bf16.msra.mxu2 %v2004_v8  ;;  %v1767_v3 = vor.u32 %v1976_v1, %v1766_v0  ;;  %v1768_v4 = vld [vmem:[%s2150_s26 + $0x138] sm:$0xf0]  ;;  %v1654_v6 = vld [vmem:[%s2150_s26 + $0x50] sm:$0xf]  ;;  %v1948_v7 = vld [vmem:[%s2150_s26 + $0x54] sm:$0xf0] }
  0x21   : > { %982 = vmatpush.bf16.msra.mxu1 %v2012_v9  ;;  %2029 = vmatpush.bf16.msra.mxu3 %v2012_v9  ;;  %v1771_v5 = vor.u32 %v1975_v2, %v1768_v4  ;;  %v1947_v8 = vld [vmem:[%s2150_s26 + $0x54] sm:$0xf]  ;;  %v1656_v9 = vld [vmem:[%s2150_s26 + $0x58] sm:$0xf0]  ;;  %v1776_v16 = vld [vmem:[%s2150_s26 + $0x148] sm:$0xf0] }
  0x22   : > { %v1662_v18 = vld [vmem:[%s2150_s26 + $0x60] sm:$0xf]  ;;  %v1950_v19 = vld [vmem:[%s2150_s26 + $0x64] sm:$0xf0]  ;;  %v1782_v24 = vld [vmem:[%s2150_s26 + $0x150] sm:$0xf] }
  0x23   : > { %v1663_v22 = vor.u32 %v1950_v19, %v1662_v18  ;;  %v1980_v25 = vld [vmem:[%s2150_s26 + $0x154] sm:$0xf0]  ;;  %v1784_v28 = vld [vmem:[%s2150_s26 + $0x158] sm:$0xf0]  ;;  %v1670_v30 = vld [vmem:[%s2150_s26 + $0x70] sm:$0xf] }
  0x24   : > { %814 = vmatpush.bf16.msra.mxu0 %v2003_v10  ;;  %2022 = vmatpush.bf16.msra.mxu2 %v2003_v10  ;;  %v1655_v10 = vor.u32 %v1948_v7, %v1654_v6  ;;  %v1951_v32 = vld [vmem:[%s2150_s26 + $0x74] sm:$0xf]  ;;  %v1790_v36 = vld [vmem:[%s2150_s26 + $0x160] sm:$0xf]  ;;  %v1982_v37 = vld [vmem:[%s2150_s26 + $0x164] sm:$0xf0] }
  0x25   : > { %983 = vmatpush.bf16.msra.mxu1 %v2011_v11  ;;  %2030 = vmatpush.bf16.msra.mxu3 %v2011_v11  ;;  %v1659_v11 = vor.u32 %v1947_v8, %v1656_v9  ;;  %v1792_v40 = vld [vmem:[%s2150_s26 + $0x168] sm:$0xf0]  ;;  %v1678_v42 = vld [vmem:[%s2150_s26 + $0x80] sm:$0xf]  ;;  %v1953_v44 = vld [vmem:[%s2150_s26 + $0x84] sm:$0xf] }
  0x26   : > { %v1984_v52 = vld [vmem:[%s2150_s26 + $0x174] sm:$0xf0]  ;;  %v1983_v53 = vld [vmem:[%s2150_s26 + $0x174] sm:$0xf]  ;;  %v1688_v2 = vld [vmem:[%s2150_s26 + $0x98] sm:$0xf0] }
  0x27   : > { %v1956_v0 = vld [vmem:[%s2150_s26 + $0x94] sm:$0xf0]  ;;  %v1955_v1 = vld [vmem:[%s2150_s26 + $0x94] sm:$0xf]  ;;  %v1806_v9 = vld [vmem:[%s2150_s26 + $0x180] sm:$0xf] }
  0x28   : > { %815 = vmatpush.bf16.msra.mxu0 %v2002_v12  ;;  %2023 = vmatpush.bf16.msra.mxu2 %v2002_v12  ;;  %v1774_v12 = vld [vmem:[%s2150_s26 + $0x140] sm:$0xf] }
  0x29   : > { %984 = vmatpush.bf16.msra.mxu1 %v2010_v13  ;;  %2031 = vmatpush.bf16.msra.mxu3 %v2010_v13  ;;  %v1978_v13 = vld [vmem:[%s2150_s26 + $0x144] sm:$0xf0] }
  0x2c   : > { %816 = vmatpush.bf16.msra.mxu0 %v2001_v14  ;;  %2024 = vmatpush.bf16.msra.mxu2 %v2001_v14  ;;  %v1977_v14 = vld [vmem:[%s2150_s26 + $0x144] sm:$0xf] }
  0x2d   : > { %985 = vmatpush.bf16.msra.mxu1 %v2009_v15  ;;  %2032 = vmatpush.bf16.msra.mxu3 %v2009_v15  ;;  %v1775_v15 = vor.u32 %v1978_v13, %v1774_v12  ;;  %v1779_v17 = vor.u32 %v1977_v14, %v1776_v16 }
  0x2f   : > { %817 = vmatmul.bf16.vlgmr.msra.gmra.mxu0 %v1615_v20  ;;  %897 = vmatmul.bf16.vlgmr.msra.gmra.mxu2 %v1743_v31  ;;  %v1949_v20 = vld [vmem:[%s2150_s26 + $0x64] sm:$0xf]  ;;  %v1952_v31 = vld [vmem:[%s2150_s26 + $0x74] sm:$0xf0] }
  0x30   : > { %986 = vmatmul.bf16.vlgmr.msra.gmra.mxu1 %v1619_v21  ;;  %1066 = vmatmul.bf16.vlgmr.msra.gmra.mxu3 %v1747_v33  ;;  %v1664_v21 = vld [vmem:[%s2150_s26 + $0x68] sm:$0xf0]  ;;  %v1672_v33 = vld [vmem:[%s2150_s26 + $0x78] sm:$0xf0]  ;;  %v1671_v34 = vor.u32 %v1952_v31, %v1670_v30 }
  0x31   : > { %v1667_v23 = vor.u32 %v1949_v20, %v1664_v21  ;;  %v1675_v35 = vor.u32 %v1951_v32, %v1672_v33 }
  0x3f   : > { %822 = vmatmul.bf16.gmra.mxu0 %v1623_v26  ;;  %902 = vmatmul.bf16.gmra.mxu2 %v1751_v43  ;;  %v1979_v26 = vld [vmem:[%s2150_s26 + $0x154] sm:$0xf]  ;;  %v1954_v43 = vld [vmem:[%s2150_s26 + $0x84] sm:$0xf0] }
  0x40   : > { %991 = vmatmul.bf16.gmra.mxu1 %v1627_v27  ;;  %1071 = vmatmul.bf16.gmra.mxu3 %v1755_v45  ;;  %v1783_v27 = vor.u32 %v1980_v25, %v1782_v24  ;;  %v1787_v29 = vor.u32 %v1979_v26, %v1784_v28  ;;  %v1680_v45 = vld [vmem:[%s2150_s26 + $0x88] sm:$0xf0]  ;;  %v1679_v46 = vor.u32 %v1954_v43, %v1678_v42  ;;  %v1694_v25 = vld [vmem:[%s2150_s26 + $0xa0] sm:$0xf]  ;;  %v1958_v26 = vld [vmem:[%s2150_s26 + $0xa4] sm:$0xf0] }
  0x41   : > { %v1683_v47 = vor.u32 %v1953_v44, %v1680_v45  ;;  %v1696_v28 = vld [vmem:[%s2150_s26 + $0xa8] sm:$0xf0]  ;;  %v1695_v31 = vor.u32 %v1958_v26, %v1694_v25  ;;  %v1816_v45 = vld [vmem:[%s2150_s26 + $0x198] sm:$0xf0] }
  0x4f   : > { %827 = vmatmul.bf16.gmra.mxu0 %v1631_v38  ;;  %907 = vmatmul.bf16.gmra.mxu2 %v1759_v55  ;;  %v1981_v38 = vld [vmem:[%s2150_s26 + $0x164] sm:$0xf]  ;;  %v1800_v55 = vld [vmem:[%s2150_s26 + $0x178] sm:$0xf0] }
  0x50   : > { %996 = vmatmul.bf16.gmra.mxu1 %v1635_v39  ;;  %1076 = vmatmul.bf16.gmra.mxu3 %v1763_v57  ;;  %v1791_v39 = vor.u32 %v1982_v37, %v1790_v36  ;;  %v1795_v41 = vor.u32 %v1981_v38, %v1792_v40  ;;  %v1803_v56 = vor.u32 %v1983_v53, %v1800_v55  ;;  %v1988_v40 = vld [vmem:[%s2150_s26 + $0x194] sm:$0xf0]  ;;  %v1702_v55 = vld [vmem:[%s2150_s26 + $0xb0] sm:$0xf] }
  0x5f   : > { %832 = vmatmul.bf16.gmra.mxu0 %v1639_v50  ;;  %912 = vmatmul.bf16.gmra.mxu2 %v1767_v3 }
  0x60   : > { %1001 = vmatmul.bf16.gmra.mxu1 %v1643_v51  ;;  %1081 = vmatmul.bf16.gmra.mxu3 %v1771_v5  ;;  %v1798_v51 = vld [vmem:[%s2150_s26 + $0x170] sm:$0xf]  ;;  %v1691_v5 = vor.u32 %v1955_v1, %v1688_v2 }
  0x61   : > { %v1799_v54 = vor.u32 %v1984_v52, %v1798_v51 }
  0x6f   : > { %837 = vmatmul.bf16.gmra.mxu0 %v1647_v62  ;;  %917 = vmatmul.bf16.gmra.mxu2 %v1775_v15  ;;  %v1808_v15 = vld [vmem:[%s2150_s26 + $0x188] sm:$0xf0] }
  0x70   : > { %1006 = vmatmul.bf16.gmra.mxu1 %v1651_v63  ;;  %1086 = vmatmul.bf16.gmra.mxu3 %v1779_v17  ;;  %v1686_v63 = vld [vmem:[%s2150_s26 + $0x90] sm:$0xf] }
  0x71   : > { %v1687_v4 = vor.u32 %v1956_v0, %v1686_v63 }
  0x7f   : > { %842 = vmatmul.bf16.gmra.mxu0 %v1655_v10  ;;  %922 = vmatmul.bf16.gmra.mxu2 %v1783_v27  ;;  %v1986_v10 = vld [vmem:[%s2150_s26 + $0x184] sm:$0xf0]  ;;  %v1957_v27 = vld [vmem:[%s2150_s26 + $0xa4] sm:$0xf] }
  0x80   : > { %1011 = vmatmul.bf16.gmra.mxu1 %v1659_v11  ;;  %1091 = vmatmul.bf16.gmra.mxu3 %v1787_v29  ;;  %v1985_v11 = vld [vmem:[%s2150_s26 + $0x184] sm:$0xf]  ;;  %v1807_v14 = vor.u32 %v1986_v10, %v1806_v9  ;;  %v1699_v32 = vor.u32 %v1957_v27, %v1696_v28 }
  0x81   : > { %v1811_v16 = vor.u32 %v1985_v11, %v1808_v15  ;;  %v1824_v11 = vld [vmem:[%s2150_s26 + $0x1a8] sm:$0xf0] }
  0x8f   : > { %847 = vmatmul.bf16.gmra.mxu0 %v1663_v22  ;;  %927 = vmatmul.bf16.gmra.mxu2 %v1791_v39  ;;  %v1814_v39 = vld [vmem:[%s2150_s26 + $0x190] sm:$0xf] }
  0x90   : > { %1016 = vmatmul.bf16.gmra.mxu1 %v1667_v23  ;;  %1096 = vmatmul.bf16.gmra.mxu3 %v1795_v41  ;;  %v1987_v41 = vld [vmem:[%s2150_s26 + $0x194] sm:$0xf]  ;;  %v1815_v44 = vor.u32 %v1988_v40, %v1814_v39 }
  0x91   : > { %v1991_v39 = vld [vmem:[%s2150_s26 + $0x1b4] sm:$0xf] }
  0x9f   : > { %852 = vmatmul.bf16.gmra.mxu0 %v1671_v34  ;;  %932 = vmatmul.bf16.gmra.mxu2 %v1799_v54 }
  0xa0   : > { %1021 = vmatmul.bf16.gmra.mxu1 %v1675_v35  ;;  %1101 = vmatmul.bf16.gmra.mxu3 %v1803_v56  ;;  %v1960_v56 = vld [vmem:[%s2150_s26 + $0xb4] sm:$0xf0] }
  0xac   : > { %v818_v48 = vpop.f32.mrf.mxu0 }
  0xad   : > { %v987_v49 = vpop.f32.mrf.mxu1 }
  0xae   : > { %v988_v50 = vadd.f32 %v987_v49, %v818_v48 }
  0xaf   : > { %857 = vmatmul.bf16.gmra.mxu0 %v1679_v46  ;;  %937 = vmatmul.bf16.gmra.mxu2 %v1807_v14  ;;  %v1819_v46 = vor.u32 %v1987_v41, %v1816_v45 }
  0xb0   : > { %1147 = vst [vmem:[%s2225_s29] sm:$0xff] %v988_v50  ;;  %1026 = vmatmul.bf16.gmra.mxu1 %v1683_v47  ;;  %v1281_v60 = vmul.f32 %v988_v50, %v988_v50  ;;  %1106 = vmatmul.bf16.gmra.mxu3 %v1811_v16 }
  0xb2   : > { %v898_v21 = vpop.f32.mrf.mxu2 }
  0xb3   : > { %v1067_v22 = vpop.f32.mrf.mxu3 }
  0xb4   : > { %v820_v57 = vpop.f32.mrf.mxu0  ;;  %v2247_v30 = vadd.f32 %v1067_v22, %v898_v21  ;;  %v1710_v21 = vld [vmem:[%s2150_s26 + $0xc0] sm:$0xf]  ;;  %v1962_v22 = vld [vmem:[%s2150_s26 + $0xc4] sm:$0xf0] }
  0xb5   : > { %v989_v58 = vpop.f32.mrf.mxu1  ;;  %v1711_v27 = vor.u32 %v1962_v22, %v1710_v21  ;;  %v1726_v21 = vld [vmem:[%s2150_s26 + $0xe0] sm:$0xf]  ;;  %v1966_v22 = vld [vmem:[%s2150_s26 + $0xe4] sm:$0xf0] }
  0xb6   : > { %v990_v59 = vadd.f32 %v989_v58, %v820_v57  ;;  %1179 = vst [vmem:[%s2225_s29 + $0x100] sm:$0xff] %v2247_v30  ;;  %v1959_v57 = vld [vmem:[%s2150_s26 + $0xb4] sm:$0xf]  ;;  %v1704_v58 = vld [vmem:[%s2150_s26 + $0xb8] sm:$0xf0] }
  0xb8   : > { %1148 = vst [vmem:[%s2225_s29 + $0x8] sm:$0xff] %v990_v59  ;;  %v1211_v61 = vadd.f32 %v990_v59, %v988_v50  ;;  %v1282_v62 = vmul.f32 %v990_v59, %v990_v59 }
  0xba   : > { %v1345_v3 = vadd.f32 %v1282_v62, %v1281_v60  ;;  %v900_v36 = vpop.f32.mrf.mxu2  ;;  %v1707_v62 = vor.u32 %v1959_v57, %v1704_v58 }
  0xbb   : > { %v1069_v37 = vpop.f32.mrf.mxu3 }
  0xbc   : > { %v823_v6 = vpop.f32.mrf.mxu0  ;;  %v2251_v38 = vadd.f32 %v1069_v37, %v900_v36  ;;  %v1830_v36 = vld [vmem:[%s2150_s26 + $0x1b0] sm:$0xf]  ;;  %v1992_v37 = vld [vmem:[%s2150_s26 + $0x1b4] sm:$0xf0] }
  0xbd   : > { %v992_v7 = vpop.f32.mrf.mxu1 }
  0xbe   : > { %v993_v8 = vadd.f32 %v992_v7, %v823_v6  ;;  %1180 = vst [vmem:[%s2225_s29 + $0x108] sm:$0xff] %v2251_v38  ;;  %v1990_v6 = vld [vmem:[%s2150_s26 + $0x1a4] sm:$0xf0]  ;;  %v1989_v7 = vld [vmem:[%s2150_s26 + $0x1a4] sm:$0xf] }
  0xbf   : > { %862 = vmatmul.bf16.gmra.mxu0 %v1687_v4  ;;  %942 = vmatmul.bf16.gmra.mxu2 %v1815_v44 }
  0xc0   : > { %1149 = vst [vmem:[%s2225_s29 + $0x10] sm:$0xff] %v993_v8  ;;  %v1212_v12 = vadd.f32 %v1211_v61, %v993_v8  ;;  %v1283_v13 = vmul.f32 %v993_v8, %v993_v8  ;;  %1031 = vmatmul.bf16.gmra.mxu1 %v1691_v5  ;;  %1111 = vmatmul.bf16.gmra.mxu3 %v1819_v46  ;;  %v1822_v5 = vld [vmem:[%s2150_s26 + $0x1a0] sm:$0xf] }
  0xc1   : > { %v1703_v61 = vor.u32 %v1960_v56, %v1702_v55  ;;  %v1823_v10 = vor.u32 %v1990_v6, %v1822_v5  ;;  %v1963_v55 = vld [vmem:[%s2150_s26 + $0xd4] sm:$0xf]  ;;  %v1720_v56 = vld [vmem:[%s2150_s26 + $0xd8] sm:$0xf0]  ;;  %v1838_v5 = vld [vmem:[%s2150_s26 + $0x1c0] sm:$0xf] }
  0xc2   : > { %v1346_v17 = vadd.f32 %v1345_v3, %v1283_v13  ;;  %v903_v51 = vpop.f32.mrf.mxu2  ;;  %v1994_v6 = vld [vmem:[%s2150_s26 + $0x1c4] sm:$0xf0] }
  0xc3   : > { %v1072_v52 = vpop.f32.mrf.mxu3 }
  0xc4   : > { %v825_v18 = vpop.f32.mrf.mxu0  ;;  %v2265_v60 = vadd.f32 %v1072_v52, %v903_v51 }
  0xc5   : > { %v994_v19 = vpop.f32.mrf.mxu1 }
  0xc6   : > { %v995_v20 = vadd.f32 %v994_v19, %v825_v18  ;;  %1181 = vst [vmem:[%s2225_s29 + $0x110] sm:$0xff] %v2265_v60 }
  0xc8   : > { %1150 = vst [vmem:[%s2225_s29 + $0x18] sm:$0xff] %v995_v20  ;;  %v1213_v23 = vadd.f32 %v1212_v12, %v995_v20  ;;  %v1284_v24 = vmul.f32 %v995_v20, %v995_v20  ;;  %v1827_v12 = vor.u32 %v1989_v7, %v1824_v11  ;;  %v1993_v7 = vld [vmem:[%s2150_s26 + $0x1c4] sm:$0xf]  ;;  %v1840_v11 = vld [vmem:[%s2150_s26 + $0x1c8] sm:$0xf0] }
  0xca   : > { %v1347_v29 = vadd.f32 %v1346_v17, %v1284_v24  ;;  %v905_v2 = vpop.f32.mrf.mxu2  ;;  %v1712_v24 = vld [vmem:[%s2150_s26 + $0xc8] sm:$0xf0] }
  0xcb   : > { %v1074_v3 = vpop.f32.mrf.mxu3 }
  0xcc   : > { %v828_v33 = vpop.f32.mrf.mxu0  ;;  %v2269_v4 = vadd.f32 %v1074_v3, %v905_v2 }
  0xcd   : > { %v997_v34 = vpop.f32.mrf.mxu1 }
  0xce   : > { %v998_v35 = vadd.f32 %v997_v34, %v828_v33  ;;  %1182 = vst [vmem:[%s2225_s29 + $0x118] sm:$0xff] %v2269_v4 }
  0xcf   : > { %867 = vmatmul.bf16.gmra.mxu0 %v1695_v31  ;;  %947 = vmatmul.bf16.gmra.mxu2 %v1823_v10  ;;  %v1839_v10 = vor.u32 %v1994_v6, %v1838_v5 }
  0xd0   : > { %1151 = vst [vmem:[%s2225_s29 + $0x20] sm:$0xff] %v998_v35  ;;  %v1214_v42 = vadd.f32 %v1213_v23, %v998_v35  ;;  %v1285_v43 = vmul.f32 %v998_v35, %v998_v35  ;;  %1036 = vmatmul.bf16.gmra.mxu1 %v1699_v32  ;;  %1116 = vmatmul.bf16.gmra.mxu3 %v1827_v12  ;;  %v1961_v23 = vld [vmem:[%s2150_s26 + $0xc4] sm:$0xf] }
  0xd1   : > { %v1715_v28 = vor.u32 %v1961_v23, %v1712_v24  ;;  %v1843_v12 = vor.u32 %v1993_v7, %v1840_v11  ;;  %v1965_v23 = vld [vmem:[%s2150_s26 + $0xe4] sm:$0xf]  ;;  %v1728_v24 = vld [vmem:[%s2150_s26 + $0xe8] sm:$0xf0] }
  0xd2   : > { %v1348_v47 = vadd.f32 %v1347_v29, %v1285_v43  ;;  %v908_v17 = vpop.f32.mrf.mxu2  ;;  %v1832_v43 = vld [vmem:[%s2150_s26 + $0x1b8] sm:$0xf0]  ;;  %v1997_v11 = vld [vmem:[%s2150_s26 + $0x1e4] sm:$0xf] }
  0xd3   : > { %v1077_v18 = vpop.f32.mrf.mxu3  ;;  %v1835_v44 = vor.u32 %v1991_v39, %v1832_v43  ;;  %v1846_v39 = vld [vmem:[%s2150_s26 + $0x1d0] sm:$0xf] }
  0xd4   : > { %v830_v48 = vpop.f32.mrf.mxu0  ;;  %v2283_v26 = vadd.f32 %v1077_v18, %v908_v17 }
  0xd5   : > { %v999_v49 = vpop.f32.mrf.mxu1 }
  0xd6   : > { %v1000_v50 = vadd.f32 %v999_v49, %v830_v48  ;;  %1183 = vst [vmem:[%s2225_s29 + $0x120] sm:$0xff] %v2283_v26 }
  0xd8   : > { %1152 = vst [vmem:[%s2225_s29 + $0x28] sm:$0xff] %v1000_v50  ;;  %v1215_v53 = vadd.f32 %v1214_v42, %v1000_v50  ;;  %v1286_v54 = vmul.f32 %v1000_v50, %v1000_v50  ;;  %v1831_v42 = vor.u32 %v1992_v37, %v1830_v36 }
  0xda   : > { %v1349_v59 = vadd.f32 %v1348_v47, %v1286_v54  ;;  %v910_v33 = vpop.f32.mrf.mxu2  ;;  %v1964_v54 = vld [vmem:[%s2150_s26 + $0xd4] sm:$0xf0] }
  0xdb   : > { %v1079_v34 = vpop.f32.mrf.mxu3 }
  0xdc   : > { %v833_v63 = vpop.f32.mrf.mxu0  ;;  %v2287_v35 = vadd.f32 %v1079_v34, %v910_v33 }
  0xdd   : > { %v1002_v0 = vpop.f32.mrf.mxu1 }
  0xde   : > { %v1003_v1 = vadd.f32 %v1002_v0, %v833_v63  ;;  %1184 = vst [vmem:[%s2225_s29 + $0x128] sm:$0xff] %v2287_v35 }
  0xdf   : > { %872 = vmatmul.bf16.gmra.mxu0 %v1703_v61  ;;  %952 = vmatmul.bf16.gmra.mxu2 %v1831_v42  ;;  %v1723_v61 = vor.u32 %v1963_v55, %v1720_v56  ;;  %v1734_v55 = vld [vmem:[%s2150_s26 + $0xf0] sm:$0xf]  ;;  %v1968_v56 = vld [vmem:[%s2150_s26 + $0xf4] sm:$0xf0] }
  0xe0   : > { %1153 = vst [vmem:[%s2225_s29 + $0x30] sm:$0xff] %v1003_v1  ;;  %v1216_v8 = vadd.f32 %v1215_v53, %v1003_v1  ;;  %v1287_v9 = vmul.f32 %v1003_v1, %v1003_v1  ;;  %1041 = vmatmul.bf16.gmra.mxu1 %v1707_v62  ;;  %1121 = vmatmul.bf16.gmra.mxu3 %v1835_v44  ;;  %v1718_v53 = vld [vmem:[%s2150_s26 + $0xd0] sm:$0xf] }
  0xe2   : > { %v1350_v13 = vadd.f32 %v1349_v59, %v1287_v9  ;;  %v913_v49 = vpop.f32.mrf.mxu2  ;;  %v1719_v59 = vor.u32 %v1964_v54, %v1718_v53 }
  0xe3   : > { %v1082_v50 = vpop.f32.mrf.mxu3 }
  0xe4   : > { %v835_v14 = vpop.f32.mrf.mxu0  ;;  %v2301_v58 = vadd.f32 %v1082_v50, %v913_v49 }
  0xe5   : > { %v1004_v15 = vpop.f32.mrf.mxu1 }
  0xe6   : > { %v1005_v16 = vadd.f32 %v1004_v15, %v835_v14  ;;  %1185 = vst [vmem:[%s2225_s29 + $0x130] sm:$0xff] %v2301_v58 }
  0xe8   : > { %1154 = vst [vmem:[%s2225_s29 + $0x38] sm:$0xff] %v1005_v16  ;;  %v1217_v19 = vadd.f32 %v1216_v8, %v1005_v16  ;;  %v1288_v20 = vmul.f32 %v1005_v16, %v1005_v16 }
  0xea   : > { %v1351_v25 = vadd.f32 %v1350_v13, %v1288_v20  ;;  %v915_v1 = vpop.f32.mrf.mxu2 }
  0xeb   : > { %v1084_v2 = vpop.f32.mrf.mxu3 }
  0xec   : > { %v838_v29 = vpop.f32.mrf.mxu0  ;;  %v2305_v3 = vadd.f32 %v1084_v2, %v915_v1 }
  0xed   : > { %v1007_v31 = vpop.f32.mrf.mxu1 }
  0xee   : > { %v1008_v32 = vadd.f32 %v1007_v31, %v838_v29  ;;  %1186 = vst [vmem:[%s2225_s29 + $0x138] sm:$0xff] %v2305_v3  ;;  %v1731_v29 = vor.u32 %v1965_v23, %v1728_v24 }
  0xef   : > { %877 = vmatmul.bf16.gmra.mxu0 %v1711_v27  ;;  %957 = vmatmul.bf16.gmra.mxu2 %v1839_v10  ;;  %v1998_v10 = vld [vmem:[%s2150_s26 + $0x1e4] sm:$0xf0] }
  0xf0   : > { %1155 = vst [vmem:[%s2225_s29 + $0x40] sm:$0xff] %v1008_v32  ;;  %v1218_v40 = vadd.f32 %v1217_v19, %v1008_v32  ;;  %v1289_v41 = vmul.f32 %v1008_v32, %v1008_v32  ;;  %1046 = vmatmul.bf16.gmra.mxu1 %v1715_v28  ;;  %1126 = vmatmul.bf16.gmra.mxu3 %v1843_v12 }
  0xf1   : > { %v1727_v28 = vor.u32 %v1966_v22, %v1726_v21 }
  0xf2   : > { %v1352_v45 = vadd.f32 %v1351_v25, %v1289_v41  ;;  %v918_v17 = vpop.f32.mrf.mxu2  ;;  %v1995_v41 = vld [vmem:[%s2150_s26 + $0x1d4] sm:$0xf] }
  0xf3   : > { %v1087_v18 = vpop.f32.mrf.mxu3 }
  0xf4   : > { %v840_v46 = vpop.f32.mrf.mxu0  ;;  %v2319_v27 = vadd.f32 %v1087_v18, %v918_v17 }
  0xf5   : > { %v1009_v47 = vpop.f32.mrf.mxu1 }
  0xf6   : > { %v1010_v48 = vadd.f32 %v1009_v47, %v840_v46  ;;  %1187 = vst [vmem:[%s2225_s29 + $0x140] sm:$0xff] %v2319_v27 }
  0xf8   : > { %1156 = vst [vmem:[%s2225_s29 + $0x48] sm:$0xff] %v1010_v48  ;;  %v1219_v51 = vadd.f32 %v1218_v40, %v1010_v48  ;;  %v1290_v52 = vmul.f32 %v1010_v48, %v1010_v48  ;;  %v1996_v40 = vld [vmem:[%s2150_s26 + $0x1d4] sm:$0xf0] }
  0xf9   : > { %v1847_v44 = vor.u32 %v1996_v40, %v1846_v39  ;;  %v1862_v39 = vld [vmem:[%s2150_s26 + $0x1f0] sm:$0xf]  ;;  %v2000_v40 = vld [vmem:[%s2150_s26 + $0x1f4] sm:$0xf0] }
  0xfa   : > { %v1353_v57 = vadd.f32 %v1352_v45, %v1290_v52  ;;  %v920_v34 = vpop.f32.mrf.mxu2  ;;  %v1848_v45 = vld [vmem:[%s2150_s26 + $0x1d8] sm:$0xf0] }
  0xfb   : > { %v1089_v36 = vpop.f32.mrf.mxu3  ;;  %v1851_v46 = vor.u32 %v1995_v41, %v1848_v45  ;;  %v1999_v41 = vld [vmem:[%s2150_s26 + $0x1f4] sm:$0xf]  ;;  %v1864_v45 = vld [vmem:[%s2150_s26 + $0x1f8] sm:$0xf0] }
  0xfc   : > { %v843_v62 = vpop.f32.mrf.mxu0  ;;  %v2323_v37 = vadd.f32 %v1089_v36, %v920_v34 }
  0xfd   : > { %v1012_v63 = vpop.f32.mrf.mxu1 }
  0xfe   : > { %v1013_v0 = vadd.f32 %v1012_v63, %v843_v62  ;;  %1188 = vst [vmem:[%s2225_s29 + $0x148] sm:$0xff] %v2323_v37  ;;  %v1735_v63 = vor.u32 %v1968_v56, %v1734_v55 }
  0xff   : > { %882 = vmatmul.bf16.gmra.mxu0 %v1719_v59  ;;  %962 = vmatmul.bf16.gmra.mxu2 %v1847_v44  ;;  %v1736_v59 = vld [vmem:[%s2150_s26 + $0xf8] sm:$0xf0]  ;;  %v1863_v44 = vor.u32 %v2000_v40, %v1862_v39 }
 0x100   : > { %1157 = vst [vmem:[%s2225_s29 + $0x50] sm:$0xff] %v1013_v0  ;;  %v1220_v8 = vadd.f32 %v1219_v51, %v1013_v0  ;;  %v1291_v9 = vmul.f32 %v1013_v0, %v1013_v0  ;;  %1051 = vmatmul.bf16.gmra.mxu1 %v1723_v61  ;;  %1131 = vmatmul.bf16.gmra.mxu3 %v1851_v46 }
 0x101   : > { %v1867_v46 = vor.u32 %v1999_v41, %v1864_v45 }
 0x102   : > { %v1354_v13 = vadd.f32 %v1353_v57, %v1291_v9  ;;  %v923_v51 = vpop.f32.mrf.mxu2  ;;  %v1967_v57 = vld [vmem:[%s2150_s26 + $0xf4] sm:$0xf]  ;;  %v1854_v9 = vld [vmem:[%s2150_s26 + $0x1e0] sm:$0xf] }
 0x103   : > { %v1092_v52 = vpop.f32.mrf.mxu3  ;;  %v1739_v0 = vor.u32 %v1967_v57, %v1736_v59 }
 0x104   : > { %v845_v14 = vpop.f32.mrf.mxu0  ;;  %v2337_v62 = vadd.f32 %v1092_v52, %v923_v51 }
 0x105   : > { %v1014_v15 = vpop.f32.mrf.mxu1 }
 0x106   : > { %v1015_v16 = vadd.f32 %v1014_v15, %v845_v14  ;;  %1189 = vst [vmem:[%s2225_s29 + $0x150] sm:$0xff] %v2337_v62  ;;  %v1855_v14 = vor.u32 %v1998_v10, %v1854_v9  ;;  %v1856_v15 = vld [vmem:[%s2150_s26 + $0x1e8] sm:$0xf0] }
 0x108   : > { %1158 = vst [vmem:[%s2225_s29 + $0x58] sm:$0xff] %v1015_v16  ;;  %v1221_v19 = vadd.f32 %v1220_v8, %v1015_v16  ;;  %v1292_v20 = vmul.f32 %v1015_v16, %v1015_v16  ;;  %v1859_v16 = vor.u32 %v1997_v11, %v1856_v15 }
 0x10a   : > { %v1355_v25 = vadd.f32 %v1354_v13, %v1292_v20  ;;  %v925_v6 = vpop.f32.mrf.mxu2 }
 0x10b   : > { %v1094_v7 = vpop.f32.mrf.mxu3 }
 0x10c   : > { %v848_v31 = vpop.f32.mrf.mxu0  ;;  %v2341_v8 = vadd.f32 %v1094_v7, %v925_v6 }
 0x10d   : > { %v1017_v32 = vpop.f32.mrf.mxu1 }
 0x10e   : > { %v1018_v33 = vadd.f32 %v1017_v32, %v848_v31  ;;  %1190 = vst [vmem:[%s2225_s29 + $0x158] sm:$0xff] %v2341_v8 }
 0x10f   : > { %887 = vmatmul.bf16.gmra.mxu0 %v1727_v28  ;;  %967 = vmatmul.bf16.gmra.mxu2 %v1855_v14 }
 0x110   : > { %1159 = vst [vmem:[%s2225_s29 + $0x60] sm:$0xff] %v1018_v33  ;;  %v1222_v42 = vadd.f32 %v1221_v19, %v1018_v33  ;;  %v1293_v43 = vmul.f32 %v1018_v33, %v1018_v33  ;;  %1056 = vmatmul.bf16.gmra.mxu1 %v1731_v29  ;;  %1136 = vmatmul.bf16.gmra.mxu3 %v1859_v16 }
 0x112   : > { %v1356_v47 = vadd.f32 %v1355_v25, %v1293_v43  ;;  %v928_v21 = vpop.f32.mrf.mxu2 }
 0x113   : > { %v1097_v22 = vpop.f32.mrf.mxu3 }
 0x114   : > { %v850_v48 = vpop.f32.mrf.mxu0  ;;  %v2351_v28 = vadd.f32 %v1097_v22, %v928_v21 }
 0x115   : > { %v1019_v49 = vpop.f32.mrf.mxu1 }
 0x116   : > { %v1020_v50 = vadd.f32 %v1019_v49, %v850_v48  ;;  %1191 = vst [vmem:[%s2225_s29 + $0x160] sm:$0xff] %v2351_v28 }
 0x118   : > { %1160 = vst [vmem:[%s2225_s29 + $0x68] sm:$0xff] %v1020_v50  ;;  %v1223_v53 = vadd.f32 %v1222_v42, %v1020_v50  ;;  %v1294_v54 = vmul.f32 %v1020_v50, %v1020_v50 }
 0x11a   : > { %v1357_v61 = vadd.f32 %v1356_v47, %v1294_v54  ;;  %v930_v33 = vpop.f32.mrf.mxu2 }
 0x11b   : > { %v1099_v34 = vpop.f32.mrf.mxu3 }
 0x11c   : > { %v853_v1 = vpop.f32.mrf.mxu0  ;;  %v2355_v36 = vadd.f32 %v1099_v34, %v930_v33 }
 0x11d   : > { %v1022_v2 = vpop.f32.mrf.mxu1 }
 0x11e   : > { %v1023_v5 = vadd.f32 %v1022_v2, %v853_v1  ;;  %1192 = vst [vmem:[%s2225_s29 + $0x168] sm:$0xff] %v2355_v36 }
 0x11f   : > { %892 = vmatmul.bf16.gmra.mxu0 %v1735_v63  ;;  %972 = vmatmul.bf16.gmra.mxu2 %v1863_v44 }
 0x120   : > { %1161 = vst [vmem:[%s2225_s29 + $0x70] sm:$0xff] %v1023_v5  ;;  %v1224_v12 = vadd.f32 %v1223_v53, %v1023_v5  ;;  %v1295_v13 = vmul.f32 %v1023_v5, %v1023_v5  ;;  %1061 = vmatmul.bf16.gmra.mxu1 %v1739_v0  ;;  %1141 = vmatmul.bf16.gmra.mxu3 %v1867_v46 }
 0x122   : > { %v1358_v17 = vadd.f32 %v1357_v61, %v1295_v13  ;;  %v933_v51 = vpop.f32.mrf.mxu2 }
 0x123   : > { %v1102_v52 = vpop.f32.mrf.mxu3 }
 0x124   : > { %v855_v18 = vpop.f32.mrf.mxu0  ;;  %v2365_v56 = vadd.f32 %v1102_v52, %v933_v51 }
 0x125   : > { %v1024_v19 = vpop.f32.mrf.mxu1 }
 0x126   : > { %v1025_v20 = vadd.f32 %v1024_v19, %v855_v18  ;;  %1193 = vst [vmem:[%s2225_s29 + $0x170] sm:$0xff] %v2365_v56 }
 0x128   : > { %1162 = vst [vmem:[%s2225_s29 + $0x78] sm:$0xff] %v1025_v20  ;;  %v1225_v23 = vadd.f32 %v1224_v12, %v1025_v20  ;;  %v1296_v24 = vmul.f32 %v1025_v20, %v1025_v20 }
 0x12a   : > { %v1359_v25 = vadd.f32 %v1358_v17, %v1296_v24  ;;  %v935_v63 = vpop.f32.mrf.mxu2 }
 0x12b   : > { %v1104_v0 = vpop.f32.mrf.mxu3 }
 0x12c   : > { %v858_v29 = vpop.f32.mrf.mxu0  ;;  %v2369_v1 = vadd.f32 %v1104_v0, %v935_v63 }
 0x12d   : > { %v1027_v31 = vpop.f32.mrf.mxu1 }
 0x12e   : > { %v1028_v32 = vadd.f32 %v1027_v31, %v858_v29  ;;  %1194 = vst [vmem:[%s2225_s29 + $0x178] sm:$0xff] %v2369_v1 }
 0x130   : > { %1163 = vst [vmem:[%s2225_s29 + $0x80] sm:$0xff] %v1028_v32  ;;  %v1226_v42 = vadd.f32 %v1225_v23, %v1028_v32  ;;  %v1297_v43 = vmul.f32 %v1028_v32, %v1028_v32 }
 0x132   : > { %v1360_v47 = vadd.f32 %v1359_v25, %v1297_v43  ;;  %v938_v11 = vpop.f32.mrf.mxu2 }
 0x133   : > { %v1107_v12 = vpop.f32.mrf.mxu3 }
 0x134   : > { %v860_v48 = vpop.f32.mrf.mxu0  ;;  %v2375_v16 = vadd.f32 %v1107_v12, %v938_v11 }
 0x135   : > { %v1029_v49 = vpop.f32.mrf.mxu1 }
 0x136   : > { %v1030_v50 = vadd.f32 %v1029_v49, %v860_v48  ;;  %1195 = vst [vmem:[%s2225_s29 + $0x180] sm:$0xff] %v2375_v16 }
 0x138   : > { %1164 = vst [vmem:[%s2225_s29 + $0x88] sm:$0xff] %v1030_v50  ;;  %v1227_v53 = vadd.f32 %v1226_v42, %v1030_v50  ;;  %v1298_v54 = vmul.f32 %v1030_v50, %v1030_v50 }
 0x13a   : > { %v1361_v55 = vadd.f32 %v1360_v47, %v1298_v54  ;;  %v940_v20 = vpop.f32.mrf.mxu2 }
 0x13b   : > { %v1109_v21 = vpop.f32.mrf.mxu3 }
 0x13c   : > { %v863_v57 = vpop.f32.mrf.mxu0  ;;  %v2379_v22 = vadd.f32 %v1109_v21, %v940_v20 }
 0x13d   : > { %v1032_v59 = vpop.f32.mrf.mxu1 }
 0x13e   : > { %v1033_v61 = vadd.f32 %v1032_v59, %v863_v57  ;;  %1196 = vst [vmem:[%s2225_s29 + $0x188] sm:$0xff] %v2379_v22 }
 0x140   : > { %1165 = vst [vmem:[%s2225_s29 + $0x90] sm:$0xff] %v1033_v61  ;;  %v1228_v2 = vadd.f32 %v1227_v53, %v1033_v61  ;;  %v1299_v5 = vmul.f32 %v1033_v61, %v1033_v61 }
 0x142   : > { %v1362_v6 = vadd.f32 %v1361_v55, %v1299_v5  ;;  %v943_v33 = vpop.f32.mrf.mxu2 }
 0x143   : > { %v1112_v34 = vpop.f32.mrf.mxu3 }
 0x144   : > { %v865_v7 = vpop.f32.mrf.mxu0  ;;  %v2392_v39 = vadd.f32 %v1112_v34, %v943_v33 }
 0x145   : > { %v1034_v9 = vpop.f32.mrf.mxu1 }
 0x146   : > { %v1035_v10 = vadd.f32 %v1034_v9, %v865_v7  ;;  %1197 = vst [vmem:[%s2225_s29 + $0x190] sm:$0xff] %v2392_v39 }
 0x148   : > { %1166 = vst [vmem:[%s2225_s29 + $0x98] sm:$0xff] %v1035_v10  ;;  %v1229_v13 = vadd.f32 %v1228_v2, %v1035_v10  ;;  %v1300_v14 = vmul.f32 %v1035_v10, %v1035_v10 }
 0x14a   : > { %v1363_v15 = vadd.f32 %v1362_v6, %v1300_v14  ;;  %v945_v43 = vpop.f32.mrf.mxu2 }
 0x14b   : > { %v1114_v44 = vpop.f32.mrf.mxu3 }
 0x14c   : > { %v868_v17 = vpop.f32.mrf.mxu0  ;;  %v2396_v45 = vadd.f32 %v1114_v44, %v945_v43 }
 0x14d   : > { %v1037_v18 = vpop.f32.mrf.mxu1 }
 0x14e   : > { %v1038_v19 = vadd.f32 %v1037_v18, %v868_v17  ;;  %1198 = vst [vmem:[%s2225_s29 + $0x198] sm:$0xff] %v2396_v45 }
 0x150   : > { %1167 = vst [vmem:[%s2225_s29 + $0xa0] sm:$0xff] %v1038_v19  ;;  %v2382_v23 = vadd.f32 %v1229_v13, %v1038_v19  ;;  %v1301_v24 = vmul.f32 %v1038_v19, %v1038_v19 }
 0x152   : > { %v2386_v25 = vadd.f32 %v1363_v15, %v1301_v24  ;;  %v948_v49 = vpop.f32.mrf.mxu2 }
 0x153   : > { %v1117_v50 = vpop.f32.mrf.mxu3 }
 0x154   : > { %v870_v29 = vpop.f32.mrf.mxu0  ;;  %v2402_v51 = vadd.f32 %v1117_v50, %v948_v49 }
 0x155   : > { %v1039_v31 = vpop.f32.mrf.mxu1 }
 0x156   : > { %v2388_v32 = vadd.f32 %v1039_v31, %v870_v29  ;;  %1199 = vst [vmem:[%s2225_s29 + $0x1a0] sm:$0xff] %v2402_v51 }
 0x158   : > { %1168 = vst [vmem:[%s2225_s29 + $0xa8] sm:$0xff] %v2388_v32  ;;  %v1231_v43 = vadd.f32 %v2382_v23, %v2388_v32 }
 0x15a   : > { %v950_v55 = vpop.f32.mrf.mxu2 }
 0x15b   : > { %v1119_v57 = vpop.f32.mrf.mxu3 }
 0x15c   : > { %v873_v40 = vpop.f32.mrf.mxu0  ;;  %v2406_v59 = vadd.f32 %v1119_v57, %v950_v55 }
 0x15d   : > { %v1042_v41 = vpop.f32.mrf.mxu1 }
 0x15e   : > { %v1043_v42 = vadd.f32 %v1042_v41, %v873_v40  ;;  %1200 = vst [vmem:[%s2225_s29 + $0x1a8] sm:$0xff] %v2406_v59  ;;  %v1302_v40 = vmul.f32 %v2388_v32, %v2388_v32 }
 0x160   : > { %1169 = vst [vmem:[%s2225_s29 + $0xb0] sm:$0xff] %v1043_v42  ;;  %v1303_v41 = vmul.f32 %v1043_v42, %v1043_v42  ;;  %v1365_v44 = vadd.f32 %v2386_v25, %v1302_v40  ;;  %v1232_v50 = vadd.f32 %v1231_v43, %v1043_v42 }
 0x162   : > { %v953_v2 = vpop.f32.mrf.mxu2  ;;  %v1366_v57 = vadd.f32 %v1365_v44, %v1303_v41 }
 0x163   : > { %v1122_v5 = vpop.f32.mrf.mxu3 }
 0x164   : > { %v875_v46 = vpop.f32.mrf.mxu0  ;;  %v2412_v6 = vadd.f32 %v1122_v5, %v953_v2 }
 0x165   : > { %v1044_v47 = vpop.f32.mrf.mxu1 }
 0x166   : > { %v1045_v48 = vadd.f32 %v1044_v47, %v875_v46  ;;  %1201 = vst [vmem:[%s2225_s29 + $0x1b0] sm:$0xff] %v2412_v6 }
 0x168   : > { %1170 = vst [vmem:[%s2225_s29 + $0xb8] sm:$0xff] %v1045_v48  ;;  %v1304_v46 = vmul.f32 %v1045_v48, %v1045_v48 }
 0x16a   : > { %v955_v11 = vpop.f32.mrf.mxu2  ;;  %v1367_v2 = vadd.f32 %v1366_v57, %v1304_v46 }
 0x16b   : > { %v1124_v12 = vpop.f32.mrf.mxu3 }
 0x16c   : > { %v878_v52 = vpop.f32.mrf.mxu0  ;;  %v2416_v13 = vadd.f32 %v1124_v12, %v955_v11 }
 0x16d   : > { %v1047_v53 = vpop.f32.mrf.mxu1 }
 0x16e   : > { %v1048_v54 = vadd.f32 %v1047_v53, %v878_v52  ;;  %1202 = vst [vmem:[%s2225_s29 + $0x1b8] sm:$0xff] %v2416_v13 }
 0x170   : > { %1171 = vst [vmem:[%s2225_s29 + $0xc0] sm:$0xff] %v1048_v54 }
 0x172   : > { %v958_v18 = vpop.f32.mrf.mxu2 }
 0x173   : > { %v1127_v19 = vpop.f32.mrf.mxu3 }
 0x174   : > { %v880_v61 = vpop.f32.mrf.mxu0  ;;  %v2422_v29 = vadd.f32 %v1127_v19, %v958_v18 }
 0x175   : > { %v1049_v63 = vpop.f32.mrf.mxu1 }
 0x176   : > { %v1050_v0 = vadd.f32 %v1049_v63, %v880_v61  ;;  %1203 = vst [vmem:[%s2225_s29 + $0x1c0] sm:$0xff] %v2422_v29  ;;  %v1305_v61 = vmul.f32 %v1048_v54, %v1048_v54  ;;  %v1233_v63 = vadd.f32 %v1232_v50, %v1045_v48 }
 0x178   : > { %1172 = vst [vmem:[%s2225_s29 + $0xc8] sm:$0xff] %v1050_v0  ;;  %v1306_v5 = vmul.f32 %v1050_v0, %v1050_v0 }
 0x17a   : > { %v960_v31 = vpop.f32.mrf.mxu2 }
 0x17b   : > { %v1129_v33 = vpop.f32.mrf.mxu3 }
 0x17c   : > { %v883_v7 = vpop.f32.mrf.mxu0  ;;  %v2424_v34 = vadd.f32 %v1129_v33, %v960_v31 }
 0x17d   : > { %v1052_v9 = vpop.f32.mrf.mxu1 }
 0x17e   : > { %v1053_v10 = vadd.f32 %v1052_v9, %v883_v7  ;;  %1204 = vst [vmem:[%s2225_s29 + $0x1c8] sm:$0xff] %v2424_v34  ;;  %v1234_v7 = vadd.f32 %v1233_v63, %v1048_v54  ;;  %v1368_v9 = vadd.f32 %v1367_v2, %v1305_v61  ;;  %v1314_v2 = vmul.f32 %v2251_v38, %v2251_v38 }
 0x180   : > { %1173 = vst [vmem:[%s2225_s29 + $0xd0] sm:$0xff] %v1053_v10  ;;  %v1235_v11 = vadd.f32 %v1234_v7, %v1050_v0  ;;  %v1307_v23 = vmul.f32 %v1053_v10, %v1053_v10  ;;  %v1369_v25 = vadd.f32 %v1368_v9, %v1306_v5  ;;  %v1315_v9 = vmul.f32 %v2265_v60, %v2265_v60 }
 0x182   : > { %v963_v53 = vpop.f32.mrf.mxu2  ;;  %v1236_v42 = vadd.f32 %v1235_v11, %v1053_v10 }
 0x183   : > { %v1132_v55 = vpop.f32.mrf.mxu3 }
 0x184   : > { %v885_v14 = vpop.f32.mrf.mxu0  ;;  %v2437_v18 = vadd.f32 %v1132_v55, %v963_v53 }
 0x185   : > { %v1054_v15 = vpop.f32.mrf.mxu1 }
 0x186   : > { %v1055_v17 = vadd.f32 %v1054_v15, %v885_v14  ;;  %1205 = vst [vmem:[%s2225_s29 + $0x1d0] sm:$0xff] %v2437_v18 }
 0x188   : > { %1174 = vst [vmem:[%s2225_s29 + $0xd8] sm:$0xff] %v1055_v17  ;;  %v1308_v14 = vmul.f32 %v1055_v17, %v1055_v17  ;;  %v1237_v54 = vadd.f32 %v1236_v42, %v1055_v17 }
 0x18a   : > { %v965_v19 = vpop.f32.mrf.mxu2 }
 0x18b   : > { %v1134_v48 = vpop.f32.mrf.mxu3 }
 0x18c   : > { %v888_v20 = vpop.f32.mrf.mxu0 }
 0x18d   : > { %v1057_v21 = vpop.f32.mrf.mxu1 }
 0x18e   : > { %v1058_v24 = vadd.f32 %v1057_v21, %v888_v20  ;;  %v2439_v20 = vadd.f32 %v1134_v48, %v965_v19  ;;  %v1370_v21 = vadd.f32 %v1369_v25, %v1307_v23  ;;  %v1318_v48 = vmul.f32 %v2287_v35, %v2287_v35 }
 0x190   : > { %1175 = vst [vmem:[%s2225_s29 + $0xe0] sm:$0xff] %v1058_v24  ;;  %v1309_v31 = vmul.f32 %v1058_v24, %v1058_v24  ;;  %v1371_v0 = vadd.f32 %v1370_v21, %v1308_v14  ;;  %v1238_v33 = vadd.f32 %v1237_v54, %v1058_v24  ;;  %v1313_v24 = vmul.f32 %v2247_v30, %v2247_v30 }
 0x191   : > { %1206 = vst [vmem:[%s2225_s29 + $0x1d8] sm:$0xff] %v2439_v20 }
 0x192   : > { %v1372_v10 = vadd.f32 %v1371_v0, %v1309_v31  ;;  %v968_v53 = vpop.f32.mrf.mxu2 }
 0x193   : > { %v1137_v17 = vpop.f32.mrf.mxu3 }
 0x194   : > { %v890_v47 = vpop.f32.mrf.mxu0  ;;  %v2456_v25 = vadd.f32 %v1137_v17, %v968_v53 }
 0x195   : > { %v1059_v49 = vpop.f32.mrf.mxu1 }
 0x196   : > { %v1060_v52 = vadd.f32 %v1059_v49, %v890_v47  ;;  %1207 = vst [vmem:[%s2225_s29 + $0x1e0] sm:$0xff] %v2456_v25 }
 0x198   : > { %1176 = vst [vmem:[%s2225_s29 + $0xe8] sm:$0xff] %v1060_v52  ;;  %v1310_v40 = vmul.f32 %v1060_v52, %v1060_v52  ;;  %v1239_v41 = vadd.f32 %v1238_v33, %v1060_v52 }
 0x19a   : > { %v1373_v47 = vadd.f32 %v1372_v10, %v1310_v40  ;;  %v1320_v10 = vmul.f32 %v2305_v3, %v2305_v3 }
 0x19c   : > { %v893_v32 = vpop.f32.mrf.mxu0 }
 0x19d   : > { %v1062_v12 = vpop.f32.mrf.mxu1 }
 0x19e   : > { %v1063_v15 = vadd.f32 %v1062_v12, %v893_v32  ;;  %v970_v32 = vpop.f32.mrf.mxu2  ;;  %v1139_v12 = vpop.f32.mrf.mxu3 }
 0x19f   : > { %v2458_v42 = vadd.f32 %v1139_v12, %v970_v32 }
 0x1a0   : > { %1177 = vst [vmem:[%s2225_s29 + $0xf0] sm:$0xff] %v1063_v15  ;;  %v1311_v43 = vmul.f32 %v1063_v15, %v1063_v15  ;;  %v1240_v49 = vadd.f32 %v1239_v41, %v1063_v15 }
 0x1a1   : > { %1208 = vst [vmem:[%s2225_s29 + $0x1e8] sm:$0xff] %v2458_v42 }
 0x1a2   : > { %v1374_v55 = vadd.f32 %v1373_v47, %v1311_v43  ;;  %v1321_v43 = vmul.f32 %v2319_v27, %v2319_v27 }
 0x1a4   : > { %v895_v44 = vpop.f32.mrf.mxu0 }
 0x1a5   : > { %v1064_v46 = vpop.f32.mrf.mxu1 }
 0x1a6   : > { %v1065_v50 = vadd.f32 %v1064_v46, %v895_v44  ;;  %v973_v33 = vpop.f32.mrf.mxu2  ;;  %v1142_v40 = vpop.f32.mrf.mxu3 }
 0x1a7   : > { %v2488_v53 = vadd.f32 %v1142_v40, %v973_v33 }
 0x1a8   : > { %1178 = vst [vmem:[%s2225_s29 + $0xf8] sm:$0xff] %v1065_v50  ;;  %v1241_v57 = vadd.f32 %v1240_v49, %v1065_v50  ;;  %v1312_v61 = vmul.f32 %v1065_v50, %v1065_v50  ;;  %v1323_v49 = vmul.f32 %v2337_v62, %v2337_v62 }
 0x1a9   : > { %1209 = vst [vmem:[%s2225_s29 + $0x1f0] sm:$0xff] %v2488_v53 }
 0x1aa   : > { %v1242_v63 = vadd.f32 %v1241_v57, %v2247_v30  ;;  %v1375_v52 = vadd.f32 %v1374_v55, %v1312_v61  ;;  %v1316_v30 = vmul.f32 %v2269_v4, %v2269_v4 }
 0x1ac   : > { %v1243_v5 = vadd.f32 %v1242_v63, %v2251_v38  ;;  %v1376_v7 = vadd.f32 %v1375_v52, %v1313_v24  ;;  %v1317_v38 = vmul.f32 %v2283_v26, %v2283_v26  ;;  %v1326_v52 = vmul.f32 %v2355_v36, %v2355_v36 }
 0x1ae   : > { %v1244_v11 = vadd.f32 %v1243_v5, %v2265_v60  ;;  %v1377_v23 = vadd.f32 %v1376_v7, %v1314_v2  ;;  %v975_v17 = vpop.f32.mrf.mxu2  ;;  %v1144_v55 = vpop.f32.mrf.mxu3 }
 0x1af   : > { %v2490_v57 = vadd.f32 %v1144_v55, %v975_v17  ;;  %v1342_v17 = vmul.f32 %v2458_v42, %v2458_v42 }
 0x1b0   : > { %v1245_v14 = vadd.f32 %v1244_v11, %v2269_v4  ;;  %v1378_v15 = vadd.f32 %v1377_v23, %v1315_v9  ;;  %v1319_v4 = vmul.f32 %v2301_v58, %v2301_v58  ;;  %v1328_v11 = vmul.f32 %v2369_v1, %v2369_v1 }
 0x1b1   : > { %1210 = vst [vmem:[%s2225_s29 + $0x1f8] sm:$0xff] %v2490_v57 }
 0x1b2   : > { %v1246_v60 = vadd.f32 %v1245_v14, %v2283_v26  ;;  %v1379_v19 = vadd.f32 %v1378_v15, %v1316_v30 }
 0x1b4   : > { %v1247_v21 = vadd.f32 %v1246_v60, %v2287_v35  ;;  %v1380_v54 = vadd.f32 %v1379_v19, %v1317_v38 }
 0x1b6   : > { %v1248_v31 = vadd.f32 %v1247_v21, %v2301_v58  ;;  %v1381_v0 = vadd.f32 %v1380_v54, %v1318_v48  ;;  %v1322_v58 = vmul.f32 %v2323_v37, %v2323_v37 }
 0x1b8   : > { %v1249_v26 = vadd.f32 %v1248_v31, %v2305_v3  ;;  %v1382_v41 = vadd.f32 %v1381_v0, %v1319_v4 }
 0x1ba   : > { %v1250_v35 = vadd.f32 %v1249_v26, %v2319_v27  ;;  %v1383_v44 = vadd.f32 %v1382_v41, %v1320_v10  ;;  %v1324_v27 = vmul.f32 %v2341_v8, %v2341_v8  ;;  %v1337_v26 = vmul.f32 %v2422_v29, %v2422_v29 }
 0x1bc   : > { %v1251_v46 = vadd.f32 %v1250_v35, %v2323_v37  ;;  %v1384_v47 = vadd.f32 %v1383_v44, %v1321_v43  ;;  %v1325_v37 = vmul.f32 %v2351_v28, %v2351_v28  ;;  %v1338_v35 = vmul.f32 %v2424_v34, %v2424_v34 }
 0x1be   : > { %v1252_v3 = vadd.f32 %v1251_v46, %v2337_v62  ;;  %v1385_v50 = vadd.f32 %v1384_v47, %v1322_v58  ;;  %v1339_v58 = vmul.f32 %v2437_v18, %v2437_v18  ;;  %v1340_v47 = vmul.f32 %v2439_v20, %v2439_v20 }
 0x1c0   : > { %v1253_v61 = vadd.f32 %v1252_v3, %v2341_v8  ;;  %v1386_v24 = vadd.f32 %v1385_v50, %v1323_v49  ;;  %v1327_v8 = vmul.f32 %v2365_v56, %v2365_v56  ;;  %v1341_v3 = vmul.f32 %v2456_v25, %v2456_v25 }
 0x1c2   : > { %v1387_v62 = vadd.f32 %v1386_v24, %v1324_v27  ;;  %v1254_v63 = vadd.f32 %v1253_v61, %v2351_v28  ;;  %v1329_v28 = vmul.f32 %v2375_v16, %v2375_v16  ;;  %v1343_v27 = vmul.f32 %v2488_v53, %v2488_v53 }
 0x1c3   : > { %v1344_v24 = vmul.f32 %v2490_v57, %v2490_v57 }
 0x1c4   : > { %v1255_v2 = vadd.f32 %v1254_v63, %v2355_v36  ;;  %v1388_v5 = vadd.f32 %v1387_v62, %v1325_v37  ;;  %v1330_v36 = vmul.f32 %v2379_v22, %v2379_v22 }
 0x1c6   : > { %v1256_v7 = vadd.f32 %v1255_v2, %v2365_v56  ;;  %v1389_v9 = vadd.f32 %v1388_v5, %v1326_v52  ;;  %v1331_v56 = vmul.f32 %v2392_v39, %v2392_v39 }
 0x1c8   : > { %v1257_v23 = vadd.f32 %v1256_v7, %v2369_v1  ;;  %v1390_v32 = vadd.f32 %v1389_v9, %v1327_v8  ;;  %v1332_v1 = vmul.f32 %v2396_v45, %v2396_v45 }
 0x1ca   : > { %v1258_v12 = vadd.f32 %v1257_v23, %v2375_v16  ;;  %v1391_v30 = vadd.f32 %v1390_v32, %v1328_v11  ;;  %v1333_v16 = vmul.f32 %v2402_v51, %v2402_v51 }
 0x1cc   : > { %v1259_v14 = vadd.f32 %v1258_v12, %v2379_v22  ;;  %v1392_v15 = vadd.f32 %v1391_v30, %v1329_v28  ;;  %v1334_v22 = vmul.f32 %v2406_v59, %v2406_v59 }
 0x1ce   : > { %v1260_v38 = vadd.f32 %v1259_v14, %v2392_v39  ;;  %v1393_v60 = vadd.f32 %v1392_v15, %v1330_v36  ;;  %v1335_v39 = vmul.f32 %v2412_v6, %v2412_v6 }
 0x1d0   : > { %v1261_v19 = vadd.f32 %v1260_v38, %v2396_v45  ;;  %v1394_v48 = vadd.f32 %v1393_v60, %v1331_v56  ;;  %v1336_v45 = vmul.f32 %v2416_v13, %v2416_v13 }
 0x1d2   : > { %v1262_v21 = vadd.f32 %v1261_v19, %v2402_v51  ;;  %v1395_v54 = vadd.f32 %v1394_v48, %v1332_v1 }
 0x1d4   : > { %v1263_v4 = vadd.f32 %v1262_v21, %v2406_v59  ;;  %v1396_v31 = vadd.f32 %v1395_v54, %v1333_v16 }
 0x1d6   : > { %v1264_v0 = vadd.f32 %v1263_v4, %v2412_v6  ;;  %v1397_v33 = vadd.f32 %v1396_v31, %v1334_v22 }
 0x1d8   : > { %v1265_v40 = vadd.f32 %v1264_v0, %v2416_v13  ;;  %v1398_v10 = vadd.f32 %v1397_v33, %v1335_v39 }
 0x1da   : > { %v1266_v51 = vadd.f32 %v1265_v40, %v2422_v29  ;;  %v1399_v41 = vadd.f32 %v1398_v10, %v1336_v45 }
 0x1dc   : > { %v1400_v59 = vadd.f32 %v1399_v41, %v1337_v26  ;;  %v1267_v43 = vadd.f32 %v1266_v51, %v2424_v34 }
 0x1de   : > { %v1401_v6 = vadd.f32 %v1400_v59, %v1338_v35  ;;  %v1268_v44 = vadd.f32 %v1267_v43, %v2437_v18 }
 0x1e0   : > { %v1402_v13 = vadd.f32 %v1401_v6, %v1339_v58  ;;  %v1269_v46 = vadd.f32 %v1268_v44, %v2439_v20 }
 0x1e2   : > { %v1403_v29 = vadd.f32 %v1402_v13, %v1340_v47  ;;  %v1270_v49 = vadd.f32 %v1269_v46, %v2456_v25 }
 0x1e4   : > { %v1404_v34 = vadd.f32 %v1403_v29, %v1341_v3  ;;  %v1271_v50 = vadd.f32 %v1270_v49, %v2458_v42 }
 0x1e6   : > { %v1405_v18 = vadd.f32 %v1404_v34, %v1342_v17  ;;  %v1272_v55 = vadd.f32 %v1271_v50, %v2488_v53 }
 0x1e8   : > { %v1406_v20 = vadd.f32 %v1405_v18, %v1343_v27  ;;  %v1273_v61 = vadd.f32 %v1272_v55, %v2490_v57 }
 0x1ea   : > { %v1274_v25 = vrot.slane %v1273_v61, 4  ;;  %v1407_v37 = vadd.f32 %v1406_v20, %v1344_v24 }
 0x1ec   : > { %v1275_v62 = vadd.f32 %v1274_v25, %v1273_v61  ;;  %v1408_v63 = vrot.slane %v1407_v37, 4 }
 0x1ee   : > { %v1276_v52 = vrot.slane %v1275_v62, 2  ;;  %v1409_v2 = vadd.f32 %v1408_v63, %v1407_v37 }
 0x1f0   : > { %v1277_v42 = vadd.f32 %v1276_v52, %v1275_v62  ;;  %v1410_v5 = vrot.slane %v1409_v2, 2 }
 0x1f2   : > { %v1278_v8 = vrot.slane %v1277_v42, 1  ;;  %v1411_v7 = vadd.f32 %v1410_v5, %v1409_v2 }
 0x1f4   : > { %v1279_v53 = vadd.f32 %v1278_v8, %v1277_v42  ;;  %v1412_v9 = vrot.slane %v1411_v7, 1 }
 0x1f6   : > { %1280 = vst [vmem:[%s289_s7] sm:$0xff] %v1279_v53  ;;  %v1413_v57 = vadd.f32 %v1412_v9, %v1411_v7 }
 0x1f8   : > { %1414 = vst [vmem:[%s296_s10] sm:$0xff] %v1413_v57 }
 0x1f9 PF: > { %s15_s17 = sadd.s32 1, %s2079_s17   ;;  %s2580_s15 = smov %s2075_s16 }
 0x1fa   : > { %p12_p5 = scmp.ge.s32.totalorder %s15_s17, 6   ;;  %s2581_s16 = smov %s2583_s18 }
 0x1fc   :  { %14 = sbr.rel (!%p12_p5) target bundleno = 2 (0x2), region = 85 }

// kernel: generator_forward.16
= control target key start
LH: loop header
LB: loop body
LE: loop exit
PB: predicated region body
PF: predicated region fallthrough
CT: control target
= control target key end

     0   :  { %s963_s12 = smov 0   ;;  %s965_s13 = smov 0   ;;  %s1238_s0 = inlined_call_operand.vmem [shape: f32[4,512,128], index: 0, kind: input, shape index: {}]   ;;  %s1239_s1 = inlined_call_operand.vmem [shape: f32[1,128], index: 1, kind: input, shape index: {}]   ;;  %s1240_s2 = inlined_call_operand.vmem [shape: f32[1,128], index: 2, kind: input, shape index: {}]   ;;  %s1241_s3 = inlined_call_operand.vmem [shape: bf16[4,512,128], index: 3, kind: output, shape index: {}]  }
   0x1   :  { %s967_s14 = smov 0  }
   0x2 LB: > { %s25_s15 = sadd.s32 1, %s937_s13  ;;  %p693_p0 = scmp.ge.s32.totalorder %s941_s14, 1  ;;  %s941_s14 = sphi %s967_s14, %s13_s14   ;;  %s937_s13 = sphi %s965_s13, %s1243_s13   ;;  %s933_s12 = sphi %s963_s12, %s1242_s12  }
   0x3   : > { %p27_p1 = scmp.ge.s32.totalorder %s25_s15, 4  ;;  %p158_p2 = scmp.lt.s32.totalorder %s941_s14, 5 }
   0x5   : > { %s1245_s15 = smov (%p27_p1, %s25_s15), 0  ;;  %p159_p3 = pnand %p693_p0, %p158_p2 }
   0x6   : > { %p191_p4 = scmp.lt.s32.totalorder (!%p159_p3), %s933_s12, 3 }
   0x7   : > { %162 = sbr.rel (%p159_p3) target bundleno = 78 (0x4e), region = 32 }
   0xc   : > { %s1247_s12 = smov (!%p191_p4, %s933_s12), 3  ;;  %v986_v0 = vld [vmem:[%s1239_s1] ss:$0 sm:$0xff] }
   0xd   : > { %s700_s18 = sshll.u32 %s1247_s12, 9  ;;  %v997_v1 = vld [vmem:[%s1240_s2] ss:$0 sm:$0xff]  ;;  %s701_s24 = sshll.u32 %s1247_s12, 8 }
   0xe   : > { %s992_s21 = scalar_lea.vmem %s1238_s0, %s700_s18  ;;  %s1029_s27 = scalar_lea.vmem %s1241_s3, %s701_s24 }
   0xf   : > { %v210_v2 = vld [vmem:[%s992_s21] sm:$0xff]  ;;  %v211_v3 = vld [vmem:[%s992_s21 + $0x8] sm:$0xff]  ;;  %v212_v4 = vld [vmem:[%s992_s21 + $0x10] sm:$0xff] }
  0x10   : > { %v278_v5 = vmul.f32 %v986_v0, %v210_v2  ;;  %v279_v6 = vmul.f32 %v986_v0, %v211_v3  ;;  %v213_v7 = vld [vmem:[%s992_s21 + $0x18] sm:$0xff]  ;;  %v280_v8 = vmul.f32 %v986_v0, %v212_v4  ;;  %v214_v9 = vld [vmem:[%s992_s21 + $0x20] sm:$0xff]  ;;  %v215_v10 = vld [vmem:[%s992_s21 + $0x28] sm:$0xff] }
  0x11   : > { %v281_v11 = vmul.f32 %v986_v0, %v213_v7  ;;  %v282_v12 = vmul.f32 %v986_v0, %v214_v9  ;;  %v283_v13 = vmul.f32 %v986_v0, %v215_v10  ;;  %v216_v14 = vld [vmem:[%s992_s21 + $0x30] sm:$0xff]  ;;  %v217_v15 = vld [vmem:[%s992_s21 + $0x38] sm:$0xff]  ;;  %v218_v24 = vld [vmem:[%s992_s21 + $0x40] sm:$0xff] }
  0x12   : > { %v346_v16 = vadd.f32 %v997_v1, %v278_v5  ;;  %v347_v17 = vadd.f32 %v997_v1, %v279_v6  ;;  %v348_v18 = vadd.f32 %v997_v1, %v280_v8  ;;  %v284_v19 = vmul.f32 %v986_v0, %v216_v14  ;;  %v219_v25 = vld [vmem:[%s992_s21 + $0x48] sm:$0xff]  ;;  %v220_v30 = vld [vmem:[%s992_s21 + $0x50] sm:$0xff]  ;;  %v221_v35 = vld [vmem:[%s992_s21 + $0x58] sm:$0xff] }
  0x13   : > { %v349_v20 = vadd.f32 %v997_v1, %v281_v11  ;;  %v350_v21 = vadd.f32 %v997_v1, %v282_v12  ;;  %v351_v22 = vadd.f32 %v997_v1, %v283_v13  ;;  %v285_v23 = vmul.f32 %v986_v0, %v217_v15  ;;  %v222_v36 = vld [vmem:[%s992_s21 + $0x60] sm:$0xff]  ;;  %v223_v41 = vld [vmem:[%s992_s21 + $0x68] sm:$0xff]  ;;  %v224_v42 = vld [vmem:[%s992_s21 + $0x70] sm:$0xff] }
  0x14   : > { %v410_v26 = vmax.f32 %v346_v16, 0.0  ;;  %v411_v27 = vmax.f32 %v347_v17, 0.0  ;;  %v412_v28 = vmax.f32 %v348_v18, 0.0  ;;  %v352_v29 = vadd.f32 %v997_v1, %v284_v19  ;;  %v225_v51 = vld [vmem:[%s992_s21 + $0x78] sm:$0xff]  ;;  %v226_v56 = vld [vmem:[%s992_s21 + $0x80] sm:$0xff]  ;;  %v227_v61 = vld [vmem:[%s992_s21 + $0x88] sm:$0xff] }
  0x15   : > { %v413_v31 = vmax.f32 %v349_v20, 0.0  ;;  %v414_v32 = vmax.f32 %v350_v21, 0.0  ;;  %v415_v33 = vmax.f32 %v351_v22, 0.0  ;;  %v353_v34 = vadd.f32 %v997_v1, %v285_v23  ;;  %v228_v4 = vld [vmem:[%s992_s21 + $0x90] sm:$0xff]  ;;  %v229_v5 = vld [vmem:[%s992_s21 + $0x98] sm:$0xff]  ;;  %v230_v10 = vld [vmem:[%s992_s21 + $0xa0] sm:$0xff] }
  0x16   : > { %v705_v37 = vpack.c.bf16 %v411_v27, %v410_v26  ;;  %v416_v38 = vmax.f32 %v352_v29, 0.0  ;;  %v286_v39 = vmul.f32 %v986_v0, %v218_v24  ;;  %v287_v40 = vmul.f32 %v986_v0, %v219_v25  ;;  %v231_v15 = vld [vmem:[%s992_s21 + $0xa8] sm:$0xff]  ;;  %v232_v20 = vld [vmem:[%s992_s21 + $0xb0] sm:$0xff]  ;;  %v233_v25 = vld [vmem:[%s992_s21 + $0xb8] sm:$0xff] }
  0x17   : > { %v710_v43 = vpack.c.bf16 %v413_v31, %v412_v28  ;;  %v715_v44 = vpack.c.bf16 %v415_v33, %v414_v32  ;;  %v417_v45 = vmax.f32 %v353_v34, 0.0  ;;  %v288_v46 = vmul.f32 %v986_v0, %v220_v30  ;;  %v234_v30 = vld [vmem:[%s992_s21 + $0xc0] sm:$0xff] }
  0x18   : > { %706 = vst [vmem:[%s1029_s27] sm:$0xff] %v705_v37   ;;  %v354_v47 = vadd.f32 %v997_v1, %v286_v39  ;;  %v355_v48 = vadd.f32 %v997_v1, %v287_v40  ;;  %v289_v49 = vmul.f32 %v986_v0, %v221_v35  ;;  %v290_v50 = vmul.f32 %v986_v0, %v222_v36  ;;  %v235_v35 = vld [vmem:[%s992_s21 + $0xc8] sm:$0xff]  ;;  %v236_v40 = vld [vmem:[%s992_s21 + $0xd0] sm:$0xff] }
  0x19   : > { %862 = vst [vmem:[%s1029_s27 + $0x8] sm:$0xff] %v710_v43   ;;  %v720_v52 = vpack.c.bf16 %v417_v45, %v416_v38  ;;  %v356_v53 = vadd.f32 %v997_v1, %v288_v46  ;;  %v291_v54 = vmul.f32 %v986_v0, %v223_v41  ;;  %v292_v55 = vmul.f32 %v986_v0, %v224_v42  ;;  %v237_v41 = vld [vmem:[%s992_s21 + $0xd8] sm:$0xff]  ;;  %v238_v46 = vld [vmem:[%s992_s21 + $0xe0] sm:$0xff] }
  0x1a   : > { %863 = vst [vmem:[%s1029_s27 + $0x10] sm:$0xff] %v715_v44   ;;  %v418_v57 = vmax.f32 %v354_v47, 0.0  ;;  %v419_v58 = vmax.f32 %v355_v48, 0.0  ;;  %v357_v59 = vadd.f32 %v997_v1, %v289_v49  ;;  %v358_v60 = vadd.f32 %v997_v1, %v290_v50 }
  0x1b   : > { %864 = vst [vmem:[%s1029_s27 + $0x18] sm:$0xff] %v720_v52   ;;  %v420_v62 = vmax.f32 %v356_v53, 0.0  ;;  %v359_v63 = vadd.f32 %v997_v1, %v291_v54  ;;  %v293_v2 = vmul.f32 %v986_v0, %v225_v51  ;;  %v360_v3 = vadd.f32 %v997_v1, %v292_v55  ;;  %v239_v51 = vld [vmem:[%s992_s21 + $0xe8] sm:$0xff] }
  0x1c   : > { %v725_v6 = vpack.c.bf16 %v419_v58, %v418_v57  ;;  %v421_v7 = vmax.f32 %v357_v59, 0.0  ;;  %v422_v8 = vmax.f32 %v358_v60, 0.0  ;;  %v294_v9 = vmul.f32 %v986_v0, %v226_v56  ;;  %v240_v56 = vld [vmem:[%s992_s21 + $0xf0] sm:$0xff] }
  0x1d   : > { %v423_v11 = vmax.f32 %v359_v63, 0.0  ;;  %v361_v12 = vadd.f32 %v997_v1, %v293_v2  ;;  %v424_v13 = vmax.f32 %v360_v3, 0.0  ;;  %v295_v14 = vmul.f32 %v986_v0, %v227_v61  ;;  %v241_v61 = vld [vmem:[%s992_s21 + $0xf8] sm:$0xff] }
  0x1e   : > { %865 = vst [vmem:[%s1029_s27 + $0x20] sm:$0xff] %v725_v6   ;;  %v730_v16 = vpack.c.bf16 %v421_v7, %v420_v62  ;;  %v362_v17 = vadd.f32 %v997_v1, %v294_v9  ;;  %v296_v18 = vmul.f32 %v986_v0, %v228_v4  ;;  %v297_v19 = vmul.f32 %v986_v0, %v229_v5  ;;  %v242_v4 = vld [vmem:[%s992_s21 + $0x100] sm:$0xff]  ;;  %v243_v9 = vld [vmem:[%s992_s21 + $0x108] sm:$0xff] }
  0x1f   : > { %v735_v21 = vpack.c.bf16 %v423_v11, %v422_v8  ;;  %v425_v22 = vmax.f32 %v361_v12, 0.0  ;;  %v363_v23 = vadd.f32 %v997_v1, %v295_v14  ;;  %v298_v24 = vmul.f32 %v986_v0, %v230_v10  ;;  %v244_v14 = vld [vmem:[%s992_s21 + $0x110] sm:$0xff] }
  0x20   : > { %866 = vst [vmem:[%s1029_s27 + $0x28] sm:$0xff] %v730_v16   ;;  %v426_v26 = vmax.f32 %v362_v17, 0.0  ;;  %v364_v27 = vadd.f32 %v997_v1, %v296_v18  ;;  %v365_v28 = vadd.f32 %v997_v1, %v297_v19  ;;  %v299_v29 = vmul.f32 %v986_v0, %v231_v15  ;;  %v245_v15 = vld [vmem:[%s992_s21 + $0x118] sm:$0xff] }
  0x21   : > { %867 = vst [vmem:[%s1029_s27 + $0x30] sm:$0xff] %v735_v21   ;;  %v740_v31 = vpack.c.bf16 %v425_v22, %v424_v13  ;;  %v427_v32 = vmax.f32 %v363_v23, 0.0  ;;  %v366_v33 = vadd.f32 %v997_v1, %v298_v24  ;;  %v300_v34 = vmul.f32 %v986_v0, %v232_v20  ;;  %v246_v20 = vld [vmem:[%s992_s21 + $0x120] sm:$0xff] }
  0x22   : > { %v428_v36 = vmax.f32 %v364_v27, 0.0  ;;  %v429_v37 = vmax.f32 %v365_v28, 0.0  ;;  %v367_v38 = vadd.f32 %v997_v1, %v299_v29  ;;  %v301_v39 = vmul.f32 %v986_v0, %v233_v25  ;;  %v247_v25 = vld [vmem:[%s992_s21 + $0x128] sm:$0xff] }
  0x23   : > { %868 = vst [vmem:[%s1029_s27 + $0x38] sm:$0xff] %v740_v31   ;;  %v745_v42 = vpack.c.bf16 %v427_v32, %v426_v26  ;;  %v430_v43 = vmax.f32 %v366_v33, 0.0  ;;  %v368_v44 = vadd.f32 %v997_v1, %v300_v34  ;;  %v302_v45 = vmul.f32 %v986_v0, %v234_v30  ;;  %v248_v30 = vld [vmem:[%s992_s21 + $0x130] sm:$0xff] }
  0x24   : > { %v750_v47 = vpack.c.bf16 %v429_v37, %v428_v36  ;;  %v431_v48 = vmax.f32 %v367_v38, 0.0  ;;  %v369_v49 = vadd.f32 %v997_v1, %v301_v39  ;;  %v303_v50 = vmul.f32 %v986_v0, %v235_v35  ;;  %v249_v35 = vld [vmem:[%s992_s21 + $0x138] sm:$0xff] }
  0x25   : > { %869 = vst [vmem:[%s1029_s27 + $0x40] sm:$0xff] %v745_v42   ;;  %v432_v52 = vmax.f32 %v368_v44, 0.0  ;;  %v370_v53 = vadd.f32 %v997_v1, %v302_v45  ;;  %v304_v54 = vmul.f32 %v986_v0, %v236_v40  ;;  %v305_v55 = vmul.f32 %v986_v0, %v237_v41  ;;  %v250_v40 = vld [vmem:[%s992_s21 + $0x140] sm:$0xff]  ;;  %v251_v45 = vld [vmem:[%s992_s21 + $0x148] sm:$0xff] }
  0x26   : > { %870 = vst [vmem:[%s1029_s27 + $0x48] sm:$0xff] %v750_v47   ;;  %v755_v57 = vpack.c.bf16 %v431_v48, %v430_v43  ;;  %v433_v58 = vmax.f32 %v369_v49, 0.0  ;;  %v371_v59 = vadd.f32 %v997_v1, %v303_v50  ;;  %v306_v60 = vmul.f32 %v986_v0, %v238_v46  ;;  %v252_v50 = vld [vmem:[%s992_s21 + $0x150] sm:$0xff] }
  0x27   : > { %v434_v62 = vmax.f32 %v370_v53, 0.0  ;;  %v372_v63 = vadd.f32 %v997_v1, %v304_v54  ;;  %v373_v2 = vadd.f32 %v997_v1, %v305_v55  ;;  %v307_v3 = vmul.f32 %v986_v0, %v239_v51  ;;  %v253_v51 = vld [vmem:[%s992_s21 + $0x158] sm:$0xff] }
  0x28   : > { %871 = vst [vmem:[%s1029_s27 + $0x50] sm:$0xff] %v755_v57   ;;  %v760_v5 = vpack.c.bf16 %v433_v58, %v432_v52  ;;  %v435_v6 = vmax.f32 %v371_v59, 0.0  ;;  %v374_v7 = vadd.f32 %v997_v1, %v306_v60  ;;  %v308_v8 = vmul.f32 %v986_v0, %v240_v56  ;;  %v254_v56 = vld [vmem:[%s992_s21 + $0x160] sm:$0xff] }
  0x29   : > { %v436_v10 = vmax.f32 %v372_v63, 0.0  ;;  %v437_v11 = vmax.f32 %v373_v2, 0.0  ;;  %v375_v12 = vadd.f32 %v997_v1, %v307_v3  ;;  %v309_v13 = vmul.f32 %v986_v0, %v241_v61  ;;  %v255_v61 = vld [vmem:[%s992_s21 + $0x168] sm:$0xff] }
  0x2a   : > { %872 = vst [vmem:[%s1029_s27 + $0x58] sm:$0xff] %v760_v5   ;;  %v765_v16 = vpack.c.bf16 %v435_v6, %v434_v62  ;;  %v438_v17 = vmax.f32 %v374_v7, 0.0  ;;  %v376_v18 = vadd.f32 %v997_v1, %v308_v8  ;;  %v310_v19 = vmul.f32 %v986_v0, %v242_v4  ;;  %v256_v4 = vld [vmem:[%s992_s21 + $0x170] sm:$0xff] }
  0x2b   : > { %v770_v21 = vpack.c.bf16 %v437_v11, %v436_v10  ;;  %v439_v22 = vmax.f32 %v375_v12, 0.0  ;;  %v377_v23 = vadd.f32 %v997_v1, %v309_v13  ;;  %v311_v24 = vmul.f32 %v986_v0, %v243_v9  ;;  %v257_v9 = vld [vmem:[%s992_s21 + $0x178] sm:$0xff] }
  0x2c   : > { %873 = vst [vmem:[%s1029_s27 + $0x60] sm:$0xff] %v765_v16   ;;  %v440_v26 = vmax.f32 %v376_v18, 0.0  ;;  %v378_v27 = vadd.f32 %v997_v1, %v310_v19  ;;  %v312_v28 = vmul.f32 %v986_v0, %v244_v14  ;;  %v313_v29 = vmul.f32 %v986_v0, %v245_v15  ;;  %v258_v14 = vld [vmem:[%s992_s21 + $0x180] sm:$0xff]  ;;  %v259_v19 = vld [vmem:[%s992_s21 + $0x188] sm:$0xff] }
  0x2d   : > { %874 = vst [vmem:[%s1029_s27 + $0x68] sm:$0xff] %v770_v21   ;;  %v775_v31 = vpack.c.bf16 %v439_v22, %v438_v17  ;;  %v441_v32 = vmax.f32 %v377_v23, 0.0  ;;  %v379_v33 = vadd.f32 %v997_v1, %v311_v24  ;;  %v314_v34 = vmul.f32 %v986_v0, %v246_v20  ;;  %v260_v24 = vld [vmem:[%s992_s21 + $0x190] sm:$0xff] }
  0x2e   : > { %v442_v36 = vmax.f32 %v378_v27, 0.0  ;;  %v380_v37 = vadd.f32 %v997_v1, %v312_v28  ;;  %v381_v38 = vadd.f32 %v997_v1, %v313_v29  ;;  %v315_v39 = vmul.f32 %v986_v0, %v247_v25  ;;  %v261_v25 = vld [vmem:[%s992_s21 + $0x198] sm:$0xff] }
  0x2f   : > { %875 = vst [vmem:[%s1029_s27 + $0x70] sm:$0xff] %v775_v31   ;;  %v780_v41 = vpack.c.bf16 %v441_v32, %v440_v26  ;;  %v443_v42 = vmax.f32 %v379_v33, 0.0  ;;  %v382_v43 = vadd.f32 %v997_v1, %v314_v34  ;;  %v316_v44 = vmul.f32 %v986_v0, %v248_v30  ;;  %v262_v30 = vld [vmem:[%s992_s21 + $0x1a0] sm:$0xff] }
  0x30   : > { %v444_v46 = vmax.f32 %v380_v37, 0.0  ;;  %v445_v47 = vmax.f32 %v381_v38, 0.0  ;;  %v383_v48 = vadd.f32 %v997_v1, %v315_v39  ;;  %v317_v49 = vmul.f32 %v986_v0, %v249_v35  ;;  %v263_v35 = vld [vmem:[%s992_s21 + $0x1a8] sm:$0xff] }
  0x31   : > { %876 = vst [vmem:[%s1029_s27 + $0x78] sm:$0xff] %v780_v41   ;;  %v785_v52 = vpack.c.bf16 %v443_v42, %v442_v36  ;;  %v446_v53 = vmax.f32 %v382_v43, 0.0  ;;  %v384_v54 = vadd.f32 %v997_v1, %v316_v44  ;;  %v318_v55 = vmul.f32 %v986_v0, %v250_v40  ;;  %v264_v40 = vld [vmem:[%s992_s21 + $0x1b0] sm:$0xff] }
  0x32   : > { %v790_v57 = vpack.c.bf16 %v445_v47, %v444_v46  ;;  %v447_v58 = vmax.f32 %v383_v48, 0.0  ;;  %v385_v59 = vadd.f32 %v997_v1, %v317_v49  ;;  %v319_v60 = vmul.f32 %v986_v0, %v251_v45  ;;  %v265_v45 = vld [vmem:[%s992_s21 + $0x1b8] sm:$0xff] }
  0x33   : > { %877 = vst [vmem:[%s1029_s27 + $0x80] sm:$0xff] %v785_v52   ;;  %v448_v62 = vmax.f32 %v384_v54, 0.0  ;;  %v386_v63 = vadd.f32 %v997_v1, %v318_v55  ;;  %v320_v2 = vmul.f32 %v986_v0, %v252_v50  ;;  %v321_v3 = vmul.f32 %v986_v0, %v253_v51  ;;  %v266_v50 = vld [vmem:[%s992_s21 + $0x1c0] sm:$0xff]  ;;  %v267_v55 = vld [vmem:[%s992_s21 + $0x1c8] sm:$0xff] }
  0x34   : > { %878 = vst [vmem:[%s1029_s27 + $0x88] sm:$0xff] %v790_v57   ;;  %v795_v5 = vpack.c.bf16 %v447_v58, %v446_v53  ;;  %v449_v6 = vmax.f32 %v385_v59, 0.0  ;;  %v387_v7 = vadd.f32 %v997_v1, %v319_v60  ;;  %v322_v8 = vmul.f32 %v986_v0, %v254_v56  ;;  %v268_v60 = vld [vmem:[%s992_s21 + $0x1d0] sm:$0xff] }
  0x35   : > { %v450_v10 = vmax.f32 %v386_v63, 0.0  ;;  %v388_v11 = vadd.f32 %v997_v1, %v320_v2  ;;  %v389_v12 = vadd.f32 %v997_v1, %v321_v3  ;;  %v323_v13 = vmul.f32 %v986_v0, %v255_v61  ;;  %v269_v61 = vld [vmem:[%s992_s21 + $0x1d8] sm:$0xff] }
  0x36   : > { %879 = vst [vmem:[%s1029_s27 + $0x90] sm:$0xff] %v795_v5   ;;  %v800_v15 = vpack.c.bf16 %v449_v6, %v448_v62  ;;  %v451_v16 = vmax.f32 %v387_v7, 0.0  ;;  %v390_v17 = vadd.f32 %v997_v1, %v322_v8  ;;  %v324_v18 = vmul.f32 %v986_v0, %v256_v4  ;;  %v270_v4 = vld [vmem:[%s992_s21 + $0x1e0] sm:$0xff] }
  0x37   : > { %v452_v20 = vmax.f32 %v388_v11, 0.0  ;;  %v453_v21 = vmax.f32 %v389_v12, 0.0  ;;  %v391_v22 = vadd.f32 %v997_v1, %v323_v13  ;;  %v325_v23 = vmul.f32 %v986_v0, %v257_v9  ;;  %v271_v9 = vld [vmem:[%s992_s21 + $0x1e8] sm:$0xff] }
  0x38   : > { %880 = vst [vmem:[%s1029_s27 + $0x98] sm:$0xff] %v800_v15   ;;  %v805_v26 = vpack.c.bf16 %v451_v16, %v450_v10  ;;  %v454_v27 = vmax.f32 %v390_v17, 0.0  ;;  %v392_v28 = vadd.f32 %v997_v1, %v324_v18  ;;  %v326_v29 = vmul.f32 %v986_v0, %v258_v14  ;;  %v272_v14 = vld [vmem:[%s992_s21 + $0x1f0] sm:$0xff] }
  0x39   : > { %v810_v31 = vpack.c.bf16 %v453_v21, %v452_v20  ;;  %v455_v32 = vmax.f32 %v391_v22, 0.0  ;;  %v393_v33 = vadd.f32 %v997_v1, %v325_v23  ;;  %v327_v34 = vmul.f32 %v986_v0, %v259_v19  ;;  %v273_v19 = vld [vmem:[%s992_s21 + $0x1f8] sm:$0xff] }
  0x3a   : > { %881 = vst [vmem:[%s1029_s27 + $0xa0] sm:$0xff] %v805_v26   ;;  %v456_v36 = vmax.f32 %v392_v28, 0.0  ;;  %v394_v37 = vadd.f32 %v997_v1, %v326_v29  ;;  %v328_v38 = vmul.f32 %v986_v0, %v260_v24  ;;  %v329_v39 = vmul.f32 %v986_v0, %v261_v25 }
  0x3b   : > { %882 = vst [vmem:[%s1029_s27 + $0xa8] sm:$0xff] %v810_v31   ;;  %v815_v41 = vpack.c.bf16 %v455_v32, %v454_v27  ;;  %v457_v42 = vmax.f32 %v393_v33, 0.0  ;;  %v395_v43 = vadd.f32 %v997_v1, %v327_v34  ;;  %v330_v44 = vmul.f32 %v986_v0, %v262_v30 }
  0x3c   : > { %v458_v46 = vmax.f32 %v394_v37, 0.0  ;;  %v396_v47 = vadd.f32 %v997_v1, %v328_v38  ;;  %v397_v48 = vadd.f32 %v997_v1, %v329_v39  ;;  %v331_v49 = vmul.f32 %v986_v0, %v263_v35 }
  0x3d   : > { %883 = vst [vmem:[%s1029_s27 + $0xb0] sm:$0xff] %v815_v41   ;;  %v820_v51 = vpack.c.bf16 %v457_v42, %v456_v36  ;;  %v459_v52 = vmax.f32 %v395_v43, 0.0  ;;  %v398_v53 = vadd.f32 %v997_v1, %v330_v44  ;;  %v332_v54 = vmul.f32 %v986_v0, %v264_v40 }
  0x3e   : > { %v460_v56 = vmax.f32 %v396_v47, 0.0  ;;  %v461_v57 = vmax.f32 %v397_v48, 0.0  ;;  %v399_v58 = vadd.f32 %v997_v1, %v331_v49  ;;  %v333_v59 = vmul.f32 %v986_v0, %v265_v45 }
  0x3f   : > { %884 = vst [vmem:[%s1029_s27 + $0xb8] sm:$0xff] %v820_v51   ;;  %v825_v62 = vpack.c.bf16 %v459_v52, %v458_v46  ;;  %v462_v63 = vmax.f32 %v398_v53, 0.0  ;;  %v400_v2 = vadd.f32 %v997_v1, %v332_v54  ;;  %v334_v3 = vmul.f32 %v986_v0, %v266_v50 }
  0x40   : > { %v830_v5 = vpack.c.bf16 %v461_v57, %v460_v56  ;;  %v463_v6 = vmax.f32 %v399_v58, 0.0  ;;  %v401_v7 = vadd.f32 %v997_v1, %v333_v59  ;;  %v335_v8 = vmul.f32 %v986_v0, %v267_v55 }
  0x41   : > { %885 = vst [vmem:[%s1029_s27 + $0xc0] sm:$0xff] %v825_v62   ;;  %v464_v10 = vmax.f32 %v400_v2, 0.0  ;;  %v402_v11 = vadd.f32 %v997_v1, %v334_v3  ;;  %v336_v12 = vmul.f32 %v986_v0, %v268_v60  ;;  %v337_v13 = vmul.f32 %v986_v0, %v269_v61 }
  0x42   : > { %886 = vst [vmem:[%s1029_s27 + $0xc8] sm:$0xff] %v830_v5   ;;  %v835_v15 = vpack.c.bf16 %v463_v6, %v462_v63  ;;  %v465_v16 = vmax.f32 %v401_v7, 0.0  ;;  %v403_v17 = vadd.f32 %v997_v1, %v335_v8  ;;  %v338_v18 = vmul.f32 %v986_v0, %v270_v4 }
  0x43   : > { %v466_v20 = vmax.f32 %v402_v11, 0.0  ;;  %v404_v21 = vadd.f32 %v997_v1, %v336_v12  ;;  %v405_v22 = vadd.f32 %v997_v1, %v337_v13  ;;  %v339_v23 = vmul.f32 %v986_v0, %v271_v9 }
  0x44   : > { %887 = vst [vmem:[%s1029_s27 + $0xd0] sm:$0xff] %v835_v15   ;;  %v840_v24 = vpack.c.bf16 %v465_v16, %v464_v10  ;;  %v467_v25 = vmax.f32 %v403_v17, 0.0  ;;  %v406_v26 = vadd.f32 %v997_v1, %v338_v18  ;;  %v340_v27 = vmul.f32 %v986_v0, %v272_v14 }
  0x45   : > { %v468_v28 = vmax.f32 %v404_v21, 0.0  ;;  %v469_v29 = vmax.f32 %v405_v22, 0.0  ;;  %v407_v30 = vadd.f32 %v997_v1, %v339_v23  ;;  %v341_v31 = vmul.f32 %v986_v0, %v273_v19 }
  0x46   : > { %888 = vst [vmem:[%s1029_s27 + $0xd8] sm:$0xff] %v840_v24   ;;  %v845_v32 = vpack.c.bf16 %v467_v25, %v466_v20  ;;  %v470_v33 = vmax.f32 %v406_v26, 0.0  ;;  %v408_v34 = vadd.f32 %v997_v1, %v340_v27 }
  0x47   : > { %v850_v35 = vpack.c.bf16 %v469_v29, %v468_v28  ;;  %v471_v36 = vmax.f32 %v407_v30, 0.0  ;;  %v409_v37 = vadd.f32 %v997_v1, %v341_v31 }
  0x48   : > { %889 = vst [vmem:[%s1029_s27 + $0xe0] sm:$0xff] %v845_v32   ;;  %v472_v38 = vmax.f32 %v408_v34, 0.0 }
  0x49   : > { %890 = vst [vmem:[%s1029_s27 + $0xe8] sm:$0xff] %v850_v35   ;;  %v855_v39 = vpack.c.bf16 %v471_v36, %v470_v33  ;;  %v473_v40 = vmax.f32 %v409_v37, 0.0 }
  0x4b   : > { %891 = vst [vmem:[%s1029_s27 + $0xf0] sm:$0xff] %v855_v39   ;;  %v860_v41 = vpack.c.bf16 %v473_v40, %v472_v38 }
  0x4d   : > { %892 = vst [vmem:[%s1029_s27 + $0xf8] sm:$0xff] %v860_v41  }
  0x4e PF: > { %s13_s14 = sadd.s32 1, %s941_s14   ;;  %s1242_s12 = smov %s937_s13 }
  0x4f   : > { %p10_p5 = scmp.ge.s32.totalorder %s13_s14, 6   ;;  %s1243_s13 = smov %s1245_s15 }
  0x51   :  { %12 = sbr.rel (!%p10_p5) target bundleno = 2 (0x2), region = 62 }

// kernel: generator_forward.17
= control target key start
LH: loop header
LB: loop body
LE: loop exit
PB: predicated region body
PF: predicated region fallthrough
CT: control target
= control target key end

     0   :  { %s3846_s9 = smov 0   ;;  %s3848_s10 = smov 0   ;;  %s4285_s0 = inlined_call_operand.vmem [shape: bf16[4,2048,128], index: 0, kind: input, shape index: {}]   ;;  %s4286_s1 = inlined_call_operand.vmem [shape: bf16[4,128,128], index: 1, kind: input, shape index: {}]   ;;  %s4287_s2 = inlined_call_operand.vmem [shape: f32[4,2048,128], index: 2, kind: output, shape index: {}]  }
   0x1   :  { %s3850_s11 = smov 0  }
   0x2 LB: > { %s24_s12 = sadd.s32 1, %s3825_s10  ;;  %p2555_p0 = scmp.ge.s32.totalorder %s3829_s11, 1  ;;  %s3829_s11 = sphi %s3850_s11, %s12_s11   ;;  %s3825_s10 = sphi %s3848_s10, %s4289_s10   ;;  %s3821_s9 = sphi %s3846_s9, %s4288_s9  }
   0x3   : > { %p26_p1 = scmp.ge.s32.totalorder %s24_s12, 4  ;;  %p143_p2 = scmp.lt.s32.totalorder %s3829_s11, 5 }
   0x5   : > { %s4291_s12 = smov (%p26_p1, %s24_s12), 0  ;;  %p144_p3 = pnand %p2555_p0, %p143_p2 }
   0x6   : > { %p179_p4 = scmp.lt.s32.totalorder (!%p144_p3), %s3821_s9, 3 }
   0x7   : > { %147 = sbr.rel (%p144_p3) target bundleno = 693 (0x2b5), region = 28 }
   0xc   : > { %s4293_s9 = smov (!%p179_p4, %s3821_s9), 3 }
   0xd   : > { %s3109_s13 = sshll.u32 %s4293_s9, 6  ;;  %s3108_s17 = sshll.u32 %s4293_s9, 10 }
   0xe   : > { %s3870_s16 = scalar_lea.vmem %s4286_s1, %s3109_s13  ;;  %s3884_s20 = scalar_lea.vmem %s4285_s0, %s3108_s17 }
   0xf   : > { %v3246_v0 = vld [vmem:[%s3870_s16 + $0x38] sm:$0xff]  ;;  %v3245_v1 = vld [vmem:[%s3870_s16 + $0x30] sm:$0xff]  ;;  %v3244_v2 = vld [vmem:[%s3870_s16 + $0x28] sm:$0xff]  ;;  %s3110_s21 = sshll.u32 %s4293_s9, 11 }
  0x10   : > { %1291 = vmatpush.bf16.msra.mxu0 %v3246_v0  ;;  %3247 = vmatpush.bf16.msra.mxu1 %v3246_v0  ;;  %v3243_v3 = vld [vmem:[%s3870_s16 + $0x20] sm:$0xff]  ;;  %v3242_v4 = vld [vmem:[%s3870_s16 + $0x18] sm:$0xff]  ;;  %v3241_v5 = vld [vmem:[%s3870_s16 + $0x10] sm:$0xff]  ;;  %s3926_s24 = scalar_lea.vmem %s4287_s2, %s3110_s21 }
  0x11   : > { %3248 = vmatpush.bf16.msra.mxu2 %v3246_v0  ;;  %3249 = vmatpush.bf16.msra.mxu3 %v3246_v0  ;;  %v3240_v6 = vld [vmem:[%s3870_s16 + $0x8] sm:$0xff]  ;;  %v3239_v7 = vld [vmem:[%s3870_s16] sm:$0xff]  ;;  %v3113_v16 = vld [vmem:[%s3884_s20 + $0x10] sm:$0xff] }
  0x12   : > { %v3111_v8 = vld [vmem:[%s3884_s20] sm:$0xff]  ;;  %v3112_v12 = vld [vmem:[%s3884_s20 + $0x8] sm:$0xff]  ;;  %v3145_v17 = vld [vmem:[%s3884_s20 + $0x110] sm:$0xff] }
  0x13   : > { %v3143_v9 = vld [vmem:[%s3884_s20 + $0x100] sm:$0xff]  ;;  %v3144_v13 = vld [vmem:[%s3884_s20 + $0x108] sm:$0xff]  ;;  %v3177_v18 = vld [vmem:[%s3884_s20 + $0x210] sm:$0xff] }
  0x14   : > { %1292 = vmatpush.bf16.msra.mxu0 %v3245_v1  ;;  %3250 = vmatpush.bf16.msra.mxu1 %v3245_v1  ;;  %v3175_v10 = vld [vmem:[%s3884_s20 + $0x200] sm:$0xff]  ;;  %v3176_v14 = vld [vmem:[%s3884_s20 + $0x208] sm:$0xff]  ;;  %v3209_v19 = vld [vmem:[%s3884_s20 + $0x310] sm:$0xff] }
  0x15   : > { %3251 = vmatpush.bf16.msra.mxu2 %v3245_v1  ;;  %3252 = vmatpush.bf16.msra.mxu3 %v3245_v1  ;;  %v3207_v11 = vld [vmem:[%s3884_s20 + $0x300] sm:$0xff]  ;;  %v3208_v15 = vld [vmem:[%s3884_s20 + $0x308] sm:$0xff]  ;;  %v3114_v20 = vld [vmem:[%s3884_s20 + $0x18] sm:$0xff] }
  0x16   : > { %v3146_v21 = vld [vmem:[%s3884_s20 + $0x118] sm:$0xff]  ;;  %v3115_v24 = vld [vmem:[%s3884_s20 + $0x20] sm:$0xff]  ;;  %v3116_v28 = vld [vmem:[%s3884_s20 + $0x28] sm:$0xff] }
  0x17   : > { %v3178_v22 = vld [vmem:[%s3884_s20 + $0x218] sm:$0xff]  ;;  %v3147_v25 = vld [vmem:[%s3884_s20 + $0x120] sm:$0xff]  ;;  %v3148_v29 = vld [vmem:[%s3884_s20 + $0x128] sm:$0xff] }
  0x18   : > { %1293 = vmatpush.bf16.msra.mxu0 %v3244_v2  ;;  %3253 = vmatpush.bf16.msra.mxu1 %v3244_v2  ;;  %v3210_v23 = vld [vmem:[%s3884_s20 + $0x318] sm:$0xff]  ;;  %v3179_v26 = vld [vmem:[%s3884_s20 + $0x220] sm:$0xff]  ;;  %v3180_v30 = vld [vmem:[%s3884_s20 + $0x228] sm:$0xff] }
  0x19   : > { %3254 = vmatpush.bf16.msra.mxu2 %v3244_v2  ;;  %3255 = vmatpush.bf16.msra.mxu3 %v3244_v2  ;;  %v3211_v27 = vld [vmem:[%s3884_s20 + $0x320] sm:$0xff]  ;;  %v3212_v31 = vld [vmem:[%s3884_s20 + $0x328] sm:$0xff]  ;;  %v3117_v32 = vld [vmem:[%s3884_s20 + $0x30] sm:$0xff] }
  0x1a   : > { %v3149_v33 = vld [vmem:[%s3884_s20 + $0x130] sm:$0xff]  ;;  %v3118_v36 = vld [vmem:[%s3884_s20 + $0x38] sm:$0xff]  ;;  %v3119_v40 = vld [vmem:[%s3884_s20 + $0x40] sm:$0xff] }
  0x1b   : > { %v3181_v34 = vld [vmem:[%s3884_s20 + $0x230] sm:$0xff]  ;;  %v3150_v37 = vld [vmem:[%s3884_s20 + $0x138] sm:$0xff]  ;;  %v3151_v41 = vld [vmem:[%s3884_s20 + $0x140] sm:$0xff] }
  0x1c   : > { %1294 = vmatpush.bf16.msra.mxu0 %v3243_v3  ;;  %3256 = vmatpush.bf16.msra.mxu1 %v3243_v3  ;;  %v3213_v35 = vld [vmem:[%s3884_s20 + $0x330] sm:$0xff]  ;;  %v3182_v38 = vld [vmem:[%s3884_s20 + $0x238] sm:$0xff]  ;;  %v3183_v44 = vld [vmem:[%s3884_s20 + $0x240] sm:$0xff] }
  0x1d   : > { %3257 = vmatpush.bf16.msra.mxu2 %v3243_v3  ;;  %3258 = vmatpush.bf16.msra.mxu3 %v3243_v3  ;;  %v3214_v39 = vld [vmem:[%s3884_s20 + $0x338] sm:$0xff]  ;;  %v3215_v45 = vld [vmem:[%s3884_s20 + $0x340] sm:$0xff]  ;;  %v3120_v56 = vld [vmem:[%s3884_s20 + $0x48] sm:$0xff] }
  0x1e   : > { %v3152_v57 = vld [vmem:[%s3884_s20 + $0x148] sm:$0xff] }
  0x1f   : > { %v3184_v61 = vld [vmem:[%s3884_s20 + $0x248] sm:$0xff] }
  0x20   : > { %1295 = vmatpush.bf16.msra.mxu0 %v3242_v4  ;;  %3259 = vmatpush.bf16.msra.mxu1 %v3242_v4  ;;  %v3216_v62 = vld [vmem:[%s3884_s20 + $0x348] sm:$0xff] }
  0x21   : > { %3260 = vmatpush.bf16.msra.mxu2 %v3242_v4  ;;  %3261 = vmatpush.bf16.msra.mxu3 %v3242_v4 }
  0x24   : > { %1296 = vmatpush.bf16.msra.mxu0 %v3241_v5  ;;  %3262 = vmatpush.bf16.msra.mxu1 %v3241_v5 }
  0x25   : > { %3263 = vmatpush.bf16.msra.mxu2 %v3241_v5  ;;  %3264 = vmatpush.bf16.msra.mxu3 %v3241_v5 }
  0x28   : > { %1297 = vmatpush.bf16.msra.mxu0 %v3240_v6  ;;  %3265 = vmatpush.bf16.msra.mxu1 %v3240_v6 }
  0x29   : > { %3266 = vmatpush.bf16.msra.mxu2 %v3240_v6  ;;  %3267 = vmatpush.bf16.msra.mxu3 %v3240_v6 }
  0x2c   : > { %1298 = vmatpush.bf16.msra.mxu0 %v3239_v7  ;;  %3268 = vmatpush.bf16.msra.mxu1 %v3239_v7 }
  0x2d   : > { %3269 = vmatpush.bf16.msra.mxu2 %v3239_v7  ;;  %3270 = vmatpush.bf16.msra.mxu3 %v3239_v7 }
  0x2f   : > { %1299 = vmatmul.bf16.vlgmr.msra.gmra.mxu0 %v3111_v8  ;;  %1459 = vmatmul.bf16.vlgmr.msra.gmra.mxu1 %v3143_v9 }
  0x30   : > { %1619 = vmatmul.bf16.vlgmr.msra.gmra.mxu2 %v3175_v10  ;;  %1779 = vmatmul.bf16.vlgmr.msra.gmra.mxu3 %v3207_v11 }
  0x3f   : > { %1304 = vmatmul.bf16.gmra.mxu0 %v3112_v12  ;;  %1464 = vmatmul.bf16.gmra.mxu1 %v3144_v13  ;;  %v3121_v12 = vld [vmem:[%s3884_s20 + $0x50] sm:$0xff] }
  0x40   : > { %1624 = vmatmul.bf16.gmra.mxu2 %v3176_v14  ;;  %1784 = vmatmul.bf16.gmra.mxu3 %v3208_v15  ;;  %v3153_v13 = vld [vmem:[%s3884_s20 + $0x150] sm:$0xff] }
  0x4f   : > { %1309 = vmatmul.bf16.gmra.mxu0 %v3113_v16  ;;  %1469 = vmatmul.bf16.gmra.mxu1 %v3145_v17  ;;  %v3185_v17 = vld [vmem:[%s3884_s20 + $0x250] sm:$0xff] }
  0x50   : > { %1629 = vmatmul.bf16.gmra.mxu2 %v3177_v18  ;;  %1789 = vmatmul.bf16.gmra.mxu3 %v3209_v19  ;;  %v3217_v18 = vld [vmem:[%s3884_s20 + $0x350] sm:$0xff] }
  0x5f   : > { %1314 = vmatmul.bf16.gmra.mxu0 %v3114_v20  ;;  %1474 = vmatmul.bf16.gmra.mxu1 %v3146_v21 }
  0x60   : > { %1634 = vmatmul.bf16.gmra.mxu2 %v3178_v22  ;;  %1794 = vmatmul.bf16.gmra.mxu3 %v3210_v23 }
  0x6f   : > { %1319 = vmatmul.bf16.gmra.mxu0 %v3115_v24  ;;  %1479 = vmatmul.bf16.gmra.mxu1 %v3147_v25 }
  0x70   : > { %1639 = vmatmul.bf16.gmra.mxu2 %v3179_v26  ;;  %1799 = vmatmul.bf16.gmra.mxu3 %v3211_v27 }
  0x7f   : > { %1324 = vmatmul.bf16.gmra.mxu0 %v3116_v28  ;;  %1484 = vmatmul.bf16.gmra.mxu1 %v3148_v29 }
  0x80   : > { %1644 = vmatmul.bf16.gmra.mxu2 %v3180_v30  ;;  %1804 = vmatmul.bf16.gmra.mxu3 %v3212_v31 }
  0x8f   : > { %1329 = vmatmul.bf16.gmra.mxu0 %v3117_v32  ;;  %1489 = vmatmul.bf16.gmra.mxu1 %v3149_v33  ;;  %v3122_v32 = vld [vmem:[%s3884_s20 + $0x58] sm:$0xff] }
  0x90   : > { %1649 = vmatmul.bf16.gmra.mxu2 %v3181_v34  ;;  %1809 = vmatmul.bf16.gmra.mxu3 %v3213_v35  ;;  %v3154_v33 = vld [vmem:[%s3884_s20 + $0x158] sm:$0xff] }
  0x9f   : > { %1334 = vmatmul.bf16.gmra.mxu0 %v3118_v36  ;;  %1494 = vmatmul.bf16.gmra.mxu1 %v3150_v37  ;;  %v3186_v37 = vld [vmem:[%s3884_s20 + $0x258] sm:$0xff] }
  0xa0   : > { %1654 = vmatmul.bf16.gmra.mxu2 %v3182_v38  ;;  %1814 = vmatmul.bf16.gmra.mxu3 %v3214_v39  ;;  %v3218_v38 = vld [vmem:[%s3884_s20 + $0x358] sm:$0xff] }
  0xac   : > { %v1300_v42 = vpop.f32.mrf.mxu0  ;;  %v1460_v43 = vpop.f32.mrf.mxu1 }
  0xad   : > { %3295 = vtanh.f32 %v1300_v42 }
  0xae   : > { %3297 = vtanh.f32 %v1460_v43 }
  0xaf   : > { %1339 = vmatmul.bf16.gmra.mxu0 %v3119_v40  ;;  %1499 = vmatmul.bf16.gmra.mxu1 %v3151_v41 }
  0xb0   : > { %1659 = vmatmul.bf16.gmra.mxu2 %v3183_v44  ;;  %1819 = vmatmul.bf16.gmra.mxu3 %v3215_v45 }
  0xb3   : > { %v3296_v46 = vpop.eup %3295  ;;  %v1620_v47 = vpop.f32.mrf.mxu2 }
  0xb4   : > { %v1780_v48 = vpop.f32.mrf.mxu3  ;;  %v3298_v49 = vpop.eup %3297  ;;  %2196 = vst [vmem:[%s3926_s24] sm:$0xff] %v3296_v46  ;;  %3299 = vtanh.f32 %v1620_v47 }
  0xb5   : > { %v1302_v50 = vpop.f32.mrf.mxu0  ;;  %v1462_v51 = vpop.f32.mrf.mxu1  ;;  %2260 = vst [vmem:[%s3926_s24 + $0x200] sm:$0xff] %v3298_v49  ;;  %3301 = vtanh.f32 %v1780_v48 }
  0xb6   : > { %3303 = vtanh.f32 %v1302_v50 }
  0xb7   : > { %3305 = vtanh.f32 %v1462_v51 }
  0xba   : > { %v3300_v52 = vpop.eup %3299 }
  0xbb   : > { %v3302_v53 = vpop.eup %3301  ;;  %2324 = vst [vmem:[%s3926_s24 + $0x400] sm:$0xff] %v3300_v52  ;;  %v1622_v54 = vpop.f32.mrf.mxu2  ;;  %v3123_v52 = vld [vmem:[%s3884_s20 + $0x60] sm:$0xff] }
  0xbc   : > { %v1782_v55 = vpop.f32.mrf.mxu3  ;;  %v3304_v58 = vpop.eup %3303  ;;  %2388 = vst [vmem:[%s3926_s24 + $0x600] sm:$0xff] %v3302_v53  ;;  %3307 = vtanh.f32 %v1622_v54  ;;  %v3155_v53 = vld [vmem:[%s3884_s20 + $0x160] sm:$0xff] }
  0xbd   : > { %v1305_v59 = vpop.f32.mrf.mxu0  ;;  %v1465_v60 = vpop.f32.mrf.mxu1  ;;  %2197 = vst [vmem:[%s3926_s24 + $0x8] sm:$0xff] %v3304_v58  ;;  %3309 = vtanh.f32 %v1782_v55  ;;  %v3219_v58 = vld [vmem:[%s3884_s20 + $0x360] sm:$0xff] }
  0xbe   : > { %v3306_v63 = vpop.eup %3305  ;;  %3311 = vtanh.f32 %v1305_v59 }
  0xbf   : > { %2261 = vst [vmem:[%s3926_s24 + $0x208] sm:$0xff] %v3306_v63  ;;  %3313 = vtanh.f32 %v1465_v60  ;;  %1344 = vmatmul.bf16.gmra.mxu0 %v3120_v56  ;;  %1504 = vmatmul.bf16.gmra.mxu1 %v3152_v57  ;;  %v3187_v57 = vld [vmem:[%s3884_s20 + $0x260] sm:$0xff] }
  0xc0   : > { %1664 = vmatmul.bf16.gmra.mxu2 %v3184_v61  ;;  %1824 = vmatmul.bf16.gmra.mxu3 %v3216_v62 }
  0xc2   : > { %v3308_v0 = vpop.eup %3307 }
  0xc3   : > { %v3310_v1 = vpop.eup %3309  ;;  %2325 = vst [vmem:[%s3926_s24 + $0x408] sm:$0xff] %v3308_v0  ;;  %v1625_v2 = vpop.f32.mrf.mxu2 }
  0xc4   : > { %v1785_v3 = vpop.f32.mrf.mxu3  ;;  %v3312_v4 = vpop.eup %3311  ;;  %2389 = vst [vmem:[%s3926_s24 + $0x608] sm:$0xff] %v3310_v1  ;;  %3315 = vtanh.f32 %v1625_v2 }
  0xc5   : > { %v1307_v5 = vpop.f32.mrf.mxu0  ;;  %v1467_v6 = vpop.f32.mrf.mxu1  ;;  %2198 = vst [vmem:[%s3926_s24 + $0x10] sm:$0xff] %v3312_v4  ;;  %3317 = vtanh.f32 %v1785_v3 }
  0xc6   : > { %v3314_v7 = vpop.eup %3313  ;;  %3319 = vtanh.f32 %v1307_v5 }
  0xc7   : > { %2262 = vst [vmem:[%s3926_s24 + $0x210] sm:$0xff] %v3314_v7  ;;  %3321 = vtanh.f32 %v1467_v6 }
  0xca   : > { %v3316_v8 = vpop.eup %3315 }
  0xcb   : > { %v3318_v9 = vpop.eup %3317  ;;  %2326 = vst [vmem:[%s3926_s24 + $0x410] sm:$0xff] %v3316_v8  ;;  %v1627_v10 = vpop.f32.mrf.mxu2  ;;  %v3124_v8 = vld [vmem:[%s3884_s20 + $0x68] sm:$0xff] }
  0xcc   : > { %v1787_v11 = vpop.f32.mrf.mxu3  ;;  %v3320_v14 = vpop.eup %3319  ;;  %2390 = vst [vmem:[%s3926_s24 + $0x610] sm:$0xff] %v3318_v9  ;;  %3323 = vtanh.f32 %v1627_v10  ;;  %v3156_v9 = vld [vmem:[%s3884_s20 + $0x168] sm:$0xff] }
  0xcd   : > { %v1310_v15 = vpop.f32.mrf.mxu0  ;;  %v1470_v16 = vpop.f32.mrf.mxu1  ;;  %2199 = vst [vmem:[%s3926_s24 + $0x18] sm:$0xff] %v3320_v14  ;;  %3325 = vtanh.f32 %v1787_v11  ;;  %v3220_v14 = vld [vmem:[%s3884_s20 + $0x368] sm:$0xff] }
  0xce   : > { %v3322_v19 = vpop.eup %3321  ;;  %3327 = vtanh.f32 %v1310_v15 }
  0xcf   : > { %2263 = vst [vmem:[%s3926_s24 + $0x218] sm:$0xff] %v3322_v19  ;;  %3329 = vtanh.f32 %v1470_v16  ;;  %1349 = vmatmul.bf16.gmra.mxu0 %v3121_v12  ;;  %1509 = vmatmul.bf16.gmra.mxu1 %v3153_v13  ;;  %v3188_v13 = vld [vmem:[%s3884_s20 + $0x268] sm:$0xff] }
  0xd0   : > { %1669 = vmatmul.bf16.gmra.mxu2 %v3185_v17  ;;  %1829 = vmatmul.bf16.gmra.mxu3 %v3217_v18 }
  0xd2   : > { %v3324_v20 = vpop.eup %3323 }
  0xd3   : > { %v3326_v21 = vpop.eup %3325  ;;  %2327 = vst [vmem:[%s3926_s24 + $0x418] sm:$0xff] %v3324_v20  ;;  %v1630_v22 = vpop.f32.mrf.mxu2 }
  0xd4   : > { %v1790_v23 = vpop.f32.mrf.mxu3  ;;  %v3328_v24 = vpop.eup %3327  ;;  %2391 = vst [vmem:[%s3926_s24 + $0x618] sm:$0xff] %v3326_v21  ;;  %3331 = vtanh.f32 %v1630_v22 }
  0xd5   : > { %v1312_v25 = vpop.f32.mrf.mxu0  ;;  %v1472_v26 = vpop.f32.mrf.mxu1  ;;  %2200 = vst [vmem:[%s3926_s24 + $0x20] sm:$0xff] %v3328_v24  ;;  %3333 = vtanh.f32 %v1790_v23 }
  0xd6   : > { %v3330_v27 = vpop.eup %3329  ;;  %3335 = vtanh.f32 %v1312_v25 }
  0xd7   : > { %2264 = vst [vmem:[%s3926_s24 + $0x220] sm:$0xff] %v3330_v27  ;;  %3337 = vtanh.f32 %v1472_v26 }
  0xda   : > { %v3332_v28 = vpop.eup %3331 }
  0xdb   : > { %v3334_v29 = vpop.eup %3333  ;;  %2328 = vst [vmem:[%s3926_s24 + $0x420] sm:$0xff] %v3332_v28  ;;  %v1632_v30 = vpop.f32.mrf.mxu2  ;;  %v3125_v28 = vld [vmem:[%s3884_s20 + $0x70] sm:$0xff] }
  0xdc   : > { %v1792_v31 = vpop.f32.mrf.mxu3  ;;  %v3336_v34 = vpop.eup %3335  ;;  %2392 = vst [vmem:[%s3926_s24 + $0x620] sm:$0xff] %v3334_v29  ;;  %3339 = vtanh.f32 %v1632_v30  ;;  %v3157_v29 = vld [vmem:[%s3884_s20 + $0x170] sm:$0xff] }
  0xdd   : > { %v1315_v35 = vpop.f32.mrf.mxu0  ;;  %v1475_v36 = vpop.f32.mrf.mxu1  ;;  %2201 = vst [vmem:[%s3926_s24 + $0x28] sm:$0xff] %v3336_v34  ;;  %3341 = vtanh.f32 %v1792_v31  ;;  %v3221_v34 = vld [vmem:[%s3884_s20 + $0x370] sm:$0xff] }
  0xde   : > { %v3338_v39 = vpop.eup %3337  ;;  %3343 = vtanh.f32 %v1315_v35 }
  0xdf   : > { %2265 = vst [vmem:[%s3926_s24 + $0x228] sm:$0xff] %v3338_v39  ;;  %3345 = vtanh.f32 %v1475_v36  ;;  %1354 = vmatmul.bf16.gmra.mxu0 %v3122_v32  ;;  %1514 = vmatmul.bf16.gmra.mxu1 %v3154_v33  ;;  %v3189_v33 = vld [vmem:[%s3884_s20 + $0x270] sm:$0xff] }
  0xe0   : > { %1674 = vmatmul.bf16.gmra.mxu2 %v3186_v37  ;;  %1834 = vmatmul.bf16.gmra.mxu3 %v3218_v38 }
  0xe2   : > { %v3340_v40 = vpop.eup %3339 }
  0xe3   : > { %v3342_v41 = vpop.eup %3341  ;;  %2329 = vst [vmem:[%s3926_s24 + $0x428] sm:$0xff] %v3340_v40  ;;  %v1635_v42 = vpop.f32.mrf.mxu2 }
  0xe4   : > { %v1795_v43 = vpop.f32.mrf.mxu3  ;;  %v3344_v44 = vpop.eup %3343  ;;  %2393 = vst [vmem:[%s3926_s24 + $0x628] sm:$0xff] %v3342_v41  ;;  %3347 = vtanh.f32 %v1635_v42 }
  0xe5   : > { %v1317_v45 = vpop.f32.mrf.mxu0  ;;  %v1477_v46 = vpop.f32.mrf.mxu1  ;;  %2202 = vst [vmem:[%s3926_s24 + $0x30] sm:$0xff] %v3344_v44  ;;  %3349 = vtanh.f32 %v1795_v43 }
  0xe6   : > { %v3346_v47 = vpop.eup %3345  ;;  %3351 = vtanh.f32 %v1317_v45 }
  0xe7   : > { %2266 = vst [vmem:[%s3926_s24 + $0x230] sm:$0xff] %v3346_v47  ;;  %3353 = vtanh.f32 %v1477_v46 }
  0xea   : > { %v3348_v48 = vpop.eup %3347 }
  0xeb   : > { %v3350_v49 = vpop.eup %3349  ;;  %2330 = vst [vmem:[%s3926_s24 + $0x430] sm:$0xff] %v3348_v48  ;;  %v1637_v50 = vpop.f32.mrf.mxu2  ;;  %v3126_v48 = vld [vmem:[%s3884_s20 + $0x78] sm:$0xff] }
  0xec   : > { %v1797_v51 = vpop.f32.mrf.mxu3  ;;  %v3352_v54 = vpop.eup %3351  ;;  %2394 = vst [vmem:[%s3926_s24 + $0x630] sm:$0xff] %v3350_v49  ;;  %3355 = vtanh.f32 %v1637_v50  ;;  %v3158_v49 = vld [vmem:[%s3884_s20 + $0x178] sm:$0xff] }
  0xed   : > { %v1320_v55 = vpop.f32.mrf.mxu0  ;;  %v1480_v56 = vpop.f32.mrf.mxu1  ;;  %2203 = vst [vmem:[%s3926_s24 + $0x38] sm:$0xff] %v3352_v54  ;;  %3357 = vtanh.f32 %v1797_v51  ;;  %v3222_v54 = vld [vmem:[%s3884_s20 + $0x378] sm:$0xff] }
  0xee   : > { %v3354_v59 = vpop.eup %3353  ;;  %3359 = vtanh.f32 %v1320_v55 }
  0xef   : > { %2267 = vst [vmem:[%s3926_s24 + $0x238] sm:$0xff] %v3354_v59  ;;  %3361 = vtanh.f32 %v1480_v56  ;;  %1359 = vmatmul.bf16.gmra.mxu0 %v3123_v52  ;;  %1519 = vmatmul.bf16.gmra.mxu1 %v3155_v53  ;;  %v3190_v53 = vld [vmem:[%s3884_s20 + $0x278] sm:$0xff] }
  0xf0   : > { %1679 = vmatmul.bf16.gmra.mxu2 %v3187_v57  ;;  %1839 = vmatmul.bf16.gmra.mxu3 %v3219_v58 }
  0xf2   : > { %v3356_v60 = vpop.eup %3355 }
  0xf3   : > { %v3358_v61 = vpop.eup %3357  ;;  %2331 = vst [vmem:[%s3926_s24 + $0x438] sm:$0xff] %v3356_v60  ;;  %v1640_v62 = vpop.f32.mrf.mxu2 }
  0xf4   : > { %v1800_v63 = vpop.f32.mrf.mxu3  ;;  %v3360_v0 = vpop.eup %3359  ;;  %2395 = vst [vmem:[%s3926_s24 + $0x638] sm:$0xff] %v3358_v61  ;;  %3363 = vtanh.f32 %v1640_v62 }
  0xf5   : > { %v1322_v1 = vpop.f32.mrf.mxu0  ;;  %v1482_v2 = vpop.f32.mrf.mxu1  ;;  %2204 = vst [vmem:[%s3926_s24 + $0x40] sm:$0xff] %v3360_v0  ;;  %3365 = vtanh.f32 %v1800_v63 }
  0xf6   : > { %v3362_v3 = vpop.eup %3361  ;;  %3367 = vtanh.f32 %v1322_v1 }
  0xf7   : > { %2268 = vst [vmem:[%s3926_s24 + $0x240] sm:$0xff] %v3362_v3  ;;  %3369 = vtanh.f32 %v1482_v2 }
  0xfa   : > { %v3364_v4 = vpop.eup %3363 }
  0xfb   : > { %v3366_v5 = vpop.eup %3365  ;;  %2332 = vst [vmem:[%s3926_s24 + $0x440] sm:$0xff] %v3364_v4  ;;  %v1642_v6 = vpop.f32.mrf.mxu2  ;;  %v3127_v4 = vld [vmem:[%s3884_s20 + $0x80] sm:$0xff] }
  0xfc   : > { %v1802_v7 = vpop.f32.mrf.mxu3  ;;  %v3368_v10 = vpop.eup %3367  ;;  %2396 = vst [vmem:[%s3926_s24 + $0x640] sm:$0xff] %v3366_v5  ;;  %3371 = vtanh.f32 %v1642_v6  ;;  %v3159_v5 = vld [vmem:[%s3884_s20 + $0x180] sm:$0xff] }
  0xfd   : > { %v1325_v11 = vpop.f32.mrf.mxu0  ;;  %v1485_v12 = vpop.f32.mrf.mxu1  ;;  %2205 = vst [vmem:[%s3926_s24 + $0x48] sm:$0xff] %v3368_v10  ;;  %3373 = vtanh.f32 %v1802_v7  ;;  %v3223_v10 = vld [vmem:[%s3884_s20 + $0x380] sm:$0xff] }
  0xfe   : > { %v3370_v15 = vpop.eup %3369  ;;  %3375 = vtanh.f32 %v1325_v11 }
  0xff   : > { %2269 = vst [vmem:[%s3926_s24 + $0x248] sm:$0xff] %v3370_v15  ;;  %3377 = vtanh.f32 %v1485_v12  ;;  %1364 = vmatmul.bf16.gmra.mxu0 %v3124_v8  ;;  %1524 = vmatmul.bf16.gmra.mxu1 %v3156_v9  ;;  %v3191_v9 = vld [vmem:[%s3884_s20 + $0x280] sm:$0xff] }
 0x100   : > { %1684 = vmatmul.bf16.gmra.mxu2 %v3188_v13  ;;  %1844 = vmatmul.bf16.gmra.mxu3 %v3220_v14 }
 0x102   : > { %v3372_v16 = vpop.eup %3371 }
 0x103   : > { %v3374_v17 = vpop.eup %3373  ;;  %2333 = vst [vmem:[%s3926_s24 + $0x448] sm:$0xff] %v3372_v16  ;;  %v1645_v18 = vpop.f32.mrf.mxu2 }
 0x104   : > { %v1805_v19 = vpop.f32.mrf.mxu3  ;;  %v3376_v20 = vpop.eup %3375  ;;  %2397 = vst [vmem:[%s3926_s24 + $0x648] sm:$0xff] %v3374_v17  ;;  %3379 = vtanh.f32 %v1645_v18 }
 0x105   : > { %v1327_v21 = vpop.f32.mrf.mxu0  ;;  %v1487_v22 = vpop.f32.mrf.mxu1  ;;  %2206 = vst [vmem:[%s3926_s24 + $0x50] sm:$0xff] %v3376_v20  ;;  %3381 = vtanh.f32 %v1805_v19 }
 0x106   : > { %v3378_v23 = vpop.eup %3377  ;;  %3383 = vtanh.f32 %v1327_v21 }
 0x107   : > { %2270 = vst [vmem:[%s3926_s24 + $0x250] sm:$0xff] %v3378_v23  ;;  %3385 = vtanh.f32 %v1487_v22 }
 0x10a   : > { %v3380_v24 = vpop.eup %3379 }
 0x10b   : > { %v3382_v25 = vpop.eup %3381  ;;  %2334 = vst [vmem:[%s3926_s24 + $0x450] sm:$0xff] %v3380_v24  ;;  %v1647_v26 = vpop.f32.mrf.mxu2  ;;  %v3128_v24 = vld [vmem:[%s3884_s20 + $0x88] sm:$0xff] }
 0x10c   : > { %v1807_v27 = vpop.f32.mrf.mxu3  ;;  %v3384_v30 = vpop.eup %3383  ;;  %2398 = vst [vmem:[%s3926_s24 + $0x650] sm:$0xff] %v3382_v25  ;;  %3387 = vtanh.f32 %v1647_v26  ;;  %v3160_v25 = vld [vmem:[%s3884_s20 + $0x188] sm:$0xff] }
 0x10d   : > { %v1330_v31 = vpop.f32.mrf.mxu0  ;;  %v1490_v32 = vpop.f32.mrf.mxu1  ;;  %2207 = vst [vmem:[%s3926_s24 + $0x58] sm:$0xff] %v3384_v30  ;;  %3389 = vtanh.f32 %v1807_v27  ;;  %v3224_v30 = vld [vmem:[%s3884_s20 + $0x388] sm:$0xff] }
 0x10e   : > { %v3386_v35 = vpop.eup %3385  ;;  %3391 = vtanh.f32 %v1330_v31 }
 0x10f   : > { %2271 = vst [vmem:[%s3926_s24 + $0x258] sm:$0xff] %v3386_v35  ;;  %3393 = vtanh.f32 %v1490_v32  ;;  %1369 = vmatmul.bf16.gmra.mxu0 %v3125_v28  ;;  %1529 = vmatmul.bf16.gmra.mxu1 %v3157_v29  ;;  %v3192_v29 = vld [vmem:[%s3884_s20 + $0x288] sm:$0xff] }
 0x110   : > { %1689 = vmatmul.bf16.gmra.mxu2 %v3189_v33  ;;  %1849 = vmatmul.bf16.gmra.mxu3 %v3221_v34 }
 0x112   : > { %v3388_v36 = vpop.eup %3387 }
 0x113   : > { %v3390_v37 = vpop.eup %3389  ;;  %2335 = vst [vmem:[%s3926_s24 + $0x458] sm:$0xff] %v3388_v36  ;;  %v1650_v38 = vpop.f32.mrf.mxu2 }
 0x114   : > { %v1810_v39 = vpop.f32.mrf.mxu3  ;;  %v3392_v40 = vpop.eup %3391  ;;  %2399 = vst [vmem:[%s3926_s24 + $0x658] sm:$0xff] %v3390_v37  ;;  %3395 = vtanh.f32 %v1650_v38 }
 0x115   : > { %v1332_v41 = vpop.f32.mrf.mxu0  ;;  %v1492_v42 = vpop.f32.mrf.mxu1  ;;  %2208 = vst [vmem:[%s3926_s24 + $0x60] sm:$0xff] %v3392_v40  ;;  %3397 = vtanh.f32 %v1810_v39 }
 0x116   : > { %v3394_v43 = vpop.eup %3393  ;;  %3399 = vtanh.f32 %v1332_v41 }
 0x117   : > { %2272 = vst [vmem:[%s3926_s24 + $0x260] sm:$0xff] %v3394_v43  ;;  %3401 = vtanh.f32 %v1492_v42 }
 0x11a   : > { %v3396_v44 = vpop.eup %3395 }
 0x11b   : > { %v3398_v45 = vpop.eup %3397  ;;  %2336 = vst [vmem:[%s3926_s24 + $0x460] sm:$0xff] %v3396_v44  ;;  %v1652_v46 = vpop.f32.mrf.mxu2  ;;  %v3129_v44 = vld [vmem:[%s3884_s20 + $0x90] sm:$0xff] }
 0x11c   : > { %v1812_v47 = vpop.f32.mrf.mxu3  ;;  %v3400_v50 = vpop.eup %3399  ;;  %2400 = vst [vmem:[%s3926_s24 + $0x660] sm:$0xff] %v3398_v45  ;;  %3403 = vtanh.f32 %v1652_v46  ;;  %v3161_v45 = vld [vmem:[%s3884_s20 + $0x190] sm:$0xff] }
 0x11d   : > { %v1335_v51 = vpop.f32.mrf.mxu0  ;;  %v1495_v52 = vpop.f32.mrf.mxu1  ;;  %2209 = vst [vmem:[%s3926_s24 + $0x68] sm:$0xff] %v3400_v50  ;;  %3405 = vtanh.f32 %v1812_v47  ;;  %v3225_v50 = vld [vmem:[%s3884_s20 + $0x390] sm:$0xff] }
 0x11e   : > { %v3402_v55 = vpop.eup %3401  ;;  %3407 = vtanh.f32 %v1335_v51 }
 0x11f   : > { %2273 = vst [vmem:[%s3926_s24 + $0x268] sm:$0xff] %v3402_v55  ;;  %3409 = vtanh.f32 %v1495_v52  ;;  %1374 = vmatmul.bf16.gmra.mxu0 %v3126_v48  ;;  %1534 = vmatmul.bf16.gmra.mxu1 %v3158_v49  ;;  %v3193_v49 = vld [vmem:[%s3884_s20 + $0x290] sm:$0xff] }
 0x120   : > { %1694 = vmatmul.bf16.gmra.mxu2 %v3190_v53  ;;  %1854 = vmatmul.bf16.gmra.mxu3 %v3222_v54 }
 0x122   : > { %v3404_v56 = vpop.eup %3403 }
 0x123   : > { %v3406_v57 = vpop.eup %3405  ;;  %2337 = vst [vmem:[%s3926_s24 + $0x468] sm:$0xff] %v3404_v56  ;;  %v1655_v58 = vpop.f32.mrf.mxu2 }
 0x124   : > { %v1815_v59 = vpop.f32.mrf.mxu3  ;;  %v3408_v60 = vpop.eup %3407  ;;  %2401 = vst [vmem:[%s3926_s24 + $0x668] sm:$0xff] %v3406_v57  ;;  %3411 = vtanh.f32 %v1655_v58 }
 0x125   : > { %v1337_v61 = vpop.f32.mrf.mxu0  ;;  %v1497_v62 = vpop.f32.mrf.mxu1  ;;  %2210 = vst [vmem:[%s3926_s24 + $0x70] sm:$0xff] %v3408_v60  ;;  %3413 = vtanh.f32 %v1815_v59 }
 0x126   : > { %v3410_v63 = vpop.eup %3409  ;;  %3415 = vtanh.f32 %v1337_v61 }
 0x127   : > { %2274 = vst [vmem:[%s3926_s24 + $0x270] sm:$0xff] %v3410_v63  ;;  %3417 = vtanh.f32 %v1497_v62 }
 0x12a   : > { %v3412_v0 = vpop.eup %3411 }
 0x12b   : > { %v3414_v1 = vpop.eup %3413  ;;  %2338 = vst [vmem:[%s3926_s24 + $0x470] sm:$0xff] %v3412_v0  ;;  %v1657_v2 = vpop.f32.mrf.mxu2  ;;  %v3130_v0 = vld [vmem:[%s3884_s20 + $0x98] sm:$0xff] }
 0x12c   : > { %v1817_v3 = vpop.f32.mrf.mxu3  ;;  %v3416_v6 = vpop.eup %3415  ;;  %2402 = vst [vmem:[%s3926_s24 + $0x670] sm:$0xff] %v3414_v1  ;;  %3419 = vtanh.f32 %v1657_v2  ;;  %v3162_v1 = vld [vmem:[%s3884_s20 + $0x198] sm:$0xff] }
 0x12d   : > { %v1340_v7 = vpop.f32.mrf.mxu0  ;;  %v1500_v8 = vpop.f32.mrf.mxu1  ;;  %2211 = vst [vmem:[%s3926_s24 + $0x78] sm:$0xff] %v3416_v6  ;;  %3421 = vtanh.f32 %v1817_v3  ;;  %v3226_v6 = vld [vmem:[%s3884_s20 + $0x398] sm:$0xff] }
 0x12e   : > { %v3418_v11 = vpop.eup %3417  ;;  %3423 = vtanh.f32 %v1340_v7 }
 0x12f   : > { %2275 = vst [vmem:[%s3926_s24 + $0x278] sm:$0xff] %v3418_v11  ;;  %3425 = vtanh.f32 %v1500_v8  ;;  %1379 = vmatmul.bf16.gmra.mxu0 %v3127_v4  ;;  %1539 = vmatmul.bf16.gmra.mxu1 %v3159_v5  ;;  %v3194_v5 = vld [vmem:[%s3884_s20 + $0x298] sm:$0xff] }
 0x130   : > { %1699 = vmatmul.bf16.gmra.mxu2 %v3191_v9  ;;  %1859 = vmatmul.bf16.gmra.mxu3 %v3223_v10 }
 0x132   : > { %v3420_v12 = vpop.eup %3419 }
 0x133   : > { %v3422_v13 = vpop.eup %3421  ;;  %2339 = vst [vmem:[%s3926_s24 + $0x478] sm:$0xff] %v3420_v12  ;;  %v1660_v14 = vpop.f32.mrf.mxu2 }
 0x134   : > { %v1820_v15 = vpop.f32.mrf.mxu3  ;;  %v3424_v16 = vpop.eup %3423  ;;  %2403 = vst [vmem:[%s3926_s24 + $0x678] sm:$0xff] %v3422_v13  ;;  %3427 = vtanh.f32 %v1660_v14 }
 0x135   : > { %v1342_v17 = vpop.f32.mrf.mxu0  ;;  %v1502_v18 = vpop.f32.mrf.mxu1  ;;  %2212 = vst [vmem:[%s3926_s24 + $0x80] sm:$0xff] %v3424_v16  ;;  %3429 = vtanh.f32 %v1820_v15 }
 0x136   : > { %v3426_v19 = vpop.eup %3425  ;;  %3431 = vtanh.f32 %v1342_v17 }
 0x137   : > { %2276 = vst [vmem:[%s3926_s24 + $0x280] sm:$0xff] %v3426_v19  ;;  %3433 = vtanh.f32 %v1502_v18 }
 0x13a   : > { %v3428_v20 = vpop.eup %3427 }
 0x13b   : > { %v3430_v21 = vpop.eup %3429  ;;  %2340 = vst [vmem:[%s3926_s24 + $0x480] sm:$0xff] %v3428_v20  ;;  %v1662_v22 = vpop.f32.mrf.mxu2  ;;  %v3131_v20 = vld [vmem:[%s3884_s20 + $0xa0] sm:$0xff] }
 0x13c   : > { %v1822_v23 = vpop.f32.mrf.mxu3  ;;  %v3432_v26 = vpop.eup %3431  ;;  %2404 = vst [vmem:[%s3926_s24 + $0x680] sm:$0xff] %v3430_v21  ;;  %3435 = vtanh.f32 %v1662_v22  ;;  %v3163_v21 = vld [vmem:[%s3884_s20 + $0x1a0] sm:$0xff] }
 0x13d   : > { %v1345_v27 = vpop.f32.mrf.mxu0  ;;  %v1505_v28 = vpop.f32.mrf.mxu1  ;;  %2213 = vst [vmem:[%s3926_s24 + $0x88] sm:$0xff] %v3432_v26  ;;  %3437 = vtanh.f32 %v1822_v23  ;;  %v3227_v26 = vld [vmem:[%s3884_s20 + $0x3a0] sm:$0xff] }
 0x13e   : > { %v3434_v31 = vpop.eup %3433  ;;  %3439 = vtanh.f32 %v1345_v27 }
 0x13f   : > { %2277 = vst [vmem:[%s3926_s24 + $0x288] sm:$0xff] %v3434_v31  ;;  %3441 = vtanh.f32 %v1505_v28  ;;  %1384 = vmatmul.bf16.gmra.mxu0 %v3128_v24  ;;  %1544 = vmatmul.bf16.gmra.mxu1 %v3160_v25  ;;  %v3195_v25 = vld [vmem:[%s3884_s20 + $0x2a0] sm:$0xff] }
 0x140   : > { %1704 = vmatmul.bf16.gmra.mxu2 %v3192_v29  ;;  %1864 = vmatmul.bf16.gmra.mxu3 %v3224_v30 }
 0x142   : > { %v3436_v32 = vpop.eup %3435 }
 0x143   : > { %v3438_v33 = vpop.eup %3437  ;;  %2341 = vst [vmem:[%s3926_s24 + $0x488] sm:$0xff] %v3436_v32  ;;  %v1665_v34 = vpop.f32.mrf.mxu2 }
 0x144   : > { %v1825_v35 = vpop.f32.mrf.mxu3  ;;  %v3440_v36 = vpop.eup %3439  ;;  %2405 = vst [vmem:[%s3926_s24 + $0x688] sm:$0xff] %v3438_v33  ;;  %3443 = vtanh.f32 %v1665_v34 }
 0x145   : > { %v1347_v37 = vpop.f32.mrf.mxu0  ;;  %v1507_v38 = vpop.f32.mrf.mxu1  ;;  %2214 = vst [vmem:[%s3926_s24 + $0x90] sm:$0xff] %v3440_v36  ;;  %3445 = vtanh.f32 %v1825_v35 }
 0x146   : > { %v3442_v39 = vpop.eup %3441  ;;  %3447 = vtanh.f32 %v1347_v37 }
 0x147   : > { %2278 = vst [vmem:[%s3926_s24 + $0x290] sm:$0xff] %v3442_v39  ;;  %3449 = vtanh.f32 %v1507_v38 }
 0x14a   : > { %v3444_v40 = vpop.eup %3443 }
 0x14b   : > { %v3446_v41 = vpop.eup %3445  ;;  %2342 = vst [vmem:[%s3926_s24 + $0x490] sm:$0xff] %v3444_v40  ;;  %v1667_v42 = vpop.f32.mrf.mxu2  ;;  %v3132_v40 = vld [vmem:[%s3884_s20 + $0xa8] sm:$0xff] }
 0x14c   : > { %v1827_v43 = vpop.f32.mrf.mxu3  ;;  %v3448_v46 = vpop.eup %3447  ;;  %2406 = vst [vmem:[%s3926_s24 + $0x690] sm:$0xff] %v3446_v41  ;;  %3451 = vtanh.f32 %v1667_v42  ;;  %v3164_v41 = vld [vmem:[%s3884_s20 + $0x1a8] sm:$0xff] }
 0x14d   : > { %v1350_v47 = vpop.f32.mrf.mxu0  ;;  %v1510_v48 = vpop.f32.mrf.mxu1  ;;  %2215 = vst [vmem:[%s3926_s24 + $0x98] sm:$0xff] %v3448_v46  ;;  %3453 = vtanh.f32 %v1827_v43  ;;  %v3228_v46 = vld [vmem:[%s3884_s20 + $0x3a8] sm:$0xff] }
 0x14e   : > { %v3450_v51 = vpop.eup %3449  ;;  %3455 = vtanh.f32 %v1350_v47 }
 0x14f   : > { %2279 = vst [vmem:[%s3926_s24 + $0x298] sm:$0xff] %v3450_v51  ;;  %3457 = vtanh.f32 %v1510_v48  ;;  %1389 = vmatmul.bf16.gmra.mxu0 %v3129_v44  ;;  %1549 = vmatmul.bf16.gmra.mxu1 %v3161_v45  ;;  %v3196_v45 = vld [vmem:[%s3884_s20 + $0x2a8] sm:$0xff] }
 0x150   : > { %1709 = vmatmul.bf16.gmra.mxu2 %v3193_v49  ;;  %1869 = vmatmul.bf16.gmra.mxu3 %v3225_v50 }
 0x152   : > { %v3452_v52 = vpop.eup %3451 }
 0x153   : > { %v3454_v53 = vpop.eup %3453  ;;  %2343 = vst [vmem:[%s3926_s24 + $0x498] sm:$0xff] %v3452_v52  ;;  %v1670_v54 = vpop.f32.mrf.mxu2 }
 0x154   : > { %v1830_v55 = vpop.f32.mrf.mxu3  ;;  %v3456_v56 = vpop.eup %3455  ;;  %2407 = vst [vmem:[%s3926_s24 + $0x698] sm:$0xff] %v3454_v53  ;;  %3459 = vtanh.f32 %v1670_v54 }
 0x155   : > { %v1352_v57 = vpop.f32.mrf.mxu0  ;;  %v1512_v58 = vpop.f32.mrf.mxu1  ;;  %2216 = vst [vmem:[%s3926_s24 + $0xa0] sm:$0xff] %v3456_v56  ;;  %3461 = vtanh.f32 %v1830_v55 }
 0x156   : > { %v3458_v59 = vpop.eup %3457  ;;  %3463 = vtanh.f32 %v1352_v57 }
 0x157   : > { %2280 = vst [vmem:[%s3926_s24 + $0x2a0] sm:$0xff] %v3458_v59  ;;  %3465 = vtanh.f32 %v1512_v58 }
 0x15a   : > { %v3460_v60 = vpop.eup %3459 }
 0x15b   : > { %v3462_v61 = vpop.eup %3461  ;;  %2344 = vst [vmem:[%s3926_s24 + $0x4a0] sm:$0xff] %v3460_v60  ;;  %v1672_v62 = vpop.f32.mrf.mxu2  ;;  %v3133_v60 = vld [vmem:[%s3884_s20 + $0xb0] sm:$0xff] }
 0x15c   : > { %v1832_v63 = vpop.f32.mrf.mxu3  ;;  %v3464_v2 = vpop.eup %3463  ;;  %2408 = vst [vmem:[%s3926_s24 + $0x6a0] sm:$0xff] %v3462_v61  ;;  %3467 = vtanh.f32 %v1672_v62  ;;  %v3165_v61 = vld [vmem:[%s3884_s20 + $0x1b0] sm:$0xff] }
 0x15d   : > { %v1355_v3 = vpop.f32.mrf.mxu0  ;;  %v1515_v4 = vpop.f32.mrf.mxu1  ;;  %2217 = vst [vmem:[%s3926_s24 + $0xa8] sm:$0xff] %v3464_v2  ;;  %3469 = vtanh.f32 %v1832_v63  ;;  %v3229_v2 = vld [vmem:[%s3884_s20 + $0x3b0] sm:$0xff] }
 0x15e   : > { %v3466_v7 = vpop.eup %3465  ;;  %3471 = vtanh.f32 %v1355_v3 }
 0x15f   : > { %2281 = vst [vmem:[%s3926_s24 + $0x2a8] sm:$0xff] %v3466_v7  ;;  %3473 = vtanh.f32 %v1515_v4  ;;  %1394 = vmatmul.bf16.gmra.mxu0 %v3130_v0  ;;  %1554 = vmatmul.bf16.gmra.mxu1 %v3162_v1  ;;  %v3197_v1 = vld [vmem:[%s3884_s20 + $0x2b0] sm:$0xff] }
 0x160   : > { %1714 = vmatmul.bf16.gmra.mxu2 %v3194_v5  ;;  %1874 = vmatmul.bf16.gmra.mxu3 %v3226_v6 }
 0x162   : > { %v3468_v8 = vpop.eup %3467 }
 0x163   : > { %v3470_v9 = vpop.eup %3469  ;;  %2345 = vst [vmem:[%s3926_s24 + $0x4a8] sm:$0xff] %v3468_v8  ;;  %v1675_v10 = vpop.f32.mrf.mxu2 }
 0x164   : > { %v1835_v11 = vpop.f32.mrf.mxu3  ;;  %v3472_v12 = vpop.eup %3471  ;;  %2409 = vst [vmem:[%s3926_s24 + $0x6a8] sm:$0xff] %v3470_v9  ;;  %3475 = vtanh.f32 %v1675_v10 }
 0x165   : > { %v1357_v13 = vpop.f32.mrf.mxu0  ;;  %v1517_v14 = vpop.f32.mrf.mxu1  ;;  %2218 = vst [vmem:[%s3926_s24 + $0xb0] sm:$0xff] %v3472_v12  ;;  %3477 = vtanh.f32 %v1835_v11 }
 0x166   : > { %v3474_v15 = vpop.eup %3473  ;;  %3479 = vtanh.f32 %v1357_v13 }
 0x167   : > { %2282 = vst [vmem:[%s3926_s24 + $0x2b0] sm:$0xff] %v3474_v15  ;;  %3481 = vtanh.f32 %v1517_v14 }
 0x16a   : > { %v3476_v16 = vpop.eup %3475 }
 0x16b   : > { %v3478_v17 = vpop.eup %3477  ;;  %2346 = vst [vmem:[%s3926_s24 + $0x4b0] sm:$0xff] %v3476_v16  ;;  %v1677_v18 = vpop.f32.mrf.mxu2  ;;  %v3134_v16 = vld [vmem:[%s3884_s20 + $0xb8] sm:$0xff] }
 0x16c   : > { %v1837_v19 = vpop.f32.mrf.mxu3  ;;  %v3480_v22 = vpop.eup %3479  ;;  %2410 = vst [vmem:[%s3926_s24 + $0x6b0] sm:$0xff] %v3478_v17  ;;  %3483 = vtanh.f32 %v1677_v18  ;;  %v3166_v17 = vld [vmem:[%s3884_s20 + $0x1b8] sm:$0xff] }
 0x16d   : > { %v1360_v23 = vpop.f32.mrf.mxu0  ;;  %v1520_v24 = vpop.f32.mrf.mxu1  ;;  %2219 = vst [vmem:[%s3926_s24 + $0xb8] sm:$0xff] %v3480_v22  ;;  %3485 = vtanh.f32 %v1837_v19  ;;  %v3230_v22 = vld [vmem:[%s3884_s20 + $0x3b8] sm:$0xff] }
 0x16e   : > { %v3482_v27 = vpop.eup %3481  ;;  %3487 = vtanh.f32 %v1360_v23 }
 0x16f   : > { %2283 = vst [vmem:[%s3926_s24 + $0x2b8] sm:$0xff] %v3482_v27  ;;  %3489 = vtanh.f32 %v1520_v24  ;;  %1399 = vmatmul.bf16.gmra.mxu0 %v3131_v20  ;;  %1559 = vmatmul.bf16.gmra.mxu1 %v3163_v21  ;;  %v3198_v21 = vld [vmem:[%s3884_s20 + $0x2b8] sm:$0xff] }
 0x170   : > { %1719 = vmatmul.bf16.gmra.mxu2 %v3195_v25  ;;  %1879 = vmatmul.bf16.gmra.mxu3 %v3227_v26 }
 0x172   : > { %v3484_v28 = vpop.eup %3483 }
 0x173   : > { %v3486_v29 = vpop.eup %3485  ;;  %2347 = vst [vmem:[%s3926_s24 + $0x4b8] sm:$0xff] %v3484_v28  ;;  %v1680_v30 = vpop.f32.mrf.mxu2 }
 0x174   : > { %v1840_v31 = vpop.f32.mrf.mxu3  ;;  %v3488_v32 = vpop.eup %3487  ;;  %2411 = vst [vmem:[%s3926_s24 + $0x6b8] sm:$0xff] %v3486_v29  ;;  %3491 = vtanh.f32 %v1680_v30 }
 0x175   : > { %v1362_v33 = vpop.f32.mrf.mxu0  ;;  %v1522_v34 = vpop.f32.mrf.mxu1  ;;  %2220 = vst [vmem:[%s3926_s24 + $0xc0] sm:$0xff] %v3488_v32  ;;  %3493 = vtanh.f32 %v1840_v31 }
 0x176   : > { %v3490_v35 = vpop.eup %3489  ;;  %3495 = vtanh.f32 %v1362_v33 }
 0x177   : > { %2284 = vst [vmem:[%s3926_s24 + $0x2c0] sm:$0xff] %v3490_v35  ;;  %3497 = vtanh.f32 %v1522_v34 }
 0x17a   : > { %v3492_v36 = vpop.eup %3491 }
 0x17b   : > { %v3494_v37 = vpop.eup %3493  ;;  %2348 = vst [vmem:[%s3926_s24 + $0x4c0] sm:$0xff] %v3492_v36  ;;  %v1682_v38 = vpop.f32.mrf.mxu2  ;;  %v3135_v36 = vld [vmem:[%s3884_s20 + $0xc0] sm:$0xff] }
 0x17c   : > { %v1842_v39 = vpop.f32.mrf.mxu3  ;;  %v3496_v42 = vpop.eup %3495  ;;  %2412 = vst [vmem:[%s3926_s24 + $0x6c0] sm:$0xff] %v3494_v37  ;;  %3499 = vtanh.f32 %v1682_v38  ;;  %v3167_v37 = vld [vmem:[%s3884_s20 + $0x1c0] sm:$0xff] }
 0x17d   : > { %v1365_v43 = vpop.f32.mrf.mxu0  ;;  %v1525_v44 = vpop.f32.mrf.mxu1  ;;  %2221 = vst [vmem:[%s3926_s24 + $0xc8] sm:$0xff] %v3496_v42  ;;  %3501 = vtanh.f32 %v1842_v39  ;;  %v3231_v42 = vld [vmem:[%s3884_s20 + $0x3c0] sm:$0xff] }
 0x17e   : > { %v3498_v47 = vpop.eup %3497  ;;  %3503 = vtanh.f32 %v1365_v43 }
 0x17f   : > { %2285 = vst [vmem:[%s3926_s24 + $0x2c8] sm:$0xff] %v3498_v47  ;;  %3505 = vtanh.f32 %v1525_v44  ;;  %1404 = vmatmul.bf16.gmra.mxu0 %v3132_v40  ;;  %1564 = vmatmul.bf16.gmra.mxu1 %v3164_v41  ;;  %v3199_v41 = vld [vmem:[%s3884_s20 + $0x2c0] sm:$0xff] }
 0x180   : > { %1724 = vmatmul.bf16.gmra.mxu2 %v3196_v45  ;;  %1884 = vmatmul.bf16.gmra.mxu3 %v3228_v46 }
 0x182   : > { %v3500_v48 = vpop.eup %3499 }
 0x183   : > { %v3502_v49 = vpop.eup %3501  ;;  %2349 = vst [vmem:[%s3926_s24 + $0x4c8] sm:$0xff] %v3500_v48  ;;  %v1685_v50 = vpop.f32.mrf.mxu2 }
 0x184   : > { %v1845_v51 = vpop.f32.mrf.mxu3  ;;  %v3504_v52 = vpop.eup %3503  ;;  %2413 = vst [vmem:[%s3926_s24 + $0x6c8] sm:$0xff] %v3502_v49  ;;  %3507 = vtanh.f32 %v1685_v50 }
 0x185   : > { %v1367_v53 = vpop.f32.mrf.mxu0  ;;  %v1527_v54 = vpop.f32.mrf.mxu1  ;;  %2222 = vst [vmem:[%s3926_s24 + $0xd0] sm:$0xff] %v3504_v52  ;;  %3509 = vtanh.f32 %v1845_v51 }
 0x186   : > { %v3506_v55 = vpop.eup %3505  ;;  %3511 = vtanh.f32 %v1367_v53 }
 0x187   : > { %2286 = vst [vmem:[%s3926_s24 + $0x2d0] sm:$0xff] %v3506_v55  ;;  %3513 = vtanh.f32 %v1527_v54 }
 0x18a   : > { %v3508_v56 = vpop.eup %3507 }
 0x18b   : > { %v3510_v57 = vpop.eup %3509  ;;  %2350 = vst [vmem:[%s3926_s24 + $0x4d0] sm:$0xff] %v3508_v56  ;;  %v1687_v58 = vpop.f32.mrf.mxu2  ;;  %v3136_v56 = vld [vmem:[%s3884_s20 + $0xc8] sm:$0xff] }
 0x18c   : > { %v1847_v59 = vpop.f32.mrf.mxu3  ;;  %v3512_v62 = vpop.eup %3511  ;;  %2414 = vst [vmem:[%s3926_s24 + $0x6d0] sm:$0xff] %v3510_v57  ;;  %3515 = vtanh.f32 %v1687_v58  ;;  %v3168_v57 = vld [vmem:[%s3884_s20 + $0x1c8] sm:$0xff] }
 0x18d   : > { %v1370_v63 = vpop.f32.mrf.mxu0  ;;  %v1530_v0 = vpop.f32.mrf.mxu1  ;;  %2223 = vst [vmem:[%s3926_s24 + $0xd8] sm:$0xff] %v3512_v62  ;;  %3517 = vtanh.f32 %v1847_v59  ;;  %v3232_v62 = vld [vmem:[%s3884_s20 + $0x3c8] sm:$0xff] }
 0x18e   : > { %v3514_v3 = vpop.eup %3513  ;;  %3519 = vtanh.f32 %v1370_v63 }
 0x18f   : > { %2287 = vst [vmem:[%s3926_s24 + $0x2d8] sm:$0xff] %v3514_v3  ;;  %3521 = vtanh.f32 %v1530_v0  ;;  %1409 = vmatmul.bf16.gmra.mxu0 %v3133_v60  ;;  %1569 = vmatmul.bf16.gmra.mxu1 %v3165_v61  ;;  %v3200_v61 = vld [vmem:[%s3884_s20 + $0x2c8] sm:$0xff] }
 0x190   : > { %1729 = vmatmul.bf16.gmra.mxu2 %v3197_v1  ;;  %1889 = vmatmul.bf16.gmra.mxu3 %v3229_v2 }
 0x192   : > { %v3516_v4 = vpop.eup %3515 }
 0x193   : > { %v3518_v5 = vpop.eup %3517  ;;  %2351 = vst [vmem:[%s3926_s24 + $0x4d8] sm:$0xff] %v3516_v4  ;;  %v1690_v6 = vpop.f32.mrf.mxu2 }
 0x194   : > { %v1850_v7 = vpop.f32.mrf.mxu3  ;;  %v3520_v8 = vpop.eup %3519  ;;  %2415 = vst [vmem:[%s3926_s24 + $0x6d8] sm:$0xff] %v3518_v5  ;;  %3523 = vtanh.f32 %v1690_v6 }
 0x195   : > { %v1372_v9 = vpop.f32.mrf.mxu0  ;;  %v1532_v10 = vpop.f32.mrf.mxu1  ;;  %2224 = vst [vmem:[%s3926_s24 + $0xe0] sm:$0xff] %v3520_v8  ;;  %3525 = vtanh.f32 %v1850_v7 }
 0x196   : > { %v3522_v11 = vpop.eup %3521  ;;  %3527 = vtanh.f32 %v1372_v9 }
 0x197   : > { %2288 = vst [vmem:[%s3926_s24 + $0x2e0] sm:$0xff] %v3522_v11  ;;  %3529 = vtanh.f32 %v1532_v10 }
 0x19a   : > { %v3524_v12 = vpop.eup %3523 }
 0x19b   : > { %v3526_v13 = vpop.eup %3525  ;;  %2352 = vst [vmem:[%s3926_s24 + $0x4e0] sm:$0xff] %v3524_v12  ;;  %v1692_v14 = vpop.f32.mrf.mxu2  ;;  %v3137_v12 = vld [vmem:[%s3884_s20 + $0xd0] sm:$0xff] }
 0x19c   : > { %v1852_v15 = vpop.f32.mrf.mxu3  ;;  %v3528_v18 = vpop.eup %3527  ;;  %2416 = vst [vmem:[%s3926_s24 + $0x6e0] sm:$0xff] %v3526_v13  ;;  %3531 = vtanh.f32 %v1692_v14  ;;  %v3169_v13 = vld [vmem:[%s3884_s20 + $0x1d0] sm:$0xff] }
 0x19d   : > { %v1375_v19 = vpop.f32.mrf.mxu0  ;;  %v1535_v20 = vpop.f32.mrf.mxu1  ;;  %2225 = vst [vmem:[%s3926_s24 + $0xe8] sm:$0xff] %v3528_v18  ;;  %3533 = vtanh.f32 %v1852_v15  ;;  %v3233_v18 = vld [vmem:[%s3884_s20 + $0x3d0] sm:$0xff] }
 0x19e   : > { %v3530_v23 = vpop.eup %3529  ;;  %3535 = vtanh.f32 %v1375_v19 }
 0x19f   : > { %2289 = vst [vmem:[%s3926_s24 + $0x2e8] sm:$0xff] %v3530_v23  ;;  %3537 = vtanh.f32 %v1535_v20  ;;  %1414 = vmatmul.bf16.gmra.mxu0 %v3134_v16  ;;  %1574 = vmatmul.bf16.gmra.mxu1 %v3166_v17  ;;  %v3201_v17 = vld [vmem:[%s3884_s20 + $0x2d0] sm:$0xff] }
 0x1a0   : > { %1734 = vmatmul.bf16.gmra.mxu2 %v3198_v21  ;;  %1894 = vmatmul.bf16.gmra.mxu3 %v3230_v22 }
 0x1a2   : > { %v3532_v24 = vpop.eup %3531 }
 0x1a3   : > { %v3534_v25 = vpop.eup %3533  ;;  %2353 = vst [vmem:[%s3926_s24 + $0x4e8] sm:$0xff] %v3532_v24  ;;  %v1695_v26 = vpop.f32.mrf.mxu2 }
 0x1a4   : > { %v1855_v27 = vpop.f32.mrf.mxu3  ;;  %v3536_v28 = vpop.eup %3535  ;;  %2417 = vst [vmem:[%s3926_s24 + $0x6e8] sm:$0xff] %v3534_v25  ;;  %3539 = vtanh.f32 %v1695_v26 }
 0x1a5   : > { %v1377_v29 = vpop.f32.mrf.mxu0  ;;  %v1537_v30 = vpop.f32.mrf.mxu1  ;;  %2226 = vst [vmem:[%s3926_s24 + $0xf0] sm:$0xff] %v3536_v28  ;;  %3541 = vtanh.f32 %v1855_v27 }
 0x1a6   : > { %v3538_v31 = vpop.eup %3537  ;;  %3543 = vtanh.f32 %v1377_v29 }
 0x1a7   : > { %2290 = vst [vmem:[%s3926_s24 + $0x2f0] sm:$0xff] %v3538_v31  ;;  %3545 = vtanh.f32 %v1537_v30 }
 0x1aa   : > { %v3540_v32 = vpop.eup %3539 }
 0x1ab   : > { %v3542_v33 = vpop.eup %3541  ;;  %2354 = vst [vmem:[%s3926_s24 + $0x4f0] sm:$0xff] %v3540_v32  ;;  %v1697_v34 = vpop.f32.mrf.mxu2  ;;  %v3138_v32 = vld [vmem:[%s3884_s20 + $0xd8] sm:$0xff] }
 0x1ac   : > { %v1857_v35 = vpop.f32.mrf.mxu3  ;;  %v3544_v38 = vpop.eup %3543  ;;  %2418 = vst [vmem:[%s3926_s24 + $0x6f0] sm:$0xff] %v3542_v33  ;;  %3547 = vtanh.f32 %v1697_v34  ;;  %v3170_v33 = vld [vmem:[%s3884_s20 + $0x1d8] sm:$0xff] }
 0x1ad   : > { %v1380_v39 = vpop.f32.mrf.mxu0  ;;  %v1540_v40 = vpop.f32.mrf.mxu1  ;;  %2227 = vst [vmem:[%s3926_s24 + $0xf8] sm:$0xff] %v3544_v38  ;;  %3549 = vtanh.f32 %v1857_v35  ;;  %v3234_v38 = vld [vmem:[%s3884_s20 + $0x3d8] sm:$0xff] }
 0x1ae   : > { %v3546_v43 = vpop.eup %3545  ;;  %3551 = vtanh.f32 %v1380_v39 }
 0x1af   : > { %2291 = vst [vmem:[%s3926_s24 + $0x2f8] sm:$0xff] %v3546_v43  ;;  %3553 = vtanh.f32 %v1540_v40  ;;  %1419 = vmatmul.bf16.gmra.mxu0 %v3135_v36  ;;  %1579 = vmatmul.bf16.gmra.mxu1 %v3167_v37  ;;  %v3202_v37 = vld [vmem:[%s3884_s20 + $0x2d8] sm:$0xff] }
 0x1b0   : > { %1739 = vmatmul.bf16.gmra.mxu2 %v3199_v41  ;;  %1899 = vmatmul.bf16.gmra.mxu3 %v3231_v42 }
 0x1b2   : > { %v3548_v44 = vpop.eup %3547 }
 0x1b3   : > { %v3550_v45 = vpop.eup %3549  ;;  %2355 = vst [vmem:[%s3926_s24 + $0x4f8] sm:$0xff] %v3548_v44  ;;  %v1700_v46 = vpop.f32.mrf.mxu2 }
 0x1b4   : > { %v1860_v47 = vpop.f32.mrf.mxu3  ;;  %v3552_v48 = vpop.eup %3551  ;;  %2419 = vst [vmem:[%s3926_s24 + $0x6f8] sm:$0xff] %v3550_v45  ;;  %3555 = vtanh.f32 %v1700_v46 }
 0x1b5   : > { %v1382_v49 = vpop.f32.mrf.mxu0  ;;  %v1542_v50 = vpop.f32.mrf.mxu1  ;;  %2228 = vst [vmem:[%s3926_s24 + $0x100] sm:$0xff] %v3552_v48  ;;  %3557 = vtanh.f32 %v1860_v47 }
 0x1b6   : > { %v3554_v51 = vpop.eup %3553  ;;  %3559 = vtanh.f32 %v1382_v49 }
 0x1b7   : > { %2292 = vst [vmem:[%s3926_s24 + $0x300] sm:$0xff] %v3554_v51  ;;  %3561 = vtanh.f32 %v1542_v50 }
 0x1ba   : > { %v3556_v52 = vpop.eup %3555 }
 0x1bb   : > { %v3558_v53 = vpop.eup %3557  ;;  %2356 = vst [vmem:[%s3926_s24 + $0x500] sm:$0xff] %v3556_v52  ;;  %v1702_v54 = vpop.f32.mrf.mxu2  ;;  %v3139_v52 = vld [vmem:[%s3884_s20 + $0xe0] sm:$0xff] }
 0x1bc   : > { %v1862_v55 = vpop.f32.mrf.mxu3  ;;  %v3560_v58 = vpop.eup %3559  ;;  %2420 = vst [vmem:[%s3926_s24 + $0x700] sm:$0xff] %v3558_v53  ;;  %3563 = vtanh.f32 %v1702_v54  ;;  %v3171_v53 = vld [vmem:[%s3884_s20 + $0x1e0] sm:$0xff] }
 0x1bd   : > { %v1385_v59 = vpop.f32.mrf.mxu0  ;;  %v1545_v60 = vpop.f32.mrf.mxu1  ;;  %2229 = vst [vmem:[%s3926_s24 + $0x108] sm:$0xff] %v3560_v58  ;;  %3565 = vtanh.f32 %v1862_v55  ;;  %v3235_v58 = vld [vmem:[%s3884_s20 + $0x3e0] sm:$0xff] }
 0x1be   : > { %v3562_v63 = vpop.eup %3561  ;;  %3567 = vtanh.f32 %v1385_v59 }
 0x1bf   : > { %2293 = vst [vmem:[%s3926_s24 + $0x308] sm:$0xff] %v3562_v63  ;;  %3569 = vtanh.f32 %v1545_v60  ;;  %1424 = vmatmul.bf16.gmra.mxu0 %v3136_v56  ;;  %1584 = vmatmul.bf16.gmra.mxu1 %v3168_v57  ;;  %v3203_v57 = vld [vmem:[%s3884_s20 + $0x2e0] sm:$0xff] }
 0x1c0   : > { %1744 = vmatmul.bf16.gmra.mxu2 %v3200_v61  ;;  %1904 = vmatmul.bf16.gmra.mxu3 %v3232_v62 }
 0x1c2   : > { %v3564_v0 = vpop.eup %3563 }
 0x1c3   : > { %v3566_v1 = vpop.eup %3565  ;;  %2357 = vst [vmem:[%s3926_s24 + $0x508] sm:$0xff] %v3564_v0  ;;  %v1705_v2 = vpop.f32.mrf.mxu2 }
 0x1c4   : > { %v1865_v3 = vpop.f32.mrf.mxu3  ;;  %v3568_v4 = vpop.eup %3567  ;;  %2421 = vst [vmem:[%s3926_s24 + $0x708] sm:$0xff] %v3566_v1  ;;  %3571 = vtanh.f32 %v1705_v2 }
 0x1c5   : > { %v1387_v5 = vpop.f32.mrf.mxu0  ;;  %v1547_v6 = vpop.f32.mrf.mxu1  ;;  %2230 = vst [vmem:[%s3926_s24 + $0x110] sm:$0xff] %v3568_v4  ;;  %3573 = vtanh.f32 %v1865_v3 }
 0x1c6   : > { %v3570_v7 = vpop.eup %3569  ;;  %3575 = vtanh.f32 %v1387_v5 }
 0x1c7   : > { %2294 = vst [vmem:[%s3926_s24 + $0x310] sm:$0xff] %v3570_v7  ;;  %3577 = vtanh.f32 %v1547_v6 }
 0x1ca   : > { %v3572_v8 = vpop.eup %3571 }
 0x1cb   : > { %v3574_v9 = vpop.eup %3573  ;;  %2358 = vst [vmem:[%s3926_s24 + $0x510] sm:$0xff] %v3572_v8  ;;  %v1707_v10 = vpop.f32.mrf.mxu2  ;;  %v3140_v8 = vld [vmem:[%s3884_s20 + $0xe8] sm:$0xff] }
 0x1cc   : > { %v1867_v11 = vpop.f32.mrf.mxu3  ;;  %v3576_v14 = vpop.eup %3575  ;;  %2422 = vst [vmem:[%s3926_s24 + $0x710] sm:$0xff] %v3574_v9  ;;  %3579 = vtanh.f32 %v1707_v10  ;;  %v3172_v9 = vld [vmem:[%s3884_s20 + $0x1e8] sm:$0xff] }
 0x1cd   : > { %v1390_v15 = vpop.f32.mrf.mxu0  ;;  %v1550_v16 = vpop.f32.mrf.mxu1  ;;  %2231 = vst [vmem:[%s3926_s24 + $0x118] sm:$0xff] %v3576_v14  ;;  %3581 = vtanh.f32 %v1867_v11  ;;  %v3236_v14 = vld [vmem:[%s3884_s20 + $0x3e8] sm:$0xff] }
 0x1ce   : > { %v3578_v19 = vpop.eup %3577  ;;  %3583 = vtanh.f32 %v1390_v15 }
 0x1cf   : > { %2295 = vst [vmem:[%s3926_s24 + $0x318] sm:$0xff] %v3578_v19  ;;  %3585 = vtanh.f32 %v1550_v16  ;;  %1429 = vmatmul.bf16.gmra.mxu0 %v3137_v12  ;;  %1589 = vmatmul.bf16.gmra.mxu1 %v3169_v13  ;;  %v3204_v13 = vld [vmem:[%s3884_s20 + $0x2e8] sm:$0xff] }
 0x1d0   : > { %1749 = vmatmul.bf16.gmra.mxu2 %v3201_v17  ;;  %1909 = vmatmul.bf16.gmra.mxu3 %v3233_v18 }
 0x1d2   : > { %v3580_v20 = vpop.eup %3579 }
 0x1d3   : > { %v3582_v21 = vpop.eup %3581  ;;  %2359 = vst [vmem:[%s3926_s24 + $0x518] sm:$0xff] %v3580_v20  ;;  %v1710_v22 = vpop.f32.mrf.mxu2 }
 0x1d4   : > { %v1870_v23 = vpop.f32.mrf.mxu3  ;;  %v3584_v24 = vpop.eup %3583  ;;  %2423 = vst [vmem:[%s3926_s24 + $0x718] sm:$0xff] %v3582_v21  ;;  %3587 = vtanh.f32 %v1710_v22 }
 0x1d5   : > { %v1392_v25 = vpop.f32.mrf.mxu0  ;;  %v1552_v26 = vpop.f32.mrf.mxu1  ;;  %2232 = vst [vmem:[%s3926_s24 + $0x120] sm:$0xff] %v3584_v24  ;;  %3589 = vtanh.f32 %v1870_v23 }
 0x1d6   : > { %v3586_v27 = vpop.eup %3585  ;;  %3591 = vtanh.f32 %v1392_v25 }
 0x1d7   : > { %2296 = vst [vmem:[%s3926_s24 + $0x320] sm:$0xff] %v3586_v27  ;;  %3593 = vtanh.f32 %v1552_v26 }
 0x1da   : > { %v3588_v28 = vpop.eup %3587 }
 0x1db   : > { %v3590_v29 = vpop.eup %3589  ;;  %2360 = vst [vmem:[%s3926_s24 + $0x520] sm:$0xff] %v3588_v28  ;;  %v1712_v30 = vpop.f32.mrf.mxu2  ;;  %v3141_v28 = vld [vmem:[%s3884_s20 + $0xf0] sm:$0xff] }
 0x1dc   : > { %v1872_v31 = vpop.f32.mrf.mxu3  ;;  %v3592_v34 = vpop.eup %3591  ;;  %2424 = vst [vmem:[%s3926_s24 + $0x720] sm:$0xff] %v3590_v29  ;;  %3595 = vtanh.f32 %v1712_v30  ;;  %v3173_v29 = vld [vmem:[%s3884_s20 + $0x1f0] sm:$0xff] }
 0x1dd   : > { %v1395_v35 = vpop.f32.mrf.mxu0  ;;  %v1555_v36 = vpop.f32.mrf.mxu1  ;;  %2233 = vst [vmem:[%s3926_s24 + $0x128] sm:$0xff] %v3592_v34  ;;  %3597 = vtanh.f32 %v1872_v31  ;;  %v3237_v34 = vld [vmem:[%s3884_s20 + $0x3f0] sm:$0xff] }
 0x1de   : > { %v3594_v39 = vpop.eup %3593  ;;  %3599 = vtanh.f32 %v1395_v35 }
 0x1df   : > { %2297 = vst [vmem:[%s3926_s24 + $0x328] sm:$0xff] %v3594_v39  ;;  %3601 = vtanh.f32 %v1555_v36  ;;  %1434 = vmatmul.bf16.gmra.mxu0 %v3138_v32  ;;  %1594 = vmatmul.bf16.gmra.mxu1 %v3170_v33  ;;  %v3205_v33 = vld [vmem:[%s3884_s20 + $0x2f0] sm:$0xff] }
 0x1e0   : > { %1754 = vmatmul.bf16.gmra.mxu2 %v3202_v37  ;;  %1914 = vmatmul.bf16.gmra.mxu3 %v3234_v38 }
 0x1e2   : > { %v3596_v40 = vpop.eup %3595 }
 0x1e3   : > { %v3598_v41 = vpop.eup %3597  ;;  %2361 = vst [vmem:[%s3926_s24 + $0x528] sm:$0xff] %v3596_v40  ;;  %v1715_v42 = vpop.f32.mrf.mxu2 }
 0x1e4   : > { %v1875_v43 = vpop.f32.mrf.mxu3  ;;  %v3600_v44 = vpop.eup %3599  ;;  %2425 = vst [vmem:[%s3926_s24 + $0x728] sm:$0xff] %v3598_v41  ;;  %3603 = vtanh.f32 %v1715_v42 }
 0x1e5   : > { %v1397_v45 = vpop.f32.mrf.mxu0  ;;  %v1557_v46 = vpop.f32.mrf.mxu1  ;;  %2234 = vst [vmem:[%s3926_s24 + $0x130] sm:$0xff] %v3600_v44  ;;  %3605 = vtanh.f32 %v1875_v43 }
 0x1e6   : > { %v3602_v47 = vpop.eup %3601  ;;  %3607 = vtanh.f32 %v1397_v45 }
 0x1e7   : > { %2298 = vst [vmem:[%s3926_s24 + $0x330] sm:$0xff] %v3602_v47  ;;  %3609 = vtanh.f32 %v1557_v46 }
 0x1ea   : > { %v3604_v48 = vpop.eup %3603 }
 0x1eb   : > { %v3606_v49 = vpop.eup %3605  ;;  %2362 = vst [vmem:[%s3926_s24 + $0x530] sm:$0xff] %v3604_v48  ;;  %v1717_v50 = vpop.f32.mrf.mxu2  ;;  %v3142_v48 = vld [vmem:[%s3884_s20 + $0xf8] sm:$0xff] }
 0x1ec   : > { %v1877_v51 = vpop.f32.mrf.mxu3  ;;  %v3608_v54 = vpop.eup %3607  ;;  %2426 = vst [vmem:[%s3926_s24 + $0x730] sm:$0xff] %v3606_v49  ;;  %3611 = vtanh.f32 %v1717_v50  ;;  %v3174_v49 = vld [vmem:[%s3884_s20 + $0x1f8] sm:$0xff] }
 0x1ed   : > { %v1400_v55 = vpop.f32.mrf.mxu0  ;;  %v1560_v56 = vpop.f32.mrf.mxu1  ;;  %2235 = vst [vmem:[%s3926_s24 + $0x138] sm:$0xff] %v3608_v54  ;;  %3613 = vtanh.f32 %v1877_v51  ;;  %v3238_v54 = vld [vmem:[%s3884_s20 + $0x3f8] sm:$0xff] }
 0x1ee   : > { %v3610_v59 = vpop.eup %3609  ;;  %3615 = vtanh.f32 %v1400_v55 }
 0x1ef   : > { %2299 = vst [vmem:[%s3926_s24 + $0x338] sm:$0xff] %v3610_v59  ;;  %3617 = vtanh.f32 %v1560_v56  ;;  %1439 = vmatmul.bf16.gmra.mxu0 %v3139_v52  ;;  %1599 = vmatmul.bf16.gmra.mxu1 %v3171_v53  ;;  %v3206_v53 = vld [vmem:[%s3884_s20 + $0x2f8] sm:$0xff] }
 0x1f0   : > { %1759 = vmatmul.bf16.gmra.mxu2 %v3203_v57  ;;  %1919 = vmatmul.bf16.gmra.mxu3 %v3235_v58 }
 0x1f2   : > { %v3612_v60 = vpop.eup %3611 }
 0x1f3   : > { %v3614_v61 = vpop.eup %3613  ;;  %2363 = vst [vmem:[%s3926_s24 + $0x538] sm:$0xff] %v3612_v60  ;;  %v1720_v62 = vpop.f32.mrf.mxu2 }
 0x1f4   : > { %v1880_v63 = vpop.f32.mrf.mxu3  ;;  %v3616_v0 = vpop.eup %3615  ;;  %2427 = vst [vmem:[%s3926_s24 + $0x738] sm:$0xff] %v3614_v61  ;;  %3619 = vtanh.f32 %v1720_v62 }
 0x1f5   : > { %v1402_v1 = vpop.f32.mrf.mxu0  ;;  %v1562_v2 = vpop.f32.mrf.mxu1  ;;  %2236 = vst [vmem:[%s3926_s24 + $0x140] sm:$0xff] %v3616_v0  ;;  %3621 = vtanh.f32 %v1880_v63 }
 0x1f6   : > { %v3618_v3 = vpop.eup %3617  ;;  %3623 = vtanh.f32 %v1402_v1 }
 0x1f7   : > { %2300 = vst [vmem:[%s3926_s24 + $0x340] sm:$0xff] %v3618_v3  ;;  %3625 = vtanh.f32 %v1562_v2 }
 0x1fa   : > { %v3620_v4 = vpop.eup %3619 }
 0x1fb   : > { %v3622_v5 = vpop.eup %3621  ;;  %2364 = vst [vmem:[%s3926_s24 + $0x540] sm:$0xff] %v3620_v4  ;;  %v1722_v6 = vpop.f32.mrf.mxu2 }
 0x1fc   : > { %v1882_v7 = vpop.f32.mrf.mxu3  ;;  %v3624_v10 = vpop.eup %3623  ;;  %2428 = vst [vmem:[%s3926_s24 + $0x740] sm:$0xff] %v3622_v5  ;;  %3627 = vtanh.f32 %v1722_v6 }
 0x1fd   : > { %v1405_v11 = vpop.f32.mrf.mxu0  ;;  %v1565_v12 = vpop.f32.mrf.mxu1  ;;  %2237 = vst [vmem:[%s3926_s24 + $0x148] sm:$0xff] %v3624_v10  ;;  %3629 = vtanh.f32 %v1882_v7 }
 0x1fe   : > { %v3626_v15 = vpop.eup %3625  ;;  %3631 = vtanh.f32 %v1405_v11 }
 0x1ff   : > { %2301 = vst [vmem:[%s3926_s24 + $0x348] sm:$0xff] %v3626_v15  ;;  %3633 = vtanh.f32 %v1565_v12  ;;  %1444 = vmatmul.bf16.gmra.mxu0 %v3140_v8  ;;  %1604 = vmatmul.bf16.gmra.mxu1 %v3172_v9 }
 0x200   : > { %1764 = vmatmul.bf16.gmra.mxu2 %v3204_v13  ;;  %1924 = vmatmul.bf16.gmra.mxu3 %v3236_v14 }
 0x202   : > { %v3628_v16 = vpop.eup %3627 }
 0x203   : > { %v3630_v17 = vpop.eup %3629  ;;  %2365 = vst [vmem:[%s3926_s24 + $0x548] sm:$0xff] %v3628_v16  ;;  %v1725_v18 = vpop.f32.mrf.mxu2 }
 0x204   : > { %v1885_v19 = vpop.f32.mrf.mxu3  ;;  %v3632_v20 = vpop.eup %3631  ;;  %2429 = vst [vmem:[%s3926_s24 + $0x748] sm:$0xff] %v3630_v17  ;;  %3635 = vtanh.f32 %v1725_v18 }
 0x205   : > { %v1407_v21 = vpop.f32.mrf.mxu0  ;;  %v1567_v22 = vpop.f32.mrf.mxu1  ;;  %2238 = vst [vmem:[%s3926_s24 + $0x150] sm:$0xff] %v3632_v20  ;;  %3637 = vtanh.f32 %v1885_v19 }
 0x206   : > { %v3634_v23 = vpop.eup %3633  ;;  %3639 = vtanh.f32 %v1407_v21 }
 0x207   : > { %2302 = vst [vmem:[%s3926_s24 + $0x350] sm:$0xff] %v3634_v23  ;;  %3641 = vtanh.f32 %v1567_v22 }
 0x20a   : > { %v3636_v24 = vpop.eup %3635 }
 0x20b   : > { %v3638_v25 = vpop.eup %3637  ;;  %2366 = vst [vmem:[%s3926_s24 + $0x550] sm:$0xff] %v3636_v24  ;;  %v1727_v26 = vpop.f32.mrf.mxu2 }
 0x20c   : > { %v1887_v27 = vpop.f32.mrf.mxu3  ;;  %v3640_v30 = vpop.eup %3639  ;;  %2430 = vst [vmem:[%s3926_s24 + $0x750] sm:$0xff] %v3638_v25  ;;  %3643 = vtanh.f32 %v1727_v26 }
 0x20d   : > { %v1410_v31 = vpop.f32.mrf.mxu0  ;;  %v1570_v32 = vpop.f32.mrf.mxu1  ;;  %2239 = vst [vmem:[%s3926_s24 + $0x158] sm:$0xff] %v3640_v30  ;;  %3645 = vtanh.f32 %v1887_v27 }
 0x20e   : > { %v3642_v35 = vpop.eup %3641  ;;  %3647 = vtanh.f32 %v1410_v31 }
 0x20f   : > { %2303 = vst [vmem:[%s3926_s24 + $0x358] sm:$0xff] %v3642_v35  ;;  %3649 = vtanh.f32 %v1570_v32  ;;  %1449 = vmatmul.bf16.gmra.mxu0 %v3141_v28  ;;  %1609 = vmatmul.bf16.gmra.mxu1 %v3173_v29 }
 0x210   : > { %1769 = vmatmul.bf16.gmra.mxu2 %v3205_v33  ;;  %1929 = vmatmul.bf16.gmra.mxu3 %v3237_v34 }
 0x212   : > { %v3644_v36 = vpop.eup %3643 }
 0x213   : > { %v3646_v37 = vpop.eup %3645  ;;  %2367 = vst [vmem:[%s3926_s24 + $0x558] sm:$0xff] %v3644_v36  ;;  %v1730_v38 = vpop.f32.mrf.mxu2 }
 0x214   : > { %v1890_v39 = vpop.f32.mrf.mxu3  ;;  %v3648_v40 = vpop.eup %3647  ;;  %2431 = vst [vmem:[%s3926_s24 + $0x758] sm:$0xff] %v3646_v37  ;;  %3651 = vtanh.f32 %v1730_v38 }
 0x215   : > { %v1412_v41 = vpop.f32.mrf.mxu0  ;;  %v1572_v42 = vpop.f32.mrf.mxu1  ;;  %2240 = vst [vmem:[%s3926_s24 + $0x160] sm:$0xff] %v3648_v40  ;;  %3653 = vtanh.f32 %v1890_v39 }
 0x216   : > { %v3650_v43 = vpop.eup %3649  ;;  %3655 = vtanh.f32 %v1412_v41 }
 0x217   : > { %2304 = vst [vmem:[%s3926_s24 + $0x360] sm:$0xff] %v3650_v43  ;;  %3657 = vtanh.f32 %v1572_v42 }
 0x21a   : > { %v3652_v44 = vpop.eup %3651 }
 0x21b   : > { %v3654_v45 = vpop.eup %3653  ;;  %2368 = vst [vmem:[%s3926_s24 + $0x560] sm:$0xff] %v3652_v44  ;;  %v1732_v46 = vpop.f32.mrf.mxu2 }
 0x21c   : > { %v1892_v47 = vpop.f32.mrf.mxu3  ;;  %v3656_v50 = vpop.eup %3655  ;;  %2432 = vst [vmem:[%s3926_s24 + $0x760] sm:$0xff] %v3654_v45  ;;  %3659 = vtanh.f32 %v1732_v46 }
 0x21d   : > { %v1415_v51 = vpop.f32.mrf.mxu0  ;;  %v1575_v52 = vpop.f32.mrf.mxu1  ;;  %2241 = vst [vmem:[%s3926_s24 + $0x168] sm:$0xff] %v3656_v50  ;;  %3661 = vtanh.f32 %v1892_v47 }
 0x21e   : > { %v3658_v55 = vpop.eup %3657  ;;  %3663 = vtanh.f32 %v1415_v51 }
 0x21f   : > { %2305 = vst [vmem:[%s3926_s24 + $0x368] sm:$0xff] %v3658_v55  ;;  %3665 = vtanh.f32 %v1575_v52  ;;  %1454 = vmatmul.bf16.gmra.mxu0 %v3142_v48  ;;  %1614 = vmatmul.bf16.gmra.mxu1 %v3174_v49 }
 0x220   : > { %1774 = vmatmul.bf16.gmra.mxu2 %v3206_v53  ;;  %1934 = vmatmul.bf16.gmra.mxu3 %v3238_v54 }
 0x222   : > { %v3660_v56 = vpop.eup %3659 }
 0x223   : > { %v3662_v57 = vpop.eup %3661  ;;  %2369 = vst [vmem:[%s3926_s24 + $0x568] sm:$0xff] %v3660_v56  ;;  %v1735_v58 = vpop.f32.mrf.mxu2 }
 0x224   : > { %v1895_v59 = vpop.f32.mrf.mxu3  ;;  %v3664_v60 = vpop.eup %3663  ;;  %2433 = vst [vmem:[%s3926_s24 + $0x768] sm:$0xff] %v3662_v57  ;;  %3667 = vtanh.f32 %v1735_v58 }
 0x225   : > { %v1417_v61 = vpop.f32.mrf.mxu0  ;;  %v1577_v62 = vpop.f32.mrf.mxu1  ;;  %2242 = vst [vmem:[%s3926_s24 + $0x170] sm:$0xff] %v3664_v60  ;;  %3669 = vtanh.f32 %v1895_v59 }
 0x226   : > { %v3666_v63 = vpop.eup %3665  ;;  %3671 = vtanh.f32 %v1417_v61 }
 0x227   : > { %2306 = vst [vmem:[%s3926_s24 + $0x370] sm:$0xff] %v3666_v63  ;;  %3673 = vtanh.f32 %v1577_v62 }
 0x22a   : > { %v3668_v0 = vpop.eup %3667 }
 0x22b   : > { %v3670_v1 = vpop.eup %3669  ;;  %2370 = vst [vmem:[%s3926_s24 + $0x570] sm:$0xff] %v3668_v0  ;;  %v1737_v2 = vpop.f32.mrf.mxu2 }
 0x22c   : > { %v1897_v3 = vpop.f32.mrf.mxu3  ;;  %v3672_v4 = vpop.eup %3671  ;;  %2434 = vst [vmem:[%s3926_s24 + $0x770] sm:$0xff] %v3670_v1  ;;  %3675 = vtanh.f32 %v1737_v2 }
 0x22d   : > { %v1420_v5 = vpop.f32.mrf.mxu0  ;;  %v1580_v6 = vpop.f32.mrf.mxu1  ;;  %2243 = vst [vmem:[%s3926_s24 + $0x178] sm:$0xff] %v3672_v4  ;;  %3677 = vtanh.f32 %v1897_v3 }
 0x22e   : > { %v3674_v7 = vpop.eup %3673  ;;  %3679 = vtanh.f32 %v1420_v5 }
 0x22f   : > { %2307 = vst [vmem:[%s3926_s24 + $0x378] sm:$0xff] %v3674_v7  ;;  %3681 = vtanh.f32 %v1580_v6 }
 0x232   : > { %v3676_v8 = vpop.eup %3675 }
 0x233   : > { %v3678_v9 = vpop.eup %3677  ;;  %2371 = vst [vmem:[%s3926_s24 + $0x578] sm:$0xff] %v3676_v8  ;;  %v1740_v10 = vpop.f32.mrf.mxu2 }
 0x234   : > { %v1900_v11 = vpop.f32.mrf.mxu3  ;;  %v3680_v12 = vpop.eup %3679  ;;  %2435 = vst [vmem:[%s3926_s24 + $0x778] sm:$0xff] %v3678_v9  ;;  %3683 = vtanh.f32 %v1740_v10 }
 0x235   : > { %v1422_v13 = vpop.f32.mrf.mxu0  ;;  %v1582_v14 = vpop.f32.mrf.mxu1  ;;  %2244 = vst [vmem:[%s3926_s24 + $0x180] sm:$0xff] %v3680_v12  ;;  %3685 = vtanh.f32 %v1900_v11 }
 0x236   : > { %v3682_v15 = vpop.eup %3681  ;;  %3687 = vtanh.f32 %v1422_v13 }
 0x237   : > { %2308 = vst [vmem:[%s3926_s24 + $0x380] sm:$0xff] %v3682_v15  ;;  %3689 = vtanh.f32 %v1582_v14 }
 0x23a   : > { %v3684_v16 = vpop.eup %3683 }
 0x23b   : > { %v3686_v17 = vpop.eup %3685  ;;  %2372 = vst [vmem:[%s3926_s24 + $0x580] sm:$0xff] %v3684_v16  ;;  %v1742_v18 = vpop.f32.mrf.mxu2 }
 0x23c   : > { %v1902_v19 = vpop.f32.mrf.mxu3  ;;  %v3688_v20 = vpop.eup %3687  ;;  %2436 = vst [vmem:[%s3926_s24 + $0x780] sm:$0xff] %v3686_v17  ;;  %3691 = vtanh.f32 %v1742_v18 }
 0x23d   : > { %v1425_v21 = vpop.f32.mrf.mxu0  ;;  %v1585_v22 = vpop.f32.mrf.mxu1  ;;  %2245 = vst [vmem:[%s3926_s24 + $0x188] sm:$0xff] %v3688_v20  ;;  %3693 = vtanh.f32 %v1902_v19 }
 0x23e   : > { %v3690_v23 = vpop.eup %3689  ;;  %3695 = vtanh.f32 %v1425_v21 }
 0x23f   : > { %2309 = vst [vmem:[%s3926_s24 + $0x388] sm:$0xff] %v3690_v23  ;;  %3697 = vtanh.f32 %v1585_v22 }
 0x242   : > { %v3692_v24 = vpop.eup %3691 }
 0x243   : > { %v3694_v25 = vpop.eup %3693  ;;  %2373 = vst [vmem:[%s3926_s24 + $0x588] sm:$0xff] %v3692_v24  ;;  %v1745_v26 = vpop.f32.mrf.mxu2 }
 0x244   : > { %v1905_v27 = vpop.f32.mrf.mxu3  ;;  %v3696_v28 = vpop.eup %3695  ;;  %2437 = vst [vmem:[%s3926_s24 + $0x788] sm:$0xff] %v3694_v25  ;;  %3699 = vtanh.f32 %v1745_v26 }
 0x245   : > { %v1427_v29 = vpop.f32.mrf.mxu0  ;;  %v1587_v30 = vpop.f32.mrf.mxu1  ;;  %2246 = vst [vmem:[%s3926_s24 + $0x190] sm:$0xff] %v3696_v28  ;;  %3701 = vtanh.f32 %v1905_v27 }
 0x246   : > { %v3698_v31 = vpop.eup %3697  ;;  %3703 = vtanh.f32 %v1427_v29 }
 0x247   : > { %2310 = vst [vmem:[%s3926_s24 + $0x390] sm:$0xff] %v3698_v31  ;;  %3705 = vtanh.f32 %v1587_v30 }
 0x24a   : > { %v3700_v32 = vpop.eup %3699 }
 0x24b   : > { %v3702_v33 = vpop.eup %3701  ;;  %2374 = vst [vmem:[%s3926_s24 + $0x590] sm:$0xff] %v3700_v32  ;;  %v1747_v34 = vpop.f32.mrf.mxu2 }
 0x24c   : > { %v1907_v35 = vpop.f32.mrf.mxu3  ;;  %v3704_v36 = vpop.eup %3703  ;;  %2438 = vst [vmem:[%s3926_s24 + $0x790] sm:$0xff] %v3702_v33  ;;  %3707 = vtanh.f32 %v1747_v34 }
 0x24d   : > { %v1430_v37 = vpop.f32.mrf.mxu0  ;;  %v1590_v38 = vpop.f32.mrf.mxu1  ;;  %2247 = vst [vmem:[%s3926_s24 + $0x198] sm:$0xff] %v3704_v36  ;;  %3709 = vtanh.f32 %v1907_v35 }
 0x24e   : > { %v3706_v39 = vpop.eup %3705  ;;  %3711 = vtanh.f32 %v1430_v37 }
 0x24f   : > { %2311 = vst [vmem:[%s3926_s24 + $0x398] sm:$0xff] %v3706_v39  ;;  %3713 = vtanh.f32 %v1590_v38 }
 0x252   : > { %v3708_v40 = vpop.eup %3707 }
 0x253   : > { %v3710_v41 = vpop.eup %3709  ;;  %2375 = vst [vmem:[%s3926_s24 + $0x598] sm:$0xff] %v3708_v40  ;;  %v1750_v42 = vpop.f32.mrf.mxu2 }
 0x254   : > { %v1910_v43 = vpop.f32.mrf.mxu3  ;;  %v3712_v44 = vpop.eup %3711  ;;  %2439 = vst [vmem:[%s3926_s24 + $0x798] sm:$0xff] %v3710_v41  ;;  %3715 = vtanh.f32 %v1750_v42 }
 0x255   : > { %v1432_v45 = vpop.f32.mrf.mxu0  ;;  %v1592_v46 = vpop.f32.mrf.mxu1  ;;  %2248 = vst [vmem:[%s3926_s24 + $0x1a0] sm:$0xff] %v3712_v44  ;;  %3717 = vtanh.f32 %v1910_v43 }
 0x256   : > { %v3714_v47 = vpop.eup %3713  ;;  %3719 = vtanh.f32 %v1432_v45 }
 0x257   : > { %2312 = vst [vmem:[%s3926_s24 + $0x3a0] sm:$0xff] %v3714_v47  ;;  %3721 = vtanh.f32 %v1592_v46 }
 0x25a   : > { %v3716_v48 = vpop.eup %3715 }
 0x25b   : > { %v3718_v49 = vpop.eup %3717  ;;  %2376 = vst [vmem:[%s3926_s24 + $0x5a0] sm:$0xff] %v3716_v48  ;;  %v1752_v50 = vpop.f32.mrf.mxu2 }
 0x25c   : > { %v1912_v51 = vpop.f32.mrf.mxu3  ;;  %v3720_v52 = vpop.eup %3719  ;;  %2440 = vst [vmem:[%s3926_s24 + $0x7a0] sm:$0xff] %v3718_v49  ;;  %3723 = vtanh.f32 %v1752_v50 }
 0x25d   : > { %v1435_v53 = vpop.f32.mrf.mxu0  ;;  %v1595_v54 = vpop.f32.mrf.mxu1  ;;  %2249 = vst [vmem:[%s3926_s24 + $0x1a8] sm:$0xff] %v3720_v52  ;;  %3725 = vtanh.f32 %v1912_v51 }
 0x25e   : > { %v3722_v55 = vpop.eup %3721  ;;  %3727 = vtanh.f32 %v1435_v53 }
 0x25f   : > { %2313 = vst [vmem:[%s3926_s24 + $0x3a8] sm:$0xff] %v3722_v55  ;;  %3729 = vtanh.f32 %v1595_v54 }
 0x262   : > { %v3724_v56 = vpop.eup %3723 }
 0x263   : > { %v3726_v57 = vpop.eup %3725  ;;  %2377 = vst [vmem:[%s3926_s24 + $0x5a8] sm:$0xff] %v3724_v56  ;;  %v1755_v58 = vpop.f32.mrf.mxu2 }
 0x264   : > { %v1915_v59 = vpop.f32.mrf.mxu3  ;;  %v3728_v60 = vpop.eup %3727  ;;  %2441 = vst [vmem:[%s3926_s24 + $0x7a8] sm:$0xff] %v3726_v57  ;;  %3731 = vtanh.f32 %v1755_v58 }
 0x265   : > { %v1437_v61 = vpop.f32.mrf.mxu0  ;;  %v1597_v62 = vpop.f32.mrf.mxu1  ;;  %2250 = vst [vmem:[%s3926_s24 + $0x1b0] sm:$0xff] %v3728_v60  ;;  %3733 = vtanh.f32 %v1915_v59 }
 0x266   : > { %v3730_v63 = vpop.eup %3729  ;;  %3735 = vtanh.f32 %v1437_v61 }
 0x267   : > { %2314 = vst [vmem:[%s3926_s24 + $0x3b0] sm:$0xff] %v3730_v63  ;;  %3737 = vtanh.f32 %v1597_v62 }
 0x26a   : > { %v3732_v0 = vpop.eup %3731 }
 0x26b   : > { %v3734_v1 = vpop.eup %3733  ;;  %2378 = vst [vmem:[%s3926_s24 + $0x5b0] sm:$0xff] %v3732_v0  ;;  %v1757_v2 = vpop.f32.mrf.mxu2 }
 0x26c   : > { %v1917_v3 = vpop.f32.mrf.mxu3  ;;  %v3736_v4 = vpop.eup %3735  ;;  %2442 = vst [vmem:[%s3926_s24 + $0x7b0] sm:$0xff] %v3734_v1  ;;  %3739 = vtanh.f32 %v1757_v2 }
 0x26d   : > { %v1440_v5 = vpop.f32.mrf.mxu0  ;;  %v1600_v6 = vpop.f32.mrf.mxu1  ;;  %2251 = vst [vmem:[%s3926_s24 + $0x1b8] sm:$0xff] %v3736_v4  ;;  %3741 = vtanh.f32 %v1917_v3 }
 0x26e   : > { %v3738_v7 = vpop.eup %3737  ;;  %3743 = vtanh.f32 %v1440_v5 }
 0x26f   : > { %2315 = vst [vmem:[%s3926_s24 + $0x3b8] sm:$0xff] %v3738_v7  ;;  %3745 = vtanh.f32 %v1600_v6 }
 0x272   : > { %v3740_v8 = vpop.eup %3739 }
 0x273   : > { %v3742_v9 = vpop.eup %3741  ;;  %2379 = vst [vmem:[%s3926_s24 + $0x5b8] sm:$0xff] %v3740_v8  ;;  %v1760_v10 = vpop.f32.mrf.mxu2 }
 0x274   : > { %v1920_v11 = vpop.f32.mrf.mxu3  ;;  %v3744_v12 = vpop.eup %3743  ;;  %2443 = vst [vmem:[%s3926_s24 + $0x7b8] sm:$0xff] %v3742_v9  ;;  %3747 = vtanh.f32 %v1760_v10 }
 0x275   : > { %v1442_v13 = vpop.f32.mrf.mxu0  ;;  %v1602_v14 = vpop.f32.mrf.mxu1  ;;  %2252 = vst [vmem:[%s3926_s24 + $0x1c0] sm:$0xff] %v3744_v12  ;;  %3749 = vtanh.f32 %v1920_v11 }
 0x276   : > { %v3746_v15 = vpop.eup %3745  ;;  %3751 = vtanh.f32 %v1442_v13 }
 0x277   : > { %2316 = vst [vmem:[%s3926_s24 + $0x3c0] sm:$0xff] %v3746_v15  ;;  %3753 = vtanh.f32 %v1602_v14 }
 0x27a   : > { %v3748_v16 = vpop.eup %3747 }
 0x27b   : > { %v3750_v17 = vpop.eup %3749  ;;  %2380 = vst [vmem:[%s3926_s24 + $0x5c0] sm:$0xff] %v3748_v16  ;;  %v1762_v18 = vpop.f32.mrf.mxu2 }
 0x27c   : > { %v1922_v19 = vpop.f32.mrf.mxu3  ;;  %v3752_v20 = vpop.eup %3751  ;;  %2444 = vst [vmem:[%s3926_s24 + $0x7c0] sm:$0xff] %v3750_v17  ;;  %3755 = vtanh.f32 %v1762_v18 }
 0x27d   : > { %v1445_v21 = vpop.f32.mrf.mxu0  ;;  %v1605_v22 = vpop.f32.mrf.mxu1  ;;  %2253 = vst [vmem:[%s3926_s24 + $0x1c8] sm:$0xff] %v3752_v20  ;;  %3757 = vtanh.f32 %v1922_v19 }
 0x27e   : > { %v3754_v23 = vpop.eup %3753  ;;  %3759 = vtanh.f32 %v1445_v21 }
 0x27f   : > { %2317 = vst [vmem:[%s3926_s24 + $0x3c8] sm:$0xff] %v3754_v23  ;;  %3761 = vtanh.f32 %v1605_v22 }
 0x282   : > { %v3756_v24 = vpop.eup %3755 }
 0x283   : > { %v3758_v25 = vpop.eup %3757  ;;  %2381 = vst [vmem:[%s3926_s24 + $0x5c8] sm:$0xff] %v3756_v24  ;;  %v1765_v26 = vpop.f32.mrf.mxu2 }
 0x284   : > { %v1925_v27 = vpop.f32.mrf.mxu3  ;;  %v3760_v28 = vpop.eup %3759  ;;  %2445 = vst [vmem:[%s3926_s24 + $0x7c8] sm:$0xff] %v3758_v25  ;;  %3763 = vtanh.f32 %v1765_v26 }
 0x285   : > { %v1447_v29 = vpop.f32.mrf.mxu0  ;;  %v1607_v30 = vpop.f32.mrf.mxu1  ;;  %2254 = vst [vmem:[%s3926_s24 + $0x1d0] sm:$0xff] %v3760_v28  ;;  %3765 = vtanh.f32 %v1925_v27 }
 0x286   : > { %v3762_v31 = vpop.eup %3761  ;;  %3767 = vtanh.f32 %v1447_v29 }
 0x287   : > { %2318 = vst [vmem:[%s3926_s24 + $0x3d0] sm:$0xff] %v3762_v31  ;;  %3769 = vtanh.f32 %v1607_v30 }
 0x28a   : > { %v3764_v32 = vpop.eup %3763 }
 0x28b   : > { %v3766_v33 = vpop.eup %3765  ;;  %2382 = vst [vmem:[%s3926_s24 + $0x5d0] sm:$0xff] %v3764_v32  ;;  %v1767_v34 = vpop.f32.mrf.mxu2 }
 0x28c   : > { %v1927_v35 = vpop.f32.mrf.mxu3  ;;  %v3768_v36 = vpop.eup %3767  ;;  %2446 = vst [vmem:[%s3926_s24 + $0x7d0] sm:$0xff] %v3766_v33  ;;  %3771 = vtanh.f32 %v1767_v34 }
 0x28d   : > { %v1450_v37 = vpop.f32.mrf.mxu0  ;;  %v1610_v38 = vpop.f32.mrf.mxu1  ;;  %2255 = vst [vmem:[%s3926_s24 + $0x1d8] sm:$0xff] %v3768_v36  ;;  %3773 = vtanh.f32 %v1927_v35 }
 0x28e   : > { %v3770_v39 = vpop.eup %3769  ;;  %3775 = vtanh.f32 %v1450_v37 }
 0x28f   : > { %2319 = vst [vmem:[%s3926_s24 + $0x3d8] sm:$0xff] %v3770_v39  ;;  %3777 = vtanh.f32 %v1610_v38 }
 0x292   : > { %v3772_v40 = vpop.eup %3771 }
 0x293   : > { %v3774_v41 = vpop.eup %3773  ;;  %2383 = vst [vmem:[%s3926_s24 + $0x5d8] sm:$0xff] %v3772_v40  ;;  %v1770_v42 = vpop.f32.mrf.mxu2 }
 0x294   : > { %v1930_v43 = vpop.f32.mrf.mxu3  ;;  %v3776_v44 = vpop.eup %3775  ;;  %2447 = vst [vmem:[%s3926_s24 + $0x7d8] sm:$0xff] %v3774_v41  ;;  %3779 = vtanh.f32 %v1770_v42 }
 0x295   : > { %v1452_v45 = vpop.f32.mrf.mxu0  ;;  %v1612_v46 = vpop.f32.mrf.mxu1  ;;  %2256 = vst [vmem:[%s3926_s24 + $0x1e0] sm:$0xff] %v3776_v44  ;;  %3781 = vtanh.f32 %v1930_v43 }
 0x296   : > { %v3778_v47 = vpop.eup %3777  ;;  %3783 = vtanh.f32 %v1452_v45 }
 0x297   : > { %2320 = vst [vmem:[%s3926_s24 + $0x3e0] sm:$0xff] %v3778_v47  ;;  %3785 = vtanh.f32 %v1612_v46 }
 0x29a   : > { %v3780_v48 = vpop.eup %3779 }
 0x29b   : > { %v3782_v49 = vpop.eup %3781  ;;  %2384 = vst [vmem:[%s3926_s24 + $0x5e0] sm:$0xff] %v3780_v48  ;;  %v1772_v50 = vpop.f32.mrf.mxu2 }
 0x29c   : > { %v1932_v51 = vpop.f32.mrf.mxu3  ;;  %v3784_v52 = vpop.eup %3783  ;;  %2448 = vst [vmem:[%s3926_s24 + $0x7e0] sm:$0xff] %v3782_v49  ;;  %3787 = vtanh.f32 %v1772_v50 }
 0x29d   : > { %v1455_v53 = vpop.f32.mrf.mxu0  ;;  %v1615_v54 = vpop.f32.mrf.mxu1  ;;  %2257 = vst [vmem:[%s3926_s24 + $0x1e8] sm:$0xff] %v3784_v52  ;;  %3789 = vtanh.f32 %v1932_v51 }
 0x29e   : > { %v3786_v55 = vpop.eup %3785  ;;  %3791 = vtanh.f32 %v1455_v53 }
 0x29f   : > { %2321 = vst [vmem:[%s3926_s24 + $0x3e8] sm:$0xff] %v3786_v55  ;;  %3793 = vtanh.f32 %v1615_v54 }
 0x2a2   : > { %v3788_v56 = vpop.eup %3787 }
 0x2a3   : > { %v3790_v57 = vpop.eup %3789  ;;  %2385 = vst [vmem:[%s3926_s24 + $0x5e8] sm:$0xff] %v3788_v56  ;;  %v1775_v58 = vpop.f32.mrf.mxu2 }
 0x2a4   : > { %v1935_v59 = vpop.f32.mrf.mxu3  ;;  %v3792_v60 = vpop.eup %3791  ;;  %2449 = vst [vmem:[%s3926_s24 + $0x7e8] sm:$0xff] %v3790_v57  ;;  %3795 = vtanh.f32 %v1775_v58 }
 0x2a5   : > { %v1457_v61 = vpop.f32.mrf.mxu0  ;;  %v1617_v62 = vpop.f32.mrf.mxu1  ;;  %2258 = vst [vmem:[%s3926_s24 + $0x1f0] sm:$0xff] %v3792_v60  ;;  %3797 = vtanh.f32 %v1935_v59 }
 0x2a6   : > { %v3794_v63 = vpop.eup %3793  ;;  %3799 = vtanh.f32 %v1457_v61 }
 0x2a7   : > { %2322 = vst [vmem:[%s3926_s24 + $0x3f0] sm:$0xff] %v3794_v63  ;;  %3801 = vtanh.f32 %v1617_v62 }
 0x2aa   : > { %v3796_v0 = vpop.eup %3795 }
 0x2ab   : > { %v3798_v1 = vpop.eup %3797  ;;  %2386 = vst [vmem:[%s3926_s24 + $0x5f0] sm:$0xff] %v3796_v0  ;;  %v1777_v2 = vpop.f32.mrf.mxu2 }
 0x2ac   : > { %v1937_v3 = vpop.f32.mrf.mxu3  ;;  %v3800_v4 = vpop.eup %3799  ;;  %2450 = vst [vmem:[%s3926_s24 + $0x7f0] sm:$0xff] %v3798_v1  ;;  %3803 = vtanh.f32 %v1777_v2 }
 0x2ad   : > { %v3802_v5 = vpop.eup %3801  ;;  %2259 = vst [vmem:[%s3926_s24 + $0x1f8] sm:$0xff] %v3800_v4  ;;  %3805 = vtanh.f32 %v1937_v3 }
 0x2ae   : > { %2323 = vst [vmem:[%s3926_s24 + $0x3f8] sm:$0xff] %v3802_v5 }
 0x2b2   : > { %v3804_v6 = vpop.eup %3803 }
 0x2b3   : > { %v3806_v7 = vpop.eup %3805  ;;  %2387 = vst [vmem:[%s3926_s24 + $0x5f8] sm:$0xff] %v3804_v6 }
 0x2b4   : > { %2451 = vst [vmem:[%s3926_s24 + $0x7f8] sm:$0xff] %v3806_v7 }
 0x2b5 PF: > { %s12_s11 = sadd.s32 1, %s3829_s11   ;;  %s4288_s9 = smov %s3825_s10 }
 0x2b6   : > { %p9_p5 = scmp.ge.s32.totalorder %s12_s11, 6   ;;  %s4289_s10 = smov %s4291_s12 }
 0x2b8   :  { %11 = sbr.rel (!%p9_p5) target bundleno = 2 (0x2), region = 61 }

</bundles_post_ra>
